<compile_context>
chip_gen: v7x
topology: tpu7x:2x2x1
jax: 0.10.0
libtpu: 0.0.40
codegen_flags: <defaults>
</compile_context>

<pallas_src>
import jax
import jax.numpy as jnp
from jax import lax
from jax.experimental import pallas as pl
from jax.experimental.pallas import tpu as pltpu

VMEM_LIMIT = 32 * 1024 * 1024  # ample for these blocks; safe on 64 MiB v7x VMEM


def _round_up(x, m):
    return (x + m - 1) // m * m


def _compiler_params():
    return pltpu.CompilerParams(dimension_semantics=("parallel",),
                                vmem_limit_bytes=VMEM_LIMIT)


def _batch_tile(n, target=8):
    """Samples per grid step: <= target, and >=2 grid steps when n allows it
    (keeps both v7x TensorCores busy; harmless on single-TC v5e/v6e)."""
    bt = max(1, min(target, n))
    if -(-n // bt) < 2 and n >= 2:
        bt = (n + 1) // 2
    return bt


def _row_tile(rows, unit, target=512):
    """Row tile: multiple of `unit`, <= target, >=2 grid steps when possible."""
    t = min(target, rows)
    t = max(unit, t - t % unit)
    if -(-rows // t) < 2 and rows >= 2 * unit:
        half = rows // 2
        t = max(unit, half - half % unit)
    return t


# --------------------------------------------------------------------------- #
# conv 3x3 (+ ReLU, optionally fused 2x2 max-pool), taps built in VMEM
# --------------------------------------------------------------------------- #
def _make_conv_relu_pool_kernel(Ho, Wo, Cin):
    def kernel(xq_ref, w_ref, b_ref, o_ref):
        # xq_ref: (4, bt, Ho+1, Wo+1, Cin) bf16 -- pool-parity split of the
        #         padded input: xq[2*ph+pw, b, i, j, :] = x_pad[b, 2i+ph, 2j+pw, :]
        # w_ref : (9, Cin, Cout) bf16, tap order (kh, kw)
        # b_ref : (1, Cout) f32
        # o_ref : (bt*Ho*Wo, Cout) bf16 = relu(maxpool2x2(conv) + bias)
        bt = xq_ref.shape[1]
        rows = bt * Ho * Wo
        # Upcast the 4 parity slabs once so the per-tap collapse reshape is
        # layout-trivial (second-minor Wo is a multiple of the f32 sublane tile).
        slabs = [xq_ref[t].astype(jnp.float32) for t in range(4)]
        wts = [w_ref[t] for t in range(9)]
        pooled = None
        for dh in range(2):
            for dw in range(2):
                acc = None
                for kh in range(3):
                    for kw in range(3):
                        ph, qh = (dh + kh) % 2, (dh + kh) // 2
                        pw, qw = (dw + kw) % 2, (dw + kw) // 2
                        xt = slabs[2 * ph + pw][:, qh:qh + Ho, qw:qw + Wo, :]
                        xt = xt.reshape(rows, Cin).astype(jnp.bfloat16)
                        r = jnp.dot(xt, wts[3 * kh + kw],
                                    preferred_element_type=jnp.float32)
                        acc = r if acc is None else acc + r
                pooled = acc if pooled is None else jnp.maximum(pooled, acc)
        # max(relu(conv+b)) == relu(max(conv)+b): pool first, then bias + ReLU.
        o_ref[...] = jnp.maximum(pooled + b_ref[...], 0.0).astype(o_ref.dtype)
    return kernel


def _make_conv_relu_kernel(H, W, Cin):
    def kernel(xp_ref, w_ref, b_ref, o_ref):
        # xp_ref: (bt, H+2, W+2, Cin) bf16 (padded input); w_ref: (9, Cin, Cout)
        # o_ref : (bt*H*W, Cout) bf16
        bt = xp_ref.shape[0]
        rows = bt * H * W
        x = xp_ref[...].astype(jnp.float32)
        wts = [w_ref[t] for t in range(9)]
        acc = None
        for kh in range(3):
            for kw in range(3):
                xt = x[:, kh:kh + H, kw:kw + W, :]
                xt = xt.reshape(rows, Cin).astype(jnp.bfloat16)
                r = jnp.dot(xt, wts[3 * kh + kw],
                            preferred_element_type=jnp.float32)
                acc = r if acc is None else acc + r
        o_ref[...] = jnp.maximum(acc + b_ref[...], 0.0).astype(o_ref.dtype)
    return kernel


def conv3x3_relu_pool(x_nhwc, w9, b, *, bt_target=8):
    """conv3x3(pad=1) + ReLU + maxpool2x2, fused.  x: (N,H,W,Cin) bf16,
    w9: (9,Cin,Cout) bf16, b: (Cout,) f32.  Returns (N, H//2, W//2, Cout) bf16."""
    N, H, W, Cin = x_nhwc.shape
    Cout = w9.shape[-1]
    Ho, Wo = H // 2, W // 2
    Hq, Wq = Ho + 1, Wo + 1
    bt = _batch_tile(N, bt_target)
    Np = _round_up(N, bt)
    if Np != N:
        x_nhwc = jnp.pad(x_nhwc, ((0, Np - N), (0, 0), (0, 0), (0, 0)))
    xp = jnp.pad(x_nhwc, ((0, 0), (1, 1), (1, 1), (0, 0)))
    # pool-parity split: a ~1x-sized rearrangement (no 9x im2col in HBM).
    xq = jnp.stack([xp[:, ph::2, pw::2, :]
                    for ph in range(2) for pw in range(2)], axis=0)
    rows = Ho * Wo
    out = pl.pallas_call(
        _make_conv_relu_pool_kernel(Ho, Wo, Cin),
        out_shape=jax.ShapeDtypeStruct((Np * rows, Cout), jnp.bfloat16),
        grid=(Np // bt,),
        in_specs=[
            pl.BlockSpec((4, bt, Hq, Wq, Cin), lambda i: (0, i, 0, 0, 0)),
            pl.BlockSpec((9, Cin, Cout), lambda i: (0, 0, 0)),
            pl.BlockSpec((1, Cout), lambda i: (0, 0)),
        ],
        out_specs=pl.BlockSpec((bt * rows, Cout), lambda i: (i, 0)),
        compiler_params=_compiler_params(),
    )(xq, w9, b.reshape(1, Cout))
    return out.reshape(Np, Ho, Wo, Cout)[:N]


def conv3x3_relu(x_nhwc, w9, b, *, bt_target=8):
    """conv3x3(pad=1) + ReLU (no pool)."""
    N, H, W, Cin = x_nhwc.shape
    Cout = w9.shape[-1]
    bt = _batch_tile(N, bt_target)
    Np = _round_up(N, bt)
    if Np != N:
        x_nhwc = jnp.pad(x_nhwc, ((0, Np - N), (0, 0), (0, 0), (0, 0)))
    xp = jnp.pad(x_nhwc, ((0, 0), (1, 1), (1, 1), (0, 0)))
    out = pl.pallas_call(
        _make_conv_relu_kernel(H, W, Cin),
        out_shape=jax.ShapeDtypeStruct((Np * H * W, Cout), jnp.bfloat16),
        grid=(Np // bt,),
        in_specs=[
            pl.BlockSpec((bt, H + 2, W + 2, Cin), lambda i: (i, 0, 0, 0)),
            pl.BlockSpec((9, Cin, Cout), lambda i: (0, 0, 0)),
            pl.BlockSpec((1, Cout), lambda i: (0, 0)),
        ],
        out_specs=pl.BlockSpec((bt * H * W, Cout), lambda i: (i, 0)),
        compiler_params=_compiler_params(),
    )(xp, w9, b.reshape(1, Cout))
    return out.reshape(Np, H, W, Cout)[:N]


# --------------------------------------------------------------------------- #
# attention MLP (lane-dense logits), softmax(dim=0) in JAX, then scale + fc
# --------------------------------------------------------------------------- #
def _att_logits_kernel(xv_ref, w1_ref, b1_ref, w2_ref, b2_ref, o_ref):
    # xv_ref: (tr, 256) bf16; w1: (256, 64) bf16; b1: (1, 64) f32;
    # w2: (8, 64) f32 (row 0 real, zero-padded sublanes); b2: (1, 1) f32;
    # o_ref: (1, tr) f32 lane-dense logits.
    h = jnp.tanh(jnp.dot(xv_ref[...], w1_ref[...],
                         preferred_element_type=jnp.float32) + b1_ref[...])
    # (8,64) x (tr,64)^T -> (8,tr): NT matmul keeps the logits lane-dense.
    lg = lax.dot_general(w2_ref[...], h, (((1,), (1,)), ((), ())),
                         preferred_element_type=jnp.float32)
    o_ref[...] = lg[0:1, :] + b2_ref[...]


def _scale_fc_kernel(xv_ref, a_ref, w_ref, b_ref, o_ref):
    # xv_ref: (tr, 256) bf16 rows of x.view(-1, 256); a_ref: (tr, 64) bf16
    # per-row spatial attention; w_ref: (256, 128) bf16 (fc weight zero-padded
    # to a lane-dense width); b_ref: (1, 128) f32; o_ref: (tr, 128) f32.
    a4 = jnp.concatenate([a_ref[...]] * 4, axis=-1)                 # (tr, 256)
    xs = xv_ref[...] * a4
    o_ref[...] = jnp.dot(xs, w_ref[...],
                         preferred_element_type=jnp.float32) + b_ref[...]


def attention_and_fc(x3_nhwc, w1, b1, w2, b2, wfc_p, bfc_p):
    N = x3_nhwc.shape[0]
    R = N * 64
    # PyTorch x.view(-1, 256) on the NCHW tensor: row (n, g) = channels
    # 4g..4g+3 x 64 spatial positions.
    # TODO(synk): fold this NHWC->NCHW permutation into the conv3 kernel epilogue
    # (one extra ~1x HBM pass remains here).
    xv = jnp.transpose(x3_nhwc, (0, 3, 1, 2)).reshape(R, 256)

    tr = _row_tile(R, unit=128, target=512)  # 128-multiple keeps logits lane-aligned
    assert tr % 64 == 0                      # per-sample (64-row) scaling alignment
    Rp = _round_up(R, tr)
    if Rp != R:
        xv = jnp.pad(xv, ((0, Rp - R), (0, 0)))
    nsteps = Rp // tr

    w2p = jnp.zeros((8, 64), jnp.float32).at[0].set(w2)

    logits = pl.pallas_call(
        _att_logits_kernel,
        out_shape=jax.ShapeDtypeStruct((1, Rp), jnp.float32),
        grid=(nsteps,),
        in_specs=[
            pl.BlockSpec((tr, 256), lambda i: (i, 0)),
            pl.BlockSpec((256, 64), lambda i: (0, 0)),
            pl.BlockSpec((1, 64), lambda i: (0, 0)),
            pl.BlockSpec((8, 64), lambda i: (0, 0)),
            pl.BlockSpec((1, 1), lambda i: (0, 0)),
        ],
        out_specs=pl.BlockSpec((1, tr), lambda i: (0, i)),
        compiler_params=_compiler_params(),
    )(xv, w1, b1.reshape(1, 64), w2p, b2.reshape(1, 1))

    # softmax over dim 0 spans the whole batch -> tiny global reduction in JAX.
    a = jax.nn.softmax(logits[0, :R])
    # Row r of xv is scaled lane-wise by tile(a[n*64 : n*64+64], 4) (PyTorch's
    # a.view(-1,1,8,8) broadcast); expand to one 64-vector per row.
    a_rows = jnp.repeat(a.reshape(N, 64), 64, axis=0).astype(jnp.bfloat16)
    if Rp != R:
        a_rows = jnp.pad(a_rows, ((0, Rp - R), (0, 0)))

    out = pl.pallas_call(
        _scale_fc_kernel,
        out_shape=jax.ShapeDtypeStruct((Rp, 128), jnp.float32),
        grid=(nsteps,),
        in_specs=[
            pl.BlockSpec((tr, 256), lambda i: (i, 0)),
            pl.BlockSpec((tr, 64), lambda i: (i, 0)),
            pl.BlockSpec((256, 128), lambda i: (0, 0)),
            pl.BlockSpec((1, 128), lambda i: (0, 0)),
        ],
        out_specs=pl.BlockSpec((tr, 128), lambda i: (i, 0)),
        compiler_params=_compiler_params(),
    )(xv, a_rows, wfc_p, bfc_p)
    return out[:R, :10]


# --------------------------------------------------------------------------- #
# full forward
# --------------------------------------------------------------------------- #
@jax.jit
def attention_cnn_forward(x_nchw, p):
    x = jnp.transpose(x_nchw, (0, 2, 3, 1))                       # NCHW -> NHWC
    # pad 3 input channels to 8 (matches zero-padded conv1 weight), drop to bf16
    x = jnp.pad(x, ((0, 0), (0, 0), (0, 0), (0, 5))).astype(jnp.bfloat16)
    x = conv3x3_relu_pool(x, p["wk1"], p["cb1"])                  # (N,16,16, 64)
    x = conv3x3_relu_pool(x, p["wk2"], p["cb2"])                  # (N, 8, 8,128)
    x = conv3x3_relu(x, p["wk3"], p["cb3"])                       # (N, 8, 8,256)
    return attention_and_fc(x, p["w1_bf"], p["att_b1"],
                            p["att_w2"], p["att_b2"],
                            p["wfc_pad"], p["bfc_pad"])           # (N*64, 10)


# --------------------------------------------------------------------------- #
# deterministic synthetic parameters (shapes from the module's __init__)
# --------------------------------------------------------------------------- #
def init_params(key):
    ks = jax.random.split(key, 12)

    def nrm(k, shape, scale=0.05):
        return jax.random.normal(k, shape, jnp.float32) * scale

    p = {
        "cw1": nrm(ks[0], (64, 3, 3, 3)),    "cb1": nrm(ks[1], (64,)),
        "cw2": nrm(ks[2], (128, 64, 3, 3)),  "cb2": nrm(ks[3], (128,)),
        "cw3": nrm(ks[4], (256, 128, 3, 3)), "cb3": nrm(ks[5], (256,)),
        "att_w1": nrm(ks[6], (256, 64)),     "att_b1": nrm(ks[7], (64,)),
        "att_w2": nrm(ks[8], (64,)),         "att_b2": nrm(ks[9], ()),
        "fc_w": nrm(ks[10], (256, 10)),      "fc_b": nrm(ks[11], (10,)),
    }
    # kernel-format conv weights: (9, Cin, Cout) bf16, tap order (kh, kw);
    # conv1's Cin is zero-padded 3 -> 8.
    for i, name in ((1, "cw1"), (2, "cw2"), (3, "cw3")):
        w = p[name]                                  # torch layout (Cout, Cin, 3, 3)
        cout, cin = w.shape[0], w.shape[1]
        wk = jnp.transpose(w, (2, 3, 1, 0))          # (3, 3, Cin, Cout)
        if i == 1:
            wk = jnp.pad(wk, ((0, 0), (0, 0), (0, 8 - cin), (0, 0)))
            cin = 8
        p[f"wk{i}"] = wk.reshape(9, cin, cout).astype(jnp.bfloat16)
    p["w1_bf"] = p["att_w1"].astype(jnp.bfloat16)
    p["wfc_pad"] = jnp.zeros((256, 128), jnp.bfloat16).at[:, :10].set(
        p["fc_w"].astype(jnp.bfloat16))
    p["bfc_pad"] = jnp.zeros((1, 128), jnp.float32).at[0, :10].set(p["fc_b"])
    return p


# --------------------------------------------------------------------------- #
# pure-JAX reference (mirrors the PyTorch forward literally, f32 HIGHEST)
# --------------------------------------------------------------------------- #
def reference_forward(x, p):
    hi = lax.Precision.HIGHEST

    def conv(x, w, b):
        y = lax.conv_general_dilated(x, w, (1, 1), ((1, 1), (1, 1)),
                                     dimension_numbers=("NCHW", "OIHW", "NCHW"),
                                     precision=hi)
        return y + b.reshape(1, -1, 1, 1)

    def pool(x):
        n, c, h, w = x.shape
        return x.reshape(n, c, h // 2, 2, w // 2, 2).max(axis=(3, 5))

    x = pool(jax.nn.relu(conv(x, p["cw1"], p["cb1"])))
    x = pool(jax.nn.relu(conv(x, p["cw2"], p["cb2"])))
    x = jax.nn.relu(conv(x, p["cw3"], p["cb3"]))                  # (N, 256, 8, 8)
    xr = x.reshape(-1, 256)
    h = jnp.tanh(jnp.dot(xr, p["att_w1"], precision=hi) + p["att_b1"])
    logits = jnp.dot(h, p["att_w2"].reshape(64, 1), precision=hi) + p["att_b2"]
    a = jax.nn.softmax(logits, axis=0)
    xs = x * a.reshape(-1, 1, 8, 8)
    return jnp.dot(xs.reshape(-1, 256), p["fc_w"], precision=hi) + p["fc_b"]


if __name__ == "__main__":
    key = jax.random.PRNGKey(0)
    pkey, xkey = jax.random.split(key)
    params = init_params(pkey)
    x = jax.random.normal(xkey, (2, 3, 32, 32), jnp.float32)  # NCHW like PyTorch

    out = jax.block_until_ready(attention_cnn_forward(x, params))
    ref = reference_forward(x, params)

    assert out.shape == (2 * 64, 10), out.shape
    assert bool(jnp.all(jnp.isfinite(out)))
    err = float(jnp.max(jnp.abs(out - ref)))
    assert err < 1e-2, err   # bf16 activations/weights vs f32 HIGHEST reference
    print("KERNEL_OK")
</pallas_src>

<mosaic_0001>
module attributes {stable_mosaic.version = 11 : i64} {
  func.func @kernel(%arg0: i32, %arg1: memref<4x1x17x17x8xbf16, #tpu.memory_space<vmem>>, %arg2: memref<9x8x64xbf16, #tpu.memory_space<vmem>>, %arg3: memref<1x64xf32, #tpu.memory_space<vmem>>, %arg4: memref<256x64xbf16, #tpu.memory_space<vmem>>) attributes {dimension_semantics = [#tpu.dimension_semantics<parallel>], iteration_bounds = array<i64: 2>, scalar_prefetch = 0 : i64, scratch_operands = 0 : i64, tpu.core_type = #tpu.core_type<tc>, window_params = [{transform_indices = @transform_0, window_bounds = array<i64: 4, 1, 17, 17, 8>}, {pipeline_mode = #tpu.pipeline_mode<synchronous>, transform_indices = @transform_1, window_bounds = array<i64: 9, 8, 64>}, {pipeline_mode = #tpu.pipeline_mode<synchronous>, transform_indices = @transform_2, window_bounds = array<i64: 1, 64>}, {transform_indices = @transform_3, window_bounds = array<i64: 256, 64>}]} {
    %c0 = arith.constant 0 : index
    %c0_0 = arith.constant 0 : index
    %c0_1 = arith.constant 0 : index
    %c0_2 = arith.constant 0 : index
    %c0_3 = arith.constant 0 : index
    %0 = vector.load %arg1[%c0, %c0_0, %c0_1, %c0_2, %c0_3] : memref<4x1x17x17x8xbf16, #tpu.memory_space<vmem>>, vector<1x1x17x17x8xbf16>
    %1 = vector.shape_cast %0 : vector<1x1x17x17x8xbf16> to vector<1x17x17x8xbf16>
    %2 = arith.extf %1 : vector<1x17x17x8xbf16> to vector<1x17x17x8xf32>
    %c1 = arith.constant 1 : index
    %c0_4 = arith.constant 0 : index
    %c0_5 = arith.constant 0 : index
    %c0_6 = arith.constant 0 : index
    %c0_7 = arith.constant 0 : index
    %3 = vector.load %arg1[%c1, %c0_4, %c0_5, %c0_6, %c0_7] : memref<4x1x17x17x8xbf16, #tpu.memory_space<vmem>>, vector<1x1x17x17x8xbf16>
    %4 = vector.shape_cast %3 : vector<1x1x17x17x8xbf16> to vector<1x17x17x8xbf16>
    %5 = arith.extf %4 : vector<1x17x17x8xbf16> to vector<1x17x17x8xf32>
    %c2 = arith.constant 2 : index
    %c0_8 = arith.constant 0 : index
    %c0_9 = arith.constant 0 : index
    %c0_10 = arith.constant 0 : index
    %c0_11 = arith.constant 0 : index
    %6 = vector.load %arg1[%c2, %c0_8, %c0_9, %c0_10, %c0_11] : memref<4x1x17x17x8xbf16, #tpu.memory_space<vmem>>, vector<1x1x17x17x8xbf16>
    %7 = vector.shape_cast %6 : vector<1x1x17x17x8xbf16> to vector<1x17x17x8xbf16>
    %8 = arith.extf %7 : vector<1x17x17x8xbf16> to vector<1x17x17x8xf32>
    %c3 = arith.constant 3 : index
    %c0_12 = arith.constant 0 : index
    %c0_13 = arith.constant 0 : index
    %c0_14 = arith.constant 0 : index
    %c0_15 = arith.constant 0 : index
    %9 = vector.load %arg1[%c3, %c0_12, %c0_13, %c0_14, %c0_15] : memref<4x1x17x17x8xbf16, #tpu.memory_space<vmem>>, vector<1x1x17x17x8xbf16>
    %10 = vector.shape_cast %9 : vector<1x1x17x17x8xbf16> to vector<1x17x17x8xbf16>
    %11 = arith.extf %10 : vector<1x17x17x8xbf16> to vector<1x17x17x8xf32>
    %c0_16 = arith.constant 0 : index
    %c0_17 = arith.constant 0 : index
    %c0_18 = arith.constant 0 : index
    %12 = vector.load %arg2[%c0_16, %c0_17, %c0_18] : memref<9x8x64xbf16, #tpu.memory_space<vmem>>, vector<1x8x64xbf16>
    %13 = vector.shape_cast %12 : vector<1x8x64xbf16> to vector<8x64xbf16>
    %c1_19 = arith.constant 1 : index
    %c0_20 = arith.constant 0 : index
    %c0_21 = arith.constant 0 : index
    %14 = vector.load %arg2[%c1_19, %c0_20, %c0_21] : memref<9x8x64xbf16, #tpu.memory_space<vmem>>, vector<1x8x64xbf16>
    %15 = vector.shape_cast %14 : vector<1x8x64xbf16> to vector<8x64xbf16>
    %c2_22 = arith.constant 2 : index
    %c0_23 = arith.constant 0 : index
    %c0_24 = arith.constant 0 : index
    %16 = vector.load %arg2[%c2_22, %c0_23, %c0_24] : memref<9x8x64xbf16, #tpu.memory_space<vmem>>, vector<1x8x64xbf16>
    %17 = vector.shape_cast %16 : vector<1x8x64xbf16> to vector<8x64xbf16>
    %c3_25 = arith.constant 3 : index
    %c0_26 = arith.constant 0 : index
    %c0_27 = arith.constant 0 : index
    %18 = vector.load %arg2[%c3_25, %c0_26, %c0_27] : memref<9x8x64xbf16, #tpu.memory_space<vmem>>, vector<1x8x64xbf16>
    %19 = vector.shape_cast %18 : vector<1x8x64xbf16> to vector<8x64xbf16>
    %c4 = arith.constant 4 : index
    %c0_28 = arith.constant 0 : index
    %c0_29 = arith.constant 0 : index
    %20 = vector.load %arg2[%c4, %c0_28, %c0_29] : memref<9x8x64xbf16, #tpu.memory_space<vmem>>, vector<1x8x64xbf16>
    %21 = vector.shape_cast %20 : vector<1x8x64xbf16> to vector<8x64xbf16>
    %c5 = arith.constant 5 : index
    %c0_30 = arith.constant 0 : index
    %c0_31 = arith.constant 0 : index
    %22 = vector.load %arg2[%c5, %c0_30, %c0_31] : memref<9x8x64xbf16, #tpu.memory_space<vmem>>, vector<1x8x64xbf16>
    %23 = vector.shape_cast %22 : vector<1x8x64xbf16> to vector<8x64xbf16>
    %c6 = arith.constant 6 : index
    %c0_32 = arith.constant 0 : index
    %c0_33 = arith.constant 0 : index
    %24 = vector.load %arg2[%c6, %c0_32, %c0_33] : memref<9x8x64xbf16, #tpu.memory_space<vmem>>, vector<1x8x64xbf16>
    %25 = vector.shape_cast %24 : vector<1x8x64xbf16> to vector<8x64xbf16>
    %c7 = arith.constant 7 : index
    %c0_34 = arith.constant 0 : index
    %c0_35 = arith.constant 0 : index
    %26 = vector.load %arg2[%c7, %c0_34, %c0_35] : memref<9x8x64xbf16, #tpu.memory_space<vmem>>, vector<1x8x64xbf16>
    %27 = vector.shape_cast %26 : vector<1x8x64xbf16> to vector<8x64xbf16>
    %c8 = arith.constant 8 : index
    %c0_36 = arith.constant 0 : index
    %c0_37 = arith.constant 0 : index
    %28 = vector.load %arg2[%c8, %c0_36, %c0_37] : memref<9x8x64xbf16, #tpu.memory_space<vmem>>, vector<1x8x64xbf16>
    %29 = vector.shape_cast %28 : vector<1x8x64xbf16> to vector<8x64xbf16>
    %30 = vector.extract_strided_slice %2 {offsets = [0, 0, 0, 0], sizes = [1, 16, 16, 8], strides = [1, 1, 1, 1]} : vector<1x17x17x8xf32> to vector<1x16x16x8xf32>
    %31 = vector.shape_cast %30 : vector<1x16x16x8xf32> to vector<256x8xf32>
    %32 = arith.truncf %31 : vector<256x8xf32> to vector<256x8xbf16>
    %cst = arith.constant dense<0.000000e+00> : vector<256x64xf32>
    %33 = tpu.matmul %32, %13, %cst {dimension_numbers = #tpu.dot_dimension_numbers<[1], [0], [0], [1], [0, 0, 1, 1], [], []>} : vector<256x8xbf16>, vector<8x64xbf16>, vector<256x64xf32> -> vector<256x64xf32>
    %34 = vector.extract_strided_slice %5 {offsets = [0, 0, 0, 0], sizes = [1, 16, 16, 8], strides = [1, 1, 1, 1]} : vector<1x17x17x8xf32> to vector<1x16x16x8xf32>
    %35 = vector.shape_cast %34 : vector<1x16x16x8xf32> to vector<256x8xf32>
    %36 = arith.truncf %35 : vector<256x8xf32> to vector<256x8xbf16>
    %cst_38 = arith.constant dense<0.000000e+00> : vector<256x64xf32>
    %37 = tpu.matmul %36, %15, %cst_38 {dimension_numbers = #tpu.dot_dimension_numbers<[1], [0], [0], [1], [0, 0, 1, 1], [], []>} : vector<256x8xbf16>, vector<8x64xbf16>, vector<256x64xf32> -> vector<256x64xf32>
    %38 = arith.addf %33, %37 : vector<256x64xf32>
    %39 = vector.extract_strided_slice %2 {offsets = [0, 0, 1, 0], sizes = [1, 16, 16, 8], strides = [1, 1, 1, 1]} : vector<1x17x17x8xf32> to vector<1x16x16x8xf32>
    %40 = vector.shape_cast %39 : vector<1x16x16x8xf32> to vector<256x8xf32>
    %41 = arith.truncf %40 : vector<256x8xf32> to vector<256x8xbf16>
    %cst_39 = arith.constant dense<0.000000e+00> : vector<256x64xf32>
    %42 = tpu.matmul %41, %17, %cst_39 {dimension_numbers = #tpu.dot_dimension_numbers<[1], [0], [0], [1], [0, 0, 1, 1], [], []>} : vector<256x8xbf16>, vector<8x64xbf16>, vector<256x64xf32> -> vector<256x64xf32>
    %43 = arith.addf %38, %42 : vector<256x64xf32>
    %44 = vector.extract_strided_slice %8 {offsets = [0, 0, 0, 0], sizes = [1, 16, 16, 8], strides = [1, 1, 1, 1]} : vector<1x17x17x8xf32> to vector<1x16x16x8xf32>
    %45 = vector.shape_cast %44 : vector<1x16x16x8xf32> to vector<256x8xf32>
    %46 = arith.truncf %45 : vector<256x8xf32> to vector<256x8xbf16>
    %cst_40 = arith.constant dense<0.000000e+00> : vector<256x64xf32>
    %47 = tpu.matmul %46, %19, %cst_40 {dimension_numbers = #tpu.dot_dimension_numbers<[1], [0], [0], [1], [0, 0, 1, 1], [], []>} : vector<256x8xbf16>, vector<8x64xbf16>, vector<256x64xf32> -> vector<256x64xf32>
    %48 = arith.addf %43, %47 : vector<256x64xf32>
    %49 = vector.extract_strided_slice %11 {offsets = [0, 0, 0, 0], sizes = [1, 16, 16, 8], strides = [1, 1, 1, 1]} : vector<1x17x17x8xf32> to vector<1x16x16x8xf32>
    %50 = vector.shape_cast %49 : vector<1x16x16x8xf32> to vector<256x8xf32>
    %51 = arith.truncf %50 : vector<256x8xf32> to vector<256x8xbf16>
    %cst_41 = arith.constant dense<0.000000e+00> : vector<256x64xf32>
    %52 = tpu.matmul %51, %21, %cst_41 {dimension_numbers = #tpu.dot_dimension_numbers<[1], [0], [0], [1], [0, 0, 1, 1], [], []>} : vector<256x8xbf16>, vector<8x64xbf16>, vector<256x64xf32> -> vector<256x64xf32>
    %53 = arith.addf %48, %52 : vector<256x64xf32>
    %54 = vector.extract_strided_slice %8 {offsets = [0, 0, 1, 0], sizes = [1, 16, 16, 8], strides = [1, 1, 1, 1]} : vector<1x17x17x8xf32> to vector<1x16x16x8xf32>
    %55 = vector.shape_cast %54 : vector<1x16x16x8xf32> to vector<256x8xf32>
    %56 = arith.truncf %55 : vector<256x8xf32> to vector<256x8xbf16>
    %cst_42 = arith.constant dense<0.000000e+00> : vector<256x64xf32>
    %57 = tpu.matmul %56, %23, %cst_42 {dimension_numbers = #tpu.dot_dimension_numbers<[1], [0], [0], [1], [0, 0, 1, 1], [], []>} : vector<256x8xbf16>, vector<8x64xbf16>, vector<256x64xf32> -> vector<256x64xf32>
    %58 = arith.addf %53, %57 : vector<256x64xf32>
    %59 = vector.extract_strided_slice %2 {offsets = [0, 1, 0, 0], sizes = [1, 16, 16, 8], strides = [1, 1, 1, 1]} : vector<1x17x17x8xf32> to vector<1x16x16x8xf32>
    %60 = vector.shape_cast %59 : vector<1x16x16x8xf32> to vector<256x8xf32>
    %61 = arith.truncf %60 : vector<256x8xf32> to vector<256x8xbf16>
    %cst_43 = arith.constant dense<0.000000e+00> : vector<256x64xf32>
    %62 = tpu.matmul %61, %25, %cst_43 {dimension_numbers = #tpu.dot_dimension_numbers<[1], [0], [0], [1], [0, 0, 1, 1], [], []>} : vector<256x8xbf16>, vector<8x64xbf16>, vector<256x64xf32> -> vector<256x64xf32>
    %63 = arith.addf %58, %62 : vector<256x64xf32>
    %64 = vector.extract_strided_slice %5 {offsets = [0, 1, 0, 0], sizes = [1, 16, 16, 8], strides = [1, 1, 1, 1]} : vector<1x17x17x8xf32> to vector<1x16x16x8xf32>
    %65 = vector.shape_cast %64 : vector<1x16x16x8xf32> to vector<256x8xf32>
    %66 = arith.truncf %65 : vector<256x8xf32> to vector<256x8xbf16>
    %cst_44 = arith.constant dense<0.000000e+00> : vector<256x64xf32>
    %67 = tpu.matmul %66, %27, %cst_44 {dimension_numbers = #tpu.dot_dimension_numbers<[1], [0], [0], [1], [0, 0, 1, 1], [], []>} : vector<256x8xbf16>, vector<8x64xbf16>, vector<256x64xf32> -> vector<256x64xf32>
    %68 = arith.addf %63, %67 : vector<256x64xf32>
    %69 = vector.extract_strided_slice %2 {offsets = [0, 1, 1, 0], sizes = [1, 16, 16, 8], strides = [1, 1, 1, 1]} : vector<1x17x17x8xf32> to vector<1x16x16x8xf32>
    %70 = vector.shape_cast %69 : vector<1x16x16x8xf32> to vector<256x8xf32>
    %71 = arith.truncf %70 : vector<256x8xf32> to vector<256x8xbf16>
    %cst_45 = arith.constant dense<0.000000e+00> : vector<256x64xf32>
    %72 = tpu.matmul %71, %29, %cst_45 {dimension_numbers = #tpu.dot_dimension_numbers<[1], [0], [0], [1], [0, 0, 1, 1], [], []>} : vector<256x8xbf16>, vector<8x64xbf16>, vector<256x64xf32> -> vector<256x64xf32>
    %73 = arith.addf %68, %72 : vector<256x64xf32>
    %74 = vector.extract_strided_slice %5 {offsets = [0, 0, 0, 0], sizes = [1, 16, 16, 8], strides = [1, 1, 1, 1]} : vector<1x17x17x8xf32> to vector<1x16x16x8xf32>
    %75 = vector.shape_cast %74 : vector<1x16x16x8xf32> to vector<256x8xf32>
    %76 = arith.truncf %75 : vector<256x8xf32> to vector<256x8xbf16>
    %cst_46 = arith.constant dense<0.000000e+00> : vector<256x64xf32>
    %77 = tpu.matmul %76, %13, %cst_46 {dimension_numbers = #tpu.dot_dimension_numbers<[1], [0], [0], [1], [0, 0, 1, 1], [], []>} : vector<256x8xbf16>, vector<8x64xbf16>, vector<256x64xf32> -> vector<256x64xf32>
    %78 = vector.extract_strided_slice %2 {offsets = [0, 0, 1, 0], sizes = [1, 16, 16, 8], strides = [1, 1, 1, 1]} : vector<1x17x17x8xf32> to vector<1x16x16x8xf32>
    %79 = vector.shape_cast %78 : vector<1x16x16x8xf32> to vector<256x8xf32>
    %80 = arith.truncf %79 : vector<256x8xf32> to vector<256x8xbf16>
    %cst_47 = arith.constant dense<0.000000e+00> : vector<256x64xf32>
    %81 = tpu.matmul %80, %15, %cst_47 {dimension_numbers = #tpu.dot_dimension_numbers<[1], [0], [0], [1], [0, 0, 1, 1], [], []>} : vector<256x8xbf16>, vector<8x64xbf16>, vector<256x64xf32> -> vector<256x64xf32>
    %82 = arith.addf %77, %81 : vector<256x64xf32>
    %83 = vector.extract_strided_slice %5 {offsets = [0, 0, 1, 0], sizes = [1, 16, 16, 8], strides = [1, 1, 1, 1]} : vector<1x17x17x8xf32> to vector<1x16x16x8xf32>
    %84 = vector.shape_cast %83 : vector<1x16x16x8xf32> to vector<256x8xf32>
    %85 = arith.truncf %84 : vector<256x8xf32> to vector<256x8xbf16>
    %cst_48 = arith.constant dense<0.000000e+00> : vector<256x64xf32>
    %86 = tpu.matmul %85, %17, %cst_48 {dimension_numbers = #tpu.dot_dimension_numbers<[1], [0], [0], [1], [0, 0, 1, 1], [], []>} : vector<256x8xbf16>, vector<8x64xbf16>, vector<256x64xf32> -> vector<256x64xf32>
    %87 = arith.addf %82, %86 : vector<256x64xf32>
    %88 = vector.extract_strided_slice %11 {offsets = [0, 0, 0, 0], sizes = [1, 16, 16, 8], strides = [1, 1, 1, 1]} : vector<1x17x17x8xf32> to vector<1x16x16x8xf32>
    %89 = vector.shape_cast %88 : vector<1x16x16x8xf32> to vector<256x8xf32>
    %90 = arith.truncf %89 : vector<256x8xf32> to vector<256x8xbf16>
    %cst_49 = arith.constant dense<0.000000e+00> : vector<256x64xf32>
    %91 = tpu.matmul %90, %19, %cst_49 {dimension_numbers = #tpu.dot_dimension_numbers<[1], [0], [0], [1], [0, 0, 1, 1], [], []>} : vector<256x8xbf16>, vector<8x64xbf16>, vector<256x64xf32> -> vector<256x64xf32>
    %92 = arith.addf %87, %91 : vector<256x64xf32>
    %93 = vector.extract_strided_slice %8 {offsets = [0, 0, 1, 0], sizes = [1, 16, 16, 8], strides = [1, 1, 1, 1]} : vector<1x17x17x8xf32> to vector<1x16x16x8xf32>
    %94 = vector.shape_cast %93 : vector<1x16x16x8xf32> to vector<256x8xf32>
    %95 = arith.truncf %94 : vector<256x8xf32> to vector<256x8xbf16>
    %cst_50 = arith.constant dense<0.000000e+00> : vector<256x64xf32>
    %96 = tpu.matmul %95, %21, %cst_50 {dimension_numbers = #tpu.dot_dimension_numbers<[1], [0], [0], [1], [0, 0, 1, 1], [], []>} : vector<256x8xbf16>, vector<8x64xbf16>, vector<256x64xf32> -> vector<256x64xf32>
    %97 = arith.addf %92, %96 : vector<256x64xf32>
    %98 = vector.extract_strided_slice %11 {offsets = [0, 0, 1, 0], sizes = [1, 16, 16, 8], strides = [1, 1, 1, 1]} : vector<1x17x17x8xf32> to vector<1x16x16x8xf32>
    %99 = vector.shape_cast %98 : vector<1x16x16x8xf32> to vector<256x8xf32>
    %100 = arith.truncf %99 : vector<256x8xf32> to vector<256x8xbf16>
    %cst_51 = arith.constant dense<0.000000e+00> : vector<256x64xf32>
    %101 = tpu.matmul %100, %23, %cst_51 {dimension_numbers = #tpu.dot_dimension_numbers<[1], [0], [0], [1], [0, 0, 1, 1], [], []>} : vector<256x8xbf16>, vector<8x64xbf16>, vector<256x64xf32> -> vector<256x64xf32>
    %102 = arith.addf %97, %101 : vector<256x64xf32>
    %103 = vector.extract_strided_slice %5 {offsets = [0, 1, 0, 0], sizes = [1, 16, 16, 8], strides = [1, 1, 1, 1]} : vector<1x17x17x8xf32> to vector<1x16x16x8xf32>
    %104 = vector.shape_cast %103 : vector<1x16x16x8xf32> to vector<256x8xf32>
    %105 = arith.truncf %104 : vector<256x8xf32> to vector<256x8xbf16>
    %cst_52 = arith.constant dense<0.000000e+00> : vector<256x64xf32>
    %106 = tpu.matmul %105, %25, %cst_52 {dimension_numbers = #tpu.dot_dimension_numbers<[1], [0], [0], [1], [0, 0, 1, 1], [], []>} : vector<256x8xbf16>, vector<8x64xbf16>, vector<256x64xf32> -> vector<256x64xf32>
    %107 = arith.addf %102, %106 : vector<256x64xf32>
    %108 = vector.extract_strided_slice %2 {offsets = [0, 1, 1, 0], sizes = [1, 16, 16, 8], strides = [1, 1, 1, 1]} : vector<1x17x17x8xf32> to vector<1x16x16x8xf32>
    %109 = vector.shape_cast %108 : vector<1x16x16x8xf32> to vector<256x8xf32>
    %110 = arith.truncf %109 : vector<256x8xf32> to vector<256x8xbf16>
    %cst_53 = arith.constant dense<0.000000e+00> : vector<256x64xf32>
    %111 = tpu.matmul %110, %27, %cst_53 {dimension_numbers = #tpu.dot_dimension_numbers<[1], [0], [0], [1], [0, 0, 1, 1], [], []>} : vector<256x8xbf16>, vector<8x64xbf16>, vector<256x64xf32> -> vector<256x64xf32>
    %112 = arith.addf %107, %111 : vector<256x64xf32>
    %113 = vector.extract_strided_slice %5 {offsets = [0, 1, 1, 0], sizes = [1, 16, 16, 8], strides = [1, 1, 1, 1]} : vector<1x17x17x8xf32> to vector<1x16x16x8xf32>
    %114 = vector.shape_cast %113 : vector<1x16x16x8xf32> to vector<256x8xf32>
    %115 = arith.truncf %114 : vector<256x8xf32> to vector<256x8xbf16>
    %cst_54 = arith.constant dense<0.000000e+00> : vector<256x64xf32>
    %116 = tpu.matmul %115, %29, %cst_54 {dimension_numbers = #tpu.dot_dimension_numbers<[1], [0], [0], [1], [0, 0, 1, 1], [], []>} : vector<256x8xbf16>, vector<8x64xbf16>, vector<256x64xf32> -> vector<256x64xf32>
    %117 = arith.addf %112, %116 : vector<256x64xf32>
    %118 = arith.maximumf %73, %117 : vector<256x64xf32>
    %119 = vector.extract_strided_slice %8 {offsets = [0, 0, 0, 0], sizes = [1, 16, 16, 8], strides = [1, 1, 1, 1]} : vector<1x17x17x8xf32> to vector<1x16x16x8xf32>
    %120 = vector.shape_cast %119 : vector<1x16x16x8xf32> to vector<256x8xf32>
    %121 = arith.truncf %120 : vector<256x8xf32> to vector<256x8xbf16>
    %cst_55 = arith.constant dense<0.000000e+00> : vector<256x64xf32>
    %122 = tpu.matmul %121, %13, %cst_55 {dimension_numbers = #tpu.dot_dimension_numbers<[1], [0], [0], [1], [0, 0, 1, 1], [], []>} : vector<256x8xbf16>, vector<8x64xbf16>, vector<256x64xf32> -> vector<256x64xf32>
    %123 = vector.extract_strided_slice %11 {offsets = [0, 0, 0, 0], sizes = [1, 16, 16, 8], strides = [1, 1, 1, 1]} : vector<1x17x17x8xf32> to vector<1x16x16x8xf32>
    %124 = vector.shape_cast %123 : vector<1x16x16x8xf32> to vector<256x8xf32>
    %125 = arith.truncf %124 : vector<256x8xf32> to vector<256x8xbf16>
    %cst_56 = arith.constant dense<0.000000e+00> : vector<256x64xf32>
    %126 = tpu.matmul %125, %15, %cst_56 {dimension_numbers = #tpu.dot_dimension_numbers<[1], [0], [0], [1], [0, 0, 1, 1], [], []>} : vector<256x8xbf16>, vector<8x64xbf16>, vector<256x64xf32> -> vector<256x64xf32>
    %127 = arith.addf %122, %126 : vector<256x64xf32>
    %128 = vector.extract_strided_slice %8 {offsets = [0, 0, 1, 0], sizes = [1, 16, 16, 8], strides = [1, 1, 1, 1]} : vector<1x17x17x8xf32> to vector<1x16x16x8xf32>
    %129 = vector.shape_cast %128 : vector<1x16x16x8xf32> to vector<256x8xf32>
    %130 = arith.truncf %129 : vector<256x8xf32> to vector<256x8xbf16>
    %cst_57 = arith.constant dense<0.000000e+00> : vector<256x64xf32>
    %131 = tpu.matmul %130, %17, %cst_57 {dimension_numbers = #tpu.dot_dimension_numbers<[1], [0], [0], [1], [0, 0, 1, 1], [], []>} : vector<256x8xbf16>, vector<8x64xbf16>, vector<256x64xf32> -> vector<256x64xf32>
    %132 = arith.addf %127, %131 : vector<256x64xf32>
    %133 = vector.extract_strided_slice %2 {offsets = [0, 1, 0, 0], sizes = [1, 16, 16, 8], strides = [1, 1, 1, 1]} : vector<1x17x17x8xf32> to vector<1x16x16x8xf32>
    %134 = vector.shape_cast %133 : vector<1x16x16x8xf32> to vector<256x8xf32>
    %135 = arith.truncf %134 : vector<256x8xf32> to vector<256x8xbf16>
    %cst_58 = arith.constant dense<0.000000e+00> : vector<256x64xf32>
    %136 = tpu.matmul %135, %19, %cst_58 {dimension_numbers = #tpu.dot_dimension_numbers<[1], [0], [0], [1], [0, 0, 1, 1], [], []>} : vector<256x8xbf16>, vector<8x64xbf16>, vector<256x64xf32> -> vector<256x64xf32>
    %137 = arith.addf %132, %136 : vector<256x64xf32>
    %138 = vector.extract_strided_slice %5 {offsets = [0, 1, 0, 0], sizes = [1, 16, 16, 8], strides = [1, 1, 1, 1]} : vector<1x17x17x8xf32> to vector<1x16x16x8xf32>
    %139 = vector.shape_cast %138 : vector<1x16x16x8xf32> to vector<256x8xf32>
    %140 = arith.truncf %139 : vector<256x8xf32> to vector<256x8xbf16>
    %cst_59 = arith.constant dense<0.000000e+00> : vector<256x64xf32>
    %141 = tpu.matmul %140, %21, %cst_59 {dimension_numbers = #tpu.dot_dimension_numbers<[1], [0], [0], [1], [0, 0, 1, 1], [], []>} : vector<256x8xbf16>, vector<8x64xbf16>, vector<256x64xf32> -> vector<256x64xf32>
    %142 = arith.addf %137, %141 : vector<256x64xf32>
    %143 = vector.extract_strided_slice %2 {offsets = [0, 1, 1, 0], sizes = [1, 16, 16, 8], strides = [1, 1, 1, 1]} : vector<1x17x17x8xf32> to vector<1x16x16x8xf32>
    %144 = vector.shape_cast %143 : vector<1x16x16x8xf32> to vector<256x8xf32>
    %145 = arith.truncf %144 : vector<256x8xf32> to vector<256x8xbf16>
    %cst_60 = arith.constant dense<0.000000e+00> : vector<256x64xf32>
    %146 = tpu.matmul %145, %23, %cst_60 {dimension_numbers = #tpu.dot_dimension_numbers<[1], [0], [0], [1], [0, 0, 1, 1], [], []>} : vector<256x8xbf16>, vector<8x64xbf16>, vector<256x64xf32> -> vector<256x64xf32>
    %147 = arith.addf %142, %146 : vector<256x64xf32>
    %148 = vector.extract_strided_slice %8 {offsets = [0, 1, 0, 0], sizes = [1, 16, 16, 8], strides = [1, 1, 1, 1]} : vector<1x17x17x8xf32> to vector<1x16x16x8xf32>
    %149 = vector.shape_cast %148 : vector<1x16x16x8xf32> to vector<256x8xf32>
    %150 = arith.truncf %149 : vector<256x8xf32> to vector<256x8xbf16>
    %cst_61 = arith.constant dense<0.000000e+00> : vector<256x64xf32>
    %151 = tpu.matmul %150, %25, %cst_61 {dimension_numbers = #tpu.dot_dimension_numbers<[1], [0], [0], [1], [0, 0, 1, 1], [], []>} : vector<256x8xbf16>, vector<8x64xbf16>, vector<256x64xf32> -> vector<256x64xf32>
    %152 = arith.addf %147, %151 : vector<256x64xf32>
    %153 = vector.extract_strided_slice %11 {offsets = [0, 1, 0, 0], sizes = [1, 16, 16, 8], strides = [1, 1, 1, 1]} : vector<1x17x17x8xf32> to vector<1x16x16x8xf32>
    %154 = vector.shape_cast %153 : vector<1x16x16x8xf32> to vector<256x8xf32>
    %155 = arith.truncf %154 : vector<256x8xf32> to vector<256x8xbf16>
    %cst_62 = arith.constant dense<0.000000e+00> : vector<256x64xf32>
    %156 = tpu.matmul %155, %27, %cst_62 {dimension_numbers = #tpu.dot_dimension_numbers<[1], [0], [0], [1], [0, 0, 1, 1], [], []>} : vector<256x8xbf16>, vector<8x64xbf16>, vector<256x64xf32> -> vector<256x64xf32>
    %157 = arith.addf %152, %156 : vector<256x64xf32>
    %158 = vector.extract_strided_slice %8 {offsets = [0, 1, 1, 0], sizes = [1, 16, 16, 8], strides = [1, 1, 1, 1]} : vector<1x17x17x8xf32> to vector<1x16x16x8xf32>
    %159 = vector.shape_cast %158 : vector<1x16x16x8xf32> to vector<256x8xf32>
    %160 = arith.truncf %159 : vector<256x8xf32> to vector<256x8xbf16>
    %cst_63 = arith.constant dense<0.000000e+00> : vector<256x64xf32>
    %161 = tpu.matmul %160, %29, %cst_63 {dimension_numbers = #tpu.dot_dimension_numbers<[1], [0], [0], [1], [0, 0, 1, 1], [], []>} : vector<256x8xbf16>, vector<8x64xbf16>, vector<256x64xf32> -> vector<256x64xf32>
    %162 = arith.addf %157, %161 : vector<256x64xf32>
    %163 = arith.maximumf %118, %162 : vector<256x64xf32>
    %164 = vector.extract_strided_slice %11 {offsets = [0, 0, 0, 0], sizes = [1, 16, 16, 8], strides = [1, 1, 1, 1]} : vector<1x17x17x8xf32> to vector<1x16x16x8xf32>
    %165 = vector.shape_cast %164 : vector<1x16x16x8xf32> to vector<256x8xf32>
    %166 = arith.truncf %165 : vector<256x8xf32> to vector<256x8xbf16>
    %cst_64 = arith.constant dense<0.000000e+00> : vector<256x64xf32>
    %167 = tpu.matmul %166, %13, %cst_64 {dimension_numbers = #tpu.dot_dimension_numbers<[1], [0], [0], [1], [0, 0, 1, 1], [], []>} : vector<256x8xbf16>, vector<8x64xbf16>, vector<256x64xf32> -> vector<256x64xf32>
    %168 = vector.extract_strided_slice %8 {offsets = [0, 0, 1, 0], sizes = [1, 16, 16, 8], strides = [1, 1, 1, 1]} : vector<1x17x17x8xf32> to vector<1x16x16x8xf32>
    %169 = vector.shape_cast %168 : vector<1x16x16x8xf32> to vector<256x8xf32>
    %170 = arith.truncf %169 : vector<256x8xf32> to vector<256x8xbf16>
    %cst_65 = arith.constant dense<0.000000e+00> : vector<256x64xf32>
    %171 = tpu.matmul %170, %15, %cst_65 {dimension_numbers = #tpu.dot_dimension_numbers<[1], [0], [0], [1], [0, 0, 1, 1], [], []>} : vector<256x8xbf16>, vector<8x64xbf16>, vector<256x64xf32> -> vector<256x64xf32>
    %172 = arith.addf %167, %171 : vector<256x64xf32>
    %173 = vector.extract_strided_slice %11 {offsets = [0, 0, 1, 0], sizes = [1, 16, 16, 8], strides = [1, 1, 1, 1]} : vector<1x17x17x8xf32> to vector<1x16x16x8xf32>
    %174 = vector.shape_cast %173 : vector<1x16x16x8xf32> to vector<256x8xf32>
    %175 = arith.truncf %174 : vector<256x8xf32> to vector<256x8xbf16>
    %cst_66 = arith.constant dense<0.000000e+00> : vector<256x64xf32>
    %176 = tpu.matmul %175, %17, %cst_66 {dimension_numbers = #tpu.dot_dimension_numbers<[1], [0], [0], [1], [0, 0, 1, 1], [], []>} : vector<256x8xbf16>, vector<8x64xbf16>, vector<256x64xf32> -> vector<256x64xf32>
    %177 = arith.addf %172, %176 : vector<256x64xf32>
    %178 = vector.extract_strided_slice %5 {offsets = [0, 1, 0, 0], sizes = [1, 16, 16, 8], strides = [1, 1, 1, 1]} : vector<1x17x17x8xf32> to vector<1x16x16x8xf32>
    %179 = vector.shape_cast %178 : vector<1x16x16x8xf32> to vector<256x8xf32>
    %180 = arith.truncf %179 : vector<256x8xf32> to vector<256x8xbf16>
    %cst_67 = arith.constant dense<0.000000e+00> : vector<256x64xf32>
    %181 = tpu.matmul %180, %19, %cst_67 {dimension_numbers = #tpu.dot_dimension_numbers<[1], [0], [0], [1], [0, 0, 1, 1], [], []>} : vector<256x8xbf16>, vector<8x64xbf16>, vector<256x64xf32> -> vector<256x64xf32>
    %182 = arith.addf %177, %181 : vector<256x64xf32>
    %183 = vector.extract_strided_slice %2 {offsets = [0, 1, 1, 0], sizes = [1, 16, 16, 8], strides = [1, 1, 1, 1]} : vector<1x17x17x8xf32> to vector<1x16x16x8xf32>
    %184 = vector.shape_cast %183 : vector<1x16x16x8xf32> to vector<256x8xf32>
    %185 = arith.truncf %184 : vector<256x8xf32> to vector<256x8xbf16>
    %cst_68 = arith.constant dense<0.000000e+00> : vector<256x64xf32>
    %186 = tpu.matmul %185, %21, %cst_68 {dimension_numbers = #tpu.dot_dimension_numbers<[1], [0], [0], [1], [0, 0, 1, 1], [], []>} : vector<256x8xbf16>, vector<8x64xbf16>, vector<256x64xf32> -> vector<256x64xf32>
    %187 = arith.addf %182, %186 : vector<256x64xf32>
    %188 = vector.extract_strided_slice %5 {offsets = [0, 1, 1, 0], sizes = [1, 16, 16, 8], strides = [1, 1, 1, 1]} : vector<1x17x17x8xf32> to vector<1x16x16x8xf32>
    %189 = vector.shape_cast %188 : vector<1x16x16x8xf32> to vector<256x8xf32>
    %190 = arith.truncf %189 : vector<256x8xf32> to vector<256x8xbf16>
    %cst_69 = arith.constant dense<0.000000e+00> : vector<256x64xf32>
    %191 = tpu.matmul %190, %23, %cst_69 {dimension_numbers = #tpu.dot_dimension_numbers<[1], [0], [0], [1], [0, 0, 1, 1], [], []>} : vector<256x8xbf16>, vector<8x64xbf16>, vector<256x64xf32> -> vector<256x64xf32>
    %192 = arith.addf %187, %191 : vector<256x64xf32>
    %193 = vector.extract_strided_slice %11 {offsets = [0, 1, 0, 0], sizes = [1, 16, 16, 8], strides = [1, 1, 1, 1]} : vector<1x17x17x8xf32> to vector<1x16x16x8xf32>
    %194 = vector.shape_cast %193 : vector<1x16x16x8xf32> to vector<256x8xf32>
    %195 = arith.truncf %194 : vector<256x8xf32> to vector<256x8xbf16>
    %cst_70 = arith.constant dense<0.000000e+00> : vector<256x64xf32>
    %196 = tpu.matmul %195, %25, %cst_70 {dimension_numbers = #tpu.dot_dimension_numbers<[1], [0], [0], [1], [0, 0, 1, 1], [], []>} : vector<256x8xbf16>, vector<8x64xbf16>, vector<256x64xf32> -> vector<256x64xf32>
    %197 = arith.addf %192, %196 : vector<256x64xf32>
    %198 = vector.extract_strided_slice %8 {offsets = [0, 1, 1, 0], sizes = [1, 16, 16, 8], strides = [1, 1, 1, 1]} : vector<1x17x17x8xf32> to vector<1x16x16x8xf32>
    %199 = vector.shape_cast %198 : vector<1x16x16x8xf32> to vector<256x8xf32>
    %200 = arith.truncf %199 : vector<256x8xf32> to vector<256x8xbf16>
    %cst_71 = arith.constant dense<0.000000e+00> : vector<256x64xf32>
    %201 = tpu.matmul %200, %27, %cst_71 {dimension_numbers = #tpu.dot_dimension_numbers<[1], [0], [0], [1], [0, 0, 1, 1], [], []>} : vector<256x8xbf16>, vector<8x64xbf16>, vector<256x64xf32> -> vector<256x64xf32>
    %202 = arith.addf %197, %201 : vector<256x64xf32>
    %203 = vector.extract_strided_slice %11 {offsets = [0, 1, 1, 0], sizes = [1, 16, 16, 8], strides = [1, 1, 1, 1]} : vector<1x17x17x8xf32> to vector<1x16x16x8xf32>
    %204 = vector.shape_cast %203 : vector<1x16x16x8xf32> to vector<256x8xf32>
    %205 = arith.truncf %204 : vector<256x8xf32> to vector<256x8xbf16>
    %cst_72 = arith.constant dense<0.000000e+00> : vector<256x64xf32>
    %206 = tpu.matmul %205, %29, %cst_72 {dimension_numbers = #tpu.dot_dimension_numbers<[1], [0], [0], [1], [0, 0, 1, 1], [], []>} : vector<256x8xbf16>, vector<8x64xbf16>, vector<256x64xf32> -> vector<256x64xf32>
    %207 = arith.addf %202, %206 : vector<256x64xf32>
    %208 = arith.maximumf %163, %207 : vector<256x64xf32>
    %c0_73 = arith.constant 0 : index
    %c0_74 = arith.constant 0 : index
    %209 = vector.load %arg3[%c0_73, %c0_74] : memref<1x64xf32, #tpu.memory_space<vmem>>, vector<1x64xf32>
    %210 = vector.broadcast %209 : vector<1x64xf32> to vector<256x64xf32>
    %211 = arith.addf %208, %210 : vector<256x64xf32>
    %cst_75 = arith.constant 0.000000e+00 : f32
    %212 = vector.broadcast %cst_75 : f32 to vector<256x64xf32>
    %213 = arith.maximumf %211, %212 : vector<256x64xf32>
    %214 = arith.truncf %213 : vector<256x64xf32> to vector<256x64xbf16>
    %c0_76 = arith.constant 0 : index
    %c0_77 = arith.constant 0 : index
    %215 = vector.load %arg4[%c0_76, %c0_77] : memref<256x64xbf16, #tpu.memory_space<vmem>>, vector<256x64xbf16>
    tpu.vector_store %arg4[%c0_76, %c0_77], %214 {strides = array<i32>} : memref<256x64xbf16, #tpu.memory_space<vmem>>, vector<256x64xbf16>,
    return
  }
  func.func @transform_0(%arg0: i32) -> (i32, i32, i32, i32, i32) {
    %c0_i32 = arith.constant 0 : i32
    %c0_i32_0 = arith.constant 0 : i32
    %c0_i32_1 = arith.constant 0 : i32
    %c0_i32_2 = arith.constant 0 : i32
    %c0_i32_3 = arith.constant 0 : i32
    return %c0_i32, %arg0, %c0_i32_0, %c0_i32_1, %c0_i32_2 : i32, i32, i32, i32, i32
  }
  func.func @transform_1(%arg0: i32) -> (i32, i32, i32) {
    %c0_i32 = arith.constant 0 : i32
    %c0_i32_0 = arith.constant 0 : i32
    %c0_i32_1 = arith.constant 0 : i32
    %c0_i32_2 = arith.constant 0 : i32
    return %c0_i32, %c0_i32_0, %c0_i32_1 : i32, i32, i32
  }
  func.func @transform_2(%arg0: i32) -> (i32, i32) {
    %c0_i32 = arith.constant 0 : i32
    %c0_i32_0 = arith.constant 0 : i32
    %c0_i32_1 = arith.constant 0 : i32
    return %c0_i32, %c0_i32_0 : i32, i32
  }
  func.func @transform_3(%arg0: i32) -> (i32, i32) {
    %c0_i32 = arith.constant 0 : i32
    %c0_i32_0 = arith.constant 0 : i32
    return %arg0, %c0_i32 : i32, i32
  }
}

module attributes {stable_mosaic.version = 11 : i64} {
  func.func @kernel(%arg0: i32, %arg1: memref<4x1x9x9x64xbf16, #tpu.memory_space<vmem>>, %arg2: memref<9x64x128xbf16, #tpu.memory_space<vmem>>, %arg3: memref<1x128xf32, #tpu.memory_space<vmem>>, %arg4: memref<64x128xbf16, #tpu.memory_space<vmem>>) attributes {dimension_semantics = [#tpu.dimension_semantics<parallel>], iteration_bounds = array<i64: 2>, scalar_prefetch = 0 : i64, scratch_operands = 0 : i64, tpu.core_type = #tpu.core_type<tc>, window_params = [{transform_indices = @transform_0, window_bounds = array<i64: 4, 1, 9, 9, 64>}, {pipeline_mode = #tpu.pipeline_mode<synchronous>, transform_indices = @transform_1, window_bounds = array<i64: 9, 64, 128>}, {pipeline_mode = #tpu.pipeline_mode<synchronous>, transform_indices = @transform_2, window_bounds = array<i64: 1, 128>}, {transform_indices = @transform_3, window_bounds = array<i64: 64, 128>}]} {
    %c0 = arith.constant 0 : index
    %c0_0 = arith.constant 0 : index
    %c0_1 = arith.constant 0 : index
    %c0_2 = arith.constant 0 : index
    %c0_3 = arith.constant 0 : index
    %0 = vector.load %arg1[%c0, %c0_0, %c0_1, %c0_2, %c0_3] : memref<4x1x9x9x64xbf16, #tpu.memory_space<vmem>>, vector<1x1x9x9x64xbf16>
    %1 = vector.shape_cast %0 : vector<1x1x9x9x64xbf16> to vector<1x9x9x64xbf16>
    %2 = arith.extf %1 : vector<1x9x9x64xbf16> to vector<1x9x9x64xf32>
    %c1 = arith.constant 1 : index
    %c0_4 = arith.constant 0 : index
    %c0_5 = arith.constant 0 : index
    %c0_6 = arith.constant 0 : index
    %c0_7 = arith.constant 0 : index
    %3 = vector.load %arg1[%c1, %c0_4, %c0_5, %c0_6, %c0_7] : memref<4x1x9x9x64xbf16, #tpu.memory_space<vmem>>, vector<1x1x9x9x64xbf16>
    %4 = vector.shape_cast %3 : vector<1x1x9x9x64xbf16> to vector<1x9x9x64xbf16>
    %5 = arith.extf %4 : vector<1x9x9x64xbf16> to vector<1x9x9x64xf32>
    %c2 = arith.constant 2 : index
    %c0_8 = arith.constant 0 : index
    %c0_9 = arith.constant 0 : index
    %c0_10 = arith.constant 0 : index
    %c0_11 = arith.constant 0 : index
    %6 = vector.load %arg1[%c2, %c0_8, %c0_9, %c0_10, %c0_11] : memref<4x1x9x9x64xbf16, #tpu.memory_space<vmem>>, vector<1x1x9x9x64xbf16>
    %7 = vector.shape_cast %6 : vector<1x1x9x9x64xbf16> to vector<1x9x9x64xbf16>
    %8 = arith.extf %7 : vector<1x9x9x64xbf16> to vector<1x9x9x64xf32>
    %c3 = arith.constant 3 : index
    %c0_12 = arith.constant 0 : index
    %c0_13 = arith.constant 0 : index
    %c0_14 = arith.constant 0 : index
    %c0_15 = arith.constant 0 : index
    %9 = vector.load %arg1[%c3, %c0_12, %c0_13, %c0_14, %c0_15] : memref<4x1x9x9x64xbf16, #tpu.memory_space<vmem>>, vector<1x1x9x9x64xbf16>
    %10 = vector.shape_cast %9 : vector<1x1x9x9x64xbf16> to vector<1x9x9x64xbf16>
    %11 = arith.extf %10 : vector<1x9x9x64xbf16> to vector<1x9x9x64xf32>
    %c0_16 = arith.constant 0 : index
    %c0_17 = arith.constant 0 : index
    %c0_18 = arith.constant 0 : index
    %12 = vector.load %arg2[%c0_16, %c0_17, %c0_18] : memref<9x64x128xbf16, #tpu.memory_space<vmem>>, vector<1x64x128xbf16>
    %13 = vector.shape_cast %12 : vector<1x64x128xbf16> to vector<64x128xbf16>
    %c1_19 = arith.constant 1 : index
    %c0_20 = arith.constant 0 : index
    %c0_21 = arith.constant 0 : index
    %14 = vector.load %arg2[%c1_19, %c0_20, %c0_21] : memref<9x64x128xbf16, #tpu.memory_space<vmem>>, vector<1x64x128xbf16>
    %15 = vector.shape_cast %14 : vector<1x64x128xbf16> to vector<64x128xbf16>
    %c2_22 = arith.constant 2 : index
    %c0_23 = arith.constant 0 : index
    %c0_24 = arith.constant 0 : index
    %16 = vector.load %arg2[%c2_22, %c0_23, %c0_24] : memref<9x64x128xbf16, #tpu.memory_space<vmem>>, vector<1x64x128xbf16>
    %17 = vector.shape_cast %16 : vector<1x64x128xbf16> to vector<64x128xbf16>
    %c3_25 = arith.constant 3 : index
    %c0_26 = arith.constant 0 : index
    %c0_27 = arith.constant 0 : index
    %18 = vector.load %arg2[%c3_25, %c0_26, %c0_27] : memref<9x64x128xbf16, #tpu.memory_space<vmem>>, vector<1x64x128xbf16>
    %19 = vector.shape_cast %18 : vector<1x64x128xbf16> to vector<64x128xbf16>
    %c4 = arith.constant 4 : index
    %c0_28 = arith.constant 0 : index
    %c0_29 = arith.constant 0 : index
    %20 = vector.load %arg2[%c4, %c0_28, %c0_29] : memref<9x64x128xbf16, #tpu.memory_space<vmem>>, vector<1x64x128xbf16>
    %21 = vector.shape_cast %20 : vector<1x64x128xbf16> to vector<64x128xbf16>
    %c5 = arith.constant 5 : index
    %c0_30 = arith.constant 0 : index
    %c0_31 = arith.constant 0 : index
    %22 = vector.load %arg2[%c5, %c0_30, %c0_31] : memref<9x64x128xbf16, #tpu.memory_space<vmem>>, vector<1x64x128xbf16>
    %23 = vector.shape_cast %22 : vector<1x64x128xbf16> to vector<64x128xbf16>
    %c6 = arith.constant 6 : index
    %c0_32 = arith.constant 0 : index
    %c0_33 = arith.constant 0 : index
    %24 = vector.load %arg2[%c6, %c0_32, %c0_33] : memref<9x64x128xbf16, #tpu.memory_space<vmem>>, vector<1x64x128xbf16>
    %25 = vector.shape_cast %24 : vector<1x64x128xbf16> to vector<64x128xbf16>
    %c7 = arith.constant 7 : index
    %c0_34 = arith.constant 0 : index
    %c0_35 = arith.constant 0 : index
    %26 = vector.load %arg2[%c7, %c0_34, %c0_35] : memref<9x64x128xbf16, #tpu.memory_space<vmem>>, vector<1x64x128xbf16>
    %27 = vector.shape_cast %26 : vector<1x64x128xbf16> to vector<64x128xbf16>
    %c8 = arith.constant 8 : index
    %c0_36 = arith.constant 0 : index
    %c0_37 = arith.constant 0 : index
    %28 = vector.load %arg2[%c8, %c0_36, %c0_37] : memref<9x64x128xbf16, #tpu.memory_space<vmem>>, vector<1x64x128xbf16>
    %29 = vector.shape_cast %28 : vector<1x64x128xbf16> to vector<64x128xbf16>
    %30 = vector.extract_strided_slice %2 {offsets = [0, 0, 0, 0], sizes = [1, 8, 8, 64], strides = [1, 1, 1, 1]} : vector<1x9x9x64xf32> to vector<1x8x8x64xf32>
    %31 = vector.shape_cast %30 : vector<1x8x8x64xf32> to vector<64x64xf32>
    %32 = arith.truncf %31 : vector<64x64xf32> to vector<64x64xbf16>
    %cst = arith.constant dense<0.000000e+00> : vector<64x128xf32>
    %33 = tpu.matmul %32, %13, %cst {dimension_numbers = #tpu.dot_dimension_numbers<[1], [0], [0], [1], [0, 0, 1, 1], [], []>} : vector<64x64xbf16>, vector<64x128xbf16>, vector<64x128xf32> -> vector<64x128xf32>
    %34 = vector.extract_strided_slice %5 {offsets = [0, 0, 0, 0], sizes = [1, 8, 8, 64], strides = [1, 1, 1, 1]} : vector<1x9x9x64xf32> to vector<1x8x8x64xf32>
    %35 = vector.shape_cast %34 : vector<1x8x8x64xf32> to vector<64x64xf32>
    %36 = arith.truncf %35 : vector<64x64xf32> to vector<64x64xbf16>
    %cst_38 = arith.constant dense<0.000000e+00> : vector<64x128xf32>
    %37 = tpu.matmul %36, %15, %cst_38 {dimension_numbers = #tpu.dot_dimension_numbers<[1], [0], [0], [1], [0, 0, 1, 1], [], []>} : vector<64x64xbf16>, vector<64x128xbf16>, vector<64x128xf32> -> vector<64x128xf32>
    %38 = arith.addf %33, %37 : vector<64x128xf32>
    %39 = vector.extract_strided_slice %2 {offsets = [0, 0, 1, 0], sizes = [1, 8, 8, 64], strides = [1, 1, 1, 1]} : vector<1x9x9x64xf32> to vector<1x8x8x64xf32>
    %40 = vector.shape_cast %39 : vector<1x8x8x64xf32> to vector<64x64xf32>
    %41 = arith.truncf %40 : vector<64x64xf32> to vector<64x64xbf16>
    %cst_39 = arith.constant dense<0.000000e+00> : vector<64x128xf32>
    %42 = tpu.matmul %41, %17, %cst_39 {dimension_numbers = #tpu.dot_dimension_numbers<[1], [0], [0], [1], [0, 0, 1, 1], [], []>} : vector<64x64xbf16>, vector<64x128xbf16>, vector<64x128xf32> -> vector<64x128xf32>
    %43 = arith.addf %38, %42 : vector<64x128xf32>
    %44 = vector.extract_strided_slice %8 {offsets = [0, 0, 0, 0], sizes = [1, 8, 8, 64], strides = [1, 1, 1, 1]} : vector<1x9x9x64xf32> to vector<1x8x8x64xf32>
    %45 = vector.shape_cast %44 : vector<1x8x8x64xf32> to vector<64x64xf32>
    %46 = arith.truncf %45 : vector<64x64xf32> to vector<64x64xbf16>
    %cst_40 = arith.constant dense<0.000000e+00> : vector<64x128xf32>
    %47 = tpu.matmul %46, %19, %cst_40 {dimension_numbers = #tpu.dot_dimension_numbers<[1], [0], [0], [1], [0, 0, 1, 1], [], []>} : vector<64x64xbf16>, vector<64x128xbf16>, vector<64x128xf32> -> vector<64x128xf32>
    %48 = arith.addf %43, %47 : vector<64x128xf32>
    %49 = vector.extract_strided_slice %11 {offsets = [0, 0, 0, 0], sizes = [1, 8, 8, 64], strides = [1, 1, 1, 1]} : vector<1x9x9x64xf32> to vector<1x8x8x64xf32>
    %50 = vector.shape_cast %49 : vector<1x8x8x64xf32> to vector<64x64xf32>
    %51 = arith.truncf %50 : vector<64x64xf32> to vector<64x64xbf16>
    %cst_41 = arith.constant dense<0.000000e+00> : vector<64x128xf32>
    %52 = tpu.matmul %51, %21, %cst_41 {dimension_numbers = #tpu.dot_dimension_numbers<[1], [0], [0], [1], [0, 0, 1, 1], [], []>} : vector<64x64xbf16>, vector<64x128xbf16>, vector<64x128xf32> -> vector<64x128xf32>
    %53 = arith.addf %48, %52 : vector<64x128xf32>
    %54 = vector.extract_strided_slice %8 {offsets = [0, 0, 1, 0], sizes = [1, 8, 8, 64], strides = [1, 1, 1, 1]} : vector<1x9x9x64xf32> to vector<1x8x8x64xf32>
    %55 = vector.shape_cast %54 : vector<1x8x8x64xf32> to vector<64x64xf32>
    %56 = arith.truncf %55 : vector<64x64xf32> to vector<64x64xbf16>
    %cst_42 = arith.constant dense<0.000000e+00> : vector<64x128xf32>
    %57 = tpu.matmul %56, %23, %cst_42 {dimension_numbers = #tpu.dot_dimension_numbers<[1], [0], [0], [1], [0, 0, 1, 1], [], []>} : vector<64x64xbf16>, vector<64x128xbf16>, vector<64x128xf32> -> vector<64x128xf32>
    %58 = arith.addf %53, %57 : vector<64x128xf32>
    %59 = vector.extract_strided_slice %2 {offsets = [0, 1, 0, 0], sizes = [1, 8, 8, 64], strides = [1, 1, 1, 1]} : vector<1x9x9x64xf32> to vector<1x8x8x64xf32>
    %60 = vector.shape_cast %59 : vector<1x8x8x64xf32> to vector<64x64xf32>
    %61 = arith.truncf %60 : vector<64x64xf32> to vector<64x64xbf16>
    %cst_43 = arith.constant dense<0.000000e+00> : vector<64x128xf32>
    %62 = tpu.matmul %61, %25, %cst_43 {dimension_numbers = #tpu.dot_dimension_numbers<[1], [0], [0], [1], [0, 0, 1, 1], [], []>} : vector<64x64xbf16>, vector<64x128xbf16>, vector<64x128xf32> -> vector<64x128xf32>
    %63 = arith.addf %58, %62 : vector<64x128xf32>
    %64 = vector.extract_strided_slice %5 {offsets = [0, 1, 0, 0], sizes = [1, 8, 8, 64], strides = [1, 1, 1, 1]} : vector<1x9x9x64xf32> to vector<1x8x8x64xf32>
    %65 = vector.shape_cast %64 : vector<1x8x8x64xf32> to vector<64x64xf32>
    %66 = arith.truncf %65 : vector<64x64xf32> to vector<64x64xbf16>
    %cst_44 = arith.constant dense<0.000000e+00> : vector<64x128xf32>
    %67 = tpu.matmul %66, %27, %cst_44 {dimension_numbers = #tpu.dot_dimension_numbers<[1], [0], [0], [1], [0, 0, 1, 1], [], []>} : vector<64x64xbf16>, vector<64x128xbf16>, vector<64x128xf32> -> vector<64x128xf32>
    %68 = arith.addf %63, %67 : vector<64x128xf32>
    %69 = vector.extract_strided_slice %2 {offsets = [0, 1, 1, 0], sizes = [1, 8, 8, 64], strides = [1, 1, 1, 1]} : vector<1x9x9x64xf32> to vector<1x8x8x64xf32>
    %70 = vector.shape_cast %69 : vector<1x8x8x64xf32> to vector<64x64xf32>
    %71 = arith.truncf %70 : vector<64x64xf32> to vector<64x64xbf16>
    %cst_45 = arith.constant dense<0.000000e+00> : vector<64x128xf32>
    %72 = tpu.matmul %71, %29, %cst_45 {dimension_numbers = #tpu.dot_dimension_numbers<[1], [0], [0], [1], [0, 0, 1, 1], [], []>} : vector<64x64xbf16>, vector<64x128xbf16>, vector<64x128xf32> -> vector<64x128xf32>
    %73 = arith.addf %68, %72 : vector<64x128xf32>
    %74 = vector.extract_strided_slice %5 {offsets = [0, 0, 0, 0], sizes = [1, 8, 8, 64], strides = [1, 1, 1, 1]} : vector<1x9x9x64xf32> to vector<1x8x8x64xf32>
    %75 = vector.shape_cast %74 : vector<1x8x8x64xf32> to vector<64x64xf32>
    %76 = arith.truncf %75 : vector<64x64xf32> to vector<64x64xbf16>
    %cst_46 = arith.constant dense<0.000000e+00> : vector<64x128xf32>
    %77 = tpu.matmul %76, %13, %cst_46 {dimension_numbers = #tpu.dot_dimension_numbers<[1], [0], [0], [1], [0, 0, 1, 1], [], []>} : vector<64x64xbf16>, vector<64x128xbf16>, vector<64x128xf32> -> vector<64x128xf32>
    %78 = vector.extract_strided_slice %2 {offsets = [0, 0, 1, 0], sizes = [1, 8, 8, 64], strides = [1, 1, 1, 1]} : vector<1x9x9x64xf32> to vector<1x8x8x64xf32>
    %79 = vector.shape_cast %78 : vector<1x8x8x64xf32> to vector<64x64xf32>
    %80 = arith.truncf %79 : vector<64x64xf32> to vector<64x64xbf16>
    %cst_47 = arith.constant dense<0.000000e+00> : vector<64x128xf32>
    %81 = tpu.matmul %80, %15, %cst_47 {dimension_numbers = #tpu.dot_dimension_numbers<[1], [0], [0], [1], [0, 0, 1, 1], [], []>} : vector<64x64xbf16>, vector<64x128xbf16>, vector<64x128xf32> -> vector<64x128xf32>
    %82 = arith.addf %77, %81 : vector<64x128xf32>
    %83 = vector.extract_strided_slice %5 {offsets = [0, 0, 1, 0], sizes = [1, 8, 8, 64], strides = [1, 1, 1, 1]} : vector<1x9x9x64xf32> to vector<1x8x8x64xf32>
    %84 = vector.shape_cast %83 : vector<1x8x8x64xf32> to vector<64x64xf32>
    %85 = arith.truncf %84 : vector<64x64xf32> to vector<64x64xbf16>
    %cst_48 = arith.constant dense<0.000000e+00> : vector<64x128xf32>
    %86 = tpu.matmul %85, %17, %cst_48 {dimension_numbers = #tpu.dot_dimension_numbers<[1], [0], [0], [1], [0, 0, 1, 1], [], []>} : vector<64x64xbf16>, vector<64x128xbf16>, vector<64x128xf32> -> vector<64x128xf32>
    %87 = arith.addf %82, %86 : vector<64x128xf32>
    %88 = vector.extract_strided_slice %11 {offsets = [0, 0, 0, 0], sizes = [1, 8, 8, 64], strides = [1, 1, 1, 1]} : vector<1x9x9x64xf32> to vector<1x8x8x64xf32>
    %89 = vector.shape_cast %88 : vector<1x8x8x64xf32> to vector<64x64xf32>
    %90 = arith.truncf %89 : vector<64x64xf32> to vector<64x64xbf16>
    %cst_49 = arith.constant dense<0.000000e+00> : vector<64x128xf32>
    %91 = tpu.matmul %90, %19, %cst_49 {dimension_numbers = #tpu.dot_dimension_numbers<[1], [0], [0], [1], [0, 0, 1, 1], [], []>} : vector<64x64xbf16>, vector<64x128xbf16>, vector<64x128xf32> -> vector<64x128xf32>
    %92 = arith.addf %87, %91 : vector<64x128xf32>
    %93 = vector.extract_strided_slice %8 {offsets = [0, 0, 1, 0], sizes = [1, 8, 8, 64], strides = [1, 1, 1, 1]} : vector<1x9x9x64xf32> to vector<1x8x8x64xf32>
    %94 = vector.shape_cast %93 : vector<1x8x8x64xf32> to vector<64x64xf32>
    %95 = arith.truncf %94 : vector<64x64xf32> to vector<64x64xbf16>
    %cst_50 = arith.constant dense<0.000000e+00> : vector<64x128xf32>
    %96 = tpu.matmul %95, %21, %cst_50 {dimension_numbers = #tpu.dot_dimension_numbers<[1], [0], [0], [1], [0, 0, 1, 1], [], []>} : vector<64x64xbf16>, vector<64x128xbf16>, vector<64x128xf32> -> vector<64x128xf32>
    %97 = arith.addf %92, %96 : vector<64x128xf32>
    %98 = vector.extract_strided_slice %11 {offsets = [0, 0, 1, 0], sizes = [1, 8, 8, 64], strides = [1, 1, 1, 1]} : vector<1x9x9x64xf32> to vector<1x8x8x64xf32>
    %99 = vector.shape_cast %98 : vector<1x8x8x64xf32> to vector<64x64xf32>
    %100 = arith.truncf %99 : vector<64x64xf32> to vector<64x64xbf16>
    %cst_51 = arith.constant dense<0.000000e+00> : vector<64x128xf32>
    %101 = tpu.matmul %100, %23, %cst_51 {dimension_numbers = #tpu.dot_dimension_numbers<[1], [0], [0], [1], [0, 0, 1, 1], [], []>} : vector<64x64xbf16>, vector<64x128xbf16>, vector<64x128xf32> -> vector<64x128xf32>
    %102 = arith.addf %97, %101 : vector<64x128xf32>
    %103 = vector.extract_strided_slice %5 {offsets = [0, 1, 0, 0], sizes = [1, 8, 8, 64], strides = [1, 1, 1, 1]} : vector<1x9x9x64xf32> to vector<1x8x8x64xf32>
    %104 = vector.shape_cast %103 : vector<1x8x8x64xf32> to vector<64x64xf32>
    %105 = arith.truncf %104 : vector<64x64xf32> to vector<64x64xbf16>
    %cst_52 = arith.constant dense<0.000000e+00> : vector<64x128xf32>
    %106 = tpu.matmul %105, %25, %cst_52 {dimension_numbers = #tpu.dot_dimension_numbers<[1], [0], [0], [1], [0, 0, 1, 1], [], []>} : vector<64x64xbf16>, vector<64x128xbf16>, vector<64x128xf32> -> vector<64x128xf32>
    %107 = arith.addf %102, %106 : vector<64x128xf32>
    %108 = vector.extract_strided_slice %2 {offsets = [0, 1, 1, 0], sizes = [1, 8, 8, 64], strides = [1, 1, 1, 1]} : vector<1x9x9x64xf32> to vector<1x8x8x64xf32>
    %109 = vector.shape_cast %108 : vector<1x8x8x64xf32> to vector<64x64xf32>
    %110 = arith.truncf %109 : vector<64x64xf32> to vector<64x64xbf16>
    %cst_53 = arith.constant dense<0.000000e+00> : vector<64x128xf32>
    %111 = tpu.matmul %110, %27, %cst_53 {dimension_numbers = #tpu.dot_dimension_numbers<[1], [0], [0], [1], [0, 0, 1, 1], [], []>} : vector<64x64xbf16>, vector<64x128xbf16>, vector<64x128xf32> -> vector<64x128xf32>
    %112 = arith.addf %107, %111 : vector<64x128xf32>
    %113 = vector.extract_strided_slice %5 {offsets = [0, 1, 1, 0], sizes = [1, 8, 8, 64], strides = [1, 1, 1, 1]} : vector<1x9x9x64xf32> to vector<1x8x8x64xf32>
    %114 = vector.shape_cast %113 : vector<1x8x8x64xf32> to vector<64x64xf32>
    %115 = arith.truncf %114 : vector<64x64xf32> to vector<64x64xbf16>
    %cst_54 = arith.constant dense<0.000000e+00> : vector<64x128xf32>
    %116 = tpu.matmul %115, %29, %cst_54 {dimension_numbers = #tpu.dot_dimension_numbers<[1], [0], [0], [1], [0, 0, 1, 1], [], []>} : vector<64x64xbf16>, vector<64x128xbf16>, vector<64x128xf32> -> vector<64x128xf32>
    %117 = arith.addf %112, %116 : vector<64x128xf32>
    %118 = arith.maximumf %73, %117 : vector<64x128xf32>
    %119 = vector.extract_strided_slice %8 {offsets = [0, 0, 0, 0], sizes = [1, 8, 8, 64], strides = [1, 1, 1, 1]} : vector<1x9x9x64xf32> to vector<1x8x8x64xf32>
    %120 = vector.shape_cast %119 : vector<1x8x8x64xf32> to vector<64x64xf32>
    %121 = arith.truncf %120 : vector<64x64xf32> to vector<64x64xbf16>
    %cst_55 = arith.constant dense<0.000000e+00> : vector<64x128xf32>
    %122 = tpu.matmul %121, %13, %cst_55 {dimension_numbers = #tpu.dot_dimension_numbers<[1], [0], [0], [1], [0, 0, 1, 1], [], []>} : vector<64x64xbf16>, vector<64x128xbf16>, vector<64x128xf32> -> vector<64x128xf32>
    %123 = vector.extract_strided_slice %11 {offsets = [0, 0, 0, 0], sizes = [1, 8, 8, 64], strides = [1, 1, 1, 1]} : vector<1x9x9x64xf32> to vector<1x8x8x64xf32>
    %124 = vector.shape_cast %123 : vector<1x8x8x64xf32> to vector<64x64xf32>
    %125 = arith.truncf %124 : vector<64x64xf32> to vector<64x64xbf16>
    %cst_56 = arith.constant dense<0.000000e+00> : vector<64x128xf32>
    %126 = tpu.matmul %125, %15, %cst_56 {dimension_numbers = #tpu.dot_dimension_numbers<[1], [0], [0], [1], [0, 0, 1, 1], [], []>} : vector<64x64xbf16>, vector<64x128xbf16>, vector<64x128xf32> -> vector<64x128xf32>
    %127 = arith.addf %122, %126 : vector<64x128xf32>
    %128 = vector.extract_strided_slice %8 {offsets = [0, 0, 1, 0], sizes = [1, 8, 8, 64], strides = [1, 1, 1, 1]} : vector<1x9x9x64xf32> to vector<1x8x8x64xf32>
    %129 = vector.shape_cast %128 : vector<1x8x8x64xf32> to vector<64x64xf32>
    %130 = arith.truncf %129 : vector<64x64xf32> to vector<64x64xbf16>
    %cst_57 = arith.constant dense<0.000000e+00> : vector<64x128xf32>
    %131 = tpu.matmul %130, %17, %cst_57 {dimension_numbers = #tpu.dot_dimension_numbers<[1], [0], [0], [1], [0, 0, 1, 1], [], []>} : vector<64x64xbf16>, vector<64x128xbf16>, vector<64x128xf32> -> vector<64x128xf32>
    %132 = arith.addf %127, %131 : vector<64x128xf32>
    %133 = vector.extract_strided_slice %2 {offsets = [0, 1, 0, 0], sizes = [1, 8, 8, 64], strides = [1, 1, 1, 1]} : vector<1x9x9x64xf32> to vector<1x8x8x64xf32>
    %134 = vector.shape_cast %133 : vector<1x8x8x64xf32> to vector<64x64xf32>
    %135 = arith.truncf %134 : vector<64x64xf32> to vector<64x64xbf16>
    %cst_58 = arith.constant dense<0.000000e+00> : vector<64x128xf32>
    %136 = tpu.matmul %135, %19, %cst_58 {dimension_numbers = #tpu.dot_dimension_numbers<[1], [0], [0], [1], [0, 0, 1, 1], [], []>} : vector<64x64xbf16>, vector<64x128xbf16>, vector<64x128xf32> -> vector<64x128xf32>
    %137 = arith.addf %132, %136 : vector<64x128xf32>
    %138 = vector.extract_strided_slice %5 {offsets = [0, 1, 0, 0], sizes = [1, 8, 8, 64], strides = [1, 1, 1, 1]} : vector<1x9x9x64xf32> to vector<1x8x8x64xf32>
    %139 = vector.shape_cast %138 : vector<1x8x8x64xf32> to vector<64x64xf32>
    %140 = arith.truncf %139 : vector<64x64xf32> to vector<64x64xbf16>
    %cst_59 = arith.constant dense<0.000000e+00> : vector<64x128xf32>
    %141 = tpu.matmul %140, %21, %cst_59 {dimension_numbers = #tpu.dot_dimension_numbers<[1], [0], [0], [1], [0, 0, 1, 1], [], []>} : vector<64x64xbf16>, vector<64x128xbf16>, vector<64x128xf32> -> vector<64x128xf32>
    %142 = arith.addf %137, %141 : vector<64x128xf32>
    %143 = vector.extract_strided_slice %2 {offsets = [0, 1, 1, 0], sizes = [1, 8, 8, 64], strides = [1, 1, 1, 1]} : vector<1x9x9x64xf32> to vector<1x8x8x64xf32>
    %144 = vector.shape_cast %143 : vector<1x8x8x64xf32> to vector<64x64xf32>
    %145 = arith.truncf %144 : vector<64x64xf32> to vector<64x64xbf16>
    %cst_60 = arith.constant dense<0.000000e+00> : vector<64x128xf32>
    %146 = tpu.matmul %145, %23, %cst_60 {dimension_numbers = #tpu.dot_dimension_numbers<[1], [0], [0], [1], [0, 0, 1, 1], [], []>} : vector<64x64xbf16>, vector<64x128xbf16>, vector<64x128xf32> -> vector<64x128xf32>
    %147 = arith.addf %142, %146 : vector<64x128xf32>
    %148 = vector.extract_strided_slice %8 {offsets = [0, 1, 0, 0], sizes = [1, 8, 8, 64], strides = [1, 1, 1, 1]} : vector<1x9x9x64xf32> to vector<1x8x8x64xf32>
    %149 = vector.shape_cast %148 : vector<1x8x8x64xf32> to vector<64x64xf32>
    %150 = arith.truncf %149 : vector<64x64xf32> to vector<64x64xbf16>
    %cst_61 = arith.constant dense<0.000000e+00> : vector<64x128xf32>
    %151 = tpu.matmul %150, %25, %cst_61 {dimension_numbers = #tpu.dot_dimension_numbers<[1], [0], [0], [1], [0, 0, 1, 1], [], []>} : vector<64x64xbf16>, vector<64x128xbf16>, vector<64x128xf32> -> vector<64x128xf32>
    %152 = arith.addf %147, %151 : vector<64x128xf32>
    %153 = vector.extract_strided_slice %11 {offsets = [0, 1, 0, 0], sizes = [1, 8, 8, 64], strides = [1, 1, 1, 1]} : vector<1x9x9x64xf32> to vector<1x8x8x64xf32>
    %154 = vector.shape_cast %153 : vector<1x8x8x64xf32> to vector<64x64xf32>
    %155 = arith.truncf %154 : vector<64x64xf32> to vector<64x64xbf16>
    %cst_62 = arith.constant dense<0.000000e+00> : vector<64x128xf32>
    %156 = tpu.matmul %155, %27, %cst_62 {dimension_numbers = #tpu.dot_dimension_numbers<[1], [0], [0], [1], [0, 0, 1, 1], [], []>} : vector<64x64xbf16>, vector<64x128xbf16>, vector<64x128xf32> -> vector<64x128xf32>
    %157 = arith.addf %152, %156 : vector<64x128xf32>
    %158 = vector.extract_strided_slice %8 {offsets = [0, 1, 1, 0], sizes = [1, 8, 8, 64], strides = [1, 1, 1, 1]} : vector<1x9x9x64xf32> to vector<1x8x8x64xf32>
    %159 = vector.shape_cast %158 : vector<1x8x8x64xf32> to vector<64x64xf32>
    %160 = arith.truncf %159 : vector<64x64xf32> to vector<64x64xbf16>
    %cst_63 = arith.constant dense<0.000000e+00> : vector<64x128xf32>
    %161 = tpu.matmul %160, %29, %cst_63 {dimension_numbers = #tpu.dot_dimension_numbers<[1], [0], [0], [1], [0, 0, 1, 1], [], []>} : vector<64x64xbf16>, vector<64x128xbf16>, vector<64x128xf32> -> vector<64x128xf32>
    %162 = arith.addf %157, %161 : vector<64x128xf32>
    %163 = arith.maximumf %118, %162 : vector<64x128xf32>
    %164 = vector.extract_strided_slice %11 {offsets = [0, 0, 0, 0], sizes = [1, 8, 8, 64], strides = [1, 1, 1, 1]} : vector<1x9x9x64xf32> to vector<1x8x8x64xf32>
    %165 = vector.shape_cast %164 : vector<1x8x8x64xf32> to vector<64x64xf32>
    %166 = arith.truncf %165 : vector<64x64xf32> to vector<64x64xbf16>
    %cst_64 = arith.constant dense<0.000000e+00> : vector<64x128xf32>
    %167 = tpu.matmul %166, %13, %cst_64 {dimension_numbers = #tpu.dot_dimension_numbers<[1], [0], [0], [1], [0, 0, 1, 1], [], []>} : vector<64x64xbf16>, vector<64x128xbf16>, vector<64x128xf32> -> vector<64x128xf32>
    %168 = vector.extract_strided_slice %8 {offsets = [0, 0, 1, 0], sizes = [1, 8, 8, 64], strides = [1, 1, 1, 1]} : vector<1x9x9x64xf32> to vector<1x8x8x64xf32>
    %169 = vector.shape_cast %168 : vector<1x8x8x64xf32> to vector<64x64xf32>
    %170 = arith.truncf %169 : vector<64x64xf32> to vector<64x64xbf16>
    %cst_65 = arith.constant dense<0.000000e+00> : vector<64x128xf32>
    %171 = tpu.matmul %170, %15, %cst_65 {dimension_numbers = #tpu.dot_dimension_numbers<[1], [0], [0], [1], [0, 0, 1, 1], [], []>} : vector<64x64xbf16>, vector<64x128xbf16>, vector<64x128xf32> -> vector<64x128xf32>
    %172 = arith.addf %167, %171 : vector<64x128xf32>
    %173 = vector.extract_strided_slice %11 {offsets = [0, 0, 1, 0], sizes = [1, 8, 8, 64], strides = [1, 1, 1, 1]} : vector<1x9x9x64xf32> to vector<1x8x8x64xf32>
    %174 = vector.shape_cast %173 : vector<1x8x8x64xf32> to vector<64x64xf32>
    %175 = arith.truncf %174 : vector<64x64xf32> to vector<64x64xbf16>
    %cst_66 = arith.constant dense<0.000000e+00> : vector<64x128xf32>
    %176 = tpu.matmul %175, %17, %cst_66 {dimension_numbers = #tpu.dot_dimension_numbers<[1], [0], [0], [1], [0, 0, 1, 1], [], []>} : vector<64x64xbf16>, vector<64x128xbf16>, vector<64x128xf32> -> vector<64x128xf32>
    %177 = arith.addf %172, %176 : vector<64x128xf32>
    %178 = vector.extract_strided_slice %5 {offsets = [0, 1, 0, 0], sizes = [1, 8, 8, 64], strides = [1, 1, 1, 1]} : vector<1x9x9x64xf32> to vector<1x8x8x64xf32>
    %179 = vector.shape_cast %178 : vector<1x8x8x64xf32> to vector<64x64xf32>
    %180 = arith.truncf %179 : vector<64x64xf32> to vector<64x64xbf16>
    %cst_67 = arith.constant dense<0.000000e+00> : vector<64x128xf32>
    %181 = tpu.matmul %180, %19, %cst_67 {dimension_numbers = #tpu.dot_dimension_numbers<[1], [0], [0], [1], [0, 0, 1, 1], [], []>} : vector<64x64xbf16>, vector<64x128xbf16>, vector<64x128xf32> -> vector<64x128xf32>
    %182 = arith.addf %177, %181 : vector<64x128xf32>
    %183 = vector.extract_strided_slice %2 {offsets = [0, 1, 1, 0], sizes = [1, 8, 8, 64], strides = [1, 1, 1, 1]} : vector<1x9x9x64xf32> to vector<1x8x8x64xf32>
    %184 = vector.shape_cast %183 : vector<1x8x8x64xf32> to vector<64x64xf32>
    %185 = arith.truncf %184 : vector<64x64xf32> to vector<64x64xbf16>
    %cst_68 = arith.constant dense<0.000000e+00> : vector<64x128xf32>
    %186 = tpu.matmul %185, %21, %cst_68 {dimension_numbers = #tpu.dot_dimension_numbers<[1], [0], [0], [1], [0, 0, 1, 1], [], []>} : vector<64x64xbf16>, vector<64x128xbf16>, vector<64x128xf32> -> vector<64x128xf32>
    %187 = arith.addf %182, %186 : vector<64x128xf32>
    %188 = vector.extract_strided_slice %5 {offsets = [0, 1, 1, 0], sizes = [1, 8, 8, 64], strides = [1, 1, 1, 1]} : vector<1x9x9x64xf32> to vector<1x8x8x64xf32>
    %189 = vector.shape_cast %188 : vector<1x8x8x64xf32> to vector<64x64xf32>
    %190 = arith.truncf %189 : vector<64x64xf32> to vector<64x64xbf16>
    %cst_69 = arith.constant dense<0.000000e+00> : vector<64x128xf32>
    %191 = tpu.matmul %190, %23, %cst_69 {dimension_numbers = #tpu.dot_dimension_numbers<[1], [0], [0], [1], [0, 0, 1, 1], [], []>} : vector<64x64xbf16>, vector<64x128xbf16>, vector<64x128xf32> -> vector<64x128xf32>
    %192 = arith.addf %187, %191 : vector<64x128xf32>
    %193 = vector.extract_strided_slice %11 {offsets = [0, 1, 0, 0], sizes = [1, 8, 8, 64], strides = [1, 1, 1, 1]} : vector<1x9x9x64xf32> to vector<1x8x8x64xf32>
    %194 = vector.shape_cast %193 : vector<1x8x8x64xf32> to vector<64x64xf32>
    %195 = arith.truncf %194 : vector<64x64xf32> to vector<64x64xbf16>
    %cst_70 = arith.constant dense<0.000000e+00> : vector<64x128xf32>
    %196 = tpu.matmul %195, %25, %cst_70 {dimension_numbers = #tpu.dot_dimension_numbers<[1], [0], [0], [1], [0, 0, 1, 1], [], []>} : vector<64x64xbf16>, vector<64x128xbf16>, vector<64x128xf32> -> vector<64x128xf32>
    %197 = arith.addf %192, %196 : vector<64x128xf32>
    %198 = vector.extract_strided_slice %8 {offsets = [0, 1, 1, 0], sizes = [1, 8, 8, 64], strides = [1, 1, 1, 1]} : vector<1x9x9x64xf32> to vector<1x8x8x64xf32>
    %199 = vector.shape_cast %198 : vector<1x8x8x64xf32> to vector<64x64xf32>
    %200 = arith.truncf %199 : vector<64x64xf32> to vector<64x64xbf16>
    %cst_71 = arith.constant dense<0.000000e+00> : vector<64x128xf32>
    %201 = tpu.matmul %200, %27, %cst_71 {dimension_numbers = #tpu.dot_dimension_numbers<[1], [0], [0], [1], [0, 0, 1, 1], [], []>} : vector<64x64xbf16>, vector<64x128xbf16>, vector<64x128xf32> -> vector<64x128xf32>
    %202 = arith.addf %197, %201 : vector<64x128xf32>
    %203 = vector.extract_strided_slice %11 {offsets = [0, 1, 1, 0], sizes = [1, 8, 8, 64], strides = [1, 1, 1, 1]} : vector<1x9x9x64xf32> to vector<1x8x8x64xf32>
    %204 = vector.shape_cast %203 : vector<1x8x8x64xf32> to vector<64x64xf32>
    %205 = arith.truncf %204 : vector<64x64xf32> to vector<64x64xbf16>
    %cst_72 = arith.constant dense<0.000000e+00> : vector<64x128xf32>
    %206 = tpu.matmul %205, %29, %cst_72 {dimension_numbers = #tpu.dot_dimension_numbers<[1], [0], [0], [1], [0, 0, 1, 1], [], []>} : vector<64x64xbf16>, vector<64x128xbf16>, vector<64x128xf32> -> vector<64x128xf32>
    %207 = arith.addf %202, %206 : vector<64x128xf32>
    %208 = arith.maximumf %163, %207 : vector<64x128xf32>
    %c0_73 = arith.constant 0 : index
    %c0_74 = arith.constant 0 : index
    %209 = vector.load %arg3[%c0_73, %c0_74] : memref<1x128xf32, #tpu.memory_space<vmem>>, vector<1x128xf32>
    %210 = vector.broadcast %209 : vector<1x128xf32> to vector<64x128xf32>
    %211 = arith.addf %208, %210 : vector<64x128xf32>
    %cst_75 = arith.constant 0.000000e+00 : f32
    %212 = vector.broadcast %cst_75 : f32 to vector<64x128xf32>
    %213 = arith.maximumf %211, %212 : vector<64x128xf32>
    %214 = arith.truncf %213 : vector<64x128xf32> to vector<64x128xbf16>
    %c0_76 = arith.constant 0 : index
    %c0_77 = arith.constant 0 : index
    %215 = vector.load %arg4[%c0_76, %c0_77] : memref<64x128xbf16, #tpu.memory_space<vmem>>, vector<64x128xbf16>
    tpu.vector_store %arg4[%c0_76, %c0_77], %214 {strides = array<i32>} : memref<64x128xbf16, #tpu.memory_space<vmem>>, vector<64x128xbf16>,
    return
  }
  func.func @transform_0(%arg0: i32) -> (i32, i32, i32, i32, i32) {
    %c0_i32 = arith.constant 0 : i32
    %c0_i32_0 = arith.constant 0 : i32
    %c0_i32_1 = arith.constant 0 : i32
    %c0_i32_2 = arith.constant 0 : i32
    %c0_i32_3 = arith.constant 0 : i32
    return %c0_i32, %arg0, %c0_i32_0, %c0_i32_1, %c0_i32_2 : i32, i32, i32, i32, i32
  }
  func.func @transform_1(%arg0: i32) -> (i32, i32, i32) {
    %c0_i32 = arith.constant 0 : i32
    %c0_i32_0 = arith.constant 0 : i32
    %c0_i32_1 = arith.constant 0 : i32
    %c0_i32_2 = arith.constant 0 : i32
    return %c0_i32, %c0_i32_0, %c0_i32_1 : i32, i32, i32
  }
  func.func @transform_2(%arg0: i32) -> (i32, i32) {
    %c0_i32 = arith.constant 0 : i32
    %c0_i32_0 = arith.constant 0 : i32
    %c0_i32_1 = arith.constant 0 : i32
    return %c0_i32, %c0_i32_0 : i32, i32
  }
  func.func @transform_3(%arg0: i32) -> (i32, i32) {
    %c0_i32 = arith.constant 0 : i32
    %c0_i32_0 = arith.constant 0 : i32
    return %arg0, %c0_i32 : i32, i32
  }
}

module attributes {stable_mosaic.version = 11 : i64} {
  func.func @kernel(%arg0: i32, %arg1: memref<1x10x10x128xbf16, #tpu.memory_space<vmem>>, %arg2: memref<9x128x256xbf16, #tpu.memory_space<vmem>>, %arg3: memref<1x256xf32, #tpu.memory_space<vmem>>, %arg4: memref<64x256xbf16, #tpu.memory_space<vmem>>) attributes {dimension_semantics = [#tpu.dimension_semantics<parallel>], iteration_bounds = array<i64: 2>, scalar_prefetch = 0 : i64, scratch_operands = 0 : i64, tpu.core_type = #tpu.core_type<tc>, window_params = [{transform_indices = @transform_0, window_bounds = array<i64: 1, 10, 10, 128>}, {pipeline_mode = #tpu.pipeline_mode<synchronous>, transform_indices = @transform_1, window_bounds = array<i64: 9, 128, 256>}, {pipeline_mode = #tpu.pipeline_mode<synchronous>, transform_indices = @transform_2, window_bounds = array<i64: 1, 256>}, {transform_indices = @transform_3, window_bounds = array<i64: 64, 256>}]} {
    %c0 = arith.constant 0 : index
    %c0_0 = arith.constant 0 : index
    %c0_1 = arith.constant 0 : index
    %c0_2 = arith.constant 0 : index
    %0 = vector.load %arg1[%c0, %c0_0, %c0_1, %c0_2] : memref<1x10x10x128xbf16, #tpu.memory_space<vmem>>, vector<1x10x10x128xbf16>
    %1 = arith.extf %0 : vector<1x10x10x128xbf16> to vector<1x10x10x128xf32>
    %c0_3 = arith.constant 0 : index
    %c0_4 = arith.constant 0 : index
    %c0_5 = arith.constant 0 : index
    %2 = vector.load %arg2[%c0_3, %c0_4, %c0_5] : memref<9x128x256xbf16, #tpu.memory_space<vmem>>, vector<1x128x256xbf16>
    %3 = vector.shape_cast %2 : vector<1x128x256xbf16> to vector<128x256xbf16>
    %c1 = arith.constant 1 : index
    %c0_6 = arith.constant 0 : index
    %c0_7 = arith.constant 0 : index
    %4 = vector.load %arg2[%c1, %c0_6, %c0_7] : memref<9x128x256xbf16, #tpu.memory_space<vmem>>, vector<1x128x256xbf16>
    %5 = vector.shape_cast %4 : vector<1x128x256xbf16> to vector<128x256xbf16>
    %c2 = arith.constant 2 : index
    %c0_8 = arith.constant 0 : index
    %c0_9 = arith.constant 0 : index
    %6 = vector.load %arg2[%c2, %c0_8, %c0_9] : memref<9x128x256xbf16, #tpu.memory_space<vmem>>, vector<1x128x256xbf16>
    %7 = vector.shape_cast %6 : vector<1x128x256xbf16> to vector<128x256xbf16>
    %c3 = arith.constant 3 : index
    %c0_10 = arith.constant 0 : index
    %c0_11 = arith.constant 0 : index
    %8 = vector.load %arg2[%c3, %c0_10, %c0_11] : memref<9x128x256xbf16, #tpu.memory_space<vmem>>, vector<1x128x256xbf16>
    %9 = vector.shape_cast %8 : vector<1x128x256xbf16> to vector<128x256xbf16>
    %c4 = arith.constant 4 : index
    %c0_12 = arith.constant 0 : index
    %c0_13 = arith.constant 0 : index
    %10 = vector.load %arg2[%c4, %c0_12, %c0_13] : memref<9x128x256xbf16, #tpu.memory_space<vmem>>, vector<1x128x256xbf16>
    %11 = vector.shape_cast %10 : vector<1x128x256xbf16> to vector<128x256xbf16>
    %c5 = arith.constant 5 : index
    %c0_14 = arith.constant 0 : index
    %c0_15 = arith.constant 0 : index
    %12 = vector.load %arg2[%c5, %c0_14, %c0_15] : memref<9x128x256xbf16, #tpu.memory_space<vmem>>, vector<1x128x256xbf16>
    %13 = vector.shape_cast %12 : vector<1x128x256xbf16> to vector<128x256xbf16>
    %c6 = arith.constant 6 : index
    %c0_16 = arith.constant 0 : index
    %c0_17 = arith.constant 0 : index
    %14 = vector.load %arg2[%c6, %c0_16, %c0_17] : memref<9x128x256xbf16, #tpu.memory_space<vmem>>, vector<1x128x256xbf16>
    %15 = vector.shape_cast %14 : vector<1x128x256xbf16> to vector<128x256xbf16>
    %c7 = arith.constant 7 : index
    %c0_18 = arith.constant 0 : index
    %c0_19 = arith.constant 0 : index
    %16 = vector.load %arg2[%c7, %c0_18, %c0_19] : memref<9x128x256xbf16, #tpu.memory_space<vmem>>, vector<1x128x256xbf16>
    %17 = vector.shape_cast %16 : vector<1x128x256xbf16> to vector<128x256xbf16>
    %c8 = arith.constant 8 : index
    %c0_20 = arith.constant 0 : index
    %c0_21 = arith.constant 0 : index
    %18 = vector.load %arg2[%c8, %c0_20, %c0_21] : memref<9x128x256xbf16, #tpu.memory_space<vmem>>, vector<1x128x256xbf16>
    %19 = vector.shape_cast %18 : vector<1x128x256xbf16> to vector<128x256xbf16>
    %20 = vector.extract_strided_slice %1 {offsets = [0, 0, 0, 0], sizes = [1, 8, 8, 128], strides = [1, 1, 1, 1]} : vector<1x10x10x128xf32> to vector<1x8x8x128xf32>
    %21 = vector.shape_cast %20 : vector<1x8x8x128xf32> to vector<64x128xf32>
    %22 = arith.truncf %21 : vector<64x128xf32> to vector<64x128xbf16>
    %cst = arith.constant dense<0.000000e+00> : vector<64x256xf32>
    %23 = tpu.matmul %22, %3, %cst {dimension_numbers = #tpu.dot_dimension_numbers<[1], [0], [0], [1], [0, 0, 1, 1], [], []>} : vector<64x128xbf16>, vector<128x256xbf16>, vector<64x256xf32> -> vector<64x256xf32>
    %24 = vector.extract_strided_slice %1 {offsets = [0, 0, 1, 0], sizes = [1, 8, 8, 128], strides = [1, 1, 1, 1]} : vector<1x10x10x128xf32> to vector<1x8x8x128xf32>
    %25 = vector.shape_cast %24 : vector<1x8x8x128xf32> to vector<64x128xf32>
    %26 = arith.truncf %25 : vector<64x128xf32> to vector<64x128xbf16>
    %cst_22 = arith.constant dense<0.000000e+00> : vector<64x256xf32>
    %27 = tpu.matmul %26, %5, %cst_22 {dimension_numbers = #tpu.dot_dimension_numbers<[1], [0], [0], [1], [0, 0, 1, 1], [], []>} : vector<64x128xbf16>, vector<128x256xbf16>, vector<64x256xf32> -> vector<64x256xf32>
    %28 = arith.addf %23, %27 : vector<64x256xf32>
    %29 = vector.extract_strided_slice %1 {offsets = [0, 0, 2, 0], sizes = [1, 8, 8, 128], strides = [1, 1, 1, 1]} : vector<1x10x10x128xf32> to vector<1x8x8x128xf32>
    %30 = vector.shape_cast %29 : vector<1x8x8x128xf32> to vector<64x128xf32>
    %31 = arith.truncf %30 : vector<64x128xf32> to vector<64x128xbf16>
    %cst_23 = arith.constant dense<0.000000e+00> : vector<64x256xf32>
    %32 = tpu.matmul %31, %7, %cst_23 {dimension_numbers = #tpu.dot_dimension_numbers<[1], [0], [0], [1], [0, 0, 1, 1], [], []>} : vector<64x128xbf16>, vector<128x256xbf16>, vector<64x256xf32> -> vector<64x256xf32>
    %33 = arith.addf %28, %32 : vector<64x256xf32>
    %34 = vector.extract_strided_slice %1 {offsets = [0, 1, 0, 0], sizes = [1, 8, 8, 128], strides = [1, 1, 1, 1]} : vector<1x10x10x128xf32> to vector<1x8x8x128xf32>
    %35 = vector.shape_cast %34 : vector<1x8x8x128xf32> to vector<64x128xf32>
    %36 = arith.truncf %35 : vector<64x128xf32> to vector<64x128xbf16>
    %cst_24 = arith.constant dense<0.000000e+00> : vector<64x256xf32>
    %37 = tpu.matmul %36, %9, %cst_24 {dimension_numbers = #tpu.dot_dimension_numbers<[1], [0], [0], [1], [0, 0, 1, 1], [], []>} : vector<64x128xbf16>, vector<128x256xbf16>, vector<64x256xf32> -> vector<64x256xf32>
    %38 = arith.addf %33, %37 : vector<64x256xf32>
    %39 = vector.extract_strided_slice %1 {offsets = [0, 1, 1, 0], sizes = [1, 8, 8, 128], strides = [1, 1, 1, 1]} : vector<1x10x10x128xf32> to vector<1x8x8x128xf32>
    %40 = vector.shape_cast %39 : vector<1x8x8x128xf32> to vector<64x128xf32>
    %41 = arith.truncf %40 : vector<64x128xf32> to vector<64x128xbf16>
    %cst_25 = arith.constant dense<0.000000e+00> : vector<64x256xf32>
    %42 = tpu.matmul %41, %11, %cst_25 {dimension_numbers = #tpu.dot_dimension_numbers<[1], [0], [0], [1], [0, 0, 1, 1], [], []>} : vector<64x128xbf16>, vector<128x256xbf16>, vector<64x256xf32> -> vector<64x256xf32>
    %43 = arith.addf %38, %42 : vector<64x256xf32>
    %44 = vector.extract_strided_slice %1 {offsets = [0, 1, 2, 0], sizes = [1, 8, 8, 128], strides = [1, 1, 1, 1]} : vector<1x10x10x128xf32> to vector<1x8x8x128xf32>
    %45 = vector.shape_cast %44 : vector<1x8x8x128xf32> to vector<64x128xf32>
    %46 = arith.truncf %45 : vector<64x128xf32> to vector<64x128xbf16>
    %cst_26 = arith.constant dense<0.000000e+00> : vector<64x256xf32>
    %47 = tpu.matmul %46, %13, %cst_26 {dimension_numbers = #tpu.dot_dimension_numbers<[1], [0], [0], [1], [0, 0, 1, 1], [], []>} : vector<64x128xbf16>, vector<128x256xbf16>, vector<64x256xf32> -> vector<64x256xf32>
    %48 = arith.addf %43, %47 : vector<64x256xf32>
    %49 = vector.extract_strided_slice %1 {offsets = [0, 2, 0, 0], sizes = [1, 8, 8, 128], strides = [1, 1, 1, 1]} : vector<1x10x10x128xf32> to vector<1x8x8x128xf32>
    %50 = vector.shape_cast %49 : vector<1x8x8x128xf32> to vector<64x128xf32>
    %51 = arith.truncf %50 : vector<64x128xf32> to vector<64x128xbf16>
    %cst_27 = arith.constant dense<0.000000e+00> : vector<64x256xf32>
    %52 = tpu.matmul %51, %15, %cst_27 {dimension_numbers = #tpu.dot_dimension_numbers<[1], [0], [0], [1], [0, 0, 1, 1], [], []>} : vector<64x128xbf16>, vector<128x256xbf16>, vector<64x256xf32> -> vector<64x256xf32>
    %53 = arith.addf %48, %52 : vector<64x256xf32>
    %54 = vector.extract_strided_slice %1 {offsets = [0, 2, 1, 0], sizes = [1, 8, 8, 128], strides = [1, 1, 1, 1]} : vector<1x10x10x128xf32> to vector<1x8x8x128xf32>
    %55 = vector.shape_cast %54 : vector<1x8x8x128xf32> to vector<64x128xf32>
    %56 = arith.truncf %55 : vector<64x128xf32> to vector<64x128xbf16>
    %cst_28 = arith.constant dense<0.000000e+00> : vector<64x256xf32>
    %57 = tpu.matmul %56, %17, %cst_28 {dimension_numbers = #tpu.dot_dimension_numbers<[1], [0], [0], [1], [0, 0, 1, 1], [], []>} : vector<64x128xbf16>, vector<128x256xbf16>, vector<64x256xf32> -> vector<64x256xf32>
    %58 = arith.addf %53, %57 : vector<64x256xf32>
    %59 = vector.extract_strided_slice %1 {offsets = [0, 2, 2, 0], sizes = [1, 8, 8, 128], strides = [1, 1, 1, 1]} : vector<1x10x10x128xf32> to vector<1x8x8x128xf32>
    %60 = vector.shape_cast %59 : vector<1x8x8x128xf32> to vector<64x128xf32>
    %61 = arith.truncf %60 : vector<64x128xf32> to vector<64x128xbf16>
    %cst_29 = arith.constant dense<0.000000e+00> : vector<64x256xf32>
    %62 = tpu.matmul %61, %19, %cst_29 {dimension_numbers = #tpu.dot_dimension_numbers<[1], [0], [0], [1], [0, 0, 1, 1], [], []>} : vector<64x128xbf16>, vector<128x256xbf16>, vector<64x256xf32> -> vector<64x256xf32>
    %63 = arith.addf %58, %62 : vector<64x256xf32>
    %c0_30 = arith.constant 0 : index
    %c0_31 = arith.constant 0 : index
    %64 = vector.load %arg3[%c0_30, %c0_31] : memref<1x256xf32, #tpu.memory_space<vmem>>, vector<1x256xf32>
    %65 = vector.broadcast %64 : vector<1x256xf32> to vector<64x256xf32>
    %66 = arith.addf %63, %65 : vector<64x256xf32>
    %cst_32 = arith.constant 0.000000e+00 : f32
    %67 = vector.broadcast %cst_32 : f32 to vector<64x256xf32>
    %68 = arith.maximumf %66, %67 : vector<64x256xf32>
    %69 = arith.truncf %68 : vector<64x256xf32> to vector<64x256xbf16>
    %c0_33 = arith.constant 0 : index
    %c0_34 = arith.constant 0 : index
    %70 = vector.load %arg4[%c0_33, %c0_34] : memref<64x256xbf16, #tpu.memory_space<vmem>>, vector<64x256xbf16>
    tpu.vector_store %arg4[%c0_33, %c0_34], %69 {strides = array<i32>} : memref<64x256xbf16, #tpu.memory_space<vmem>>, vector<64x256xbf16>,
    return
  }
  func.func @transform_0(%arg0: i32) -> (i32, i32, i32, i32) {
    %c0_i32 = arith.constant 0 : i32
    %c0_i32_0 = arith.constant 0 : i32
    %c0_i32_1 = arith.constant 0 : i32
    %c0_i32_2 = arith.constant 0 : i32
    return %arg0, %c0_i32, %c0_i32_0, %c0_i32_1 : i32, i32, i32, i32
  }
  func.func @transform_1(%arg0: i32) -> (i32, i32, i32) {
    %c0_i32 = arith.constant 0 : i32
    %c0_i32_0 = arith.constant 0 : i32
    %c0_i32_1 = arith.constant 0 : i32
    %c0_i32_2 = arith.constant 0 : i32
    return %c0_i32, %c0_i32_0, %c0_i32_1 : i32, i32, i32
  }
  func.func @transform_2(%arg0: i32) -> (i32, i32) {
    %c0_i32 = arith.constant 0 : i32
    %c0_i32_0 = arith.constant 0 : i32
    %c0_i32_1 = arith.constant 0 : i32
    return %c0_i32, %c0_i32_0 : i32, i32
  }
  func.func @transform_3(%arg0: i32) -> (i32, i32) {
    %c0_i32 = arith.constant 0 : i32
    %c0_i32_0 = arith.constant 0 : i32
    return %arg0, %c0_i32 : i32, i32
  }
}

module attributes {stable_mosaic.version = 11 : i64} {
  func.func @_att_logits_kernel(%arg0: i32, %arg1: memref<128x256xbf16, #tpu.memory_space<vmem>>, %arg2: memref<256x64xbf16, #tpu.memory_space<vmem>>, %arg3: memref<1x64xf32, #tpu.memory_space<vmem>>, %arg4: memref<8x64xf32, #tpu.memory_space<vmem>>, %arg5: memref<1x1xf32, #tpu.memory_space<vmem>>, %arg6: memref<1x128xf32, #tpu.memory_space<vmem>>) attributes {dimension_semantics = [#tpu.dimension_semantics<parallel>], iteration_bounds = array<i64: 1>, scalar_prefetch = 0 : i64, scratch_operands = 0 : i64, tpu.core_type = #tpu.core_type<tc>, window_params = [{transform_indices = @transform_0, window_bounds = array<i64: 128, 256>}, {pipeline_mode = #tpu.pipeline_mode<synchronous>, transform_indices = @transform_1, window_bounds = array<i64: 256, 64>}, {pipeline_mode = #tpu.pipeline_mode<synchronous>, transform_indices = @transform_2, window_bounds = array<i64: 1, 64>}, {pipeline_mode = #tpu.pipeline_mode<synchronous>, transform_indices = @transform_3, window_bounds = array<i64: 8, 64>}, {pipeline_mode = #tpu.pipeline_mode<synchronous>, transform_indices = @transform_4, window_bounds = array<i64: 1, 1>}, {transform_indices = @transform_5, window_bounds = array<i64: 1, 128>}]} {
    %c0 = arith.constant 0 : index
    %c0_0 = arith.constant 0 : index
    %0 = vector.load %arg1[%c0, %c0_0] : memref<128x256xbf16, #tpu.memory_space<vmem>>, vector<128x256xbf16>
    %c0_1 = arith.constant 0 : index
    %c0_2 = arith.constant 0 : index
    %1 = vector.load %arg2[%c0_1, %c0_2] : memref<256x64xbf16, #tpu.memory_space<vmem>>, vector<256x64xbf16>
    %cst = arith.constant dense<0.000000e+00> : vector<128x64xf32>
    %2 = tpu.matmul %0, %1, %cst {dimension_numbers = #tpu.dot_dimension_numbers<[1], [0], [0], [1], [0, 0, 1, 1], [], []>} : vector<128x256xbf16>, vector<256x64xbf16>, vector<128x64xf32> -> vector<128x64xf32>
    %c0_3 = arith.constant 0 : index
    %c0_4 = arith.constant 0 : index
    %3 = vector.load %arg3[%c0_3, %c0_4] : memref<1x64xf32, #tpu.memory_space<vmem>>, vector<1x64xf32>
    %4 = vector.broadcast %3 : vector<1x64xf32> to vector<128x64xf32>
    %5 = arith.addf %2, %4 : vector<128x64xf32>
    %6 = math.tanh %5 : vector<128x64xf32>
    %c0_5 = arith.constant 0 : index
    %c0_6 = arith.constant 0 : index
    %7 = vector.load %arg4[%c0_5, %c0_6] : memref<8x64xf32, #tpu.memory_space<vmem>>, vector<8x64xf32>
    %cst_7 = arith.constant dense<0.000000e+00> : vector<8x128xf32>
    %8 = tpu.matmul %7, %6, %cst_7 {dimension_numbers = #tpu.dot_dimension_numbers<[1], [1], [0], [0], [0, 0, 1, 0], [], []>} : vector<8x64xf32>, vector<128x64xf32>, vector<8x128xf32> -> vector<8x128xf32>
    %9 = vector.extract_strided_slice %8 {offsets = [0, 0], sizes = [1, 128], strides = [1, 1]} : vector<8x128xf32> to vector<1x128xf32>
    %c0_8 = arith.constant 0 : index
    %c0_9 = arith.constant 0 : index
    %10 = vector.load %arg5[%c0_8, %c0_9] : memref<1x1xf32, #tpu.memory_space<vmem>>, vector<1x1xf32>
    %11 = vector.broadcast %10 : vector<1x1xf32> to vector<1x128xf32>
    %12 = arith.addf %9, %11 : vector<1x128xf32>
    %c0_10 = arith.constant 0 : index
    %c0_11 = arith.constant 0 : index
    %13 = vector.load %arg6[%c0_10, %c0_11] : memref<1x128xf32, #tpu.memory_space<vmem>>, vector<1x128xf32>
    tpu.vector_store %arg6[%c0_10, %c0_11], %12 {strides = array<i32>} : memref<1x128xf32, #tpu.memory_space<vmem>>, vector<1x128xf32>,
    return
  }
  func.func @transform_0(%arg0: i32) -> (i32, i32) {
    %c0_i32 = arith.constant 0 : i32
    %c0_i32_0 = arith.constant 0 : i32
    return %arg0, %c0_i32 : i32, i32
  }
  func.func @transform_1(%arg0: i32) -> (i32, i32) {
    %c0_i32 = arith.constant 0 : i32
    %c0_i32_0 = arith.constant 0 : i32
    %c0_i32_1 = arith.constant 0 : i32
    return %c0_i32, %c0_i32_0 : i32, i32
  }
  func.func @transform_2(%arg0: i32) -> (i32, i32) {
    %c0_i32 = arith.constant 0 : i32
    %c0_i32_0 = arith.constant 0 : i32
    %c0_i32_1 = arith.constant 0 : i32
    return %c0_i32, %c0_i32_0 : i32, i32
  }
  func.func @transform_3(%arg0: i32) -> (i32, i32) {
    %c0_i32 = arith.constant 0 : i32
    %c0_i32_0 = arith.constant 0 : i32
    %c0_i32_1 = arith.constant 0 : i32
    return %c0_i32, %c0_i32_0 : i32, i32
  }
  func.func @transform_4(%arg0: i32) -> (i32, i32) {
    %c0_i32 = arith.constant 0 : i32
    %c0_i32_0 = arith.constant 0 : i32
    %c0_i32_1 = arith.constant 0 : i32
    return %c0_i32, %c0_i32_0 : i32, i32
  }
  func.func @transform_5(%arg0: i32) -> (i32, i32) {
    %c0_i32 = arith.constant 0 : i32
    %c0_i32_0 = arith.constant 0 : i32
    return %c0_i32, %arg0 : i32, i32
  }
}

module attributes {stable_mosaic.version = 11 : i64} {
  func.func @_scale_fc_kernel(%arg0: i32, %arg1: memref<128x256xbf16, #tpu.memory_space<vmem>>, %arg2: memref<128x64xbf16, #tpu.memory_space<vmem>>, %arg3: memref<256x128xbf16, #tpu.memory_space<vmem>>, %arg4: memref<1x128xf32, #tpu.memory_space<vmem>>, %arg5: memref<128x128xf32, #tpu.memory_space<vmem>>) attributes {dimension_semantics = [#tpu.dimension_semantics<parallel>], iteration_bounds = array<i64: 1>, scalar_prefetch = 0 : i64, scratch_operands = 0 : i64, tpu.core_type = #tpu.core_type<tc>, window_params = [{transform_indices = @transform_0, window_bounds = array<i64: 128, 256>}, {transform_indices = @transform_1, window_bounds = array<i64: 128, 64>}, {pipeline_mode = #tpu.pipeline_mode<synchronous>, transform_indices = @transform_2, window_bounds = array<i64: 256, 128>}, {pipeline_mode = #tpu.pipeline_mode<synchronous>, transform_indices = @transform_3, window_bounds = array<i64: 1, 128>}, {transform_indices = @transform_4, window_bounds = array<i64: 128, 128>}]} {
    %c0 = arith.constant 0 : index
    %c0_0 = arith.constant 0 : index
    %0 = vector.load %arg2[%c0, %c0_0] : memref<128x64xbf16, #tpu.memory_space<vmem>>, vector<128x64xbf16>
    %1 = tpu.concatenate %0, %0, %0, %0 in 1 : vector<128x64xbf16>, vector<128x64xbf16>, vector<128x64xbf16>, vector<128x64xbf16> -> vector<128x256xbf16>
    %c0_1 = arith.constant 0 : index
    %c0_2 = arith.constant 0 : index
    %2 = vector.load %arg1[%c0_1, %c0_2] : memref<128x256xbf16, #tpu.memory_space<vmem>>, vector<128x256xbf16>
    %3 = arith.mulf %2, %1 : vector<128x256xbf16>
    %c0_3 = arith.constant 0 : index
    %c0_4 = arith.constant 0 : index
    %4 = vector.load %arg3[%c0_3, %c0_4] : memref<256x128xbf16, #tpu.memory_space<vmem>>, vector<256x128xbf16>
    %cst = arith.constant dense<0.000000e+00> : vector<128x128xf32>
    %5 = tpu.matmul %3, %4, %cst {dimension_numbers = #tpu.dot_dimension_numbers<[1], [0], [0], [1], [0, 0, 1, 1], [], []>} : vector<128x256xbf16>, vector<256x128xbf16>, vector<128x128xf32> -> vector<128x128xf32>
    %c0_5 = arith.constant 0 : index
    %c0_6 = arith.constant 0 : index
    %6 = vector.load %arg4[%c0_5, %c0_6] : memref<1x128xf32, #tpu.memory_space<vmem>>, vector<1x128xf32>
    %7 = vector.broadcast %6 : vector<1x128xf32> to vector<128x128xf32>
    %8 = arith.addf %5, %7 : vector<128x128xf32>
    %c0_7 = arith.constant 0 : index
    %c0_8 = arith.constant 0 : index
    %9 = vector.load %arg5[%c0_7, %c0_8] : memref<128x128xf32, #tpu.memory_space<vmem>>, vector<128x128xf32>
    tpu.vector_store %arg5[%c0_7, %c0_8], %8 {strides = array<i32>} : memref<128x128xf32, #tpu.memory_space<vmem>>, vector<128x128xf32>,
    return
  }
  func.func @transform_0(%arg0: i32) -> (i32, i32) {
    %c0_i32 = arith.constant 0 : i32
    %c0_i32_0 = arith.constant 0 : i32
    return %arg0, %c0_i32 : i32, i32
  }
  func.func @transform_1(%arg0: i32) -> (i32, i32) {
    %c0_i32 = arith.constant 0 : i32
    %c0_i32_0 = arith.constant 0 : i32
    return %arg0, %c0_i32 : i32, i32
  }
  func.func @transform_2(%arg0: i32) -> (i32, i32) {
    %c0_i32 = arith.constant 0 : i32
    %c0_i32_0 = arith.constant 0 : i32
    %c0_i32_1 = arith.constant 0 : i32
    return %c0_i32, %c0_i32_0 : i32, i32
  }
  func.func @transform_3(%arg0: i32) -> (i32, i32) {
    %c0_i32 = arith.constant 0 : i32
    %c0_i32_0 = arith.constant 0 : i32
    %c0_i32_1 = arith.constant 0 : i32
    return %c0_i32, %c0_i32_0 : i32, i32
  }
  func.func @transform_4(%arg0: i32) -> (i32, i32) {
    %c0_i32 = arith.constant 0 : i32
    %c0_i32_0 = arith.constant 0 : i32
    return %arg0, %c0_i32 : i32, i32
  }
}

</mosaic_0001>

<bundles_post_ra>
// kernel: attention_cnn_forward.6
= control target key start
LH: loop header
LB: loop body
LE: loop exit
PB: predicated region body
PF: predicated region fallthrough
CT: control target
= control target key end

     0   :  { %s5775_s12 = smov 0   ;;  %s5777_s13 = smov 0   ;;  %s7025_s0 = inlined_call_operand.vmem [shape: bf16[4,2,9,9,64], index: 0, kind: input, shape index: {}]   ;;  %s7026_s1 = inlined_call_operand.vmem [shape: bf16[9,64,128], index: 1, kind: input, shape index: {}]   ;;  %s7027_s2 = inlined_call_operand.vmem [shape: f32[1,128], index: 2, kind: input, shape index: {}]   ;;  %s7028_s3 = inlined_call_operand.vmem [shape: bf16[128,128], index: 3, kind: output, shape index: {}]  }
   0x1   :  { %s5779_s14 = smov 0  }
   0x2 LB: > { %s4129_s15 = sadd.s32 4294967295, %s5753_s14   ;;  %s5792_s16 = sadd.s32 1, %s5753_s14   ;;  %s5753_s14 = sphi %s5779_s14, %s7129_s14   ;;  %s5749_s13 = sphi %s5777_s13, %s7128_s13   ;;  %s5745_s12 = sphi %s5775_s12, %s7127_s12  }
   0x3   : > { %s17_s17 = ssub.s32 %s5753_s14, %s5792_s16  ;;  %s20_s18 = sadd.s32 1, %s5749_s13 }
   0x4   : > { %p18_p0 = scmp.eq.s32.totalorder %s17_s17, 0  ;;  %p27_p1 = scmp.ne.s32.totalorder %s5749_s13, %s5745_s12 }
   0x5   : > { %p28_p2 = scmp.eq.s32.totalorder %s5753_s14, 0  ;;  %p4132_p4 = scmp.ge.s32.totalorder %s5753_s14, 2 }
   0x6   : > { %s5801_s19 = scalar_select %p18_p0, %s5749_s13, %s20_s18  }
   0x7   : > { %p29_p3 = por %p28_p2, %p27_p1  ;;  %127 = sbr.rel (%p4132_p4) target bundleno = 37 (0x25), region = 24 }
   0xe   : > { %130 = sbr.rel (!%p29_p3) target bundleno = 37 (0x25), region = 28  ;;  %s132_s20 = sand.u32 (%p29_p3), 1, %s5749_s13  }
   0xf   : > { %s5630_s21 = smul.u32 (%p29_p3), 72, %s5753_s14 }
  0x10   : > { %s5629_s22 = smul.u32 (%p29_p3), 288, %s132_s20 }
  0x11   : > { %s5809_s25 = scalar_lea.vmem (%p29_p3), %s7025_s0, %s5630_s21 }
  0x12   : > { %v153_v0 = vld [vmem:[%s5809_s25] sm:$0xff] (%p29_p3)   ;;  %v157_v1 = vld [vmem:[%s5809_s25 + $0x8] sm:$0xff] (%p29_p3)   ;;  %v161_v2 = vld [vmem:[%s5809_s25 + $0x10] sm:$0xff] (%p29_p3)   ;;  %s5814_s26 = scalar_lea.vmem (%p29_p3), [#allocation2], %s5629_s22 }
  0x13   : > { %154 = vst [vmem:[%s5814_s26] sm:$0xff] (%p29_p3), %v153_v0   ;;  %158 = vst [vmem:[%s5814_s26 + $0x8] sm:$0xff] (%p29_p3), %v157_v1   ;;  %v165_v3 = vld [vmem:[%s5809_s25 + $0x18] sm:$0xff] (%p29_p3)   ;;  %v169_v4 = vld [vmem:[%s5809_s25 + $0x20] sm:$0xff] (%p29_p3)  }
  0x14   : > { %162 = vst [vmem:[%s5814_s26 + $0x10] sm:$0xff] (%p29_p3), %v161_v2   ;;  %v173_v5 = vld [vmem:[%s5809_s25 + $0x28] sm:$0xff] (%p29_p3)   ;;  %166 = vst [vmem:[%s5814_s26 + $0x18] sm:$0xff] (%p29_p3), %v165_v3   ;;  %v177_v6 = vld [vmem:[%s5809_s25 + $0x30] sm:$0xff] (%p29_p3)  }
  0x15   : > { %170 = vst [vmem:[%s5814_s26 + $0x20] sm:$0xff] %v169_v4   ;;  %174 = vst [vmem:[%s5814_s26 + $0x28] sm:$0xff] %v173_v5   ;;  %v181_v7 = vld [vmem:[%s5809_s25 + $0x38] sm:$0xff]   ;;  %v185_v8 = vld [vmem:[%s5809_s25 + $0x40] sm:$0xff]  }
  0x16   : > { %178 = vst [vmem:[%s5814_s26 + $0x30] sm:$0xff] %v177_v6   ;;  %182 = vst [vmem:[%s5814_s26 + $0x38] sm:$0xff] %v181_v7   ;;  %v189_v9 = vld [vmem:[%s5809_s25 + $0x90] sm:$0xff]   ;;  %v193_v10 = vld [vmem:[%s5809_s25 + $0x98] sm:$0xff]  }
  0x17   : > { %186 = vst [vmem:[%s5814_s26 + $0x40] sm:$0xff] %v185_v8   ;;  %v197_v11 = vld [vmem:[%s5809_s25 + $0xa0] sm:$0xff]   ;;  %190 = vst [vmem:[%s5814_s26 + $0x48] sm:$0xff] %v189_v9   ;;  %v201_v12 = vld [vmem:[%s5809_s25 + $0xa8] sm:$0xff]  }
  0x18   : > { %194 = vst [vmem:[%s5814_s26 + $0x50] sm:$0xff] %v193_v10   ;;  %198 = vst [vmem:[%s5814_s26 + $0x58] sm:$0xff] %v197_v11   ;;  %v205_v13 = vld [vmem:[%s5809_s25 + $0xb0] sm:$0xff]   ;;  %v209_v14 = vld [vmem:[%s5809_s25 + $0xb8] sm:$0xff]  }
  0x19   : > { %202 = vst [vmem:[%s5814_s26 + $0x60] sm:$0xff] %v201_v12   ;;  %206 = vst [vmem:[%s5814_s26 + $0x68] sm:$0xff] %v205_v13   ;;  %v213_v15 = vld [vmem:[%s5809_s25 + $0xc0] sm:$0xff]   ;;  %v217_v16 = vld [vmem:[%s5809_s25 + $0xc8] sm:$0xff]  }
  0x1a   : > { %210 = vst [vmem:[%s5814_s26 + $0x70] sm:$0xff] %v209_v14   ;;  %v221_v17 = vld [vmem:[%s5809_s25 + $0xd0] sm:$0xff]   ;;  %214 = vst [vmem:[%s5814_s26 + $0x78] sm:$0xff] %v213_v15   ;;  %v225_v18 = vld [vmem:[%s5809_s25 + $0x120] sm:$0xff]  }
  0x1b   : > { %218 = vst [vmem:[%s5814_s26 + $0x80] sm:$0xff] %v217_v16   ;;  %222 = vst [vmem:[%s5814_s26 + $0x88] sm:$0xff] %v221_v17   ;;  %v229_v19 = vld [vmem:[%s5809_s25 + $0x128] sm:$0xff]   ;;  %v233_v20 = vld [vmem:[%s5809_s25 + $0x130] sm:$0xff]  }
  0x1c   : > { %226 = vst [vmem:[%s5814_s26 + $0x90] sm:$0xff] %v225_v18   ;;  %230 = vst [vmem:[%s5814_s26 + $0x98] sm:$0xff] %v229_v19   ;;  %v237_v21 = vld [vmem:[%s5809_s25 + $0x138] sm:$0xff]   ;;  %v241_v22 = vld [vmem:[%s5809_s25 + $0x140] sm:$0xff]  }
  0x1d   : > { %234 = vst [vmem:[%s5814_s26 + $0xa0] sm:$0xff] %v233_v20   ;;  %v245_v23 = vld [vmem:[%s5809_s25 + $0x148] sm:$0xff]   ;;  %238 = vst [vmem:[%s5814_s26 + $0xa8] sm:$0xff] %v237_v21   ;;  %v249_v24 = vld [vmem:[%s5809_s25 + $0x150] sm:$0xff]  }
  0x1e   : > { %242 = vst [vmem:[%s5814_s26 + $0xb0] sm:$0xff] %v241_v22   ;;  %246 = vst [vmem:[%s5814_s26 + $0xb8] sm:$0xff] %v245_v23   ;;  %v253_v25 = vld [vmem:[%s5809_s25 + $0x158] sm:$0xff]   ;;  %v257_v26 = vld [vmem:[%s5809_s25 + $0x160] sm:$0xff]  }
  0x1f   : > { %250 = vst [vmem:[%s5814_s26 + $0xc0] sm:$0xff] %v249_v24   ;;  %254 = vst [vmem:[%s5814_s26 + $0xc8] sm:$0xff] %v253_v25   ;;  %v261_v27 = vld [vmem:[%s5809_s25 + $0x1b0] sm:$0xff]   ;;  %v265_v28 = vld [vmem:[%s5809_s25 + $0x1b8] sm:$0xff]  }
  0x20   : > { %258 = vst [vmem:[%s5814_s26 + $0xd0] sm:$0xff] %v257_v26   ;;  %v269_v29 = vld [vmem:[%s5809_s25 + $0x1c0] sm:$0xff]   ;;  %262 = vst [vmem:[%s5814_s26 + $0xd8] sm:$0xff] %v261_v27   ;;  %v273_v30 = vld [vmem:[%s5809_s25 + $0x1c8] sm:$0xff]  }
  0x21   : > { %266 = vst [vmem:[%s5814_s26 + $0xe0] sm:$0xff] %v265_v28   ;;  %270 = vst [vmem:[%s5814_s26 + $0xe8] sm:$0xff] %v269_v29   ;;  %v277_v31 = vld [vmem:[%s5809_s25 + $0x1d0] sm:$0xff]   ;;  %v281_v32 = vld [vmem:[%s5809_s25 + $0x1d8] sm:$0xff]  }
  0x22   : > { %274 = vst [vmem:[%s5814_s26 + $0xf0] sm:$0xff] %v273_v30   ;;  %278 = vst [vmem:[%s5814_s26 + $0xf8] sm:$0xff] %v277_v31   ;;  %v285_v33 = vld [vmem:[%s5809_s25 + $0x1e0] sm:$0xff]   ;;  %v289_v34 = vld [vmem:[%s5809_s25 + $0x1e8] sm:$0xff]  }
  0x23   : > { %282 = vst [vmem:[%s5814_s26 + $0x100] sm:$0xff] %v281_v32   ;;  %v293_v35 = vld [vmem:[%s5809_s25 + $0x1f0] sm:$0xff]   ;;  %286 = vst [vmem:[%s5814_s26 + $0x108] sm:$0xff] %v285_v33  }
  0x24   : > { %290 = vst [vmem:[%s5814_s26 + $0x110] sm:$0xff] %v289_v34   ;;  %294 = vst [vmem:[%s5814_s26 + $0x118] sm:$0xff] %v293_v35  }
  0x25 PF: > { %p4134_p5 = scmp.ge.s32.totalorder %s5753_s14, 1  ;;  %p462_p6 = scmp.lt.s32.totalorder %s5753_s14, 3 }
  0x27   : > { %p463_p7 = pnand %p4134_p5, %p462_p6 }
  0x29   : > { %466 = sbr.rel (%p463_p7) target bundleno = 571 (0x23b), region = 69 }
  0x30   : > { %v5656_v36 = vld [vmem:[%s7026_s1 + $0x20] sm:$0xff]   ;;  %s469_s29 = sand.u32 1, %s5745_s12   ;;  %v5657_v37 = vld [vmem:[%s7026_s1 + $0x28] sm:$0xff]   ;;  %v5658_v38 = vld [vmem:[%s7026_s1 + $0x30] sm:$0xff]   ;;  %vm758_vm0 = vcmask 523264   ;;  %vm953_vm1 = vcmask 1046528  }
  0x31   : > { %s5631_s5 = smul.u32 288, %s469_s29  ;;  %4797 = vmatprep.subr.bf16.mxu0 %v5656_v36  ;;  %4941 = vmatprep.subr.bf16.mxu1 %v5656_v36  ;;  %v5659_v54 = vld [vmem:[%s7026_s1 + $0x38] sm:$0xff]   ;;  %v5665_v7 = vld [vmem:[%s7026_s1] sm:$0xff]  }
  0x32   : > { %4798 = vmatpush3.bf16.msra.mxu0 %v5656_v36  ;;  %4942 = vmatpush3.bf16.msra.mxu1 %v5656_v36  ;;  %v5666_v36 = vld [vmem:[%s7026_s1 + $0x8] sm:$0xff]  }
  0x33   : > { %4799 = vmatprep.subr.bf16.mxu0 %v5657_v37  ;;  %4943 = vmatprep.subr.bf16.mxu1 %v5657_v37  ;;  %s5897_s8 = scalar_lea.vmem [#allocation2], %s5631_s5 }
  0x34   : > { %v5900_v39 = vld [vmem:[%s5897_s8 + $0x48] sm:$0xf]  ;;  %v4139_v40 = vld [vmem:[%s5897_s8 + $0x50] sm:$0xf]  ;;  %v5904_v41 = vld [vmem:[%s5897_s8 + $0x58] sm:$0xf] }
  0x35   : > { %v556_v42 = vunpack.c.l.bf16 %v4139_v40  ;;  %v5907_v43 = vcombine.low %v5900_v39, %v4139_v40  ;;  %v5910_v44 = vld [vmem:[%s5897_s8] sm:$0xf]  ;;  %v500_v45 = vld [vmem:[%s5897_s8 + $0x4] sm:$0x1]  ;;  %v4142_v46 = vld [vmem:[%s5897_s8 + $0x5c] sm:$0x1]  ;;  %v558_v47 = vunpack.c.l.bf16 %v5904_v41  ;;  %v5916_v48 = vcombine.low %v4139_v40, %v5904_v41 }
  0x36   : > { %v5919_v49 = vld [vmem:[%s5897_s8 + $0x8] sm:$0xf]  ;;  %v502_v50 = vld [vmem:[%s5897_s8 + $0xc] sm:$0x1]  ;;  %4800 = vmatpush3.bf16.msra.mxu0 %v5657_v37  ;;  %4944 = vmatpush3.bf16.msra.mxu1 %v5657_v37  ;;  %v5923_v51 = vld [vmem:[%s5897_s8 + $0x10] sm:$0xf]  ;;  %v517_v52 = vunpack.c.l.bf16 %v5910_v44  ;;  %v518_v53 = vunpack.c.l.bf16 %v500_v45  ;;  %v559_v61 = vunpack.c.l.bf16 %v4142_v46 }
  0x37   : > { %4801 = vmatprep.subr.bf16.mxu0 %v5658_v38  ;;  %4945 = vmatprep.subr.bf16.mxu1 %v5658_v38  ;;  %v5929_v55 = vrot.slane %v556_v42, 1  ;;  %v504_v56 = vld [vmem:[%s5897_s8 + $0x14] sm:$0x1]  ;;  %v5933_v57 = vld [vmem:[%s5897_s8 + $0x18] sm:$0xf]  ;;  %v519_v58 = vunpack.c.l.bf16 %v5919_v49  ;;  %v520_v59 = vunpack.c.l.bf16 %v502_v50  ;;  %v521_v60 = vunpack.c.l.bf16 %v5923_v51 }
  0x38   : > { %4805 = vmatprep.mubr.msk.bf16.mxu0 %vm758_vm0, %v5907_v43  ;;  %v506_v62 = vld [vmem:[%s5897_s8 + $0x1c] sm:$0x1]  ;;  %v5941_v63 = vld [vmem:[%s5897_s8 + $0x20] sm:$0xf]  ;;  %v508_v0 = vld [vmem:[%s5897_s8 + $0x24] sm:$0x1]  ;;  %v522_v1 = vunpack.c.l.bf16 %v504_v56  ;;  %v523_v2 = vunpack.c.l.bf16 %v5933_v57 }
  0x39   : > { %v5945_v3 = vrot.slane %v558_v47, 1  ;;  %v524_v4 = vunpack.c.l.bf16 %v506_v62  ;;  %v525_v5 = vunpack.c.l.bf16 %v5941_v63  ;;  %v526_v6 = vunpack.c.l.bf16 %v508_v0  ;;  %v5954_v20 = vld [vmem:[%s5897_s8 + $0x60] sm:$0xf]  ;;  %v5965_v25 = vld [vmem:[%s5897_s8 + $0x68] sm:$0xf]  ;;  %v5670_v50 = vld [vmem:[%s7026_s1 + $0x10] sm:$0xff]  }
  0x3a   : > { %4802 = vmatpush3.bf16.msra.mxu0 %v5658_v38  ;;  %4946 = vmatpush3.bf16.msra.mxu1 %v5658_v38  ;;  %v954_v8 = vrot.slane %v517_v52, 1  ;;  %v955_v9 = vrot.slane %v518_v53, 1  ;;  %v957_v10 = vrot.slane %v519_v58, 1  ;;  %v958_v11 = vrot.slane %v520_v59, 1  ;;  %v5968_v26 = vld [vmem:[%s5897_s8 + $0x70] sm:$0xf] }
  0x3b   : > { %4803 = vmatprep.subr.bf16.mxu0 %v5659_v54  ;;  %4947 = vmatprep.subr.bf16.mxu1 %v5659_v54  ;;  %v960_v12 = vrot.slane %v521_v60, 1  ;;  %v961_v13 = vrot.slane %v522_v1, 1  ;;  %v963_v14 = vrot.slane %v523_v2, 1  ;;  %v964_v15 = vrot.slane %v524_v4, 1  ;;  %v5976_v30 = vld [vmem:[%s5897_s8 + $0x28] sm:$0xf] }
  0x3c   : > { %v956_v16 = vsel %vm953_vm1, %v954_v8, %v955_v9  ;;  %v959_v17 = vsel %vm953_vm1, %v957_v10, %v958_v11  ;;  %v966_v18 = vrot.slane %v525_v5, 1  ;;  %v967_v19 = vrot.slane %v526_v6, 1  ;;  %v510_v31 = vld [vmem:[%s5897_s8 + $0x2c] sm:$0x1]  ;;  %v4144_v34 = vld [vmem:[%s5897_s8 + $0x64] sm:$0x1] }
  0x3d   : > { %v962_v21 = vsel %vm953_vm1, %v960_v12, %v961_v13  ;;  %v965_v22 = vsel %vm953_vm1, %v963_v14, %v964_v15  ;;  %v5958_v23 = vpack.c.bf16 %v959_v17, %v956_v16  ;;  %v5962_v24 = vcombine.low %v5933_v57, %v5941_v63  ;;  %v6002_v40 = vld [vmem:[%s5897_s8 + $0x78] sm:$0xf]  ;;  %v6005_v42 = vld [vmem:[%s5897_s8 + $0x80] sm:$0xf]  ;;  %v512_v45 = vld [vmem:[%s5897_s8 + $0x34] sm:$0x1] }
  0x3e   : > { %4804 = vmatpush3.bf16.msra.mxu0 %v5659_v54  ;;  %4948 = vmatpush3.bf16.msra.mxu1 %v5659_v54  ;;  %v968_v27 = vsel %vm953_vm1, %v966_v18, %v967_v19  ;;  %v5971_v28 = vpack.c.bf16 %v965_v22, %v962_v21  ;;  %v5973_v29 = vpack.c.bf16 %v962_v21, %v959_v17  ;;  %v5979_v32 = vrot.slane %v559_v61, 1  ;;  %v6020_v52 = vld [vmem:[%s5897_s8 + $0x38] sm:$0xf]  ;;  %v514_v53 = vld [vmem:[%s5897_s8 + $0x3c] sm:$0x1] }
  0x3f   : > { %v5981_v33 = vpack.c.bf16 %v968_v27, %v965_v22  ;;  %4949 = vmatprep.mubr.msk.bf16.mxu1 %vm758_vm0, %v5958_v23  ;;  %v5988_v35 = vcombine.low %v5904_v41, %v5954_v20  ;;  %4813 = vmatprep.subr.bf16.mxu0 %v5665_v7  ;;  %v5995_v37 = vcombine.low %v5965_v25, %v5968_v26  ;;  %v6008_v41 = vld [vmem:[%s5897_s8 + $0x30] sm:$0xf]  ;;  %v527_v46 = vunpack.c.l.bf16 %v5976_v30  ;;  %v6039_v10 = vld [vmem:[%s7026_s1 + $0x18] sm:$0xff]   ;;  %v4140_v12 = vld [vmem:[%s5897_s8 + $0x54] sm:$0x1] }
  0x40   : > { %4957 = vmatprep.subr.bf16.mxu1 %v5665_v7  ;;  %v5999_v38 = vcombine.low %v5954_v20, %v5965_v25  ;;  %v528_v47 = vunpack.c.l.bf16 %v510_v31  ;;  %v529_v58 = vunpack.c.l.bf16 %v6008_v41  ;;  %v560_v59 = vunpack.c.l.bf16 %v5954_v20  ;;  %v4138_v19 = vld [vmem:[%s5897_s8 + $0x4c] sm:$0x1] }
  0x41   : > { %4806 = vmatmul.mubr.msk.bf16.vlgmr.msra.gmra.mrb[0].mxu0 %vm758_vm0, %v5988_v35  ;;  %4950 = vmatmul.mubr.msk.bf16.vlgmr.msra.gmra.mrb[0].mxu1 %vm758_vm0, %v5971_v28  ;;  %v969_v54 = vrot.slane %v527_v46, 1  ;;  %v561_v60 = vunpack.c.l.bf16 %v4144_v34  ;;  %v530_v61 = vunpack.c.l.bf16 %v512_v45  ;;  %v531_v62 = vunpack.c.l.bf16 %v6020_v52  ;;  %v4146_v20 = vld [vmem:[%s5897_s8 + $0x6c] sm:$0x1]  ;;  %v6076_v34 = vld [vmem:[%s7026_s1 + $0x40] sm:$0xff]  }
  0x42   : > { %4814 = vmatpush3.bf16.msra.mxu0 %v5665_v7  ;;  %4958 = vmatpush3.bf16.msra.mxu1 %v5665_v7  ;;  %v970_v56 = vrot.slane %v528_v47, 1  ;;  %v6031_v1 = vcombine.low %v6002_v40, %v6005_v42  ;;  %v532_v2 = vunpack.c.l.bf16 %v514_v53  ;;  %v972_v4 = vrot.slane %v529_v58, 1  ;;  %v4150_v53 = vld [vmem:[%s5897_s8 + $0x7c] sm:$0x1] }
  0x43   : > { %4815 = vmatprep.subr.bf16.mxu0 %v5666_v36  ;;  %4959 = vmatprep.subr.bf16.mxu1 %v5666_v36  ;;  %v562_v5 = vunpack.c.l.bf16 %v5965_v25  ;;  %v973_v7 = vrot.slane %v530_v61, 1  ;;  %v975_v8 = vrot.slane %v531_v62, 1  ;;  %v4255_v11 = vcombine.low %v5910_v44, %v5919_v49 }
  0x44   : > { %4809 = vmatprep.mubr.msk.bf16.mxu0 %vm758_vm0, %v5995_v37  ;;  %v971_v0 = vsel %vm953_vm1, %v969_v54, %v970_v56  ;;  %v976_v9 = vrot.slane %v532_v2, 1  ;;  %v6046_v13 = vcombine.low %v5919_v49, %v5923_v51  ;;  %v557_v15 = vunpack.c.l.bf16 %v4140_v12 }
  0x45   : > { %v6034_v6 = vpack.c.bf16 %v971_v0, %v968_v27  ;;  %v974_v14 = vsel %vm953_vm1, %v972_v4, %v973_v7  ;;  %v6053_v16 = vcombine.low %v5976_v30, %v6008_v41  ;;  %v6057_v17 = vcombine.low %v5968_v26, %v6002_v40  ;;  %v6145_v7 = vld [vmem:[%s5897_s8 + $0xb0] sm:$0xf] }
  0x46   : > { %4816 = vmatpush3.bf16.msra.mxu0 %v5666_v36  ;;  %4960 = vmatpush3.bf16.msra.mxu1 %v5666_v36  ;;  %v1986_v44 = vrot.slane %v560_v59, 1  ;;  %v1987_v18 = vrot.slane %v561_v60, 1  ;;  %v6062_v49 = vsel %vm953_vm1, %v975_v8, %v976_v9  ;;  %v6066_v21 = vpack.c.bf16 %v974_v14, %v971_v0  ;;  %7066 = vst [vmem:[#allocation4_spill] sm:$0xff] %v6145_v7 }
  0x47   : > { %4817 = vmatprep.subr.bf16.mxu0 %v5670_v50  ;;  %4961 = vmatprep.subr.bf16.mxu1 %v5670_v50  ;;  %v1989_v22 = vrot.slane %v562_v5, 1  ;;  %v6069_v25 = vpack.c.bf16 %v6062_v49, %v974_v14  ;;  %v1981_v27 = vrot.slane %v557_v15, 1  ;;  %v563_v31 = vunpack.c.l.bf16 %v4146_v20  ;;  %v6142_v5 = vld [vmem:[%s5897_s8 + $0xa8] sm:$0xf]  ;;  %v4152_v14 = vld [vmem:[%s5897_s8 + $0x84] sm:$0x1] }
  0x48   : > { %4953 = vmatprep.mubr.msk.bf16.mxu1 %vm758_vm0, %v6034_v6  ;;  %v6081_v36 = vsel %vm953_vm1, %v5945_v3, %v5979_v32  ;;  %v554_v47 = vunpack.c.l.bf16 %v5900_v39  ;;  %v555_v3 = vunpack.c.l.bf16 %v4138_v19  ;;  %v4148_v32 = vld [vmem:[%s5897_s8 + $0x74] sm:$0x1]  ;;  %v6102_v56 = vsel %vm953_vm1, %v1986_v44, %v1987_v18  ;;  %7065 = vst [vmem:[#allocation3_spill] sm:$0xff] %v6142_v5  ;;  %v6188_v20 = vld [vmem:[%s7026_s1 + $0x60] sm:$0xff]  }
  0x49   : > { %4810 = vmatmul.mubr.msk.bf16.gmra.mrb[4].mxu0 %vm758_vm0, %v6031_v1  ;;  %4954 = vmatmul.mubr.msk.bf16.gmra.mrb[4].mxu1 %vm758_vm0, %v6069_v25  ;;  %v6088_v45 = vsel %vm953_vm1, %v5929_v55, %v1981_v27  ;;  %v1990_v46 = vrot.slane %v563_v31, 1  ;;  %v4257_v39 = vcombine.low %v5941_v63, %v5976_v30  ;;  %v566_v63 = vunpack.c.l.bf16 %v6002_v40 }
  0x4a   : > { %4818 = vmatpush3.bf16.msra.mxu0 %v5670_v50  ;;  %4962 = vmatpush3.bf16.msra.mxu1 %v5670_v50  ;;  %v4256_v50 = vcombine.low %v5923_v51, %v5933_v57  ;;  %v6099_v54 = vpack.c.bf16 %v6081_v36, %v6088_v45  ;;  %v564_v57 = vunpack.c.l.bf16 %v5968_v26  ;;  %v565_v30 = vunpack.c.l.bf16 %v4148_v32  ;;  %v6131_v26 = vld [vmem:[%s7026_s1 + $0x50] sm:$0xff]  }
  0x4b   : > { %4819 = vmatprep.subr.bf16.mxu0 %v6039_v10  ;;  %4963 = vmatprep.subr.bf16.mxu1 %v6039_v10  ;;  %v6109_v51 = vsel %vm953_vm1, %v1989_v22, %v1990_v46  ;;  %v567_v58 = vunpack.c.l.bf16 %v4150_v53  ;;  %v1977_v59 = vrot.slane %v554_v47, 1  ;;  %v1978_v60 = vrot.slane %v555_v3, 1  ;;  %v4162_v22 = vld [vmem:[%s5897_s8 + $0xac] sm:$0x1]  ;;  %v4164_v46 = vld [vmem:[%s5897_s8 + $0xb4] sm:$0x1] }
  0x4c   : > { %4821 = vmatprep.mubr.msk.bf16.mxu0 %vm758_vm0, %v4255_v11  ;;  %4965 = vmatprep.mubr.msk.bf16.mxu1 %vm758_vm0, %v5907_v43  ;;  %v6116_v43 = vld [vmem:[%s7026_s1 + $0x48] sm:$0xff]   ;;  %v6120_v55 = vpack.c.bf16 %v6109_v51, %v6102_v56  ;;  %v1992_v40 = vrot.slane %v564_v57, 1  ;;  %v1995_v61 = vrot.slane %v566_v63, 1  ;;  %v1993_v62 = vrot.slane %v565_v30, 1 }
  0x4d   : > { %v1996_v0 = vrot.slane %v567_v58, 1  ;;  %v4258_v2 = vcombine.low %v6008_v41, %v6020_v52  ;;  %v1979_v4 = vsel %vm953_vm1, %v1977_v59, %v1978_v60  ;;  %v6161_v41 = vld [vmem:[%s7026_s1 + $0x58] sm:$0xff]   ;;  %v597_v44 = vunpack.c.l.bf16 %v6142_v5  ;;  %v4180_v60 = vld [vmem:[%s5897_s8 + $0xf4] sm:$0x1] }
  0x4e   : > { %4820 = vmatpush3.bf16.msra.mxu0 %v6039_v10  ;;  %4964 = vmatpush3.bf16.msra.mxu1 %v6039_v10  ;;  %v2009_v11 = vpack.c.bf16 %v6088_v45, %v1979_v4  ;;  %v1994_v12 = vsel %vm953_vm1, %v1992_v40, %v1993_v62  ;;  %v599_v18 = vunpack.c.l.bf16 %v6145_v7  ;;  %v568_v27 = vunpack.c.l.bf16 %v6005_v42  ;;  %v6237_v40 = vld [vmem:[%s5897_s8 + $0x98] sm:$0xf]  ;;  %v4182_v62 = vld [vmem:[%s5897_s8 + $0xfc] sm:$0x1] }
  0x4f   : > { %4829 = vmatprep.subr.bf16.mxu0 %v6076_v34  ;;  %4973 = vmatprep.subr.bf16.mxu1 %v6076_v34  ;;  %v6173_v15 = vsel %vm953_vm1, %v1995_v61, %v1996_v0  ;;  %v569_v31 = vunpack.c.l.bf16 %v4152_v14  ;;  %v598_v45 = vunpack.c.l.bf16 %v4162_v22  ;;  %v1350_v47 = vrot.slane %v597_v44, 1  ;;  %7069 = vst [vmem:[#allocation7_spill] sm:$0xff] %v6237_v40  ;;  %v6257_v44 = vld [vmem:[%s7026_s1 + $0x78] sm:$0xff]  }
  0x50   : > { %v6180_v19 = vpack.c.bf16 %v6173_v15, %v1994_v12  ;;  %v1998_v53 = vrot.slane %v568_v27, 1  ;;  %v2011_v57 = vpack.c.bf16 %v1994_v12, %v6109_v51  ;;  %v4155_v51 = vld [vmem:[%s5897_s8 + $0x90] sm:$0xf]  ;;  %v635_v61 = vunpack.c.l.bf16 %v4180_v60  ;;  %v6251_v12 = vld [vmem:[%s5897_s8 + $0xe0] sm:$0xf] }
  0x51   : > { %4822 = vmatmul.mubr.msk.bf16.vlgmr.msra.gmra.mrb[0].mxu0 %vm758_vm0, %v4256_v50  ;;  %4966 = vmatmul.mubr.msk.bf16.vlgmr.msra.gmra.mrb[0].mxu1 %vm758_vm0, %v5988_v35  ;;  %v6150_v35 = vld [vmem:[%s5897_s8 + $0xf0] sm:$0xf]  ;;  %v600_v50 = vunpack.c.l.bf16 %v4164_v46  ;;  %v1351_v3 = vrot.slane %v598_v45, 1  ;;  %v1999_v63 = vrot.slane %v569_v31, 1  ;;  %7070 = vst [vmem:[#allocation8_spill] sm:$0xff] %v6251_v12  ;;  %v6277_v46 = vld [vmem:[%s7026_s1 + $0x80] sm:$0xff]  }
  0x52   : > { %4830 = vmatpush3.bf16.msra.mxu0 %v6076_v34  ;;  %4825 = vmatprep.mubr.msk.bf16.mxu0 %vm758_vm0, %v4257_v39  ;;  %v2010_v39 = vpack.c.bf16 %v6102_v56, %v6081_v36  ;;  %v634_v30 = vunpack.c.l.bf16 %v6150_v35  ;;  %v2270_v14 = vrot.slane %v635_v61, 1  ;;  %v6272_v45 = vld [vmem:[%s5897_s8 + $0xa0] sm:$0xf]  ;;  %7072 = vst [vmem:[#allocation10_spill] sm:$0xff] %v6277_v46 }
  0x53   : > { %4831 = vmatprep.subr.bf16.mxu0 %v6116_v43  ;;  %4974 = vmatpush3.bf16.msra.mxu1 %v6076_v34  ;;  %v1354_v32 = vrot.slane %v600_v50, 1  ;;  %v6214_v59 = vsel %vm953_vm1, %v1350_v47, %v1351_v3  ;;  %v6243_v0 = vsel %vm953_vm1, %v1998_v53, %v1999_v63  ;;  %7071 = vst [vmem:[#allocation9_spill] sm:$0xff] %v6272_v45  ;;  %v4158_v3 = vld [vmem:[%s5897_s8 + $0x9c] sm:$0x1]  ;;  %v593_v53 = vunpack.c.l.bf16 %v6237_v40  ;;  %v6312_v63 = vld [vmem:[%s5897_s8 + $0x100] sm:$0xf] }
  0x54   : > { %4969 = vmatprep.mubr.msk.bf16.mxu1 %vm758_vm0, %v5995_v37  ;;  %4975 = vmatprep.subr.bf16.mxu1 %v6116_v43  ;;  %v6155_v37 = vld [vmem:[%s5897_s8 + $0xf8] sm:$0xf]  ;;  %v2012_v27 = vpack.c.bf16 %v6243_v0, %v6173_v15 }
  0x55   : > { %v6165_v9 = vcombine.low %v6150_v35, %v6155_v37  ;;  %v636_v58 = vunpack.c.l.bf16 %v6155_v37 }
  0x56   : > { %4832 = vmatpush3.bf16.msra.mxu0 %v6116_v43 }
  0x57   : > { %4833 = vmatprep.subr.bf16.mxu0 %v6131_v26  ;;  %7067 = vst [vmem:[#allocation5_spill] sm:$0xff] %v6165_v9  ;;  %4976 = vmatpush3.bf16.msra.mxu1 %v6116_v43  ;;  %v2272_v4 = vrot.slane %v636_v58, 1  ;;  %v594_v58 = vunpack.c.l.bf16 %v4158_v3  ;;  %v595_v3 = vunpack.c.l.bf16 %v6272_v45 }
  0x58   : > { %4977 = vmatprep.subr.bf16.mxu1 %v6131_v26 }
  0x59   : > { %4826 = vmatmul.mubr.msk.bf16.gmra.mrb[4].mxu0 %vm758_vm0, %v4258_v2  ;;  %4970 = vmatmul.mubr.msk.bf16.gmra.mrb[4].mxu1 %vm758_vm0, %v6031_v1  ;;  %v6203_v1 = vld [vmem:[%s7026_s1 + $0x68] sm:$0xff]   ;;  %v6246_v2 = vld [vmem:[%s5897_s8 + $0xd8] sm:$0xf] }
  0x5a   : > { %4834 = vmatpush3.bf16.msra.mxu0 %v6131_v26  ;;  %4837 = vmatprep.mubr.msk.bf16.mxu0 %vm758_vm0, %v5958_v23  ;;  %v1353_v23 = vrot.slane %v599_v18, 1  ;;  %v6260_v18 = vcombine.low %v4155_v51, %v6237_v40  ;;  %v6269_v31 = vcombine.low %v6246_v2, %v6251_v12 }
  0x5b   : > { %4835 = vmatprep.subr.bf16.mxu0 %v6161_v41  ;;  %4978 = vmatpush3.bf16.msra.mxu1 %v6131_v26 }
  0x5c   : > { %4981 = vmatprep.mubr.msk.bf16.mxu1 %vm758_vm0, %v2009_v11  ;;  %4979 = vmatprep.subr.bf16.mxu1 %v6161_v41  ;;  %v6217_v36 = vsel %vm953_vm1, %v1353_v23, %v1354_v32  ;;  %v637_v11 = vunpack.c.l.bf16 %v4182_v62  ;;  %v4156_v23 = vld [vmem:[%s5897_s8 + $0x94] sm:$0x1]  ;;  %v591_v32 = vunpack.c.l.bf16 %v4155_v51  ;;  %v6318_v51 = vld [vmem:[%s7026_s1 + $0x88] sm:$0xff]  }
  0x5d   : > { %v6228_v56 = vpack.c.bf16 %v6217_v36, %v6214_v59  ;;  %7077 = vst [vmem:[#allocation15_spill] sm:$0xff] %v6318_v51 }
  0x5e   : > { %4836 = vmatpush3.bf16.msra.mxu0 %v6161_v41  ;;  %v2273_v22 = vrot.slane %v637_v11, 1  ;;  %v1341_v62 = vrot.slane %v591_v32, 1  ;;  %v6336_v11 = vld [vmem:[%s5897_s8 + $0xc0] sm:$0xf] }
  0x5f   : > { %4845 = vmatprep.subr.bf16.mxu0 %v6188_v20  ;;  %4980 = vmatpush3.bf16.msra.mxu1 %v6161_v41  ;;  %7068 = vst [vmem:[#allocation6_spill] sm:$0xff] %v6228_v56  ;;  %7078 = vst [vmem:[#allocation16_spill] sm:$0xff] %v6336_v11 }
  0x60   : > { %4989 = vmatprep.subr.bf16.mxu1 %v6188_v20  ;;  %v6283_v15 = vsel %vm953_vm1, %v2272_v4, %v2273_v22  ;;  %v6333_v4 = vcombine.low %v6155_v37, %v6312_v63  ;;  %v1345_v22 = vrot.slane %v594_v58, 1  ;;  %v6350_v37 = vld [vmem:[%s7026_s1 + $0x90] sm:$0xff]  }
  0x61   : > { %4838 = vmatmul.mubr.msk.bf16.vlgmr.msra.gmra.mrb[0].mxu0 %vm758_vm0, %v5971_v28  ;;  %v6224_v28 = vld [vmem:[%s7026_s1 + $0x70] sm:$0xff]   ;;  %7074 = vst [vmem:[#allocation12_spill] sm:$0xff] %v6283_v15 }
  0x62   : > { %4846 = vmatpush3.bf16.msra.mxu0 %v6188_v20  ;;  %4841 = vmatprep.mubr.msk.bf16.mxu0 %vm758_vm0, %v6034_v6  ;;  %v2269_v6 = vrot.slane %v634_v30, 1  ;;  %v592_v30 = vunpack.c.l.bf16 %v4156_v23  ;;  %v4166_v23 = vld [vmem:[%s5897_s8 + $0xbc] sm:$0x1] }
  0x63   : > { %4847 = vmatprep.subr.bf16.mxu0 %v6203_v1  ;;  %4982 = vmatmul.mubr.msk.bf16.vlgmr.msra.gmra.mrb[0].mxu1 %vm758_vm0, %v2010_v39  ;;  %v6304_v39 = vcombine.low %v6272_v45, %v6142_v5  ;;  %v602_v9 = vunpack.c.l.bf16 %v4166_v23  ;;  %v1347_v5 = vrot.slane %v595_v3, 1  ;;  %v4168_v23 = vld [vmem:[%s5897_s8 + $0xc4] sm:$0x1] }
  0x64   : > { %4990 = vmatpush3.bf16.msra.mxu1 %v6188_v20  ;;  %4985 = vmatprep.mubr.msk.bf16.mxu1 %vm758_vm0, %v2011_v57  ;;  %v6280_v47 = vsel %vm953_vm1, %v2269_v6, %v2270_v14  ;;  %v6307_v57 = vld [vmem:[%s5897_s8 + $0xe8] sm:$0xf]  ;;  %v1344_v6 = vrot.slane %v593_v53, 1  ;;  %v1342_v14 = vrot.slane %v592_v30, 1  ;;  %v6367_v30 = vld [vmem:[%s5897_s8 + $0x110] sm:$0xf]  ;;  %v604_v45 = vunpack.c.l.bf16 %v4168_v23 }
  0x65   : > { %4991 = vmatprep.subr.bf16.mxu1 %v6203_v1  ;;  %7073 = vst [vmem:[#allocation11_spill] sm:$0xff] %v6280_v47  ;;  %7076 = vst [vmem:[#allocation14_spill] sm:$0xff] %v6307_v57  ;;  %v6326_v61 = vcombine.low %v6307_v57, %v6150_v35  ;;  %v6341_v35 = vld [vmem:[%s5897_s8 + $0xc8] sm:$0xf]  ;;  %v6402_v3 = vld [vmem:[%s7026_s1 + $0xa0] sm:$0xff]  }
  0x66   : > { %4848 = vmatpush3.bf16.msra.mxu0 %v6203_v1  ;;  %7079 = vst [vmem:[#allocation17_spill] sm:$0xff] %v6341_v35  ;;  %v6361_v32 = vcombine.low %v6336_v11, %v6341_v35  ;;  %v6364_v53 = vld [vmem:[%s5897_s8 + $0x108] sm:$0xf]  ;;  %7080 = vst [vmem:[#allocation18_spill] sm:$0xff] %v6367_v30  ;;  %v1343_v8 = vsel %vm953_vm1, %v1341_v62, %v1342_v14  ;;  %v6374_v56 = vsel %vm953_vm1, %v1344_v6, %v1345_v22 }
  0x67   : > { %4849 = vmatprep.subr.bf16.mxu0 %v6224_v28  ;;  %7081 = vst [vmem:[#allocation19_spill] sm:$0xff] %v6374_v56  ;;  %v6390_v62 = vpack.c.bf16 %v6374_v56, %v1343_v8  ;;  %v1357_v22 = vrot.slane %v602_v9, 1  ;;  %v4174_v8 = vld [vmem:[%s5897_s8 + $0xdc] sm:$0x1]  ;;  %v603_v56 = vunpack.c.l.bf16 %v6336_v11  ;;  %v605_v9 = vunpack.c.l.bf16 %v6341_v35 }
  0x68   : > { %4992 = vmatpush3.bf16.msra.mxu1 %v6203_v1  ;;  %v629_v35 = vunpack.c.l.bf16 %v4174_v8 }
  0x69   : > { %4842 = vmatmul.mubr.msk.bf16.gmra.mrb[4].mxu0 %vm758_vm0, %v6069_v25  ;;  %4993 = vmatprep.subr.bf16.mxu1 %v6224_v28  ;;  %v6288_v25 = vld [vmem:[%s5897_s8 + $0xb8] sm:$0xf]  ;;  %v1362_v23 = vrot.slane %v605_v9, 1  ;;  %v4178_v9 = vld [vmem:[%s5897_s8 + $0xec] sm:$0x1] }
  0x6a   : > { %4850 = vmatpush3.bf16.msra.mxu0 %v6224_v28  ;;  %7075 = vst [vmem:[#allocation13_spill] sm:$0xff] %v6288_v25  ;;  %4853 = vmatprep.mubr.msk.bf16.mxu0 %vm758_vm0, %v6260_v18  ;;  %v6322_v60 = vcombine.low %v6145_v7, %v6288_v25  ;;  %v601_v50 = vunpack.c.l.bf16 %v6288_v25  ;;  %v6384_v7 = vcombine.low %v6364_v53, %v6367_v30  ;;  %v4170_v25 = vld [vmem:[%s5897_s8 + $0xcc] sm:$0x1] }
  0x6b   : > { %4851 = vmatprep.subr.bf16.mxu0 %v6257_v44  ;;  %4986 = vmatmul.mubr.msk.bf16.gmra.mrb[4].mxu1 %vm758_vm0, %v2012_v27  ;;  %v4160_v27 = vld [vmem:[%s5897_s8 + $0xa4] sm:$0x1] }
  0x6c   : > { %4994 = vmatpush3.bf16.msra.mxu1 %v6224_v28  ;;  %4997 = vmatprep.mubr.msk.bf16.mxu1 %vm758_vm0, %v6269_v31  ;;  %v596_v58 = vunpack.c.l.bf16 %v4160_v27  ;;  %v6380_v27 = vld [vmem:[%s7026_s1 + $0x98] sm:$0xff]   ;;  %v1356_v14 = vrot.slane %v601_v50, 1  ;;  %v628_v50 = vunpack.c.l.bf16 %v6246_v2 }
  0x6d   : > { %4995 = vmatprep.subr.bf16.mxu1 %v6257_v44 }
  0x6e   : > { %4852 = vmatpush3.bf16.msra.mxu0 %v6257_v44  ;;  %v1348_v6 = vrot.slane %v596_v58, 1  ;;  %v4176_v58 = vld [vmem:[%s5897_s8 + $0xe4] sm:$0x1]  ;;  %v6421_v2 = vsel %vm953_vm1, %v1356_v14, %v1357_v22  ;;  %v1360_v22 = vrot.slane %v604_v45, 1 }
  0x6f   : > { %4861 = vmatprep.subr.bf16.mxu0 %v6277_v46  ;;  %7083 = vst [vmem:[#allocation21_spill] sm:$0xff] %v6421_v2  ;;  %v631_v11 = vunpack.c.l.bf16 %v4176_v58  ;;  %v6438_v14 = vpack.c.bf16 %v6421_v2, %v6217_v36  ;;  %v2260_v58 = vrot.slane %v628_v50, 1  ;;  %v6449_v36 = vld [vmem:[%s7026_s1 + $0xb0] sm:$0xff]   ;;  %v4184_v45 = vld [vmem:[%s5897_s8 + $0x104] sm:$0x1]  ;;  %v638_v50 = vunpack.c.l.bf16 %v6312_v63 }
  0x70   : > { %4996 = vmatpush3.bf16.msra.mxu1 %v6257_v44  ;;  %v6415_v40 = vsel %vm953_vm1, %v1347_v5, %v1348_v6  ;;  %v6427_v5 = vld [vmem:[%s7026_s1 + $0xa8] sm:$0xff]  }
  0x71   : > { %4854 = vmatmul.mubr.msk.bf16.vlgmr.msra.gmra.mrb[0].mxu0 %vm758_vm0, %v6304_v39  ;;  %5005 = vmatprep.subr.bf16.mxu1 %v6277_v46  ;;  %7082 = vst [vmem:[#allocation20_spill] sm:$0xff] %v6415_v40  ;;  %v6431_v6 = vpack.c.bf16 %v6214_v59, %v6415_v40  ;;  %v2261_v59 = vrot.slane %v629_v35, 1  ;;  %v633_v35 = vunpack.c.l.bf16 %v4178_v9  ;;  %v4188_v9 = vld [vmem:[%s5897_s8 + $0x114] sm:$0x1] }
  0x72   : > { %4862 = vmatpush3.bf16.msra.mxu0 %v6277_v46  ;;  %4857 = vmatprep.mubr.msk.bf16.mxu0 %vm758_vm0, %v6322_v60 }
  0x73   : > { %4863 = vmatprep.subr.bf16.mxu0 %v6318_v51  ;;  %4998 = vmatmul.mubr.msk.bf16.vlgmr.msra.gmra.mrb[0].mxu1 %vm758_vm0, %v6326_v61  ;;  %v2262_v2 = vsel %vm953_vm1, %v2260_v58, %v2261_v59  ;;  %v2275_v58 = vrot.slane %v638_v50, 1  ;;  %v643_v50 = vunpack.c.l.bf16 %v4188_v9  ;;  %v6539_v9 = vld [vmem:[%s7026_s1 + $0xd0] sm:$0xff]  }
  0x74   : > { %5006 = vmatpush3.bf16.msra.mxu1 %v6277_v46  ;;  %5001 = vmatprep.mubr.msk.bf16.mxu1 %vm758_vm0, %v6333_v4  ;;  %v630_v46 = vunpack.c.l.bf16 %v6251_v12 }
  0x75   : > { %5007 = vmatprep.subr.bf16.mxu1 %v6318_v51 }
  0x76   : > { %4864 = vmatpush3.bf16.msra.mxu0 %v6318_v51  ;;  %v2263_v12 = vrot.slane %v630_v46, 1  ;;  %v632_v46 = vunpack.c.l.bf16 %v6307_v57  ;;  %v639_v57 = vunpack.c.l.bf16 %v4184_v45  ;;  %v6497_v45 = vld [vmem:[%s7026_s1 + $0xc0] sm:$0xff]  }
  0x77   : > { %4865 = vmatprep.subr.bf16.mxu0 %v6350_v37 }
  0x78   : > { %5008 = vmatpush3.bf16.msra.mxu1 %v6318_v51  ;;  %v606_v51 = vunpack.c.l.bf16 %v4170_v25  ;;  %v1359_v25 = vrot.slane %v603_v56, 1  ;;  %v2264_v56 = vrot.slane %v631_v11, 1  ;;  %v2276_v59 = vrot.slane %v639_v57, 1 }
  0x79   : > { %4858 = vmatmul.mubr.msk.bf16.gmra.mrb[4].mxu0 %vm758_vm0, %v6361_v32  ;;  %5009 = vmatprep.subr.bf16.mxu1 %v6350_v37 }
  0x7a   : > { %4866 = vmatpush3.bf16.msra.mxu0 %v6350_v37  ;;  %4869 = vmatprep.mubr.msk.bf16.mxu0 %vm758_vm0, %v6269_v31  ;;  %v1363_v8 = vrot.slane %v606_v51, 1  ;;  %v6459_v51 = vsel %vm953_vm1, %v1359_v25, %v1360_v22  ;;  %v6469_v40 = vsel %vm953_vm1, %v2263_v12, %v2264_v56  ;;  %v6475_v25 = vld [vmem:[%s7026_s1 + $0xb8] sm:$0xff]   ;;  %v2266_v22 = vrot.slane %v632_v46, 1  ;;  %v4186_v56 = vld [vmem:[%s5897_s8 + $0x10c] sm:$0x1] }
  0x7b   : > { %4867 = vmatprep.subr.bf16.mxu0 %v6380_v27  ;;  %5002 = vmatmul.mubr.msk.bf16.gmra.mrb[4].mxu1 %vm758_vm0, %v6384_v7  ;;  %7084 = vst [vmem:[#allocation22_spill] sm:$0xff] %v6459_v51  ;;  %7086 = vst [vmem:[#allocation24_spill] sm:$0xff] %v6469_v40  ;;  %v6485_v12 = vpack.c.bf16 %v6469_v40, %v2262_v2  ;;  %v640_v2 = vunpack.c.l.bf16 %v6364_v53  ;;  %v642_v46 = vunpack.c.l.bf16 %v6367_v30  ;;  %v6649_v30 = vld [vmem:[%s7026_s1 + $0x108] sm:$0xff]  }
  0x7c   : > { %5010 = vmatpush3.bf16.msra.mxu1 %v6350_v37  ;;  %5013 = vmatprep.mubr.msk.bf16.mxu1 %vm758_vm0, %v6390_v62  ;;  %v6462_v11 = vsel %vm953_vm1, %v1362_v23, %v1363_v8  ;;  %v2267_v8 = vrot.slane %v633_v35, 1  ;;  %v641_v35 = vunpack.c.l.bf16 %v4186_v56  ;;  %v6512_v40 = vsel %vm953_vm1, %v2275_v58, %v2276_v59  ;;  %7093 = vst [vmem:[#allocation31_spill] sm:$0xff] %v6649_v30 }
  0x7d   : > { %5011 = vmatprep.subr.bf16.mxu1 %v6380_v27  ;;  %7085 = vst [vmem:[#allocation23_spill] sm:$0xff] %v6462_v11  ;;  %v6479_v23 = vpack.c.bf16 %v6462_v11, %v6459_v51  ;;  %7088 = vst [vmem:[#allocation26_spill] sm:$0xff] %v6512_v40  ;;  %v6518_v11 = vld [vmem:[%s7026_s1 + $0xc8] sm:$0xff]   ;;  %v2278_v51 = vrot.slane %v640_v2, 1  ;;  %v6529_v58 = vpack.c.bf16 %v6512_v40, %v6283_v15  ;;  %v2282_v56 = vrot.slane %v643_v50, 1  ;;  %v6619_v15 = vld [vmem:[%s7026_s1 + $0xf8] sm:$0xff]  }
  0x7e   : > { %4868 = vmatpush3.bf16.msra.mxu0 %v6380_v27  ;;  %v6507_v57 = vsel %vm953_vm1, %v2266_v22, %v2267_v8  ;;  %v2281_v8 = vrot.slane %v642_v46, 1  ;;  %v2279_v59 = vrot.slane %v641_v35, 1  ;;  %v6558_v35 = vld [vmem:[%s7026_s1 + $0xd8] sm:$0xff]   ;;  %7092 = vst [vmem:[#allocation30_spill] sm:$0xff] %v6619_v15 }
  0x7f   : > { %4877 = vmatprep.subr.bf16.mxu0 %v6402_v3  ;;  %7087 = vst [vmem:[#allocation25_spill] sm:$0xff] %v6507_v57  ;;  %v6522_v22 = vpack.c.bf16 %v6280_v47, %v6507_v57  ;;  %v4153_v47 = vld [vmem:[%s5897_s8 + $0x88] sm:$0xf] }
  0x80   : > { %5012 = vmatpush3.bf16.msra.mxu1 %v6380_v27  ;;  %v6547_v2 = vsel %vm953_vm1, %v2278_v51, %v2279_v59  ;;  %v6550_v46 = vsel %vm953_vm1, %v2281_v8, %v2282_v56  ;;  %v6575_v51 = vld [vmem:[%s7026_s1 + $0xe0] sm:$0xff]   ;;  %v6588_v8 = vld [vmem:[%s7026_s1 + $0xe8] sm:$0xff]   ;;  %v6602_v56 = vld [vmem:[%s7026_s1 + $0xf0] sm:$0xff]  }
  0x81   : > { %4870 = vmatmul.mubr.msk.bf16.vlgmr.msra.gmra.mrb[0].mxu0 %vm758_vm0, %v6326_v61  ;;  %5021 = vmatprep.subr.bf16.mxu1 %v6402_v3  ;;  %7089 = vst [vmem:[#allocation27_spill] sm:$0xff] %v6547_v2  ;;  %7090 = vst [vmem:[#allocation28_spill] sm:$0xff] %v6550_v46  ;;  %v6562_v50 = vpack.c.bf16 %v6550_v46, %v6547_v2  ;;  %v515_v59 = vld [vmem:[%s5897_s8 + $0x40] sm:$0xf]  ;;  %v6622_v2 = vcombine.low %v6005_v42, %v4153_v47 }
  0x82   : > { %4878 = vmatpush3.bf16.msra.mxu0 %v6402_v3  ;;  %4873 = vmatprep.mubr.msk.bf16.mxu0 %vm758_vm0, %v6333_v4  ;;  %7091 = vst [vmem:[#allocation29_spill] sm:$0xff] %v6588_v8  ;;  %v6610_v46 = vcombine.low %v6020_v52, %v515_v59  ;;  %v516_v52 = vld [vmem:[%s5897_s8 + $0x44] sm:$0x1]  ;;  %v533_v40 = vunpack.c.l.bf16 %v515_v59 }
  0x83   : > { %4879 = vmatprep.subr.bf16.mxu0 %v6427_v5  ;;  %5014 = vmatmul.mubr.msk.bf16.vlgmr.msra.gmra.mrb[0].mxu1 %vm758_vm0, %v6431_v6  ;;  %v6636_v42 = vld [vmem:[%s7026_s1 + $0x100] sm:$0xff]   ;;  %v534_v57 = vunpack.c.l.bf16 %v516_v52  ;;  %v6676_v52 = vld [vmem:[%s7026_s1 + $0x118] sm:$0xff]  }
  0x84   : > { %5022 = vmatpush3.bf16.msra.mxu1 %v6402_v3  ;;  %5017 = vmatprep.mubr.msk.bf16.mxu1 %vm758_vm0, %v6438_v14  ;;  %7094 = vst [vmem:[#allocation32_spill] sm:$0xff] %v6676_v52 }
  0x85   : > { %5023 = vmatprep.subr.bf16.mxu1 %v6427_v5  ;;  %v1715_v59 = vrot.slane %v534_v57, 1 }
  0x86   : > { %4880 = vmatpush3.bf16.msra.mxu0 %v6427_v5 }
  0x87   : > { %4881 = vmatprep.subr.bf16.mxu0 %v6449_v36 }
  0x88   : > { %5024 = vmatpush3.bf16.msra.mxu1 %v6427_v5 }
  0x89   : > { %4874 = vmatmul.mubr.msk.bf16.gmra.mrb[4].mxu0 %vm758_vm0, %v6384_v7  ;;  %5025 = vmatprep.subr.bf16.mxu1 %v6449_v36 }
  0x8a   : > { %4882 = vmatpush3.bf16.msra.mxu0 %v6449_v36  ;;  %4885 = vmatprep.mubr.msk.bf16.mxu0 %vm758_vm0, %v6390_v62 }
  0x8b   : > { %4883 = vmatprep.subr.bf16.mxu0 %v6475_v25  ;;  %5018 = vmatmul.mubr.msk.bf16.gmra.mrb[4].mxu1 %vm758_vm0, %v6479_v23 }
  0x8c   : > { %5026 = vmatpush3.bf16.msra.mxu1 %v6449_v36  ;;  %5029 = vmatprep.mubr.msk.bf16.mxu1 %vm758_vm0, %v6485_v12 }
  0x8d   : > { %5027 = vmatprep.subr.bf16.mxu1 %v6475_v25 }
  0x8e   : > { %4884 = vmatpush3.bf16.msra.mxu0 %v6475_v25 }
  0x8f   : > { %4893 = vmatprep.subr.bf16.mxu0 %v6497_v45 }
  0x90   : > { %5028 = vmatpush3.bf16.msra.mxu1 %v6475_v25 }
  0x91   : > { %4886 = vmatmul.mubr.msk.bf16.vlgmr.msra.gmra.mrb[0].mxu0 %vm758_vm0, %v6431_v6  ;;  %5037 = vmatprep.subr.bf16.mxu1 %v6497_v45 }
  0x92   : > { %4894 = vmatpush3.bf16.msra.mxu0 %v6497_v45  ;;  %4889 = vmatprep.mubr.msk.bf16.mxu0 %vm758_vm0, %v6438_v14 }
  0x93   : > { %4895 = vmatprep.subr.bf16.mxu0 %v6518_v11  ;;  %5030 = vmatmul.mubr.msk.bf16.vlgmr.msra.gmra.mrb[0].mxu1 %vm758_vm0, %v6522_v22 }
  0x94   : > { %5038 = vmatpush3.bf16.msra.mxu1 %v6497_v45  ;;  %5033 = vmatprep.mubr.msk.bf16.mxu1 %vm758_vm0, %v6529_v58 }
  0x95   : > { %5039 = vmatprep.subr.bf16.mxu1 %v6518_v11 }
  0x96   : > { %4896 = vmatpush3.bf16.msra.mxu0 %v6518_v11 }
  0x97   : > { %4897 = vmatprep.subr.bf16.mxu0 %v6539_v9 }
  0x98   : > { %5040 = vmatpush3.bf16.msra.mxu1 %v6518_v11 }
  0x99   : > { %4890 = vmatmul.mubr.msk.bf16.gmra.mrb[4].mxu0 %vm758_vm0, %v6479_v23  ;;  %5041 = vmatprep.subr.bf16.mxu1 %v6539_v9 }
  0x9a   : > { %4898 = vmatpush3.bf16.msra.mxu0 %v6539_v9  ;;  %4901 = vmatprep.mubr.msk.bf16.mxu0 %vm758_vm0, %v6046_v13 }
  0x9b   : > { %4899 = vmatprep.subr.bf16.mxu0 %v6558_v35  ;;  %5034 = vmatmul.mubr.msk.bf16.gmra.mrb[4].mxu1 %vm758_vm0, %v6562_v50 }
  0x9c   : > { %5042 = vmatpush3.bf16.msra.mxu1 %v6539_v9  ;;  %5045 = vmatprep.mubr.msk.bf16.mxu1 %vm758_vm0, %v5916_v48 }
  0x9d   : > { %5043 = vmatprep.subr.bf16.mxu1 %v6558_v35 }
  0x9e   : > { %4900 = vmatpush3.bf16.msra.mxu0 %v6558_v35 }
  0x9f   : > { %4909 = vmatprep.subr.bf16.mxu0 %v6575_v51 }
  0xa0   : > { %5044 = vmatpush3.bf16.msra.mxu1 %v6558_v35 }
  0xa1   : > { %4902 = vmatmul.mubr.msk.bf16.vlgmr.msra.gmra.mrb[0].mxu0 %vm758_vm0, %v5962_v24  ;;  %5053 = vmatprep.subr.bf16.mxu1 %v6575_v51 }
  0xa2   : > { %4910 = vmatpush3.bf16.msra.mxu0 %v6575_v51  ;;  %4905 = vmatprep.mubr.msk.bf16.mxu0 %vm758_vm0, %v6053_v16 }
  0xa3   : > { %4911 = vmatprep.subr.bf16.mxu0 %v6588_v8  ;;  %5046 = vmatmul.mubr.msk.bf16.vlgmr.msra.gmra.mrb[0].mxu1 %vm758_vm0, %v5999_v38 }
  0xa4   : > { %5054 = vmatpush3.bf16.msra.mxu1 %v6575_v51  ;;  %5049 = vmatprep.mubr.msk.bf16.mxu1 %vm758_vm0, %v6057_v17 }
  0xa5   : > { %5055 = vmatprep.subr.bf16.mxu1 %v6588_v8 }
  0xa6   : > { %4912 = vmatpush3.bf16.msra.mxu0 %v6588_v8 }
  0xa7   : > { %4913 = vmatprep.subr.bf16.mxu0 %v6602_v56 }
  0xa8   : > { %5056 = vmatpush3.bf16.msra.mxu1 %v6588_v8  ;;  %v1714_v8 = vrot.slane %v533_v40, 1  ;;  %v6662_v40 = vld [vmem:[%s7026_s1 + $0x110] sm:$0xff]  }
  0xa9   : > { %4906 = vmatmul.mubr.msk.bf16.gmra.mrb[4].mxu0 %vm758_vm0, %v6610_v46  ;;  %5057 = vmatprep.subr.bf16.mxu1 %v6602_v56 }
  0xaa   : > { %4914 = vmatpush3.bf16.msra.mxu0 %v6602_v56  ;;  %4917 = vmatprep.mubr.msk.bf16.mxu0 %vm758_vm0, %v5916_v48  ;;  %v1716_v57 = vsel %vm953_vm1, %v1714_v8, %v1715_v59  ;;  %v4154_v8 = vld [vmem:[%s5897_s8 + $0x8c] sm:$0x1] }
  0xab   : > { %4915 = vmatprep.subr.bf16.mxu0 %v6619_v15  ;;  %5050 = vmatmul.mubr.msk.bf16.gmra.mrb[4].mxu1 %vm758_vm0, %v6622_v2  ;;  %v571_v59 = vunpack.c.l.bf16 %v4154_v8  ;;  %v5725_v8 = vld [vmem:[%s7026_s1 + $0x28] sm:$0xff]  }
  0xac   : > { %5058 = vmatpush3.bf16.msra.mxu1 %v6602_v56  ;;  %5061 = vmatprep.mubr.msk.bf16.mxu1 %vm758_vm0, %v5973_v29 }
  0xad   : > { %5059 = vmatprep.subr.bf16.mxu1 %v6619_v15 }
  0xae   : > { %4916 = vmatpush3.bf16.msra.mxu0 %v6619_v15 }
  0xaf   : > { %4925 = vmatprep.subr.bf16.mxu0 %v6636_v42 }
  0xb0   : > { %5060 = vmatpush3.bf16.msra.mxu1 %v6619_v15  ;;  %v6679_v15 = vpack.c.bf16 %v1716_v57, %v6062_v49  ;;  %v570_v49 = vunpack.c.l.bf16 %v4153_v47  ;;  %v5724_v57 = vld [vmem:[%s7026_s1 + $0x20] sm:$0xff]   ;;  %v2530_v47 = vrot.slane %v571_v59, 1  ;;  %v5726_v59 = vld [vmem:[%s7026_s1 + $0x30] sm:$0xff]  }
  0xb1   : > { %4918 = vmatmul.mubr.msk.bf16.vlgmr.msra.gmra.mrb[0].mxu0 %vm758_vm0, %v5999_v38  ;;  %5069 = vmatprep.subr.bf16.mxu1 %v6636_v42 }
  0xb2   : > { %4926 = vmatpush3.bf16.msra.mxu0 %v6636_v42  ;;  %4921 = vmatprep.mubr.msk.bf16.mxu0 %vm758_vm0, %v6057_v17 }
  0xb3   : > { %4927 = vmatprep.subr.bf16.mxu0 %v6649_v30  ;;  %5062 = vmatmul.mubr.msk.bf16.vlgmr.msra.gmra.mrb[0].mxu1 %vm758_vm0, %v5981_v33 }
  0xb4   : > { %5070 = vmatpush3.bf16.msra.mxu1 %v6636_v42  ;;  %5065 = vmatprep.mubr.msk.bf16.mxu1 %vm758_vm0, %v6066_v21 }
  0xb5   : > { %5071 = vmatprep.subr.bf16.mxu1 %v6649_v30 }
  0xb6   : > { %4928 = vmatpush3.bf16.msra.mxu0 %v6649_v30 }
  0xb7   : > { %4929 = vmatprep.subr.bf16.mxu0 %v6662_v40 }
  0xb8   : > { %5072 = vmatpush3.bf16.msra.mxu1 %v6649_v30  ;;  %v2529_v30 = vrot.slane %v570_v49, 1 }
  0xb9   : > { %4922 = vmatmul.mubr.msk.bf16.gmra.mrb[4].mxu0 %vm758_vm0, %v6622_v2  ;;  %5073 = vmatprep.subr.bf16.mxu1 %v6662_v40 }
  0xba   : > { %4930 = vmatpush3.bf16.msra.mxu0 %v6662_v40  ;;  %4933 = vmatprep.mubr.msk.bf16.mxu0 %vm758_vm0, %v5973_v29  ;;  %v2531_v49 = vsel %vm953_vm1, %v2529_v30, %v2530_v47  ;;  %v5727_v30 = vld [vmem:[%s7026_s1 + $0x38] sm:$0xff]   ;;  %v5730_v47 = vld [vmem:[%s7026_s1 + $0x10] sm:$0xff]  }
  0xbb   : > { %4931 = vmatprep.subr.bf16.mxu0 %v6676_v52  ;;  %5066 = vmatmul.mubr.msk.bf16.gmra.mrb[4].mxu1 %vm758_vm0, %v6679_v15 }
  0xbc   : > { %5074 = vmatpush3.bf16.msra.mxu1 %v6662_v40  ;;  %5077 = vmatprep.mubr.msk.bf16.mxu1 %vm758_vm0, %v6099_v54 }
  0xbd   : > { %5075 = vmatprep.subr.bf16.mxu1 %v6676_v52 }
  0xbe   : > { %4932 = vmatpush3.bf16.msra.mxu0 %v6676_v52 }
  0xbf   : > { %5085 = vmatprep.subr.bf16.mxu0 %v5724_v57 }
  0xc0   : > { %5076 = vmatpush3.bf16.msra.mxu1 %v6676_v52  ;;  %v6717_v52 = vpack.c.bf16 %v2531_v49, %v6243_v0  ;;  %v5728_v0 = vld [vmem:[%s7026_s1] sm:$0xff]  }
  0xc1   : > { %4934 = vmatmul.mubr.msk.bf16.vlgmr.msra.gmra.mrb[0].mxu0 %vm758_vm0, %v5981_v33  ;;  %5229 = vmatprep.subr.bf16.mxu1 %v5724_v57 }
  0xc2   : > { %5086 = vmatpush3.bf16.msra.mxu0 %v5724_v57  ;;  %4937 = vmatprep.mubr.msk.bf16.mxu0 %vm758_vm0, %v6066_v21 }
  0xc3   : > { %5087 = vmatprep.subr.bf16.mxu0 %v5725_v8  ;;  %5078 = vmatmul.mubr.msk.bf16.vlgmr.msra.gmra.mrb[0].mxu1 %vm758_vm0, %v6120_v55 }
  0xc4   : > { %5230 = vmatpush3.bf16.msra.mxu1 %v5724_v57  ;;  %5081 = vmatprep.mubr.msk.bf16.mxu1 %vm758_vm0, %v6180_v19  ;;  %v5729_v57 = vld [vmem:[%s7026_s1 + $0x8] sm:$0xff]  }
  0xc5   : > { %5231 = vmatprep.subr.bf16.mxu1 %v5725_v8 }
  0xc6   : > { %5088 = vmatpush3.bf16.msra.mxu0 %v5725_v8 }
  0xc7   : > { %5089 = vmatprep.subr.bf16.mxu0 %v5726_v59 }
  0xc8   : > { %5232 = vmatpush3.bf16.msra.mxu1 %v5725_v8 }
  0xc9   : > { %4938 = vmatmul.mubr.msk.bf16.gmra.mrb[4].mxu0 %vm758_vm0, %v6679_v15  ;;  %5233 = vmatprep.subr.bf16.mxu1 %v5726_v59 }
  0xca   : > { %5090 = vmatpush3.bf16.msra.mxu0 %v5726_v59  ;;  %5093 = vmatprep.mubr.msk.bf16.mxu0 %vm758_vm0, %v6269_v31 }
  0xcb   : > { %5091 = vmatprep.subr.bf16.mxu0 %v5727_v30  ;;  %5082 = vmatmul.mubr.msk.bf16.gmra.mrb[4].mxu1 %vm758_vm0, %v6717_v52 }
  0xcc   : > { %5234 = vmatpush3.bf16.msra.mxu1 %v5726_v59  ;;  %5237 = vmatprep.mubr.msk.bf16.mxu1 %vm758_vm0, %v6390_v62 }
  0xcd   : > { %5235 = vmatprep.subr.bf16.mxu1 %v5727_v30 }
  0xce   : > { %5092 = vmatpush3.bf16.msra.mxu0 %v5727_v30 }
  0xcf   : > { %5101 = vmatprep.subr.bf16.mxu0 %v5728_v0 }
  0xd0   : > { %5236 = vmatpush3.bf16.msra.mxu1 %v5727_v30 }
  0xd1   : > { %5094 = vmatmul.mubr.msk.bf16.vlgmr.msra.gmra.mrb[8].mxu0 %vm758_vm0, %v6326_v61  ;;  %5245 = vmatprep.subr.bf16.mxu1 %v5728_v0 }
  0xd2   : > { %5102 = vmatpush3.bf16.msra.mxu0 %v5728_v0  ;;  %5097 = vmatprep.mubr.msk.bf16.mxu0 %vm758_vm0, %v6333_v4 }
  0xd3   : > { %5103 = vmatprep.subr.bf16.mxu0 %v5729_v57  ;;  %5238 = vmatmul.mubr.msk.bf16.vlgmr.msra.gmra.mrb[8].mxu1 %vm758_vm0, %v6431_v6 }
  0xd4   : > { %5246 = vmatpush3.bf16.msra.mxu1 %v5728_v0  ;;  %5241 = vmatprep.mubr.msk.bf16.mxu1 %vm758_vm0, %v6438_v14 }
  0xd5   : > { %5247 = vmatprep.subr.bf16.mxu1 %v5729_v57 }
  0xd6   : > { %5104 = vmatpush3.bf16.msra.mxu0 %v5729_v57 }
  0xd7   : > { %5105 = vmatprep.subr.bf16.mxu0 %v5730_v47 }
  0xd8   : > { %5248 = vmatpush3.bf16.msra.mxu1 %v5729_v57 }
  0xd9   : > { %5098 = vmatmul.mubr.msk.bf16.gmra.mrb[12].mxu0 %vm758_vm0, %v6384_v7  ;;  %5249 = vmatprep.subr.bf16.mxu1 %v5730_v47 }
  0xda   : > { %5106 = vmatpush3.bf16.msra.mxu0 %v5730_v47  ;;  %5109 = vmatprep.mubr.msk.bf16.mxu0 %vm758_vm0, %v6260_v18 }
  0xdb   : > { %5107 = vmatprep.subr.bf16.mxu0 %v6039_v10  ;;  %5242 = vmatmul.mubr.msk.bf16.gmra.mrb[12].mxu1 %vm758_vm0, %v6479_v23 }
  0xdc   : > { %5250 = vmatpush3.bf16.msra.mxu1 %v5730_v47  ;;  %5253 = vmatprep.mubr.msk.bf16.mxu1 %vm758_vm0, %v6269_v31  ;;  %v7110_v31 = vld [vmem:[#allocation19_spill] sm:$0xff] }
  0xdd   : > { %5251 = vmatprep.subr.bf16.mxu1 %v6039_v10 }
  0xde   : > { %5108 = vmatpush3.bf16.msra.mxu0 %v6039_v10 }
  0xdf   : > { %5117 = vmatprep.subr.bf16.mxu0 %v6076_v34 }
  0xe0   : > { %5252 = vmatpush3.bf16.msra.mxu1 %v6039_v10  ;;  %v7095_v10 = vld [vmem:[#allocation10_spill] sm:$0xff] }
  0xe1   : > { %5110 = vmatmul.mubr.msk.bf16.vlgmr.msra.gmra.mrb[8].mxu0 %vm758_vm0, %v6304_v39  ;;  %5261 = vmatprep.subr.bf16.mxu1 %v6076_v34 }
  0xe2   : > { %5118 = vmatpush3.bf16.msra.mxu0 %v6076_v34  ;;  %5113 = vmatprep.mubr.msk.bf16.mxu0 %vm758_vm0, %v6322_v60  ;;  %v7112_v60 = vld [vmem:[#allocation30_spill] sm:$0xff] }
  0xe3   : > { %5119 = vmatprep.subr.bf16.mxu0 %v6116_v43  ;;  %5254 = vmatmul.mubr.msk.bf16.vlgmr.msra.gmra.mrb[8].mxu1 %vm758_vm0, %v6326_v61 }
  0xe4   : > { %5262 = vmatpush3.bf16.msra.mxu1 %v6076_v34  ;;  %5257 = vmatprep.mubr.msk.bf16.mxu1 %vm758_vm0, %v6333_v4 }
  0xe5   : > { %5263 = vmatprep.subr.bf16.mxu1 %v6116_v43 }
  0xe6   : > { %5120 = vmatpush3.bf16.msra.mxu0 %v6116_v43 }
  0xe7   : > { %5121 = vmatprep.subr.bf16.mxu0 %v6131_v26 }
  0xe8   : > { %5264 = vmatpush3.bf16.msra.mxu1 %v6116_v43  ;;  %v7104_v43 = vld [vmem:[#allocation4_spill] sm:$0xff] }
  0xe9   : > { %5114 = vmatmul.mubr.msk.bf16.gmra.mrb[12].mxu0 %vm758_vm0, %v6361_v32  ;;  %5265 = vmatprep.subr.bf16.mxu1 %v6131_v26  ;;  %v7113_v32 = vld [vmem:[#allocation21_spill] sm:$0xff] }
  0xea   : > { %5122 = vmatpush3.bf16.msra.mxu0 %v6131_v26  ;;  %5125 = vmatprep.mubr.msk.bf16.mxu0 %vm758_vm0, %v6390_v62 }
  0xeb   : > { %5123 = vmatprep.subr.bf16.mxu0 %v6161_v41  ;;  %5258 = vmatmul.mubr.msk.bf16.gmra.mrb[12].mxu1 %vm758_vm0, %v6384_v7  ;;  %v4171_v7 = vld [vmem:[%s5897_s8 + $0xd0] sm:$0xf] }
  0xec   : > { %5266 = vmatpush3.bf16.msra.mxu1 %v6131_v26  ;;  %5269 = vmatprep.mubr.msk.bf16.mxu1 %vm758_vm0, %v6485_v12  ;;  %v4421_v26 = vcombine.low %v6312_v63, %v6364_v53  ;;  %v4172_v63 = vld [vmem:[%s5897_s8 + $0xd4] sm:$0x1]  ;;  %v607_v61 = vunpack.c.l.bf16 %v4171_v7  ;;  %v7114_v53 = vld [vmem:[#allocation22_spill] sm:$0xff] }
  0xed   : > { %5267 = vmatprep.subr.bf16.mxu1 %v6161_v41  ;;  %v608_v4 = vunpack.c.l.bf16 %v4172_v63  ;;  %v4190_v12 = vld [vmem:[%s5897_s8 + $0x11c] sm:$0x1] }
  0xee   : > { %5124 = vmatpush3.bf16.msra.mxu0 %v6161_v41 }
  0xef   : > { %5133 = vmatprep.subr.bf16.mxu0 %v6188_v20  ;;  %v3233_v62 = vrot.slane %v608_v4, 1 }
  0xf0   : > { %5268 = vmatpush3.bf16.msra.mxu1 %v6161_v41  ;;  %v7106_v41 = vld [vmem:[#allocation29_spill] sm:$0xff] }
  0xf1   : > { %5126 = vmatmul.mubr.msk.bf16.vlgmr.msra.gmra.mrb[8].mxu0 %vm758_vm0, %v6431_v6  ;;  %5277 = vmatprep.subr.bf16.mxu1 %v6188_v20 }
  0xf2   : > { %5134 = vmatpush3.bf16.msra.mxu0 %v6188_v20  ;;  %5129 = vmatprep.mubr.msk.bf16.mxu0 %vm758_vm0, %v6438_v14  ;;  %v7117_v14 = vld [vmem:[#allocation23_spill] sm:$0xff] }
  0xf3   : > { %5135 = vmatprep.subr.bf16.mxu0 %v6203_v1  ;;  %5270 = vmatmul.mubr.msk.bf16.vlgmr.msra.gmra.mrb[8].mxu1 %vm758_vm0, %v6522_v22 }
  0xf4   : > { %5278 = vmatpush3.bf16.msra.mxu1 %v6188_v20  ;;  %5273 = vmatprep.mubr.msk.bf16.mxu1 %vm758_vm0, %v6529_v58  ;;  %v7108_v20 = vld [vmem:[#allocation17_spill] sm:$0xff]  ;;  %v645_v58 = vunpack.c.l.bf16 %v4190_v12 }
  0xf5   : > { %5279 = vmatprep.subr.bf16.mxu1 %v6203_v1 }
  0xf6   : > { %5136 = vmatpush3.bf16.msra.mxu0 %v6203_v1 }
  0xf7   : > { %5137 = vmatprep.subr.bf16.mxu0 %v6224_v28 }
  0xf8   : > { %5280 = vmatpush3.bf16.msra.mxu1 %v6203_v1  ;;  %v4414_v1 = vcombine.low %v7108_v20, %v4171_v7 }
  0xf9   : > { %5130 = vmatmul.mubr.msk.bf16.gmra.mrb[12].mxu0 %vm758_vm0, %v6479_v23  ;;  %5281 = vmatprep.subr.bf16.mxu1 %v6224_v28 }
  0xfa   : > { %5138 = vmatpush3.bf16.msra.mxu0 %v6224_v28  ;;  %5141 = vmatprep.mubr.msk.bf16.mxu0 %vm758_vm0, %v6046_v13  ;;  %v7096_v13 = vld [vmem:[#allocation15_spill] sm:$0xff] }
  0xfb   : > { %5139 = vmatprep.subr.bf16.mxu0 %v6257_v44  ;;  %5274 = vmatmul.mubr.msk.bf16.gmra.mrb[12].mxu1 %vm758_vm0, %v6562_v50  ;;  %v3904_v50 = vrot.slane %v645_v58, 1 }
  0xfc   : > { %5282 = vmatpush3.bf16.msra.mxu1 %v6224_v28  ;;  %5285 = vmatprep.mubr.msk.bf16.mxu1 %vm758_vm0, %v5916_v48  ;;  %v4189_v28 = vld [vmem:[%s5897_s8 + $0x118] sm:$0xf]  ;;  %s4135_s8 = sshll.u32 %s4129_s15, 3 }
  0xfd   : > { %5283 = vmatprep.subr.bf16.mxu1 %v6257_v44  ;;  %v644_v22 = vunpack.c.l.bf16 %v4189_v28  ;;  %p493_p8 = scmp.lt.s32.totalorder %s4135_s8, 15 }
  0xfe   : > { %5140 = vmatpush3.bf16.msra.mxu0 %v6257_v44 }
  0xff   : > { %5149 = vmatprep.subr.bf16.mxu0 %v7095_v10  ;;  %s7131_s8 = smov (!%p493_p8, %s4135_s8), 15 }
 0x100   : > { %5284 = vmatpush3.bf16.msra.mxu1 %v6257_v44  ;;  %v7109_v44 = vld [vmem:[#allocation18_spill] sm:$0xff]  ;;  %s4136_s14 = sshll.u32 %s7131_s8, 2 }
 0x101   : > { %5142 = vmatmul.mubr.msk.bf16.vlgmr.msra.gmra.mrb[8].mxu0 %vm758_vm0, %v5962_v24  ;;  %5293 = vmatprep.subr.bf16.mxu1 %v7095_v10  ;;  %v7098_v24 = vld [vmem:[#allocation7_spill] sm:$0xff]  ;;  %v4422_v18 = vcombine.low %v7109_v44, %v4189_v28  ;;  %s496_s7 = scalar_lea.vmem %s7028_s3, %s4136_s14 }
 0x102   : > { %5150 = vmatpush3.bf16.msra.mxu0 %v7095_v10  ;;  %5145 = vmatprep.mubr.msk.bf16.mxu0 %vm758_vm0, %v6053_v16 }
 0x103   : > { %5151 = vmatprep.subr.bf16.mxu0 %v7096_v13  ;;  %5286 = vmatmul.mubr.msk.bf16.vlgmr.msra.gmra.mrb[8].mxu1 %vm758_vm0, %v5999_v38 }
 0x104   : > { %5294 = vmatpush3.bf16.msra.mxu1 %v7095_v10  ;;  %5289 = vmatprep.mubr.msk.bf16.mxu1 %vm758_vm0, %v6057_v17 }
 0x105   : > { %5295 = vmatprep.subr.bf16.mxu1 %v7096_v13 }
 0x106   : > { %5152 = vmatpush3.bf16.msra.mxu0 %v7096_v13 }
 0x107   : > { %5153 = vmatprep.subr.bf16.mxu0 %v6350_v37 }
 0x108   : > { %5296 = vmatpush3.bf16.msra.mxu1 %v7096_v13 }
 0x109   : > { %5146 = vmatmul.mubr.msk.bf16.gmra.mrb[12].mxu0 %vm758_vm0, %v6610_v46  ;;  %5297 = vmatprep.subr.bf16.mxu1 %v6350_v37  ;;  %v7122_v46 = vld [vmem:[#allocation27_spill] sm:$0xff] }
 0x10a   : > { %5154 = vmatpush3.bf16.msra.mxu0 %v6350_v37  ;;  %5157 = vmatprep.mubr.msk.bf16.mxu0 %vm758_vm0, %v5916_v48  ;;  %v7097_v48 = vld [vmem:[#allocation9_spill] sm:$0xff] }
 0x10b   : > { %5155 = vmatprep.subr.bf16.mxu0 %v6380_v27  ;;  %5290 = vmatmul.mubr.msk.bf16.gmra.mrb[12].mxu1 %vm758_vm0, %v6622_v2 }
 0x10c   : > { %5298 = vmatpush3.bf16.msra.mxu1 %v6350_v37  ;;  %5301 = vmatprep.mubr.msk.bf16.mxu1 %vm758_vm0, %v5973_v29  ;;  %v3232_v37 = vrot.slane %v607_v61, 1 }
 0x10d   : > { %5299 = vmatprep.subr.bf16.mxu1 %v6380_v27 }
 0x10e   : > { %5156 = vmatpush3.bf16.msra.mxu0 %v6380_v27  ;;  %v3234_v6 = vsel %vm953_vm1, %v3232_v37, %v3233_v62 }
 0x10f   : > { %5165 = vmatprep.subr.bf16.mxu0 %v6402_v3 }
 0x110   : > { %5300 = vmatpush3.bf16.msra.mxu1 %v6380_v27  ;;  %v3238_v27 = vpack.c.bf16 %v7114_v53, %v7113_v32 }
 0x111   : > { %5158 = vmatmul.mubr.msk.bf16.vlgmr.msra.gmra.mrb[8].mxu0 %vm758_vm0, %v5999_v38  ;;  %5309 = vmatprep.subr.bf16.mxu1 %v6402_v3  ;;  %v7100_v38 = vld [vmem:[#allocation8_spill] sm:$0xff] }
 0x112   : > { %5166 = vmatpush3.bf16.msra.mxu0 %v6402_v3  ;;  %5161 = vmatprep.mubr.msk.bf16.mxu0 %vm758_vm0, %v6057_v17  ;;  %v7101_v17 = vld [vmem:[#allocation16_spill] sm:$0xff] }
 0x113   : > { %5167 = vmatprep.subr.bf16.mxu0 %v6427_v5  ;;  %5302 = vmatmul.mubr.msk.bf16.vlgmr.msra.gmra.mrb[8].mxu1 %vm758_vm0, %v5981_v33 }
 0x114   : > { %5310 = vmatpush3.bf16.msra.mxu1 %v6402_v3  ;;  %5305 = vmatprep.mubr.msk.bf16.mxu1 %vm758_vm0, %v6066_v21  ;;  %v7115_v3 = vld [vmem:[#allocation31_spill] sm:$0xff] }
 0x115   : > { %5311 = vmatprep.subr.bf16.mxu1 %v6427_v5 }
 0x116   : > { %5168 = vmatpush3.bf16.msra.mxu0 %v6427_v5 }
 0x117   : > { %5169 = vmatprep.subr.bf16.mxu0 %v6449_v36 }
 0x118   : > { %5312 = vmatpush3.bf16.msra.mxu1 %v6427_v5  ;;  %v7116_v5 = vld [vmem:[#allocation6_spill] sm:$0xff] }
 0x119   : > { %5162 = vmatmul.mubr.msk.bf16.gmra.mrb[12].mxu0 %vm758_vm0, %v6622_v2  ;;  %5313 = vmatprep.subr.bf16.mxu1 %v6449_v36  ;;  %v7121_v2 = vld [vmem:[#allocation26_spill] sm:$0xff] }
 0x11a   : > { %5170 = vmatpush3.bf16.msra.mxu0 %v6449_v36  ;;  %5173 = vmatprep.mubr.msk.bf16.mxu0 %vm758_vm0, %v5973_v29  ;;  %v4411_v29 = vcombine.low %v7098_v24, %v7097_v48 }
 0x11b   : > { %5171 = vmatprep.subr.bf16.mxu0 %v6475_v25  ;;  %5306 = vmatmul.mubr.msk.bf16.gmra.mrb[12].mxu1 %vm758_vm0, %v6679_v15 }
 0x11c   : > { %5314 = vmatpush3.bf16.msra.mxu1 %v6449_v36  ;;  %5317 = vmatprep.mubr.msk.bf16.mxu1 %vm758_vm0, %v6099_v54  ;;  %v7103_v54 = vld [vmem:[#allocation3_spill] sm:$0xff]  ;;  %v3239_v36 = vpack.c.bf16 %v3234_v6, %v7117_v14 }
 0x11d   : > { %5315 = vmatprep.subr.bf16.mxu1 %v6475_v25 }
 0x11e   : > { %5172 = vmatpush3.bf16.msra.mxu0 %v6475_v25 }
 0x11f   : > { %5181 = vmatprep.subr.bf16.mxu0 %v6497_v45 }
 0x120   : > { %5316 = vmatpush3.bf16.msra.mxu1 %v6475_v25  ;;  %v7119_v25 = vld [vmem:[#allocation25_spill] sm:$0xff] }
 0x121   : > { %5174 = vmatmul.mubr.msk.bf16.vlgmr.msra.gmra.mrb[8].mxu0 %vm758_vm0, %v5981_v33  ;;  %5325 = vmatprep.subr.bf16.mxu1 %v6497_v45  ;;  %v7099_v33 = vld [vmem:[#allocation14_spill] sm:$0xff] }
 0x122   : > { %5182 = vmatpush3.bf16.msra.mxu0 %v6497_v45  ;;  %5177 = vmatprep.mubr.msk.bf16.mxu0 %vm758_vm0, %v6066_v21  ;;  %v4419_v16 = vcombine.low %v7100_v38, %v7099_v33  ;;  %v7102_v21 = vld [vmem:[#allocation13_spill] sm:$0xff] }
 0x123   : > { %5183 = vmatprep.subr.bf16.mxu0 %v6518_v11  ;;  %5318 = vmatmul.mubr.msk.bf16.vlgmr.msra.gmra.mrb[8].mxu1 %vm758_vm0, %v6120_v55  ;;  %v4413_v34 = vcombine.low %v7102_v21, %v7101_v17  ;;  %v7105_v55 = vcombine.low %v7103_v54, %v7104_v43 }
 0x124   : > { %5326 = vmatpush3.bf16.msra.mxu1 %v6497_v45  ;;  %5321 = vmatprep.mubr.msk.bf16.mxu1 %vm758_vm0, %v6180_v19  ;;  %v7107_v19 = vld [vmem:[#allocation5_spill] sm:$0xff]  ;;  %v7120_v45 = vld [vmem:[#allocation32_spill] sm:$0xff] }
 0x125   : > { %5327 = vmatprep.subr.bf16.mxu1 %v6518_v11 }
 0x126   : > { %5184 = vmatpush3.bf16.msra.mxu0 %v6518_v11 }
 0x127   : > { %5185 = vmatprep.subr.bf16.mxu0 %v6539_v9 }
 0x128   : > { %5328 = vmatpush3.bf16.msra.mxu1 %v6518_v11  ;;  %v7118_v11 = vld [vmem:[#allocation24_spill] sm:$0xff] }
 0x129   : > { %5178 = vmatmul.mubr.msk.bf16.gmra.mrb[12].mxu0 %vm758_vm0, %v6679_v15  ;;  %5329 = vmatprep.subr.bf16.mxu1 %v6539_v9  ;;  %v7111_v15 = vld [vmem:[#allocation20_spill] sm:$0xff]  ;;  %v3907_v23 = vpack.c.bf16 %v7119_v25, %v7118_v11 }
 0x12a   : > { %5186 = vmatpush3.bf16.msra.mxu0 %v6539_v9  ;;  %5189 = vmatprep.mubr.msk.bf16.mxu0 %vm758_vm0, %v4411_v29  ;;  %v3236_v39 = vpack.c.bf16 %v7111_v15, %v7110_v31  ;;  %v4467_v15 = vld [vmem:[%s7027_s2] ss:$0 sm:$0xff] }
 0x12b   : > { %5187 = vmatprep.subr.bf16.mxu0 %v6558_v35  ;;  %5322 = vmatmul.mubr.msk.bf16.gmra.mrb[12].mxu1 %vm758_vm0, %v6717_v52  ;;  %v7126_v52 = vld [vmem:[#allocation28_spill] sm:$0xff] }
 0x12c   : > { %5330 = vmatpush3.bf16.msra.mxu1 %v6539_v9  ;;  %5333 = vmatprep.mubr.msk.bf16.mxu1 %vm758_vm0, %v4419_v16  ;;  %v3903_v9 = vrot.slane %v644_v22, 1 }
 0x12d   : > { %5331 = vmatprep.subr.bf16.mxu1 %v6558_v35 }
 0x12e   : > { %5188 = vmatpush3.bf16.msra.mxu0 %v6558_v35 }
 0x12f   : > { %5197 = vmatprep.subr.bf16.mxu0 %v6575_v51 }
 0x130   : > { %5332 = vmatpush3.bf16.msra.mxu1 %v6558_v35  ;;  %v3909_v35 = vpack.c.bf16 %v7122_v46, %v7121_v2 }
 0x131   : > { %5190 = vmatmul.mubr.msk.bf16.vlgmr.msra.gmra.mrb[8].mxu0 %vm758_vm0, %v7105_v55  ;;  %5341 = vmatprep.subr.bf16.mxu1 %v6575_v51 }
 0x132   : > { %5198 = vmatpush3.bf16.msra.mxu0 %v6575_v51  ;;  %5193 = vmatprep.mubr.msk.bf16.mxu0 %vm758_vm0, %v4413_v34 }
 0x133   : > { %5199 = vmatprep.subr.bf16.mxu0 %v7106_v41  ;;  %5334 = vmatmul.mubr.msk.bf16.vlgmr.msra.gmra.mrb[8].mxu1 %vm758_vm0, %v7107_v19 }
 0x134   : > { %5342 = vmatpush3.bf16.msra.mxu1 %v6575_v51  ;;  %5337 = vmatprep.mubr.msk.bf16.mxu1 %vm758_vm0, %v4421_v26  ;;  %v7123_v51 = vld [vmem:[#allocation12_spill] sm:$0xff] }
 0x135   : > { %5343 = vmatprep.subr.bf16.mxu1 %v7106_v41 }
 0x136   : > { %5200 = vmatpush3.bf16.msra.mxu0 %v7106_v41 }
 0x137   : > { %5201 = vmatprep.subr.bf16.mxu0 %v6602_v56 }
 0x138   : > { %5344 = vmatpush3.bf16.msra.mxu1 %v7106_v41 }
 0x139   : > { %5194 = vmatmul.mubr.msk.bf16.gmra.mrb[12].mxu0 %vm758_vm0, %v4414_v1  ;;  %5345 = vmatprep.subr.bf16.mxu1 %v6602_v56 }
 0x13a   : > { %5202 = vmatpush3.bf16.msra.mxu0 %v6602_v56  ;;  %5205 = vmatprep.mubr.msk.bf16.mxu0 %vm758_vm0, %v4419_v16 }
 0x13b   : > { %5203 = vmatprep.subr.bf16.mxu0 %v7112_v60  ;;  %5338 = vmatmul.mubr.msk.bf16.gmra.mrb[12].mxu1 %vm758_vm0, %v4422_v18 }
 0x13c   : > { %5346 = vmatpush3.bf16.msra.mxu1 %v6602_v56  ;;  %5349 = vmatprep.mubr.msk.bf16.mxu1 %vm758_vm0, %v3236_v39  ;;  %v7124_v56 = vld [vmem:[#allocation11_spill] sm:$0xff] }
 0x13d   : > { %5347 = vmatprep.subr.bf16.mxu1 %v7112_v60 }
 0x13e   : > { %5204 = vmatpush3.bf16.msra.mxu0 %v7112_v60 }
 0x13f   : > { %5213 = vmatprep.subr.bf16.mxu0 %v6636_v42 }
 0x140   : > { %5348 = vmatpush3.bf16.msra.mxu1 %v7112_v60 }
 0x141   : > { %5206 = vmatmul.mubr.msk.bf16.vlgmr.msra.gmra.mrb[8].mxu0 %vm758_vm0, %v7107_v19  ;;  %5357 = vmatprep.subr.bf16.mxu1 %v6636_v42 }
 0x142   : > { %5214 = vmatpush3.bf16.msra.mxu0 %v6636_v42  ;;  %5209 = vmatprep.mubr.msk.bf16.mxu0 %vm758_vm0, %v4421_v26 }
 0x143   : > { %5215 = vmatprep.subr.bf16.mxu0 %v7115_v3  ;;  %5350 = vmatmul.mubr.msk.bf16.vlgmr.msra.gmra.mrb[8].mxu1 %vm758_vm0, %v7116_v5 }
 0x144   : > { %5358 = vmatpush3.bf16.msra.mxu1 %v6636_v42  ;;  %5353 = vmatprep.mubr.msk.bf16.mxu1 %vm758_vm0, %v3238_v27  ;;  %v7125_v42 = vpack.c.bf16 %v7123_v51, %v7124_v56 }
 0x145   : > { %5359 = vmatprep.subr.bf16.mxu1 %v7115_v3 }
 0x146   : > { %5216 = vmatpush3.bf16.msra.mxu0 %v7115_v3 }
 0x147   : > { %5217 = vmatprep.subr.bf16.mxu0 %v6662_v40 }
 0x148   : > { %5360 = vmatpush3.bf16.msra.mxu1 %v7115_v3 }
 0x149   : > { %5210 = vmatmul.mubr.msk.bf16.gmra.mrb[12].mxu0 %vm758_vm0, %v4422_v18  ;;  %5361 = vmatprep.subr.bf16.mxu1 %v6662_v40 }
 0x14a   : > { %5218 = vmatpush3.bf16.msra.mxu0 %v6662_v40  ;;  %5221 = vmatprep.mubr.msk.bf16.mxu0 %vm758_vm0, %v3236_v39 }
 0x14b   : > { %5219 = vmatprep.subr.bf16.mxu0 %v7120_v45  ;;  %5354 = vmatmul.mubr.msk.bf16.gmra.mrb[12].mxu1 %vm758_vm0, %v3239_v36 }
 0x14c   : > { %5362 = vmatpush3.bf16.msra.mxu1 %v6662_v40  ;;  %5365 = vmatprep.mubr.msk.bf16.mxu1 %vm758_vm0, %v3907_v23  ;;  %v3905_v40 = vsel %vm953_vm1, %v3903_v9, %v3904_v50 }
 0x14d   : > { %5363 = vmatprep.subr.bf16.mxu1 %v7120_v45  ;;  %v3910_v8 = vpack.c.bf16 %v3905_v40, %v7126_v52 }
 0x14e   : > { %5220 = vmatpush3.bf16.msra.mxu0 %v7120_v45 }
 0x150   : > { %5364 = vmatpush3.bf16.msra.mxu1 %v7120_v45 }
 0x151   : > { %5222 = vmatmul.mubr.msk.bf16.vlgmr.msra.gmra.mrb[8].mxu0 %vm758_vm0, %v7116_v5 }
 0x152   : > { %5225 = vmatprep.mubr.msk.bf16.mxu0 %vm758_vm0, %v3238_v27 }
 0x153   : > { %5366 = vmatmul.mubr.msk.bf16.vlgmr.msra.gmra.mrb[8].mxu1 %vm758_vm0, %v7125_v42 }
 0x154   : > { %5369 = vmatprep.mubr.msk.bf16.mxu1 %vm758_vm0, %v3909_v35 }
 0x159   : > { %5226 = vmatmul.mubr.msk.bf16.gmra.mrb[12].mxu0 %vm758_vm0, %v3239_v36 }
 0x15b   : > { %5370 = vmatmul.mubr.msk.bf16.gmra.mrb[12].mxu1 %vm758_vm0, %v3910_v8 }
 0x194   : > { %v4935_v49 = vpop.f32.mrb[0].mxu0 }
 0x195   : > { %v1792_v59 = vpop.f32.mrb[1].mxu0 }
 0x196   : > { %v4936_v30 = vpop.f32.mrb[2].mxu0  ;;  %v5079_v0 = vpop.f32.mrb[0].mxu1 }
 0x197   : > { %v1795_v57 = vpop.f32.mrb[3].mxu0  ;;  %v2624_v47 = vmax.f32 %v4935_v49, %v5079_v0  ;;  %v2583_v10 = vpop.f32.mrb[1].mxu1 }
 0x198   : > { %v2622_v13 = vmax.f32 %v1792_v59, %v2583_v10  ;;  %v5080_v48 = vpop.f32.mrb[2].mxu1 }
 0x199   : > { %v2625_v24 = vmax.f32 %v4936_v30, %v5080_v48  ;;  %v2586_v29 = vpop.f32.mrb[3].mxu1 }
 0x19a   : > { %v2623_v33 = vmax.f32 %v1795_v57, %v2586_v29 }
 0x19c   : > { %v4939_v38 = vpop.f32.mrb[4].mxu0 }
 0x19d   : > { %v1808_v16 = vpop.f32.mrb[5].mxu0 }
 0x19e   : > { %v4940_v17 = vpop.f32.mrb[6].mxu0  ;;  %v5083_v21 = vpop.f32.mrb[4].mxu1 }
 0x19f   : > { %v1811_v34 = vpop.f32.mrb[7].mxu0  ;;  %v2628_v54 = vmax.f32 %v4939_v38, %v5083_v21  ;;  %v2599_v43 = vpop.f32.mrb[5].mxu1 }
 0x1a0   : > { %v2626_v55 = vmax.f32 %v1808_v16, %v2599_v43  ;;  %v5084_v26 = vpop.f32.mrb[6].mxu1 }
 0x1a1   : > { %v2629_v7 = vmax.f32 %v4940_v17, %v5084_v26  ;;  %v2602_v41 = vpop.f32.mrb[7].mxu1 }
 0x1a2   : > { %v2627_v19 = vmax.f32 %v1811_v34, %v2602_v41 }
 0x224   : > { %v5223_v20 = vpop.f32.mrb[8].mxu0 }
 0x225   : > { %v3327_v1 = vmax.f32 %v2624_v47, %v5223_v20  ;;  %v3286_v28 = vpop.f32.mrb[9].mxu0 }
 0x226   : > { %v3325_v44 = vmax.f32 %v2622_v13, %v3286_v28  ;;  %v5224_v18 = vpop.f32.mrb[10].mxu0  ;;  %v5367_v31 = vpop.f32.mrb[8].mxu1 }
 0x227   : > { %v3328_v39 = vmax.f32 %v2625_v24, %v5224_v18  ;;  %v3289_v63 = vpop.f32.mrb[11].mxu0  ;;  %v3998_v60 = vmax.f32 %v3327_v1, %v5367_v31  ;;  %v3957_v61 = vpop.f32.mrb[9].mxu1 }
 0x228   : > { %v3326_v4 = vmax.f32 %v2623_v33, %v3289_v63  ;;  %v3996_v37 = vmax.f32 %v3325_v44, %v3957_v61  ;;  %v5368_v32 = vpop.f32.mrb[10].mxu1 }
 0x229   : > { %v4013_v53 = vadd.f32 %v4467_v15, %v3998_v60  ;;  %v3999_v27 = vmax.f32 %v3328_v39, %v5368_v32  ;;  %v3960_v62 = vpop.f32.mrb[11].mxu1 }
 0x22a   : > { %v4011_v3 = vadd.f32 %v4467_v15, %v3996_v37  ;;  %v3997_v5 = vmax.f32 %v3326_v4, %v3960_v62 }
 0x22b   : > { %v4014_v6 = vadd.f32 %v4467_v15, %v3999_v27  ;;  %v4021_v23 = vmax.f32 %v4013_v53, 0.0 }
 0x22c   : > { %v5227_v14 = vpop.f32.mrb[12].mxu0  ;;  %v4012_v36 = vadd.f32 %v4467_v15, %v3997_v5  ;;  %v4019_v58 = vmax.f32 %v4011_v3, 0.0 }
 0x22d   : > { %v3331_v11 = vmax.f32 %v2628_v54, %v5227_v14  ;;  %v3302_v25 = vpop.f32.mrb[13].mxu0  ;;  %v4022_v12 = vmax.f32 %v4014_v6, 0.0 }
 0x22e   : > { %v3329_v45 = vmax.f32 %v2626_v55, %v3302_v25  ;;  %v5228_v22 = vpop.f32.mrb[14].mxu0  ;;  %v4020_v9 = vmax.f32 %v4012_v36, 0.0  ;;  %v5371_v2 = vpop.f32.mrb[12].mxu1 }
 0x22f   : > { %v3332_v46 = vmax.f32 %v2629_v7, %v5228_v22  ;;  %v3305_v35 = vpop.f32.mrb[15].mxu0  ;;  %v4494_v50 = vpack.c.bf16 %v4022_v12, %v4021_v23  ;;  %v4002_v51 = vmax.f32 %v3331_v11, %v5371_v2  ;;  %v3973_v56 = vpop.f32.mrb[13].mxu1 }
 0x230   : > { %v3330_v42 = vmax.f32 %v2627_v19, %v3305_v35  ;;  %v4489_v40 = vpack.c.bf16 %v4020_v9, %v4019_v58  ;;  %v4000_v52 = vmax.f32 %v3329_v45, %v3973_v56  ;;  %v5372_v8 = vpop.f32.mrb[14].mxu1 }
 0x231   : > { %4506 = vst [vmem:[%s496_s7 + $0x8] sm:$0xff] %v4494_v50   ;;  %v4017_v49 = vadd.f32 %v4467_v15, %v4002_v51  ;;  %v4003_v59 = vmax.f32 %v3332_v46, %v5372_v8  ;;  %v3976_v30 = vpop.f32.mrb[15].mxu1 }
 0x232   : > { %4490 = vst [vmem:[%s496_s7] sm:$0xff] %v4489_v40   ;;  %v4015_v0 = vadd.f32 %v4467_v15, %v4000_v52  ;;  %v4001_v57 = vmax.f32 %v3330_v42, %v3976_v30 }
 0x233   : > { %v4018_v47 = vadd.f32 %v4467_v15, %v4003_v59  ;;  %v4025_v13 = vmax.f32 %v4017_v49, 0.0 }
 0x234   : > { %v4016_v10 = vadd.f32 %v4467_v15, %v4001_v57  ;;  %v4023_v24 = vmax.f32 %v4015_v0, 0.0 }
 0x235   : > { %v4026_v48 = vmax.f32 %v4018_v47, 0.0 }
 0x236   : > { %v4024_v29 = vmax.f32 %v4016_v10, 0.0 }
 0x237   : > { %v4504_v33 = vpack.c.bf16 %v4026_v48, %v4025_v13 }
 0x238   : > { %v4499_v38 = vpack.c.bf16 %v4024_v29, %v4023_v24 }
 0x239   : > { %4508 = vst [vmem:[%s496_s7 + $0x18] sm:$0xff] %v4504_v33  }
 0x23a   : > { %4507 = vst [vmem:[%s496_s7 + $0x10] sm:$0xff] %v4499_v38  }
 0x23b PF: > { %p10_p9 = scmp.ge.s32.totalorder %s5792_s16, 4   ;;  %s7127_s12 = smov %s5749_s13 }
 0x23c   : > { %s7128_s13 = smov %s5801_s19  ;;  %s7129_s14 = smov %s5792_s16 }
 0x23d   :  { %12 = sbr.rel (!%p10_p9) target bundleno = 2 (0x2), region = 119 }

// kernel: attention_cnn_forward.7
= control target key start
LH: loop header
LB: loop body
LE: loop exit
PB: predicated region body
PF: predicated region fallthrough
CT: control target
= control target key end

     0   :  { %s2860_s12 = smov 0   ;;  %s3669_s0 = inlined_call_operand.vmem [shape: bf16[2,10,10,128], index: 0, kind: input, shape index: {}]   ;;  %s3670_s1 = inlined_call_operand.vmem [shape: bf16[9,128,256], index: 1, kind: input, shape index: {}]   ;;  %s3671_s2 = inlined_call_operand.vmem [shape: f32[1,256], index: 2, kind: input, shape index: {}]   ;;  %s3672_s3 = inlined_call_operand.vmem [shape: bf16[128,256], index: 3, kind: output, shape index: {}]  }
   0x1 LB: > { %s2866_s13 = sadd.s32 4294967295, %s2837_s12   ;;  %p2147_p0 = scmp.ge.s32.totalorder %s2837_s12, 1  ;;  %s2837_s12 = sphi %s2860_s12, %s13_s12  }
   0x2   : > { %p137_p1 = scmp.lt.s32.totalorder %s2837_s12, 3 }
   0x4   : > { %p138_p2 = pnand %p2147_p0, %p137_p1 }
   0x5   : > { %v2606_v0 = vld [vmem:[%s3670_s1 + $0x84] ss:$8 sps:$4 sm:$0xff] (!%p138_p2)   ;;  %v2839_v2 = vmov (!%p138_p2), 0   ;;  %v2610_v3 = vld [vmem:[%s3670_s1 + $0x80] ss:$8 sps:$4 sm:$0xff] (!%p138_p2)   ;;  %p162_p3 = scmp.lt.s32.totalorder (!%p138_p2), %s2866_s13, 1 }
   0x6   : > { %141 = sbr.rel (%p138_p2) target bundleno = 400 (0x190), region = 32  ;;  %v2608_v1 = vld [vmem:[%s3670_s1 + $0x204] ss:$8 sps:$4 sm:$0xff] (!%p138_p2)   ;;  %536 = vmatprep.mubr.bf16.mxu1 (!%p138_p2), %v2839_v2  ;;  %1231 = vmatprep.mubr.bf16.mxu0 (!%p138_p2), %v2839_v2  ;;  %v2611_v4 = vld [vmem:[%s3670_s1 + $0x200] ss:$8 sps:$4 sm:$0xff] (!%p138_p2)   ;;  %vm387_vm0 = vcmask (!%p138_p2), 1046528  }
   0x7   : > { %504 = vmatprep.subr.bf16.mxu1 (!%p138_p2), %v2606_v0  ;;  %1199 = vmatprep.subr.bf16.mxu0 (!%p138_p2), %v2608_v1  ;;  %v2612_v5 = vld [vmem:[%s3670_s1 + $0x94] ss:$8 sps:$4 sm:$0xff] (!%p138_p2)   ;;  %v2616_v7 = vld [vmem:[%s3670_s1 + $0x90] ss:$8 sps:$4 sm:$0xff] (!%p138_p2)   ;;  %v2618_v9 = vld [vmem:[%s3670_s1 + $0xa4] ss:$8 sps:$4 sm:$0xff] (!%p138_p2)  }
   0x8   : > { %505 = vmatpush1.bf16.msra.mxu1 (!%p138_p2), %v2610_v3  ;;  %1200 = vmatpush1.bf16.msra.mxu0 (!%p138_p2), %v2611_v4  ;;  %v2614_v6 = vld [vmem:[%s3670_s1 + $0x214] ss:$8 sps:$4 sm:$0xff] (!%p138_p2)   ;;  %v2617_v8 = vld [vmem:[%s3670_s1 + $0x210] ss:$8 sps:$4 sm:$0xff] (!%p138_p2)   ;;  %v2620_v10 = vld [vmem:[%s3670_s1 + $0x224] ss:$8 sps:$4 sm:$0xff] (!%p138_p2)  }
   0x9   : > { %506 = vmatprep.subr.bf16.mxu1 (!%p138_p2), %v2612_v5  ;;  %1201 = vmatprep.subr.bf16.mxu0 (!%p138_p2), %v2614_v6  ;;  %v2622_v11 = vld [vmem:[%s3670_s1 + $0xa0] ss:$8 sps:$4 sm:$0xff] (!%p138_p2)   ;;  %v2624_v13 = vld [vmem:[%s3670_s1 + $0xb4] ss:$8 sps:$4 sm:$0xff] (!%p138_p2)   ;;  %v2628_v15 = vld [vmem:[%s3670_s1 + $0xb0] ss:$8 sps:$4 sm:$0xff] (!%p138_p2)  }
   0xa   : > { %v2623_v12 = vld [vmem:[%s3670_s1 + $0x220] ss:$8 sps:$4 sm:$0xff] (!%p138_p2)   ;;  %v2626_v14 = vld [vmem:[%s3670_s1 + $0x234] ss:$8 sps:$4 sm:$0xff] (!%p138_p2)   ;;  %v2629_v16 = vld [vmem:[%s3670_s1 + $0x230] ss:$8 sps:$4 sm:$0xff] (!%p138_p2)  }
   0xb   : > { %v2630_v17 = vld [vmem:[%s3670_s1 + $0xc4] ss:$8 sps:$4 sm:$0xff] (!%p138_p2)   ;;  %v2634_v19 = vld [vmem:[%s3670_s1 + $0xc0] ss:$8 sps:$4 sm:$0xff] (!%p138_p2)   ;;  %v2636_v21 = vld [vmem:[%s3670_s1 + $0xd4] ss:$8 sps:$4 sm:$0xff] (!%p138_p2)  }
   0xc   : > { %507 = vmatpush1.bf16.msra.mxu1 (!%p138_p2), %v2616_v7  ;;  %1202 = vmatpush1.bf16.msra.mxu0 (!%p138_p2), %v2617_v8  ;;  %v2632_v18 = vld [vmem:[%s3670_s1 + $0x244] ss:$8 sps:$4 sm:$0xff] (!%p138_p2)   ;;  %v2635_v20 = vld [vmem:[%s3670_s1 + $0x240] ss:$8 sps:$4 sm:$0xff] (!%p138_p2)   ;;  %v2638_v22 = vld [vmem:[%s3670_s1 + $0x254] ss:$8 sps:$4 sm:$0xff] (!%p138_p2)  }
   0xd   : > { %508 = vmatprep.subr.bf16.mxu1 %v2618_v9  ;;  %1203 = vmatprep.subr.bf16.mxu0 %v2620_v10  ;;  %s163_s17 = scalar_select %p162_p3, %s2866_s13, 1  ;;  %v2640_v23 = vld [vmem:[%s3670_s1 + $0xd0] ss:$8 sps:$4 sm:$0xff]   ;;  %v2642_v25 = vld [vmem:[%s3670_s1 + $0xe4] ss:$8 sps:$4 sm:$0xff]   ;;  %vm730_vm1 = vcmask 1045504  }
   0xe   : > { %v2641_v24 = vld [vmem:[%s3670_s1 + $0x250] ss:$8 sps:$4 sm:$0xff]   ;;  %v2644_v26 = vld [vmem:[%s3670_s1 + $0x264] ss:$8 sps:$4 sm:$0xff]   ;;  %v2646_v29 = vld [vmem:[%s3670_s1 + $0xe0] ss:$8 sps:$4 sm:$0xff]  }
   0xf   : > { %s2596_s26 = smul.u32 80, %s163_s17  ;;  %v2647_v34 = vld [vmem:[%s3670_s1 + $0x260] ss:$8 sps:$4 sm:$0xff]   ;;  %v2648_v35 = vld [vmem:[%s3670_s1 + $0xf4] ss:$8 sps:$4 sm:$0xff]   ;;  %s2149_s16 = sshll.u32 %s2866_s13, 3 }
  0x10   : > { %509 = vmatpush1.bf16.msra.mxu1 %v2622_v11  ;;  %1204 = vmatpush1.bf16.msra.mxu0 %v2623_v12  ;;  %v2650_v43 = vld [vmem:[%s3670_s1 + $0x274] ss:$8 sps:$4 sm:$0xff]   ;;  %v2652_v50 = vld [vmem:[%s3670_s1 + $0xf0] ss:$8 sps:$4 sm:$0xff]   ;;  %v2656_v57 = vld [vmem:[%s3670_s1 + $0x4] ss:$8 sps:$4 sm:$0xff]  }
  0x11   : > { %510 = vmatprep.subr.bf16.mxu1 %v2624_v13  ;;  %1205 = vmatprep.subr.bf16.mxu0 %v2626_v14  ;;  %s2943_s10 = scalar_lea.vmem %s3669_s0, %s2596_s26  ;;  %v2653_v52 = vld [vmem:[%s3670_s1 + $0x270] ss:$8 sps:$4 sm:$0xff]   ;;  %v2659_v58 = vld [vmem:[%s3670_s1 + $0x284] ss:$8 sps:$4 sm:$0xff]   ;;  %v2654_v59 = vld [vmem:[%s3670_s1] ss:$8 sps:$4 sm:$0xff]  }
  0x12   : > { %v2958_v27 = vld [vmem:[%s2943_s10] sm:$0xf]  ;;  %v176_v28 = vld [vmem:[%s2943_s10 + $0x4] sm:$0x1]  ;;  %v2965_v30 = vld [vmem:[%s2943_s10 + $0x8] sm:$0xf] }
  0x13   : > { %v2968_v31 = vld [vmem:[%s2943_s10 + $0xc] sm:$0x1]  ;;  %v195_v32 = vunpack.c.l.bf16 %v2958_v27  ;;  %v196_v33 = vunpack.c.l.bf16 %v176_v28  ;;  %v197_v36 = vunpack.c.l.bf16 %v2965_v30  ;;  %v2980_v42 = vld [vmem:[%s2943_s10 + $0x10] sm:$0xf]  ;;  %v2990_v46 = vld [vmem:[%s2943_s10 + $0x14] sm:$0x1] }
  0x14   : > { %511 = vmatpush1.bf16.msra.mxu1 %v2628_v15  ;;  %1206 = vmatpush1.bf16.msra.mxu0 %v2629_v16  ;;  %v198_v37 = vunpack.c.l.bf16 %v2968_v31  ;;  %v199_v47 = vunpack.c.l.bf16 %v2980_v42  ;;  %v200_v48 = vunpack.c.l.bf16 %v2990_v46  ;;  %v2332_v51 = vcombine.low %v2965_v30, %v2980_v42  ;;  %v3022_v61 = vld [vmem:[%s2943_s10 + $0x18] sm:$0xf]  ;;  %v3025_v62 = vld [vmem:[%s2943_s10 + $0x1c] sm:$0x1]  ;;  %v2657_v1 = vld [vmem:[%s3670_s1 + $0x280] ss:$8 sps:$4 sm:$0xff]  }
  0x15   : > { %512 = vmatprep.subr.bf16.mxu1 %v2630_v17  ;;  %1207 = vmatprep.subr.bf16.mxu0 %v2632_v18  ;;  %v388_v38 = vrot.slane %v195_v32, 1  ;;  %v389_v39 = vrot.slane %v196_v33, 1  ;;  %v731_v40 = vrot.slane %v195_v32, 2  ;;  %v732_v41 = vrot.slane %v196_v33, 2  ;;  %v2662_v5 = vld [vmem:[%s3670_s1 + $0x14] ss:$8 sps:$4 sm:$0xff]  }
  0x16   : > { %v391_v44 = vrot.slane %v197_v36, 1  ;;  %v392_v45 = vrot.slane %v198_v37, 1  ;;  %v394_v55 = vrot.slane %v199_v47, 1  ;;  %v395_v56 = vrot.slane %v200_v48, 1  ;;  %v3036_v6 = vld [vmem:[%s2943_s10 + $0x20] sm:$0xf] }
  0x17   : > { %v2995_v49 = vsel %vm730_vm1, %v731_v40, %v732_v41  ;;  %v390_v53 = vsel %vm387_vm0, %v388_v38, %v389_v39  ;;  %v201_v3 = vunpack.c.l.bf16 %v3022_v61  ;;  %v202_v4 = vunpack.c.l.bf16 %v3025_v62  ;;  %v3039_v7 = vld [vmem:[%s2943_s10 + $0x24] sm:$0x1]  ;;  %v2665_v8 = vld [vmem:[%s3670_s1 + $0x294] ss:$8 sps:$4 sm:$0xff]   ;;  %v2660_v14 = vld [vmem:[%s3670_s1 + $0x10] ss:$8 sps:$4 sm:$0xff]  }
  0x18   : > { %513 = vmatpush1.bf16.msra.mxu1 %v2634_v19  ;;  %1208 = vmatpush1.bf16.msra.mxu0 %v2635_v20  ;;  %v393_v54 = vsel %vm387_vm0, %v391_v44, %v392_v45  ;;  %v396_v60 = vsel %vm387_vm0, %v394_v55, %v395_v56  ;;  %v203_v11 = vunpack.c.l.bf16 %v3036_v6  ;;  %v204_v12 = vunpack.c.l.bf16 %v3039_v7  ;;  %v2663_v15 = vld [vmem:[%s3670_s1 + $0x290] ss:$8 sps:$4 sm:$0xff]   ;;  %v2668_v19 = vld [vmem:[%s3670_s1 + $0x24] ss:$8 sps:$4 sm:$0xff]   ;;  %v2669_v32 = vld [vmem:[%s3670_s1 + $0x2a0] ss:$8 sps:$4 sm:$0xff]  }
  0x19   : > { %514 = vmatprep.subr.bf16.mxu1 %v2636_v21  ;;  %1209 = vmatprep.subr.bf16.mxu0 %v2638_v22  ;;  %v420_v63 = vpack.c.bf16 %v393_v54, %v390_v53  ;;  %v1115_v0 = vpack.c.bf16 %v396_v60, %v393_v54  ;;  %v397_v9 = vrot.slane %v201_v3, 1  ;;  %v398_v10 = vrot.slane %v202_v4, 1  ;;  %v2671_v21 = vld [vmem:[%s3670_s1 + $0x2a4] ss:$8 sps:$4 sm:$0xff]   ;;  %v3071_v22 = vld [vmem:[%s2943_s10 + $0x28] sm:$0xf] }
  0x1a   : > { %v2333_v13 = vcombine.low %v3022_v61, %v3036_v6  ;;  %v400_v16 = vrot.slane %v203_v11, 1  ;;  %v401_v17 = vrot.slane %v204_v12, 1  ;;  %v3089_v33 = vld [vmem:[%s2943_s10 + $0x30] sm:$0xf]  ;;  %v2680_v55 = vld [vmem:[%s3670_s1 + $0x44] ss:$8 sps:$4 sm:$0xff]  }
  0x1b   : > { %v399_v18 = vsel %vm387_vm0, %v397_v9, %v398_v10  ;;  %v207_v40 = vunpack.c.l.bf16 %v3089_v33  ;;  %v2334_v44 = vcombine.low %v3071_v22, %v3089_v33  ;;  %v2672_v45 = vld [vmem:[%s3670_s1 + $0x30] ss:$8 sps:$4 sm:$0xff]   ;;  %v2693_v31 = vld [vmem:[%s3670_s1 + $0x2e0] ss:$8 sps:$4 sm:$0xff]   ;;  %v2701_v46 = vld [vmem:[%s3670_s1 + $0x2f4] ss:$8 sps:$4 sm:$0xff]  }
  0x1c   : > { %515 = vmatpush1.bf16.msra.mxu1 %v2640_v23  ;;  %1210 = vmatpush1.bf16.msra.mxu0 %v2641_v24  ;;  %v402_v20 = vsel %vm387_vm0, %v400_v16, %v401_v17  ;;  %v3074_v23 = vld [vmem:[%s2943_s10 + $0x2c] sm:$0x1]  ;;  %v2666_v24 = vld [vmem:[%s3670_s1 + $0x20] ss:$8 sps:$4 sm:$0xff]   ;;  %v3083_v28 = vpack.c.bf16 %v399_v18, %v396_v60  ;;  %v2675_v53 = vld [vmem:[%s3670_s1 + $0x2b0] ss:$8 sps:$4 sm:$0xff]  }
  0x1d   : > { %516 = vmatprep.subr.bf16.mxu1 %v2642_v25  ;;  %1211 = vmatprep.subr.bf16.mxu0 %v2644_v26  ;;  %v205_v25 = vunpack.c.l.bf16 %v3071_v22  ;;  %v206_v26 = vunpack.c.l.bf16 %v3074_v23  ;;  %v2711_v62 = vld [vmem:[%s3670_s1 + $0x114] ss:$8 sps:$4 sm:$0xff]   ;;  %v2712_v7 = vld [vmem:[%s3670_s1 + $0x310] ss:$8 sps:$4 sm:$0xff]   ;;  %p168_p4 = scmp.lt.s32.totalorder %s2149_s16, 15 }
  0x1e   : > { %v2724_v23 = vld [vmem:[%s3670_s1 + $0x134] ss:$8 sps:$4 sm:$0xff]  }
  0x1f   : > { %v403_v38 = vrot.slane %v205_v25, 1  ;;  %v404_v39 = vrot.slane %v206_v26, 1  ;;  %s3674_s16 = smov (!%p168_p4, %s2149_s16), 15 }
  0x20   : > { %517 = vmatpush1.bf16.msra.mxu1 %v2646_v29  ;;  %1212 = vmatpush1.bf16.msra.mxu0 %v2647_v34  ;;  %v1116_v29 = vpack.c.bf16 %v402_v20, %v399_v18  ;;  %v3092_v34 = vld [vmem:[%s2943_s10 + $0x34] sm:$0x1]  ;;  %s2443_s13 = sshll.u32 %s3674_s16, 3 }
  0x21   : > { %518 = vmatprep.subr.bf16.mxu1 %v2648_v35  ;;  %1213 = vmatprep.subr.bf16.mxu0 %v2650_v43  ;;  %v2674_v35 = vld [vmem:[%s3670_s1 + $0x34] ss:$8 sps:$4 sm:$0xff]   ;;  %v208_v41 = vunpack.c.l.bf16 %v3092_v34  ;;  %v405_v54 = vsel %vm387_vm0, %v403_v38, %v404_v39  ;;  %v2692_v39 = vld [vmem:[%s3670_s1 + $0x64] ss:$8 sps:$4 sm:$0xff]   ;;  %v2725_v34 = vld [vmem:[%s3670_s1 + $0x330] ss:$8 sps:$4 sm:$0xff]   ;;  %s3642_s21 = scalar_lea.vmem %s3672_s3, %s2443_s13 }
  0x22   : > { %v2677_v43 = vld [vmem:[%s3670_s1 + $0x2b4] ss:$8 sps:$4 sm:$0xff]  }
  0x24   : > { %519 = vmatpush1.bf16.msra.mxu1 %v2652_v50  ;;  %1214 = vmatpush1.bf16.msra.mxu0 %v2653_v52  ;;  %v406_v50 = vrot.slane %v207_v40, 1  ;;  %v407_v52 = vrot.slane %v208_v41, 1 }
  0x25   : > { %657 = vmatprep.subr.bf16.mxu1 %v2656_v57  ;;  %1376 = vmatprep.subr.bf16.mxu0 %v2659_v58  ;;  %v3125_v57 = vld [vmem:[%s2943_s10 + $0x38] sm:$0xf]  ;;  %v3128_v58 = vld [vmem:[%s2943_s10 + $0x3c] sm:$0x1] }
  0x26   : > { %v408_v56 = vsel %vm387_vm0, %v406_v50, %v407_v52  ;;  %v209_v60 = vunpack.c.l.bf16 %v3125_v57  ;;  %v735_v50 = vrot.slane %v198_v37, 2  ;;  %v737_v52 = vrot.slane %v199_v47, 2  ;;  %v2698_v37 = vld [vmem:[%s3670_s1 + $0x74] ss:$8 sps:$4 sm:$0xff]   ;;  %v2696_v47 = vld [vmem:[%s3670_s1 + $0x70] ss:$8 sps:$4 sm:$0xff]  }
  0x27   : > { %537 = vmatmul.mubr.bf16.vlgmr.msra.gmra.mrb[0].mxu1 %v420_v63  ;;  %1232 = vmatmul.mubr.bf16.vlgmr.msra.gmra.mrb[0].mxu0 %v1115_v0  ;;  %v210_v63 = vunpack.c.l.bf16 %v3128_v58  ;;  %v3138_v0 = vld [vmem:[%s2943_s10 + $0x40] sm:$0xf]  ;;  %v1117_v9 = vpack.c.bf16 %v408_v56, %v405_v54  ;;  %v2737_v58 = vld [vmem:[%s3670_s1 + $0x154] ss:$8 sps:$4 sm:$0xff]  }
  0x28   : > { %658 = vmatpush1.bf16.msra.mxu1 %v2654_v59  ;;  %1377 = vmatpush1.bf16.msra.mxu0 %v2657_v1  ;;  %v2683_v59 = vld [vmem:[%s3670_s1 + $0x2c4] ss:$8 sps:$4 sm:$0xff]   ;;  %v211_v10 = vunpack.c.l.bf16 %v3138_v0  ;;  %v409_v16 = vrot.slane %v209_v60, 1  ;;  %v2335_v18 = vcombine.low %v3125_v57, %v3138_v0 }
  0x29   : > { %659 = vmatprep.subr.bf16.mxu1 %v2662_v5  ;;  %1378 = vmatprep.subr.bf16.mxu0 %v2665_v8  ;;  %v3141_v1 = vld [vmem:[%s2943_s10 + $0x44] sm:$0x1]  ;;  %v3143_v5 = vpack.c.bf16 %v405_v54, %v402_v20  ;;  %v2678_v8 = vld [vmem:[%s3670_s1 + $0x40] ss:$8 sps:$4 sm:$0xff]   ;;  %v410_v17 = vrot.slane %v210_v63, 1 }
  0x2a   : > { %546 = vmatprep.mubr.bf16.mxu1 %v2839_v2  ;;  %1241 = vmatprep.mubr.bf16.mxu0 %v2839_v2  ;;  %v2689_v20 = vld [vmem:[%s3670_s1 + $0x2d4] ss:$8 sps:$4 sm:$0xff]  }
  0x2c   : > { %660 = vmatpush1.bf16.msra.mxu1 %v2660_v14  ;;  %1379 = vmatpush1.bf16.msra.mxu0 %v2663_v15  ;;  %v212_v14 = vunpack.c.l.bf16 %v3141_v1  ;;  %v2681_v15 = vld [vmem:[%s3670_s1 + $0x2c0] ss:$8 sps:$4 sm:$0xff]   ;;  %v2738_v1 = vld [vmem:[%s3670_s1 + $0x350] ss:$8 sps:$4 sm:$0xff]  }
  0x2d   : > { %661 = vmatprep.subr.bf16.mxu1 %v2668_v19  ;;  %1380 = vmatprep.subr.bf16.mxu0 %v2671_v21  ;;  %v2686_v19 = vld [vmem:[%s3670_s1 + $0x54] ss:$8 sps:$4 sm:$0xff]   ;;  %v1111_v21 = vrot.slane %v211_v10, 1 }
  0x2f   : > { %547 = vmatmul.mubr.bf16.gmra.mrb[4].mxu1 %v3083_v28  ;;  %1242 = vmatmul.mubr.bf16.gmra.mrb[4].mxu0 %v1116_v29  ;;  %v2684_v29 = vld [vmem:[%s3670_s1 + $0x50] ss:$8 sps:$4 sm:$0xff]  }
  0x30   : > { %662 = vmatpush1.bf16.msra.mxu1 %v2666_v24  ;;  %1381 = vmatpush1.bf16.msra.mxu0 %v2669_v32  ;;  %v1112_v24 = vrot.slane %v212_v14, 1  ;;  %v2687_v32 = vld [vmem:[%s3670_s1 + $0x2d0] ss:$8 sps:$4 sm:$0xff]  }
  0x31   : > { %663 = vmatprep.subr.bf16.mxu1 %v2674_v35  ;;  %1382 = vmatprep.subr.bf16.mxu0 %v2677_v43  ;;  %v411_v35 = vsel %vm387_vm0, %v409_v16, %v410_v17  ;;  %v2695_v43 = vld [vmem:[%s3670_s1 + $0x2e4] ss:$8 sps:$4 sm:$0xff]   ;;  %v740_v17 = vrot.slane %v201_v3, 2  ;;  %v2714_v3 = vld [vmem:[%s3670_s1 + $0x314] ss:$8 sps:$4 sm:$0xff]  }
  0x32   : > { %556 = vmatprep.mubr.bf16.mxu1 %v2839_v2  ;;  %1251 = vmatprep.mubr.bf16.mxu0 %v2839_v2  ;;  %v3178_v38 = vsel %vm387_vm0, %v1111_v21, %v1112_v24  ;;  %v2703_v21 = vld [vmem:[%s3670_s1 + $0x100] ss:$8 sps:$4 sm:$0xff]   ;;  %v744_v24 = vrot.slane %v204_v12, 2 }
  0x33   : > { %v1118_v54 = vpack.c.bf16 %v3178_v38, %v411_v35 }
  0x34   : > { %664 = vmatpush1.bf16.msra.mxu1 %v2672_v45  ;;  %1383 = vmatpush1.bf16.msra.mxu0 %v2675_v53  ;;  %v734_v45 = vrot.slane %v197_v36, 2  ;;  %v3194_v53 = vpack.c.bf16 %v411_v35, %v408_v56  ;;  %v2690_v36 = vld [vmem:[%s3670_s1 + $0x60] ss:$8 sps:$4 sm:$0xff]   ;;  %v3278_v35 = vcombine.low %v2980_v42, %v3022_v61  ;;  %v2816_v42 = vld [vmem:[%s3670_s1 + $0x434] ss:$8 sps:$4 sm:$0xff]  }
  0x35   : > { %665 = vmatprep.subr.bf16.mxu1 %v2680_v55  ;;  %1384 = vmatprep.subr.bf16.mxu0 %v2683_v59  ;;  %v738_v55 = vrot.slane %v200_v48, 2  ;;  %v2699_v48 = vld [vmem:[%s3670_s1 + $0x2f0] ss:$8 sps:$4 sm:$0xff]  }
  0x36   : > { %v3219_v56 = vsel %vm730_vm1, %v734_v45, %v735_v50  ;;  %v747_v45 = vrot.slane %v206_v26, 2  ;;  %v749_v50 = vrot.slane %v207_v40, 2  ;;  %v2722_v26 = vld [vmem:[%s3670_s1 + $0x130] ss:$8 sps:$4 sm:$0xff]  }
  0x37   : > { %557 = vmatmul.mubr.bf16.gmra.mrb[8].mxu1 %v3143_v5  ;;  %1252 = vmatmul.mubr.bf16.gmra.mrb[8].mxu0 %v1117_v9  ;;  %v3222_v59 = vsel %vm730_vm1, %v737_v52, %v738_v55  ;;  %v2708_v9 = vld [vmem:[%s3670_s1 + $0x304] ss:$8 sps:$4 sm:$0xff]   ;;  %v2716_v52 = vld [vmem:[%s3670_s1 + $0x120] ss:$8 sps:$4 sm:$0xff]   ;;  %v750_v55 = vrot.slane %v208_v41, 2 }
  0x38   : > { %666 = vmatpush1.bf16.msra.mxu1 %v2678_v8  ;;  %1385 = vmatpush1.bf16.msra.mxu0 %v2681_v15  ;;  %v2705_v8 = vld [vmem:[%s3670_s1 + $0x104] ss:$8 sps:$4 sm:$0xff]   ;;  %v2280_v15 = vcombine.low %v2958_v27, %v2965_v30  ;;  %v1292_v16 = vpack.c.bf16 %v3222_v59, %v3219_v56  ;;  %v2706_v27 = vld [vmem:[%s3670_s1 + $0x300] ss:$8 sps:$4 sm:$0xff]  }
  0x39   : > { %667 = vmatprep.subr.bf16.mxu1 %v2686_v19  ;;  %1386 = vmatprep.subr.bf16.mxu0 %v2689_v20  ;;  %v741_v19 = vrot.slane %v202_v4, 2  ;;  %v743_v20 = vrot.slane %v203_v11, 2  ;;  %v2709_v4 = vld [vmem:[%s3670_s1 + $0x110] ss:$8 sps:$4 sm:$0xff]   ;;  %v3313_v41 = vsel %vm730_vm1, %v749_v50, %v750_v55  ;;  %v2762_v50 = vld [vmem:[%s3670_s1 + $0x194] ss:$8 sps:$4 sm:$0xff]  }
  0x3a   : > { %566 = vmatprep.mubr.bf16.mxu1 %v2839_v2  ;;  %1261 = vmatprep.mubr.bf16.mxu0 %v2839_v2  ;;  %v2811_v30 = vld [vmem:[%s3670_s1 + $0x420] ss:$8 sps:$4 sm:$0xff]  }
  0x3b   : > { %v3263_v11 = vsel %vm730_vm1, %v740_v17, %v741_v19  ;;  %v3266_v12 = vsel %vm730_vm1, %v743_v20, %v744_v24  ;;  %v2744_v17 = vld [vmem:[%s3670_s1 + $0x164] ss:$8 sps:$4 sm:$0xff]   ;;  %v3372_v20 = vcombine.low %v3089_v33, %v3125_v57  ;;  %v2745_v24 = vld [vmem:[%s3670_s1 + $0x360] ss:$8 sps:$4 sm:$0xff]  }
  0x3c   : > { %668 = vmatpush1.bf16.msra.mxu1 %v2684_v29  ;;  %1387 = vmatpush1.bf16.msra.mxu0 %v2687_v32  ;;  %v2718_v29 = vld [vmem:[%s3670_s1 + $0x124] ss:$8 sps:$4 sm:$0xff]   ;;  %v3434_v55 = vpack.c.bf16 %v3263_v11, %v3222_v59  ;;  %v2777_v59 = vld [vmem:[%s3670_s1 + $0x3b4] ss:$8 sps:$4 sm:$0xff]   ;;  %v2825_v33 = vld [vmem:[%s3670_s1 + $0x460] ss:$8 sps:$4 sm:$0xff]  }
  0x3d   : > { %669 = vmatprep.subr.bf16.mxu1 %v2692_v39  ;;  %1388 = vmatprep.subr.bf16.mxu0 %v2695_v43  ;;  %v2721_v32 = vld [vmem:[%s3670_s1 + $0x324] ss:$8 sps:$4 sm:$0xff]   ;;  %v1293_v39 = vpack.c.bf16 %v3266_v12, %v3263_v11  ;;  %v746_v43 = vrot.slane %v205_v25, 2  ;;  %v2727_v25 = vld [vmem:[%s3670_s1 + $0x334] ss:$8 sps:$4 sm:$0xff]  }
  0x3e   : > { %v2747_v19 = vld [vmem:[%s3670_s1 + $0x364] ss:$8 sps:$4 sm:$0xff]   ;;  %v2772_v11 = vld [vmem:[%s3670_s1 + $0x1b0] ss:$8 sps:$4 sm:$0xff]  }
  0x3f   : > { %567 = vmatmul.mubr.bf16.gmra.mrb[12].mxu1 %v3194_v53  ;;  %1262 = vmatmul.mubr.bf16.gmra.mrb[12].mxu0 %v1118_v54  ;;  %v2719_v54 = vld [vmem:[%s3670_s1 + $0x320] ss:$8 sps:$4 sm:$0xff]   ;;  %v3310_v40 = vsel %vm730_vm1, %v746_v43, %v747_v45 }
  0x40   : > { %670 = vmatpush1.bf16.msra.mxu1 %v2690_v36  ;;  %1389 = vmatpush1.bf16.msra.mxu0 %v2693_v31  ;;  %v2731_v36 = vld [vmem:[%s3670_s1 + $0x144] ss:$8 sps:$4 sm:$0xff]   ;;  %v2754_v43 = vld [vmem:[%s3670_s1 + $0x180] ss:$8 sps:$4 sm:$0xff]  }
  0x41   : > { %671 = vmatprep.subr.bf16.mxu1 %v2698_v37  ;;  %1390 = vmatprep.subr.bf16.mxu0 %v2701_v46  ;;  %v2734_v31 = vld [vmem:[%s3670_s1 + $0x344] ss:$8 sps:$4 sm:$0xff]   ;;  %v3325_v37 = vcombine.low %v3036_v6, %v3071_v22  ;;  %v1294_v46 = vpack.c.bf16 %v3313_v41, %v3310_v40  ;;  %v2757_v45 = vld [vmem:[%s3670_s1 + $0x380] ss:$8 sps:$4 sm:$0xff]  }
  0x42   : > { %689 = vmatprep.mubr.bf16.mxu1 %v2839_v2  ;;  %1408 = vmatprep.mubr.bf16.mxu0 %v2839_v2  ;;  %v2818_v6 = vld [vmem:[%s3670_s1 + $0x440] ss:$8 sps:$4 sm:$0xff]  }
  0x44   : > { %672 = vmatpush1.bf16.msra.mxu1 %v2696_v47  ;;  %1391 = vmatpush1.bf16.msra.mxu0 %v2699_v48  ;;  %v752_v47 = vrot.slane %v209_v60, 2  ;;  %v753_v48 = vrot.slane %v210_v63, 2  ;;  %v2740_v60 = vld [vmem:[%s3670_s1 + $0x354] ss:$8 sps:$4 sm:$0xff]   ;;  %v2735_v63 = vld [vmem:[%s3670_s1 + $0x150] ss:$8 sps:$4 sm:$0xff]  }
  0x45   : > { %847 = vmatprep.subr.bf16.mxu1 %v2705_v8  ;;  %1546 = vmatprep.subr.bf16.mxu0 %v2708_v9  ;;  %v1288_v8 = vrot.slane %v211_v10, 2  ;;  %v2729_v9 = vld [vmem:[%s3670_s1 + $0x140] ss:$8 sps:$4 sm:$0xff]  }
  0x46   : > { %v3357_v10 = vsel %vm730_vm1, %v752_v47, %v753_v48  ;;  %v2781_v47 = vld [vmem:[%s3670_s1 + $0x3c0] ss:$8 sps:$4 sm:$0xff]   ;;  %v2786_v48 = vld [vmem:[%s3670_s1 + $0x1d4] ss:$8 sps:$4 sm:$0xff]  }
  0x47   : > { %690 = vmatmul.mubr.bf16.vlgmr.msra.gmra.mrb[0].mxu1 %v2280_v15  ;;  %1409 = vmatmul.mubr.bf16.vlgmr.msra.gmra.mrb[0].mxu0 %v1292_v16  ;;  %v2732_v15 = vld [vmem:[%s3670_s1 + $0x340] ss:$8 sps:$4 sm:$0xff]   ;;  %v1289_v16 = vrot.slane %v212_v14, 2 }
  0x48   : > { %848 = vmatpush1.bf16.msra.mxu1 %v2703_v21  ;;  %1547 = vmatpush1.bf16.msra.mxu0 %v2706_v27  ;;  %v2742_v27 = vld [vmem:[%s3670_s1 + $0x160] ss:$8 sps:$4 sm:$0xff]  }
  0x49   : > { %849 = vmatprep.subr.bf16.mxu1 %v2711_v62  ;;  %1548 = vmatprep.subr.bf16.mxu0 %v2714_v3  ;;  %v3360_v14 = vsel %vm730_vm1, %v1288_v8, %v1289_v16  ;;  %v2750_v62 = vld [vmem:[%s3670_s1 + $0x174] ss:$8 sps:$4 sm:$0xff]   ;;  %v2787_v8 = vld [vmem:[%s3670_s1 + $0x3d0] ss:$8 sps:$4 sm:$0xff]   ;;  %v2796_v16 = vld [vmem:[%s3670_s1 + $0x3e4] ss:$8 sps:$4 sm:$0xff]  }
  0x4a   : > { %699 = vmatprep.mubr.bf16.mxu1 %v2839_v2  ;;  %1418 = vmatprep.mubr.bf16.mxu0 %v2839_v2  ;;  %v1295_v21 = vpack.c.bf16 %v3360_v14, %v3357_v10  ;;  %v2753_v3 = vld [vmem:[%s3670_s1 + $0x374] ss:$8 sps:$4 sm:$0xff]  }
  0x4c   : > { %850 = vmatpush1.bf16.msra.mxu1 %v2709_v4  ;;  %1549 = vmatpush1.bf16.msra.mxu0 %v2712_v7  ;;  %v2748_v4 = vld [vmem:[%s3670_s1 + $0x170] ss:$8 sps:$4 sm:$0xff]  }
  0x4d   : > { %851 = vmatprep.subr.bf16.mxu1 %v2718_v29  ;;  %1550 = vmatprep.subr.bf16.mxu0 %v2721_v32  ;;  %v2751_v7 = vld [vmem:[%s3670_s1 + $0x370] ss:$8 sps:$4 sm:$0xff]   ;;  %v2756_v29 = vld [vmem:[%s3670_s1 + $0x184] ss:$8 sps:$4 sm:$0xff]  }
  0x4e   : > { %v2759_v32 = vld [vmem:[%s3670_s1 + $0x384] ss:$8 sps:$4 sm:$0xff]  }
  0x4f   : > { %700 = vmatmul.mubr.bf16.gmra.mrb[4].mxu1 %v3278_v35  ;;  %1419 = vmatmul.mubr.bf16.gmra.mrb[4].mxu0 %v1293_v39  ;;  %v763_v39 = vpack.c.bf16 %v3219_v56, %v2995_v49  ;;  %v2765_v49 = vld [vmem:[%s3670_s1 + $0x394] ss:$8 sps:$4 sm:$0xff]   ;;  %v2760_v56 = vld [vmem:[%s3670_s1 + $0x190] ss:$8 sps:$4 sm:$0xff]  }
  0x50   : > { %852 = vmatpush1.bf16.msra.mxu1 %v2716_v52  ;;  %1551 = vmatpush1.bf16.msra.mxu0 %v2719_v54  ;;  %v2763_v52 = vld [vmem:[%s3670_s1 + $0x390] ss:$8 sps:$4 sm:$0xff]   ;;  %v2768_v54 = vld [vmem:[%s3670_s1 + $0x1a4] ss:$8 sps:$4 sm:$0xff]  }
  0x51   : > { %853 = vmatprep.subr.bf16.mxu1 %v2724_v23  ;;  %1552 = vmatprep.subr.bf16.mxu0 %v2727_v25  ;;  %v2766_v23 = vld [vmem:[%s3670_s1 + $0x1a0] ss:$8 sps:$4 sm:$0xff]  }
  0x52   : > { %709 = vmatprep.mubr.bf16.mxu1 %v2839_v2  ;;  %1428 = vmatprep.mubr.bf16.mxu0 %v2839_v2  ;;  %v2769_v25 = vld [vmem:[%s3670_s1 + $0x3a0] ss:$8 sps:$4 sm:$0xff]  }
  0x54   : > { %854 = vmatpush1.bf16.msra.mxu1 %v2722_v26  ;;  %1553 = vmatpush1.bf16.msra.mxu0 %v2725_v34  ;;  %v2774_v26 = vld [vmem:[%s3670_s1 + $0x1b4] ss:$8 sps:$4 sm:$0xff]   ;;  %v2775_v34 = vld [vmem:[%s3670_s1 + $0x3b0] ss:$8 sps:$4 sm:$0xff]  }
  0x55   : > { %855 = vmatprep.subr.bf16.mxu1 %v2731_v36  ;;  %1554 = vmatprep.subr.bf16.mxu0 %v2734_v31  ;;  %v2780_v36 = vld [vmem:[%s3670_s1 + $0x1c4] ss:$8 sps:$4 sm:$0xff]  }
  0x56   : > { %v2783_v31 = vld [vmem:[%s3670_s1 + $0x3c4] ss:$8 sps:$4 sm:$0xff]  }
  0x57   : > { %710 = vmatmul.mubr.bf16.gmra.mrb[8].mxu1 %v3325_v37  ;;  %1429 = vmatmul.mubr.bf16.gmra.mrb[8].mxu0 %v1294_v46  ;;  %v2778_v46 = vld [vmem:[%s3670_s1 + $0x1c0] ss:$8 sps:$4 sm:$0xff]  }
  0x58   : > { %856 = vmatpush1.bf16.msra.mxu1 %v2729_v9  ;;  %1555 = vmatpush1.bf16.msra.mxu0 %v2732_v15  ;;  %v3489_v9 = vld [vmem:[%s2943_s10 + $0x48] sm:$0xf]  ;;  %v2792_v15 = vld [vmem:[%s3670_s1 + $0x1e4] ss:$8 sps:$4 sm:$0xff]  }
  0x59   : > { %857 = vmatprep.subr.bf16.mxu1 %v2737_v58  ;;  %1556 = vmatprep.subr.bf16.mxu0 %v2740_v60  ;;  %v3501_v58 = vpack.c.bf16 %v3357_v10, %v3313_v41  ;;  %v2384_v60 = vcombine.low %v3138_v0, %v3489_v9  ;;  %v2799_v41 = vld [vmem:[%s3670_s1 + $0x1f4] ss:$8 sps:$4 sm:$0xff]  }
  0x5a   : > { %719 = vmatprep.mubr.bf16.mxu1 %v2839_v2  ;;  %1438 = vmatprep.mubr.bf16.mxu0 %v2839_v2  ;;  %v2802_v10 = vld [vmem:[%s3670_s1 + $0x3f4] ss:$8 sps:$4 sm:$0xff]  }
  0x5c   : > { %858 = vmatpush1.bf16.msra.mxu1 %v2735_v63  ;;  %1557 = vmatpush1.bf16.msra.mxu0 %v2738_v1  ;;  %v2790_v63 = vld [vmem:[%s3670_s1 + $0x1e0] ss:$8 sps:$4 sm:$0xff]  }
  0x5d   : > { %859 = vmatprep.subr.bf16.mxu1 %v2744_v17  ;;  %1558 = vmatprep.subr.bf16.mxu0 %v2747_v19  ;;  %v2794_v1 = vld [vmem:[%s3670_s1 + $0x3e0] ss:$8 sps:$4 sm:$0xff]   ;;  %v2797_v17 = vld [vmem:[%s3670_s1 + $0x1f0] ss:$8 sps:$4 sm:$0xff]  }
  0x5e   : > { %v2800_v19 = vld [vmem:[%s3670_s1 + $0x3f0] ss:$8 sps:$4 sm:$0xff]  }
  0x5f   : > { %720 = vmatmul.mubr.bf16.gmra.mrb[12].mxu1 %v3372_v20  ;;  %1439 = vmatmul.mubr.bf16.gmra.mrb[12].mxu0 %v1295_v21  ;;  %v2804_v21 = vld [vmem:[%s3670_s1 + $0x400] ss:$8 sps:$4 sm:$0xff]  }
  0x60   : > { %860 = vmatpush1.bf16.msra.mxu1 %v2742_v27  ;;  %1559 = vmatpush1.bf16.msra.mxu0 %v2745_v24  ;;  %v2809_v27 = vld [vmem:[%s3670_s1 + $0x414] ss:$8 sps:$4 sm:$0xff]   ;;  %v2807_v24 = vld [vmem:[%s3670_s1 + $0x410] ss:$8 sps:$4 sm:$0xff]  }
  0x61   : > { %861 = vmatprep.subr.bf16.mxu1 %v2750_v62  ;;  %1560 = vmatprep.subr.bf16.mxu0 %v2753_v3  ;;  %v2813_v62 = vld [vmem:[%s3670_s1 + $0x424] ss:$8 sps:$4 sm:$0xff]   ;;  %v2814_v3 = vld [vmem:[%s3670_s1 + $0x430] ss:$8 sps:$4 sm:$0xff]  }
  0x62   : > { %879 = vmatprep.mubr.bf16.mxu1 %v2839_v2  ;;  %1578 = vmatprep.mubr.bf16.mxu0 %v2839_v2 }
  0x64   : > { %862 = vmatpush1.bf16.msra.mxu1 %v2748_v4  ;;  %1561 = vmatpush1.bf16.msra.mxu0 %v2751_v7  ;;  %v2820_v7 = vld [vmem:[%s3670_s1 + $0x444] ss:$8 sps:$4 sm:$0xff]  }
  0x65   : > { %1020 = vmatprep.subr.bf16.mxu1 %v2756_v29  ;;  %1722 = vmatprep.subr.bf16.mxu0 %v2759_v32  ;;  %v2821_v29 = vld [vmem:[%s3670_s1 + $0x450] ss:$8 sps:$4 sm:$0xff]  }
  0x67   : > { %880 = vmatmul.mubr.bf16.vlgmr.msra.gmra.mrb[0].mxu1 %v763_v39  ;;  %1579 = vmatmul.mubr.bf16.vlgmr.msra.gmra.mrb[0].mxu0 %v3278_v35  ;;  %v2771_v35 = vld [vmem:[%s3670_s1 + $0x3a4] ss:$8 sps:$4 sm:$0xff]  }
  0x68   : > { %1021 = vmatpush1.bf16.msra.mxu1 %v2754_v43  ;;  %1723 = vmatpush1.bf16.msra.mxu0 %v2757_v45  ;;  %v2827_v39 = vld [vmem:[%s3670_s1 + $0x464] ss:$8 sps:$4 sm:$0xff]  }
  0x69   : > { %1022 = vmatprep.subr.bf16.mxu1 %v2762_v50  ;;  %1724 = vmatprep.subr.bf16.mxu0 %v2765_v49 }
  0x6a   : > { %889 = vmatprep.mubr.bf16.mxu1 %v2839_v2  ;;  %1588 = vmatprep.mubr.bf16.mxu0 %v2839_v2 }
  0x6c   : > { %1023 = vmatpush1.bf16.msra.mxu1 %v2760_v56  ;;  %1725 = vmatpush1.bf16.msra.mxu0 %v2763_v52 }
  0x6d   : > { %1024 = vmatprep.subr.bf16.mxu1 %v2768_v54  ;;  %1726 = vmatprep.subr.bf16.mxu0 %v2771_v35 }
  0x6f   : > { %890 = vmatmul.mubr.bf16.gmra.mrb[4].mxu1 %v3434_v55  ;;  %1589 = vmatmul.mubr.bf16.gmra.mrb[4].mxu0 %v3325_v37  ;;  %v3466_v37 = vpack.c.bf16 %v3310_v40, %v3266_v12  ;;  %v2789_v12 = vld [vmem:[%s3670_s1 + $0x3d4] ss:$8 sps:$4 sm:$0xff]   ;;  %v2784_v40 = vld [vmem:[%s3670_s1 + $0x1d0] ss:$8 sps:$4 sm:$0xff]  }
  0x70   : > { %1025 = vmatpush1.bf16.msra.mxu1 %v2766_v23  ;;  %1727 = vmatpush1.bf16.msra.mxu0 %v2769_v25 }
  0x71   : > { %1026 = vmatprep.subr.bf16.mxu1 %v2774_v26  ;;  %1728 = vmatprep.subr.bf16.mxu0 %v2777_v59 }
  0x72   : > { %899 = vmatprep.mubr.bf16.mxu1 %v2839_v2  ;;  %1598 = vmatprep.mubr.bf16.mxu0 %v2839_v2 }
  0x74   : > { %1027 = vmatpush1.bf16.msra.mxu1 %v2772_v11  ;;  %1729 = vmatpush1.bf16.msra.mxu0 %v2775_v34 }
  0x75   : > { %1028 = vmatprep.subr.bf16.mxu1 %v2780_v36  ;;  %1730 = vmatprep.subr.bf16.mxu0 %v2783_v31 }
  0x77   : > { %900 = vmatmul.mubr.bf16.gmra.mrb[8].mxu1 %v3466_v37  ;;  %1599 = vmatmul.mubr.bf16.gmra.mrb[8].mxu0 %v3372_v20  ;;  %v2806_v20 = vld [vmem:[%s3670_s1 + $0x404] ss:$8 sps:$4 sm:$0xff]  }
  0x78   : > { %1029 = vmatpush1.bf16.msra.mxu1 %v2778_v46  ;;  %1731 = vmatpush1.bf16.msra.mxu0 %v2781_v47 }
  0x79   : > { %1030 = vmatprep.subr.bf16.mxu1 %v2786_v48  ;;  %1732 = vmatprep.subr.bf16.mxu0 %v2789_v12 }
  0x7a   : > { %909 = vmatprep.mubr.bf16.mxu1 %v2839_v2  ;;  %1608 = vmatprep.mubr.bf16.mxu0 %v2839_v2 }
  0x7c   : > { %1031 = vmatpush1.bf16.msra.mxu1 %v2784_v40  ;;  %1733 = vmatpush1.bf16.msra.mxu0 %v2787_v8 }
  0x7d   : > { %1032 = vmatprep.subr.bf16.mxu1 %v2792_v15  ;;  %1734 = vmatprep.subr.bf16.mxu0 %v2796_v16 }
  0x7f   : > { %910 = vmatmul.mubr.bf16.gmra.mrb[12].mxu1 %v3501_v58  ;;  %1609 = vmatmul.mubr.bf16.gmra.mrb[12].mxu0 %v2384_v60 }
  0x80   : > { %1033 = vmatpush1.bf16.msra.mxu1 %v2790_v63  ;;  %1735 = vmatpush1.bf16.msra.mxu0 %v2794_v1 }
  0x81   : > { %1034 = vmatprep.subr.bf16.mxu1 %v2799_v41  ;;  %1736 = vmatprep.subr.bf16.mxu0 %v2802_v10 }
  0x82   : > { %1052 = vmatprep.mubr.bf16.mxu1 %v2839_v2  ;;  %1754 = vmatprep.mubr.bf16.mxu0 %v2839_v2 }
  0x84   : > { %1035 = vmatpush1.bf16.msra.mxu1 %v2797_v17  ;;  %1737 = vmatpush1.bf16.msra.mxu0 %v2800_v19  ;;  %v1985_v17 = vld [vmem:[%s3671_s2] sm:$0x3] }
  0x85   : > { %1896 = vmatprep.subr.bf16.mxu0 %v2806_v20  ;;  %2452 = vmatprep.subr.bf16.mxu1 %v2806_v20 }
  0x87   : > { %1053 = vmatmul.mubr.bf16.vlgmr.msra.gmra.mrb[0].mxu1 %v2332_v51  ;;  %1755 = vmatmul.mubr.bf16.vlgmr.msra.gmra.mrb[0].mxu0 %v3083_v28  ;;  %v194_v51 = vld [vmem:[%s2943_s10 + $0x4c] sm:$0x1]  ;;  %v213_v28 = vunpack.c.l.bf16 %v3489_v9 }
  0x88   : > { %1897 = vmatpush1.bf16.msra.mxu0 %v2804_v21  ;;  %2460 = vmatpush1.bf16.msra.mxu1 %v2804_v21  ;;  %v214_v4 = vunpack.c.l.bf16 %v194_v51 }
  0x89   : > { %1898 = vmatprep.subr.bf16.mxu0 %v2809_v27  ;;  %2453 = vmatprep.subr.bf16.mxu1 %v2809_v27  ;;  %v1637_v61 = vrot.slane %v213_v28, 1 }
  0x8a   : > { %1062 = vmatprep.mubr.bf16.mxu1 %v2839_v2  ;;  %1764 = vmatprep.mubr.bf16.mxu0 %v2839_v2  ;;  %v1812_v43 = vrot.slane %v214_v4, 2 }
  0x8c   : > { %1899 = vmatpush1.bf16.msra.mxu0 %v2807_v24  ;;  %2461 = vmatpush1.bf16.msra.mxu1 %v2807_v24 }
  0x8d   : > { %1900 = vmatprep.subr.bf16.mxu0 %v2813_v62  ;;  %2454 = vmatprep.subr.bf16.mxu1 %v2813_v62 }
  0x8f   : > { %1063 = vmatmul.mubr.bf16.gmra.mrb[4].mxu1 %v2333_v13  ;;  %1765 = vmatmul.mubr.bf16.gmra.mrb[4].mxu0 %v3143_v5  ;;  %v1638_v13 = vrot.slane %v214_v4, 1  ;;  %v2823_v5 = vld [vmem:[%s3670_s1 + $0x454] ss:$8 sps:$4 sm:$0xff]  }
  0x90   : > { %1901 = vmatpush1.bf16.msra.mxu0 %v2811_v30  ;;  %2462 = vmatpush1.bf16.msra.mxu1 %v2811_v30 }
  0x91   : > { %1902 = vmatprep.subr.bf16.mxu0 %v2816_v42  ;;  %2455 = vmatprep.subr.bf16.mxu1 %v2816_v42  ;;  %v1639_v32 = vsel %vm387_vm0, %v1637_v61, %v1638_v13 }
  0x92   : > { %1072 = vmatprep.mubr.bf16.mxu1 %v2839_v2  ;;  %1774 = vmatprep.mubr.bf16.mxu0 %v2839_v2  ;;  %v1641_v22 = vpack.c.bf16 %v1639_v32, %v3178_v38  ;;  %v2828_v38 = vld [vmem:[%s3670_s1 + $0x470] ss:$8 sps:$4 sm:$0xff]  }
  0x94   : > { %1903 = vmatpush1.bf16.msra.mxu0 %v2814_v3  ;;  %2463 = vmatpush1.bf16.msra.mxu1 %v2814_v3 }
  0x95   : > { %1904 = vmatprep.subr.bf16.mxu0 %v2820_v7  ;;  %2456 = vmatprep.subr.bf16.mxu1 %v2820_v7 }
  0x97   : > { %1073 = vmatmul.mubr.bf16.gmra.mrb[8].mxu1 %v2334_v44  ;;  %1775 = vmatmul.mubr.bf16.gmra.mrb[8].mxu0 %v3194_v53  ;;  %v2830_v44 = vld [vmem:[%s3670_s1 + $0x474] ss:$8 sps:$4 sm:$0xff]   ;;  %v1811_v53 = vrot.slane %v213_v28, 2 }
  0x98   : > { %1905 = vmatpush1.bf16.msra.mxu0 %v2818_v6  ;;  %2464 = vmatpush1.bf16.msra.mxu1 %v2818_v6 }
  0x99   : > { %1906 = vmatprep.subr.bf16.mxu0 %v2823_v5  ;;  %2457 = vmatprep.subr.bf16.mxu1 %v2823_v5  ;;  %v1813_v57 = vsel %vm730_vm1, %v1811_v53, %v1812_v43 }
  0x9a   : > { %1082 = vmatprep.mubr.bf16.mxu1 %v2839_v2  ;;  %1784 = vmatprep.mubr.bf16.mxu0 %v2839_v2  ;;  %v1815_v0 = vpack.c.bf16 %v1813_v57, %v3360_v14 }
  0x9c   : > { %1907 = vmatpush1.bf16.msra.mxu0 %v2821_v29  ;;  %2465 = vmatpush1.bf16.msra.mxu1 %v2821_v29 }
  0x9d   : > { %1908 = vmatprep.subr.bf16.mxu0 %v2827_v39  ;;  %2458 = vmatprep.subr.bf16.mxu1 %v2827_v39 }
  0x9f   : > { %1083 = vmatmul.mubr.bf16.gmra.mrb[12].mxu1 %v2335_v18  ;;  %1785 = vmatmul.mubr.bf16.gmra.mrb[12].mxu0 %v1641_v22 }
  0xa0   : > { %1909 = vmatpush1.bf16.msra.mxu0 %v2825_v33  ;;  %2466 = vmatpush1.bf16.msra.mxu1 %v2825_v33 }
  0xa1   : > { %1910 = vmatprep.subr.bf16.mxu0 %v2830_v44  ;;  %2459 = vmatprep.subr.bf16.mxu1 %v2830_v44 }
  0xa2   : > { %1928 = vmatprep.mubr.bf16.mxu0 %v2839_v2  ;;  %1948 = vmatprep.mubr.bf16.mxu1 %v2839_v2 }
  0xa4   : > { %1911 = vmatpush1.bf16.msra.mxu0 %v2828_v38  ;;  %2467 = vmatpush1.bf16.msra.mxu1 %v2828_v38 }
  0xa7   : > { %1929 = vmatmul.mubr.bf16.vlgmr.msra.gmra.mrb[0].mxu0 %v3434_v55  ;;  %1949 = vmatmul.mubr.bf16.vlgmr.msra.gmra.mrb[16].mxu1 %v3501_v58 }
  0xa8   : > { %1938 = vmatprep.mubr.bf16.mxu0 %v2839_v2  ;;  %1958 = vmatprep.mubr.bf16.mxu1 %v2839_v2 }
  0xaf   : > { %1939 = vmatmul.mubr.bf16.gmra.mrb[4].mxu0 %v3466_v37  ;;  %1959 = vmatmul.mubr.bf16.gmra.mrb[20].mxu1 %v1815_v0  ;;  %v1987_v37 = vlaneseq }
  0xb1   : > { %v1988_v47 = vshrl.u32 %v1987_v37, 7 }
  0xb3   : > { %v1989_v41 = vsub.s32 0, %v1988_v47  ;;  %v1993_v19 = vsub.s32 1, %v1988_v47 }
  0xb5   : > { %v3624_v20 = vrot.slane %v1985_v17, %v1989_v41  ;;  %v3628_v24 = vrot.slane %v1985_v17, %v1993_v19 }
 0x15a   : > { %v1054_v18 = vpop.f32.mrb[0].mxu1 }
 0x15b   : > { %v1056_v45 = vpop.f32.mrb[1].mxu1 }
 0x15c   : > { %v1058_v50 = vpop.f32.mrb[2].mxu1 }
 0x15d   : > { %v1060_v49 = vpop.f32.mrb[3].mxu1 }
 0x162   : > { %v3608_v56 = vpop.f32.mrb[4].mxu1 }
 0x163   : > { %v3610_v52 = vpop.f32.mrb[5].mxu1 }
 0x164   : > { %v3612_v54 = vpop.f32.mrb[6].mxu1 }
 0x165   : > { %v3614_v35 = vpop.f32.mrb[7].mxu1 }
 0x16a   : > { %v1074_v2 = vpop.f32.mrb[8].mxu1  ;;  %v1776_v55 = vpop.f32.mrb[8].mxu0 }
 0x16b   : > { %v2476_v23 = vadd.f32 %v1776_v55, %v1074_v2  ;;  %v1076_v25 = vpop.f32.mrb[9].mxu1  ;;  %v1778_v14 = vpop.f32.mrb[9].mxu0 }
 0x16c   : > { %v2478_v26 = vadd.f32 %v1778_v14, %v1076_v25  ;;  %v1078_v59 = vpop.f32.mrb[10].mxu1  ;;  %v1780_v11 = vpop.f32.mrb[10].mxu0 }
 0x16d   : > { %v2480_v34 = vadd.f32 %v1780_v11, %v1078_v59  ;;  %v1080_v36 = vpop.f32.mrb[11].mxu1  ;;  %v1782_v31 = vpop.f32.mrb[11].mxu0 }
 0x16e   : > { %v2482_v46 = vadd.f32 %v1782_v31, %v1080_v36 }
 0x172   : > { %v1084_v48 = vpop.f32.mrb[12].mxu1  ;;  %v1786_v12 = vpop.f32.mrb[12].mxu0 }
 0x173   : > { %v2484_v40 = vadd.f32 %v1786_v12, %v1084_v48  ;;  %v1086_v8 = vpop.f32.mrb[13].mxu1  ;;  %v1788_v9 = vpop.f32.mrb[13].mxu0 }
 0x174   : > { %v2486_v15 = vadd.f32 %v1788_v9, %v1086_v8  ;;  %v1088_v16 = vpop.f32.mrb[14].mxu1  ;;  %v1790_v58 = vpop.f32.mrb[14].mxu0 }
 0x175   : > { %v3617_v60 = vadd.f32 %v1790_v58, %v1088_v16  ;;  %v1090_v63 = vpop.f32.mrb[15].mxu1  ;;  %v1792_v1 = vpop.f32.mrb[15].mxu0 }
 0x176   : > { %v3619_v10 = vadd.f32 %v1792_v1, %v1090_v63 }
 0x17a   : > { %v1930_v21 = vpop.f32.mrb[0].mxu0  ;;  %v1950_v27 = vpop.f32.mrb[16].mxu1 }
 0x17b   : > { %v2468_v62 = vadd.f32 %v1930_v21, %v1054_v18  ;;  %v2477_v30 = vadd.f32 %v2476_v23, %v1950_v27  ;;  %v1932_v42 = vpop.f32.mrb[1].mxu0  ;;  %v1952_v51 = vpop.f32.mrb[17].mxu1 }
 0x17c   : > { %v2469_v28 = vadd.f32 %v1932_v42, %v1056_v45  ;;  %v2479_v3 = vadd.f32 %v2478_v26, %v1952_v51  ;;  %v1934_v4 = vpop.f32.mrb[2].mxu0  ;;  %v1954_v7 = vpop.f32.mrb[18].mxu1 }
 0x17d   : > { %v1997_v61 = vadd.f32 %v2468_v62, %v3624_v20  ;;  %v2005_v6 = vadd.f32 %v2477_v30, %v3624_v20  ;;  %v2470_v13 = vadd.f32 %v1934_v4, %v1058_v50  ;;  %v2481_v5 = vadd.f32 %v2480_v34, %v1954_v7  ;;  %v1936_v29 = vpop.f32.mrb[3].mxu0  ;;  %v1956_v32 = vpop.f32.mrb[19].mxu1 }
 0x17e   : > { %v1998_v39 = vadd.f32 %v2469_v28, %v3628_v24  ;;  %v2006_v22 = vadd.f32 %v2479_v3, %v3628_v24  ;;  %v2471_v33 = vadd.f32 %v1936_v29, %v1060_v49  ;;  %v2483_v44 = vadd.f32 %v2482_v46, %v1956_v32 }
 0x17f   : > { %v2013_v38 = vmax.f32 %v1997_v61, 0.0  ;;  %v2021_v53 = vmax.f32 %v2005_v6, 0.0  ;;  %v1999_v43 = vadd.f32 %v2470_v13, %v3624_v20  ;;  %v2007_v57 = vadd.f32 %v2481_v5, %v3624_v20 }
 0x180   : > { %v2014_v0 = vmax.f32 %v1998_v39, 0.0  ;;  %v2022_v18 = vmax.f32 %v2006_v22, 0.0  ;;  %v2000_v45 = vadd.f32 %v2471_v33, %v3628_v24  ;;  %v2008_v50 = vadd.f32 %v2483_v44, %v3628_v24 }
 0x181   : > { %v2015_v49 = vmax.f32 %v1999_v43, 0.0  ;;  %v2023_v2 = vmax.f32 %v2007_v57, 0.0 }
 0x182   : > { %v2444_v55 = vpack.c.bf16 %v2014_v0, %v2013_v38  ;;  %v2448_v23 = vpack.c.bf16 %v2022_v18, %v2021_v53  ;;  %v2016_v25 = vmax.f32 %v2000_v45, 0.0  ;;  %v2024_v14 = vmax.f32 %v2008_v50, 0.0  ;;  %v1940_v26 = vpop.f32.mrb[4].mxu0  ;;  %v1960_v59 = vpop.f32.mrb[20].mxu1 }
 0x183   : > { %v2472_v11 = vadd.f32 %v1940_v26, %v3608_v56  ;;  %v2485_v34 = vadd.f32 %v2484_v40, %v1960_v59  ;;  %v1942_v36 = vpop.f32.mrb[5].mxu0  ;;  %v1962_v31 = vpop.f32.mrb[21].mxu1 }
 0x184   : > { %2077 = vst [vmem:[%s3642_s21] sm:$0xff] %v2444_v55  ;;  %2081 = vst [vmem:[%s3642_s21 + $0x20] sm:$0xff] %v2448_v23  ;;  %v2445_v37 = vpack.c.bf16 %v2016_v25, %v2015_v49  ;;  %v2449_v46 = vpack.c.bf16 %v2024_v14, %v2023_v2  ;;  %v2473_v47 = vadd.f32 %v1942_v36, %v3610_v52  ;;  %v1944_v12 = vpop.f32.mrb[6].mxu0  ;;  %v1964_v8 = vpop.f32.mrb[22].mxu1 }
 0x185   : > { %v2487_v48 = vadd.f32 %v2486_v15, %v1962_v31  ;;  %v2001_v9 = vadd.f32 %v2472_v11, %v3624_v20  ;;  %v2009_v16 = vadd.f32 %v2485_v34, %v3624_v20  ;;  %v2474_v56 = vadd.f32 %v1944_v12, %v3612_v54  ;;  %v1946_v58 = vpop.f32.mrb[7].mxu0  ;;  %v1966_v63 = vpop.f32.mrb[23].mxu1 }
 0x186   : > { %v2489_v40 = vadd.f32 %v3617_v60, %v1964_v8  ;;  %2078 = vst [vmem:[%s3642_s21 + $0x8] sm:$0xff] %v2445_v37  ;;  %2082 = vst [vmem:[%s3642_s21 + $0x28] sm:$0xff] %v2449_v46  ;;  %v2002_v1 = vadd.f32 %v2473_v47, %v3628_v24  ;;  %v2475_v52 = vadd.f32 %v1946_v58, %v3614_v35 }
 0x187   : > { %v2010_v41 = vadd.f32 %v2487_v48, %v3628_v24  ;;  %v2491_v15 = vadd.f32 %v3619_v10, %v1966_v63  ;;  %v2017_v17 = vmax.f32 %v2001_v9, 0.0  ;;  %v2025_v19 = vmax.f32 %v2009_v16, 0.0 }
 0x188   : > { %v2003_v54 = vadd.f32 %v2474_v56, %v3624_v20  ;;  %v2011_v60 = vadd.f32 %v2489_v40, %v3624_v20  ;;  %v2018_v21 = vmax.f32 %v2002_v1, 0.0  ;;  %v2004_v62 = vadd.f32 %v2475_v52, %v3628_v24 }
 0x189   : > { %v2026_v27 = vmax.f32 %v2010_v41, 0.0  ;;  %v2012_v30 = vadd.f32 %v2491_v15, %v3628_v24 }
 0x18a   : > { %v2019_v42 = vmax.f32 %v2003_v54, 0.0  ;;  %v2027_v35 = vmax.f32 %v2011_v60, 0.0  ;;  %v2446_v51 = vpack.c.bf16 %v2018_v21, %v2017_v17  ;;  %v2020_v10 = vmax.f32 %v2004_v62, 0.0 }
 0x18b   : > { %v2450_v28 = vpack.c.bf16 %v2026_v27, %v2025_v19  ;;  %v2028_v3 = vmax.f32 %v2012_v30, 0.0 }
 0x18c   : > { %2079 = vst [vmem:[%s3642_s21 + $0x10] sm:$0xff] %v2446_v51  ;;  %v2447_v4 = vpack.c.bf16 %v2020_v10, %v2019_v42 }
 0x18d   : > { %2083 = vst [vmem:[%s3642_s21 + $0x30] sm:$0xff] %v2450_v28  ;;  %v2451_v7 = vpack.c.bf16 %v2028_v3, %v2027_v35 }
 0x18e   : > { %2080 = vst [vmem:[%s3642_s21 + $0x18] sm:$0xff] %v2447_v4 }
 0x18f   : > { %2084 = vst [vmem:[%s3642_s21 + $0x38] sm:$0xff] %v2451_v7 }
 0x190 PF: > { %s13_s12 = sadd.s32 1, %s2837_s12  }
 0x191   : > { %p10_p5 = scmp.ge.s32.totalorder %s13_s12, 4  }
 0x193   :  { %12 = sbr.rel (!%p10_p5) target bundleno = 1 (0x1), region = 70 }

// kernel: attention_cnn_forward.5
= control target key start
LH: loop header
LB: loop body
LE: loop exit
PB: predicated region body
PF: predicated region fallthrough
CT: control target
= control target key end

     0   :  { %s13782_s12 = smov 0   ;;  %s13784_s13 = smov 0   ;;  %s16438_s0 = inlined_call_operand.vmem [shape: bf16[4,2,17,17,8], index: 0, kind: input, shape index: {}]   ;;  %s16439_s1 = inlined_call_operand.vmem [shape: bf16[9,8,64], index: 1, kind: input, shape index: {}]   ;;  %s16440_s2 = inlined_call_operand.vmem [shape: f32[1,64], index: 2, kind: input, shape index: {}]   ;;  %s16441_s3 = inlined_call_operand.vmem [shape: bf16[512,64], index: 3, kind: output, shape index: {}]  }
   0x1   :  { %s13786_s14 = smov 0  }
   0x2 LB: > { %s9791_s15 = sadd.s32 4294967295, %s13760_s14   ;;  %s13799_s16 = sadd.s32 1, %s13760_s14   ;;  %s13760_s14 = sphi %s13786_s14, %s17165_s14   ;;  %s13756_s13 = sphi %s13784_s13, %s17164_s13   ;;  %s13752_s12 = sphi %s13782_s12, %s17163_s12  }
   0x3   : > { %s17_s17 = ssub.s32 %s13760_s14, %s13799_s16  ;;  %s20_s18 = sadd.s32 1, %s13756_s13 }
   0x4   : > { %p18_p0 = scmp.eq.s32.totalorder %s17_s17, 0  ;;  %p27_p1 = scmp.ne.s32.totalorder %s13756_s13, %s13752_s12 }
   0x5   : > { %p28_p2 = scmp.eq.s32.totalorder %s13760_s14, 0  ;;  %p9794_p4 = scmp.ge.s32.totalorder %s13760_s14, 2 }
   0x6   : > { %s13808_s19 = scalar_select %p18_p0, %s13756_s13, %s20_s18  }
   0x7   : > { %p29_p3 = por %p28_p2, %p27_p1  ;;  %127 = sbr.rel (%p9794_p4) target bundleno = 71 (0x47), region = 24 }
   0xe   : > { %130 = sbr.rel (!%p29_p3) target bundleno = 71 (0x47), region = 28  ;;  %s132_s20 = sand.u32 (%p29_p3), 1, %s13756_s13  }
   0xf   : > { %s13568_s21 = smul.u32 (%p29_p3), 204, %s13760_s14 }
  0x10   : > { %s13567_s22 = smul.u32 (%p29_p3), 816, %s132_s20 }
  0x11   : > { %s13816_s25 = scalar_lea.vmem (%p29_p3), %s16438_s0, %s13568_s21 }
  0x12   : > { %v153_v0 = vld [vmem:[%s13816_s25] sm:$0xff] (%p29_p3)   ;;  %v157_v1 = vld [vmem:[%s13816_s25 + $0x8] sm:$0xff] (%p29_p3)   ;;  %v161_v2 = vld [vmem:[%s13816_s25 + $0x10] sm:$0xff] (%p29_p3)   ;;  %s13821_s26 = scalar_lea.vmem (%p29_p3), [#allocation2], %s13567_s22 }
  0x13   : > { %154 = vst [vmem:[%s13821_s26] sm:$0xff] (%p29_p3), %v153_v0   ;;  %158 = vst [vmem:[%s13821_s26 + $0x8] sm:$0xff] (%p29_p3), %v157_v1   ;;  %v165_v3 = vld [vmem:[%s13816_s25 + $0x18] sm:$0xff] (%p29_p3)   ;;  %v169_v4 = vld [vmem:[%s13816_s25 + $0x20] sm:$0xff] (%p29_p3)  }
  0x14   : > { %162 = vst [vmem:[%s13821_s26 + $0x10] sm:$0xff] (%p29_p3), %v161_v2   ;;  %v173_v5 = vld [vmem:[%s13816_s25 + $0x28] sm:$0xff] (%p29_p3)   ;;  %166 = vst [vmem:[%s13821_s26 + $0x18] sm:$0xff] (%p29_p3), %v165_v3   ;;  %v177_v6 = vld [vmem:[%s13816_s25 + $0x30] sm:$0xff] (%p29_p3)  }
  0x15   : > { %170 = vst [vmem:[%s13821_s26 + $0x20] sm:$0xff] %v169_v4   ;;  %174 = vst [vmem:[%s13821_s26 + $0x28] sm:$0xff] %v173_v5   ;;  %v181_v7 = vld [vmem:[%s13816_s25 + $0x38] sm:$0xff]   ;;  %v185_v8 = vld [vmem:[%s13816_s25 + $0x40] sm:$0xff]  }
  0x16   : > { %178 = vst [vmem:[%s13821_s26 + $0x30] sm:$0xff] %v177_v6   ;;  %182 = vst [vmem:[%s13821_s26 + $0x38] sm:$0xff] %v181_v7   ;;  %v189_v9 = vld [vmem:[%s13816_s25 + $0x48] sm:$0xff]   ;;  %v193_v10 = vld [vmem:[%s13816_s25 + $0x50] sm:$0xff]  }
  0x17   : > { %186 = vst [vmem:[%s13821_s26 + $0x40] sm:$0xff] %v185_v8   ;;  %v197_v11 = vld [vmem:[%s13816_s25 + $0x58] sm:$0xff]   ;;  %190 = vst [vmem:[%s13821_s26 + $0x48] sm:$0xff] %v189_v9   ;;  %v201_v12 = vld [vmem:[%s13816_s25 + $0x60] sm:$0xff]  }
  0x18   : > { %194 = vst [vmem:[%s13821_s26 + $0x50] sm:$0xff] %v193_v10   ;;  %198 = vst [vmem:[%s13821_s26 + $0x58] sm:$0xff] %v197_v11   ;;  %v205_v13 = vld [vmem:[%s13816_s25 + $0x68] sm:$0xff]   ;;  %v209_v14 = vld [vmem:[%s13816_s25 + $0x70] sm:$0xff]  }
  0x19   : > { %202 = vst [vmem:[%s13821_s26 + $0x60] sm:$0xff] %v201_v12   ;;  %206 = vst [vmem:[%s13821_s26 + $0x68] sm:$0xff] %v205_v13   ;;  %v213_v15 = vld [vmem:[%s13816_s25 + $0x78] sm:$0xff]   ;;  %v217_v16 = vld [vmem:[%s13816_s25 + $0x80] sm:$0xff]  }
  0x1a   : > { %210 = vst [vmem:[%s13821_s26 + $0x70] sm:$0xff] %v209_v14   ;;  %v221_v17 = vld [vmem:[%s13816_s25 + $0x88] sm:$0xff]   ;;  %214 = vst [vmem:[%s13821_s26 + $0x78] sm:$0xff] %v213_v15   ;;  %v225_v18 = vld [vmem:[%s13816_s25 + $0x90] sm:$0xff]  }
  0x1b   : > { %218 = vst [vmem:[%s13821_s26 + $0x80] sm:$0xff] %v217_v16   ;;  %222 = vst [vmem:[%s13821_s26 + $0x88] sm:$0xff] %v221_v17   ;;  %v229_v19 = vld [vmem:[%s13816_s25 + $0x98] sm:$0xff]   ;;  %v233_v20 = vld [vmem:[%s13816_s25 + $0xa0] sm:$0xff]  }
  0x1c   : > { %226 = vst [vmem:[%s13821_s26 + $0x90] sm:$0xff] %v225_v18   ;;  %230 = vst [vmem:[%s13821_s26 + $0x98] sm:$0xff] %v229_v19   ;;  %v237_v21 = vld [vmem:[%s13816_s25 + $0xa8] sm:$0xff]   ;;  %v241_v22 = vld [vmem:[%s13816_s25 + $0xb0] sm:$0xff]  }
  0x1d   : > { %234 = vst [vmem:[%s13821_s26 + $0xa0] sm:$0xff] %v233_v20   ;;  %v245_v23 = vld [vmem:[%s13816_s25 + $0xb8] sm:$0xff]   ;;  %238 = vst [vmem:[%s13821_s26 + $0xa8] sm:$0xff] %v237_v21   ;;  %v249_v24 = vld [vmem:[%s13816_s25 + $0xc0] sm:$0xff]  }
  0x1e   : > { %242 = vst [vmem:[%s13821_s26 + $0xb0] sm:$0xff] %v241_v22   ;;  %246 = vst [vmem:[%s13821_s26 + $0xb8] sm:$0xff] %v245_v23   ;;  %v253_v25 = vld [vmem:[%s13816_s25 + $0xc8] sm:$0xf]  ;;  %v255_v26 = vld [vmem:[%s13816_s25 + $0x198] sm:$0xff]  }
  0x1f   : > { %250 = vst [vmem:[%s13821_s26 + $0xc0] sm:$0xff] %v249_v24   ;;  %254 = vst [vmem:[%s13821_s26 + $0xc8] sm:$0xf] %v253_v25  ;;  %v259_v27 = vld [vmem:[%s13816_s25 + $0x1a0] sm:$0xff]   ;;  %v263_v28 = vld [vmem:[%s13816_s25 + $0x1a8] sm:$0xff]  }
  0x20   : > { %256 = vst [vmem:[%s13821_s26 + $0xcc] sm:$0xff] %v255_v26   ;;  %v267_v29 = vld [vmem:[%s13816_s25 + $0x1b0] sm:$0xff]   ;;  %260 = vst [vmem:[%s13821_s26 + $0xd4] sm:$0xff] %v259_v27   ;;  %v271_v30 = vld [vmem:[%s13816_s25 + $0x1b8] sm:$0xff]  }
  0x21   : > { %264 = vst [vmem:[%s13821_s26 + $0xdc] sm:$0xff] %v263_v28   ;;  %268 = vst [vmem:[%s13821_s26 + $0xe4] sm:$0xff] %v267_v29   ;;  %v275_v31 = vld [vmem:[%s13816_s25 + $0x1c0] sm:$0xff]   ;;  %v279_v32 = vld [vmem:[%s13816_s25 + $0x1c8] sm:$0xff]  }
  0x22   : > { %272 = vst [vmem:[%s13821_s26 + $0xec] sm:$0xff] %v271_v30   ;;  %276 = vst [vmem:[%s13821_s26 + $0xf4] sm:$0xff] %v275_v31   ;;  %v283_v33 = vld [vmem:[%s13816_s25 + $0x1d0] sm:$0xff]   ;;  %v287_v34 = vld [vmem:[%s13816_s25 + $0x1d8] sm:$0xff]  }
  0x23   : > { %280 = vst [vmem:[%s13821_s26 + $0xfc] sm:$0xff] %v279_v32   ;;  %v291_v35 = vld [vmem:[%s13816_s25 + $0x1e0] sm:$0xff]   ;;  %284 = vst [vmem:[%s13821_s26 + $0x104] sm:$0xff] %v283_v33   ;;  %v295_v36 = vld [vmem:[%s13816_s25 + $0x1e8] sm:$0xff]  }
  0x24   : > { %288 = vst [vmem:[%s13821_s26 + $0x10c] sm:$0xff] %v287_v34   ;;  %292 = vst [vmem:[%s13821_s26 + $0x114] sm:$0xff] %v291_v35   ;;  %v299_v37 = vld [vmem:[%s13816_s25 + $0x1f0] sm:$0xff]   ;;  %v303_v38 = vld [vmem:[%s13816_s25 + $0x1f8] sm:$0xff]  }
  0x25   : > { %296 = vst [vmem:[%s13821_s26 + $0x11c] sm:$0xff] %v295_v36   ;;  %300 = vst [vmem:[%s13821_s26 + $0x124] sm:$0xff] %v299_v37   ;;  %v307_v39 = vld [vmem:[%s13816_s25 + $0x200] sm:$0xff]   ;;  %v311_v40 = vld [vmem:[%s13816_s25 + $0x208] sm:$0xff]  }
  0x26   : > { %304 = vst [vmem:[%s13821_s26 + $0x12c] sm:$0xff] %v303_v38   ;;  %v315_v41 = vld [vmem:[%s13816_s25 + $0x210] sm:$0xff]   ;;  %308 = vst [vmem:[%s13821_s26 + $0x134] sm:$0xff] %v307_v39   ;;  %v319_v42 = vld [vmem:[%s13816_s25 + $0x218] sm:$0xff]  }
  0x27   : > { %312 = vst [vmem:[%s13821_s26 + $0x13c] sm:$0xff] %v311_v40   ;;  %316 = vst [vmem:[%s13821_s26 + $0x144] sm:$0xff] %v315_v41   ;;  %v323_v43 = vld [vmem:[%s13816_s25 + $0x220] sm:$0xff]   ;;  %v327_v44 = vld [vmem:[%s13816_s25 + $0x228] sm:$0xff]  }
  0x28   : > { %320 = vst [vmem:[%s13821_s26 + $0x14c] sm:$0xff] %v319_v42   ;;  %324 = vst [vmem:[%s13821_s26 + $0x154] sm:$0xff] %v323_v43   ;;  %v331_v45 = vld [vmem:[%s13816_s25 + $0x230] sm:$0xff]   ;;  %v335_v46 = vld [vmem:[%s13816_s25 + $0x238] sm:$0xff]  }
  0x29   : > { %328 = vst [vmem:[%s13821_s26 + $0x15c] sm:$0xff] %v327_v44   ;;  %v339_v47 = vld [vmem:[%s13816_s25 + $0x240] sm:$0xff]   ;;  %332 = vst [vmem:[%s13821_s26 + $0x164] sm:$0xff] %v331_v45   ;;  %v343_v48 = vld [vmem:[%s13816_s25 + $0x248] sm:$0xff]  }
  0x2a   : > { %336 = vst [vmem:[%s13821_s26 + $0x16c] sm:$0xff] %v335_v46   ;;  %340 = vst [vmem:[%s13821_s26 + $0x174] sm:$0xff] %v339_v47   ;;  %v347_v49 = vld [vmem:[%s13816_s25 + $0x250] sm:$0xff]   ;;  %v351_v50 = vld [vmem:[%s13816_s25 + $0x258] sm:$0xff]  }
  0x2b   : > { %344 = vst [vmem:[%s13821_s26 + $0x17c] sm:$0xff] %v343_v48   ;;  %348 = vst [vmem:[%s13821_s26 + $0x184] sm:$0xff] %v347_v49   ;;  %v355_v51 = vld [vmem:[%s13816_s25 + $0x260] sm:$0xf]  ;;  %v357_v52 = vld [vmem:[%s13816_s25 + $0x330] sm:$0xff]  }
  0x2c   : > { %352 = vst [vmem:[%s13821_s26 + $0x18c] sm:$0xff] %v351_v50   ;;  %v361_v53 = vld [vmem:[%s13816_s25 + $0x338] sm:$0xff]   ;;  %356 = vst [vmem:[%s13821_s26 + $0x194] sm:$0xf] %v355_v51  ;;  %v365_v54 = vld [vmem:[%s13816_s25 + $0x340] sm:$0xff]  }
  0x2d   : > { %358 = vst [vmem:[%s13821_s26 + $0x198] sm:$0xff] %v357_v52   ;;  %362 = vst [vmem:[%s13821_s26 + $0x1a0] sm:$0xff] %v361_v53   ;;  %v369_v55 = vld [vmem:[%s13816_s25 + $0x348] sm:$0xff]   ;;  %v373_v56 = vld [vmem:[%s13816_s25 + $0x350] sm:$0xff]  }
  0x2e   : > { %366 = vst [vmem:[%s13821_s26 + $0x1a8] sm:$0xff] %v365_v54   ;;  %370 = vst [vmem:[%s13821_s26 + $0x1b0] sm:$0xff] %v369_v55   ;;  %v377_v57 = vld [vmem:[%s13816_s25 + $0x358] sm:$0xff]   ;;  %v381_v58 = vld [vmem:[%s13816_s25 + $0x360] sm:$0xff]  }
  0x2f   : > { %374 = vst [vmem:[%s13821_s26 + $0x1b8] sm:$0xff] %v373_v56   ;;  %v385_v59 = vld [vmem:[%s13816_s25 + $0x368] sm:$0xff]   ;;  %378 = vst [vmem:[%s13821_s26 + $0x1c0] sm:$0xff] %v377_v57   ;;  %v389_v60 = vld [vmem:[%s13816_s25 + $0x370] sm:$0xff]  }
  0x30   : > { %382 = vst [vmem:[%s13821_s26 + $0x1c8] sm:$0xff] %v381_v58   ;;  %386 = vst [vmem:[%s13821_s26 + $0x1d0] sm:$0xff] %v385_v59   ;;  %v393_v61 = vld [vmem:[%s13816_s25 + $0x378] sm:$0xff]   ;;  %v397_v62 = vld [vmem:[%s13816_s25 + $0x380] sm:$0xff]  }
  0x31   : > { %390 = vst [vmem:[%s13821_s26 + $0x1d8] sm:$0xff] %v389_v60   ;;  %394 = vst [vmem:[%s13821_s26 + $0x1e0] sm:$0xff] %v393_v61   ;;  %v401_v63 = vld [vmem:[%s13816_s25 + $0x388] sm:$0xff]   ;;  %v405_v0 = vld [vmem:[%s13816_s25 + $0x390] sm:$0xff]  }
  0x32   : > { %398 = vst [vmem:[%s13821_s26 + $0x1e8] sm:$0xff] %v397_v62   ;;  %v409_v1 = vld [vmem:[%s13816_s25 + $0x398] sm:$0xff]   ;;  %402 = vst [vmem:[%s13821_s26 + $0x1f0] sm:$0xff] %v401_v63   ;;  %v413_v2 = vld [vmem:[%s13816_s25 + $0x3a0] sm:$0xff]  }
  0x33   : > { %406 = vst [vmem:[%s13821_s26 + $0x1f8] sm:$0xff] %v405_v0   ;;  %410 = vst [vmem:[%s13821_s26 + $0x200] sm:$0xff] %v409_v1   ;;  %v417_v3 = vld [vmem:[%s13816_s25 + $0x3a8] sm:$0xff]   ;;  %v421_v4 = vld [vmem:[%s13816_s25 + $0x3b0] sm:$0xff]  }
  0x34   : > { %414 = vst [vmem:[%s13821_s26 + $0x208] sm:$0xff] %v413_v2   ;;  %418 = vst [vmem:[%s13821_s26 + $0x210] sm:$0xff] %v417_v3   ;;  %v425_v5 = vld [vmem:[%s13816_s25 + $0x3b8] sm:$0xff]   ;;  %v429_v6 = vld [vmem:[%s13816_s25 + $0x3c0] sm:$0xff]  }
  0x35   : > { %422 = vst [vmem:[%s13821_s26 + $0x218] sm:$0xff] %v421_v4   ;;  %v433_v7 = vld [vmem:[%s13816_s25 + $0x3c8] sm:$0xff]   ;;  %426 = vst [vmem:[%s13821_s26 + $0x220] sm:$0xff] %v425_v5   ;;  %v437_v8 = vld [vmem:[%s13816_s25 + $0x3d0] sm:$0xff]  }
  0x36   : > { %430 = vst [vmem:[%s13821_s26 + $0x228] sm:$0xff] %v429_v6   ;;  %434 = vst [vmem:[%s13821_s26 + $0x230] sm:$0xff] %v433_v7   ;;  %v441_v9 = vld [vmem:[%s13816_s25 + $0x3d8] sm:$0xff]   ;;  %v445_v10 = vld [vmem:[%s13816_s25 + $0x3e0] sm:$0xff]  }
  0x37   : > { %438 = vst [vmem:[%s13821_s26 + $0x238] sm:$0xff] %v437_v8   ;;  %442 = vst [vmem:[%s13821_s26 + $0x240] sm:$0xff] %v441_v9   ;;  %v449_v11 = vld [vmem:[%s13816_s25 + $0x3e8] sm:$0xff]   ;;  %v453_v12 = vld [vmem:[%s13816_s25 + $0x3f0] sm:$0xff]  }
  0x38   : > { %446 = vst [vmem:[%s13821_s26 + $0x248] sm:$0xff] %v445_v10   ;;  %v457_v13 = vld [vmem:[%s13816_s25 + $0x3f8] sm:$0xf]  ;;  %450 = vst [vmem:[%s13821_s26 + $0x250] sm:$0xff] %v449_v11   ;;  %v459_v14 = vld [vmem:[%s13816_s25 + $0x4c8] sm:$0xff]  }
  0x39   : > { %454 = vst [vmem:[%s13821_s26 + $0x258] sm:$0xff] %v453_v12   ;;  %458 = vst [vmem:[%s13821_s26 + $0x260] sm:$0xf] %v457_v13  ;;  %v463_v15 = vld [vmem:[%s13816_s25 + $0x4d0] sm:$0xff]   ;;  %v467_v16 = vld [vmem:[%s13816_s25 + $0x4d8] sm:$0xff]  }
  0x3a   : > { %460 = vst [vmem:[%s13821_s26 + $0x264] sm:$0xff] %v459_v14   ;;  %464 = vst [vmem:[%s13821_s26 + $0x26c] sm:$0xff] %v463_v15   ;;  %v471_v17 = vld [vmem:[%s13816_s25 + $0x4e0] sm:$0xff]   ;;  %v475_v18 = vld [vmem:[%s13816_s25 + $0x4e8] sm:$0xff]  }
  0x3b   : > { %468 = vst [vmem:[%s13821_s26 + $0x274] sm:$0xff] %v467_v16   ;;  %v479_v19 = vld [vmem:[%s13816_s25 + $0x4f0] sm:$0xff]   ;;  %472 = vst [vmem:[%s13821_s26 + $0x27c] sm:$0xff] %v471_v17   ;;  %v483_v20 = vld [vmem:[%s13816_s25 + $0x4f8] sm:$0xff]  }
  0x3c   : > { %476 = vst [vmem:[%s13821_s26 + $0x284] sm:$0xff] %v475_v18   ;;  %480 = vst [vmem:[%s13821_s26 + $0x28c] sm:$0xff] %v479_v19   ;;  %v487_v21 = vld [vmem:[%s13816_s25 + $0x500] sm:$0xff]   ;;  %v491_v22 = vld [vmem:[%s13816_s25 + $0x508] sm:$0xff]  }
  0x3d   : > { %484 = vst [vmem:[%s13821_s26 + $0x294] sm:$0xff] %v483_v20   ;;  %488 = vst [vmem:[%s13821_s26 + $0x29c] sm:$0xff] %v487_v21   ;;  %v495_v23 = vld [vmem:[%s13816_s25 + $0x510] sm:$0xff]   ;;  %v499_v24 = vld [vmem:[%s13816_s25 + $0x518] sm:$0xff]  }
  0x3e   : > { %492 = vst [vmem:[%s13821_s26 + $0x2a4] sm:$0xff] %v491_v22   ;;  %v503_v25 = vld [vmem:[%s13816_s25 + $0x520] sm:$0xff]   ;;  %496 = vst [vmem:[%s13821_s26 + $0x2ac] sm:$0xff] %v495_v23   ;;  %v507_v26 = vld [vmem:[%s13816_s25 + $0x528] sm:$0xff]  }
  0x3f   : > { %500 = vst [vmem:[%s13821_s26 + $0x2b4] sm:$0xff] %v499_v24   ;;  %504 = vst [vmem:[%s13821_s26 + $0x2bc] sm:$0xff] %v503_v25   ;;  %v511_v27 = vld [vmem:[%s13816_s25 + $0x530] sm:$0xff]   ;;  %v515_v28 = vld [vmem:[%s13816_s25 + $0x538] sm:$0xff]  }
  0x40   : > { %508 = vst [vmem:[%s13821_s26 + $0x2c4] sm:$0xff] %v507_v26   ;;  %512 = vst [vmem:[%s13821_s26 + $0x2cc] sm:$0xff] %v511_v27   ;;  %v519_v29 = vld [vmem:[%s13816_s25 + $0x540] sm:$0xff]   ;;  %v523_v30 = vld [vmem:[%s13816_s25 + $0x548] sm:$0xff]  }
  0x41   : > { %516 = vst [vmem:[%s13821_s26 + $0x2d4] sm:$0xff] %v515_v28   ;;  %v527_v31 = vld [vmem:[%s13816_s25 + $0x550] sm:$0xff]   ;;  %520 = vst [vmem:[%s13821_s26 + $0x2dc] sm:$0xff] %v519_v29   ;;  %v531_v32 = vld [vmem:[%s13816_s25 + $0x558] sm:$0xff]  }
  0x42   : > { %524 = vst [vmem:[%s13821_s26 + $0x2e4] sm:$0xff] %v523_v30   ;;  %528 = vst [vmem:[%s13821_s26 + $0x2ec] sm:$0xff] %v527_v31   ;;  %v535_v33 = vld [vmem:[%s13816_s25 + $0x560] sm:$0xff]   ;;  %v539_v34 = vld [vmem:[%s13816_s25 + $0x568] sm:$0xff]  }
  0x43   : > { %532 = vst [vmem:[%s13821_s26 + $0x2f4] sm:$0xff] %v531_v32   ;;  %536 = vst [vmem:[%s13821_s26 + $0x2fc] sm:$0xff] %v535_v33   ;;  %v543_v35 = vld [vmem:[%s13816_s25 + $0x570] sm:$0xff]   ;;  %v547_v36 = vld [vmem:[%s13816_s25 + $0x578] sm:$0xff]  }
  0x44   : > { %540 = vst [vmem:[%s13821_s26 + $0x304] sm:$0xff] %v539_v34   ;;  %v551_v37 = vld [vmem:[%s13816_s25 + $0x580] sm:$0xff]   ;;  %544 = vst [vmem:[%s13821_s26 + $0x30c] sm:$0xff] %v543_v35   ;;  %v555_v38 = vld [vmem:[%s13816_s25 + $0x588] sm:$0xff]  }
  0x45   : > { %548 = vst [vmem:[%s13821_s26 + $0x314] sm:$0xff] %v547_v36   ;;  %552 = vst [vmem:[%s13821_s26 + $0x31c] sm:$0xff] %v551_v37   ;;  %v559_v39 = vld [vmem:[%s13816_s25 + $0x590] sm:$0xf] }
  0x46   : > { %556 = vst [vmem:[%s13821_s26 + $0x324] sm:$0xff] %v555_v38   ;;  %560 = vst [vmem:[%s13821_s26 + $0x32c] sm:$0xf] %v559_v39 }
  0x47 PF: > { %p9796_p5 = scmp.ge.s32.totalorder %s13760_s14, 1  ;;  %p990_p6 = scmp.lt.s32.totalorder %s13760_s14, 3 }
  0x49   : > { %p991_p7 = pnand %p9796_p5, %p990_p6 }
  0x4b   : > { %994 = sbr.rel (%p991_p7) target bundleno = 1464 (0x5b8), region = 69 }
  0x52   : > { %v9952_v40 = vld [vmem:[%s16439_s1 + $0x4] sm:$0xf]  ;;  %vm1536_vm0 = vcmask 1043456   ;;  %s997_s29 = sand.u32 1, %s13752_s12   ;;  %v1438_v42 = vld [vmem:[%s16439_s1] sm:$0xf] }
  0x53   : > { %13531 = vmatprep.subr.msk.bf16.mxu0 %vm1536_vm0, %v9952_v40  ;;  %v14036_v41 = vsel %vm1536_vm0, %v9952_v40, 0  ;;  %s13569_s30 = smul.u32 816, %s997_s29  ;;  %13540 = vmatprep.subr.msk.bf16.mxu1 %vm1536_vm0, %v9952_v40  ;;  %vm1487_vm1 = vcmask 64512   ;;  %v14062_v48 = vsel %vm1536_vm0, %v1438_v42, 0  ;;  %vm1961_vm2 = vcmask 1046528  }
  0x54   : > { %16730 = vst [vmem:[#allocation3_spill] sm:$0xff] %v14036_v41  ;;  %11284 = vmatpush3.bf16.msra.mxu0 %v14036_v41  ;;  %11590 = vmatpush3.bf16.msra.mxu1 %v14036_v41  ;;  %16731 = vst [vmem:[#allocation4_spill] sm:$0xff] %v14062_v48  ;;  %v14081_v56 = vld [vmem:[%s16439_s1 + $0x8] sm:$0xf]  ;;  %vm9696_vm3 = vcmask 519168  }
  0x55   : > { %13532 = vmatprep.subr.msk.bf16.mxu0 %vm1536_vm0, %v1438_v42  ;;  %13541 = vmatprep.subr.msk.bf16.mxu1 %vm1536_vm0, %v1438_v42  ;;  %s14046_s6 = scalar_lea.vmem [#allocation2], %s13569_s30 }
  0x56   : > { %v14049_v43 = vld [vmem:[%s14046_s6 + $0xcc] sm:$0xff]   ;;  %v14052_v44 = vld [vmem:[%s14046_s6 + $0xd8] sm:$0xff]   ;;  %v14055_v45 = vld [vmem:[%s14046_s6] sm:$0xff]  }
  0x57   : > { %v1029_v46 = vld [vmem:[%s14046_s6 + $0x8] sm:$0x1]  ;;  %v14059_v47 = vld [vmem:[%s14046_s6 + $0xc] sm:$0xff]   ;;  %v1078_v49 = vunpack.c.l.bf16 %v14055_v45  ;;  %v1079_v50 = vunpack.c.h.bf16 %v14055_v45  ;;  %v1032_v51 = vld [vmem:[%s14046_s6 + $0x14] sm:$0x1]  ;;  %11285 = vmatprep.mubr.msk.bf16.mxu0 %vm1487_vm1, %v14049_v43 }
  0x58   : > { %v14068_v52 = vld [vmem:[%s14046_s6 + $0xe4] sm:$0xff]   ;;  %v1080_v53 = vunpack.c.l.bf16 %v1029_v46  ;;  %v14073_v54 = vld [vmem:[%s14046_s6 + $0xf0] sm:$0xff]   ;;  %v14076_v55 = vld [vmem:[%s14046_s6 + $0x18] sm:$0xff]   ;;  %11286 = vmatmul.mubr.msk.bf16.vlgmr.msra.gmra.mrb[0].mxu0 %vm1487_vm1, %v14052_v44  ;;  %v1081_v59 = vunpack.c.l.bf16 %v14059_v47  ;;  %v1082_v61 = vunpack.c.h.bf16 %v14059_v47  ;;  %v1083_v62 = vunpack.c.l.bf16 %v1032_v51 }
  0x59   : > { %16732 = vst [vmem:[#allocation5_spill] sm:$0xff] %v14068_v52  ;;  %16733 = vst [vmem:[#allocation6_spill] sm:$0xff] %v14073_v54  ;;  %v1962_v57 = vrot.slane %v1078_v49, 1  ;;  %v1963_v58 = vrot.slane %v1079_v50, 1  ;;  %11318 = vmatpush3.bf16.msra.mxu0 %v14062_v48  ;;  %v1035_v63 = vld [vmem:[%s14046_s6 + $0x20] sm:$0x1]  ;;  %v1084_v3 = vunpack.c.l.bf16 %v14076_v55  ;;  %11289 = vmatprep.mubr.msk.bf16.mxu0 %vm1487_vm1, %v14068_v52  ;;  %v1085_v7 = vunpack.c.h.bf16 %v14076_v55 }
  0x5a   : > { %v1965_v60 = vrot.slane %v1080_v53, 1  ;;  %v14090_v0 = vld [vmem:[%s14046_s6 + $0x24] sm:$0xff]   ;;  %v1967_v2 = vrot.slane %v1081_v59, 1  ;;  %13533 = vmatprep.subr.msk.bf16.mxu0 %vm1536_vm0, %v14081_v56  ;;  %v1968_v5 = vrot.slane %v1082_v61, 1  ;;  %v1970_v6 = vrot.slane %v1083_v62, 1  ;;  %v14105_v13 = vld [vmem:[%s14046_s6 + $0xfc] sm:$0xff]  }
  0x5b   : > { %16734 = vst [vmem:[#allocation7_spill] sm:$0xff] %v14090_v0  ;;  %v1964_v1 = vsel %vm1961_vm2, %v1962_v57, %v1963_v58  ;;  %v1038_v8 = vld [vmem:[%s14046_s6 + $0x2c] sm:$0x1]  ;;  %v1086_v10 = vunpack.c.l.bf16 %v1035_v63  ;;  %v1972_v11 = vrot.slane %v1084_v3, 1  ;;  %v1087_v12 = vunpack.c.l.bf16 %v14090_v0  ;;  %16735 = vst [vmem:[#allocation8_spill] sm:$0xff] %v14105_v13  ;;  %v14111_v18 = vld [vmem:[%s14046_s6 + $0x30] sm:$0xff]  }
  0x5c   : > { %v1966_v4 = vsel %vm1961_vm2, %v1963_v58, %v1965_v60  ;;  %v1969_v14 = vsel %vm1961_vm2, %v1967_v2, %v1968_v5  ;;  %v1971_v15 = vsel %vm1961_vm2, %v1968_v5, %v1970_v6  ;;  %v1973_v16 = vrot.slane %v1085_v7, 1  ;;  %16736 = vst [vmem:[#allocation9_spill] sm:$0xff] %v14111_v18  ;;  %v1041_v23 = vld [vmem:[%s14046_s6 + $0x38] sm:$0x1]  ;;  %v14119_v24 = vld [vmem:[%s14046_s6 + $0x3c] sm:$0xff]   ;;  %v14128_v29 = vld [vmem:[%s14046_s6 + $0x108] sm:$0xff]  }
  0x5d   : > { %v14101_v9 = vpack.c.bf16 %v1966_v4, %v1964_v1  ;;  %v1088_v17 = vunpack.c.h.bf16 %v14090_v0  ;;  %v14115_v19 = vpack.c.bf16 %v1971_v15, %v1969_v14  ;;  %v1975_v20 = vrot.slane %v1086_v10, 1  ;;  %16738 = vst [vmem:[#allocation11_spill] sm:$0xff] %v14119_v24  ;;  %16739 = vst [vmem:[#allocation12_spill] sm:$0xff] %v14128_v29  ;;  %v1044_v32 = vld [vmem:[%s14046_s6 + $0x44] sm:$0x1]  ;;  %v14141_v37 = vld [vmem:[%s14046_s6 + $0x114] sm:$0xff]  }
  0x5e   : > { %v1089_v21 = vunpack.c.l.bf16 %v1038_v8  ;;  %v1977_v22 = vrot.slane %v1087_v12, 1  ;;  %v1974_v25 = vsel %vm1961_vm2, %v1972_v11, %v1973_v16  ;;  %v1090_v30 = vunpack.c.l.bf16 %v14111_v18  ;;  %16741 = vst [vmem:[#allocation14_spill] sm:$0xff] %v14141_v37  ;;  %v14146_v46 = vld [vmem:[%s14046_s6 + $0x48] sm:$0xff]   ;;  %v1047_v53 = vld [vmem:[%s14046_s6 + $0x50] sm:$0x1]  ;;  %v14160_v1 = vld [vmem:[%s14046_s6 + $0x54] sm:$0xff]  }
  0x5f   : > { %11591 = vmatprep.mubr.msk.bf16.mxu1 %vm1487_vm1, %v14101_v9  ;;  %16737 = vst [vmem:[#allocation10_spill] sm:$0xff] %v14115_v19  ;;  %v1978_v26 = vrot.slane %v1088_v17, 1  ;;  %v1976_v27 = vsel %vm1961_vm2, %v1973_v16, %v1975_v20  ;;  %v1091_v31 = vunpack.c.h.bf16 %v14111_v18  ;;  %v1092_v35 = vunpack.c.l.bf16 %v1041_v23  ;;  %16742 = vst [vmem:[#allocation15_spill] sm:$0xff] %v14146_v46  ;;  %v1050_v4 = vld [vmem:[%s14046_s6 + $0x5c] sm:$0x1]  ;;  %v14166_v7 = vld [vmem:[%s14046_s6 + $0x60] sm:$0xff]  }
  0x60   : > { %11592 = vmatmul.mubr.msk.bf16.vlgmr.msra.gmra.mrb[0].mxu1 %vm1487_vm1, %v14115_v19  ;;  %11290 = vmatmul.mubr.msk.bf16.gmra.mrb[4].mxu0 %vm1487_vm1, %v14073_v54  ;;  %v1980_v28 = vrot.slane %v1089_v21, 1  ;;  %v14134_v33 = vpack.c.bf16 %v1976_v27, %v1974_v25  ;;  %v1093_v36 = vunpack.c.l.bf16 %v14119_v24  ;;  %v1982_v39 = vrot.slane %v1090_v30, 1  ;;  %16744 = vst [vmem:[#allocation17_spill] sm:$0xff] %v14160_v1  ;;  %16746 = vst [vmem:[#allocation19_spill] sm:$0xff] %v14166_v7  ;;  %v14173_v8 = vld [vmem:[%s14046_s6 + $0x120] sm:$0xff]   ;;  %v14185_v20 = vld [vmem:[%s14046_s6 + $0x12c] sm:$0xff]  }
  0x61   : > { %11624 = vmatpush3.bf16.msra.mxu1 %v14062_v48  ;;  %v1979_v34 = vsel %vm1961_vm2, %v1977_v22, %v1978_v26  ;;  %11293 = vmatprep.mubr.msk.bf16.mxu0 %vm1487_vm1, %v14105_v13  ;;  %v1983_v40 = vrot.slane %v1091_v31, 1  ;;  %v1094_v42 = vunpack.c.h.bf16 %v14119_v24  ;;  %v1985_v50 = vrot.slane %v1092_v35, 1  ;;  %16747 = vst [vmem:[#allocation20_spill] sm:$0xff] %v14173_v8  ;;  %v1053_v14 = vld [vmem:[%s14046_s6 + $0x68] sm:$0x1]  ;;  %16748 = vst [vmem:[#allocation21_spill] sm:$0xff] %v14185_v20 }
  0x62   : > { %16740 = vst [vmem:[#allocation13_spill] sm:$0xff] %v14134_v33  ;;  %v1981_v38 = vsel %vm1961_vm2, %v1978_v26, %v1980_v28  ;;  %13542 = vmatprep.subr.msk.bf16.mxu1 %vm1536_vm0, %v14081_v56  ;;  %11595 = vmatprep.mubr.msk.bf16.mxu1 %vm1487_vm1, %v14134_v33  ;;  %v1095_v51 = vunpack.c.l.bf16 %v1044_v32  ;;  %v1987_v58 = vrot.slane %v1093_v36, 1  ;;  %v1096_v62 = vunpack.c.l.bf16 %v14146_v46  ;;  %v14196_v36 = vld [vmem:[%s14046_s6 + $0x6c] sm:$0xff]  }
  0x63   : > { %v14152_v49 = vpack.c.bf16 %v1981_v38, %v1979_v34  ;;  %v1984_v57 = vsel %vm1961_vm2, %v1982_v39, %v1983_v40  ;;  %v1988_v59 = vrot.slane %v1094_v42, 1  ;;  %v1986_v60 = vsel %vm1961_vm2, %v1983_v40, %v1985_v50  ;;  %16751 = vst [vmem:[#allocation24_spill] sm:$0xff] %v14196_v36  ;;  %v1056_v39 = vld [vmem:[%s14046_s6 + $0x74] sm:$0x1]  ;;  %v14200_v40 = vld [vmem:[%s14046_s6 + $0x78] sm:$0xff]  }
  0x64   : > { %v1990_v61 = vrot.slane %v1095_v51, 1  ;;  %v1097_v63 = vunpack.c.h.bf16 %v14146_v46  ;;  %v14162_v2 = vpack.c.bf16 %v1986_v60, %v1984_v57  ;;  %v1098_v3 = vunpack.c.l.bf16 %v1047_v53  ;;  %16752 = vst [vmem:[#allocation25_spill] sm:$0xff] %v14200_v40  ;;  %v1059_v42 = vld [vmem:[%s14046_s6 + $0x80] sm:$0x1] }
  0x65   : > { %16743 = vst [vmem:[#allocation16_spill] sm:$0xff] %v14152_v49  ;;  %v1992_v5 = vrot.slane %v1096_v62, 1  ;;  %v1099_v11 = vunpack.c.l.bf16 %v14160_v1  ;;  %v1100_v12 = vunpack.c.h.bf16 %v14160_v1  ;;  %v1989_v15 = vsel %vm1961_vm2, %v1987_v58, %v1988_v59  ;;  %v14216_v58 = vld [vmem:[%s14046_s6 + $0x138] sm:$0xff]   ;;  %v14221_v62 = vld [vmem:[%s14046_s6 + $0x144] sm:$0xff]  }
  0x66   : > { %16745 = vst [vmem:[#allocation18_spill] sm:$0xff] %v14162_v2  ;;  %v1993_v6 = vrot.slane %v1097_v63, 1  ;;  %v1995_v10 = vrot.slane %v1098_v3, 1  ;;  %v1991_v16 = vsel %vm1961_vm2, %v1988_v59, %v1990_v61  ;;  %v1101_v17 = vunpack.c.l.bf16 %v1050_v4  ;;  %16753 = vst [vmem:[#allocation26_spill] sm:$0xff] %v14216_v58 }
  0x67   : > { %v1102_v23 = vunpack.c.l.bf16 %v14166_v7  ;;  %v1103_v25 = vunpack.c.h.bf16 %v14166_v7  ;;  %v1104_v26 = vunpack.c.l.bf16 %v1053_v14  ;;  %v14191_v27 = vpack.c.bf16 %v1991_v16, %v1989_v15  ;;  %16754 = vst [vmem:[#allocation27_spill] sm:$0xff] %v14221_v62  ;;  %v14230_v14 = vld [vmem:[%s14046_s6 + $0x84] sm:$0xff]  }
  0x68   : > { %11596 = vmatmul.mubr.msk.bf16.gmra.mrb[4].mxu1 %vm1487_vm1, %v14152_v49  ;;  %11294 = vmatmul.mubr.msk.bf16.gmra.mrb[8].mxu0 %vm1487_vm1, %v14128_v29  ;;  %v1994_v21 = vsel %vm1961_vm2, %v1992_v5, %v1993_v6  ;;  %v1996_v22 = vsel %vm1961_vm2, %v1993_v6, %v1995_v10  ;;  %v1997_v28 = vrot.slane %v1099_v11, 1  ;;  %v1998_v30 = vrot.slane %v1100_v12, 1  ;;  %16757 = vst [vmem:[#allocation30_spill] sm:$0xff] %v14230_v14 }
  0x69   : > { %11599 = vmatprep.mubr.msk.bf16.mxu1 %vm1487_vm1, %v14162_v2  ;;  %11297 = vmatprep.mubr.msk.bf16.mxu0 %vm1487_vm1, %v14141_v37  ;;  %16749 = vst [vmem:[#allocation22_spill] sm:$0xff] %v14191_v27  ;;  %v14193_v31 = vpack.c.bf16 %v1996_v22, %v1994_v21  ;;  %v2000_v32 = vrot.slane %v1101_v17, 1  ;;  %v2002_v34 = vrot.slane %v1102_v23, 1  ;;  %v2003_v35 = vrot.slane %v1103_v25, 1  ;;  %v1062_v21 = vld [vmem:[%s14046_s6 + $0x8c] sm:$0x1] }
  0x6a   : > { %v2005_v38 = vrot.slane %v1104_v26, 1  ;;  %v1105_v50 = vunpack.c.l.bf16 %v14196_v36  ;;  %v1106_v51 = vunpack.c.h.bf16 %v14196_v36  ;;  %v1999_v53 = vsel %vm1961_vm2, %v1997_v28, %v1998_v30  ;;  %v14234_v22 = vld [vmem:[%s14046_s6 + $0x90] sm:$0xff]   ;;  %v1065_v23 = vld [vmem:[%s14046_s6 + $0x98] sm:$0x1] }
  0x6b   : > { %16750 = vst [vmem:[#allocation23_spill] sm:$0xff] %v14193_v31  ;;  %v2001_v57 = vsel %vm1961_vm2, %v1998_v30, %v2000_v32  ;;  %v2004_v59 = vsel %vm1961_vm2, %v2002_v34, %v2003_v35  ;;  %v1107_v60 = vunpack.c.l.bf16 %v1056_v39  ;;  %v1108_v63 = vunpack.c.l.bf16 %v14200_v40  ;;  %16758 = vst [vmem:[#allocation31_spill] sm:$0xff] %v14234_v22  ;;  %v14243_v26 = vld [vmem:[%s14046_s6 + $0x150] sm:$0xff]  }
  0x6c   : > { %v2006_v61 = vsel %vm1961_vm2, %v2003_v35, %v2005_v38  ;;  %v1109_v3 = vunpack.c.h.bf16 %v14200_v40  ;;  %v1110_v4 = vunpack.c.l.bf16 %v1059_v42  ;;  %v14225_v5 = vpack.c.bf16 %v2001_v57, %v1999_v53  ;;  %16759 = vst [vmem:[#allocation32_spill] sm:$0xff] %v14243_v26  ;;  %v14253_v35 = vld [vmem:[%s14046_s6 + $0x15c] sm:$0xff]  }
  0x6d   : > { %v2007_v6 = vrot.slane %v1105_v50, 1  ;;  %v2008_v10 = vrot.slane %v1106_v51, 1  ;;  %v14227_v11 = vpack.c.bf16 %v2006_v61, %v2004_v59  ;;  %v2010_v12 = vrot.slane %v1107_v60, 1  ;;  %16760 = vst [vmem:[#allocation33_spill] sm:$0xff] %v14253_v35 }
  0x6e   : > { %16755 = vst [vmem:[#allocation28_spill] sm:$0xff] %v14225_v5  ;;  %v2012_v15 = vrot.slane %v1108_v63, 1  ;;  %v2013_v16 = vrot.slane %v1109_v3, 1  ;;  %v2015_v17 = vrot.slane %v1110_v4, 1  ;;  %v1111_v28 = vunpack.c.l.bf16 %v14230_v14  ;;  %v14264_v4 = vld [vmem:[%s14046_s6 + $0x9c] sm:$0xff]  }
  0x6f   : > { %16756 = vst [vmem:[#allocation29_spill] sm:$0xff] %v14227_v11  ;;  %v2009_v25 = vsel %vm1961_vm2, %v2007_v6, %v2008_v10  ;;  %v1112_v30 = vunpack.c.h.bf16 %v14230_v14  ;;  %v2011_v32 = vsel %vm1961_vm2, %v2008_v10, %v2010_v12  ;;  %v1113_v34 = vunpack.c.l.bf16 %v1062_v21  ;;  %16763 = vst [vmem:[#allocation36_spill] sm:$0xff] %v14264_v4  ;;  %v1068_v10 = vld [vmem:[%s14046_s6 + $0xa4] sm:$0x1]  ;;  %v14268_v12 = vld [vmem:[%s14046_s6 + $0xa8] sm:$0xff]  }
  0x70   : > { %11600 = vmatmul.mubr.msk.bf16.gmra.mrb[8].mxu1 %vm1487_vm1, %v14191_v27  ;;  %11298 = vmatmul.mubr.msk.bf16.gmra.mrb[12].mxu0 %vm1487_vm1, %v14173_v8  ;;  %v1114_v38 = vunpack.c.l.bf16 %v14234_v22  ;;  %v1115_v39 = vunpack.c.h.bf16 %v14234_v22  ;;  %v2014_v42 = vsel %vm1961_vm2, %v2012_v15, %v2013_v16  ;;  %v2016_v50 = vsel %vm1961_vm2, %v2013_v16, %v2015_v17  ;;  %16764 = vst [vmem:[#allocation37_spill] sm:$0xff] %v14268_v12  ;;  %v1071_v15 = vld [vmem:[%s14046_s6 + $0xb0] sm:$0x1] }
  0x71   : > { %11603 = vmatprep.mubr.msk.bf16.mxu1 %vm1487_vm1, %v14193_v31  ;;  %11301 = vmatprep.mubr.msk.bf16.mxu0 %vm1487_vm1, %v14185_v20  ;;  %v1116_v51 = vunpack.c.l.bf16 %v1065_v23  ;;  %v14259_v53 = vpack.c.bf16 %v2011_v32, %v2009_v25  ;;  %v2017_v57 = vrot.slane %v1111_v28, 1  ;;  %v2018_v59 = vrot.slane %v1112_v30, 1  ;;  %v14283_v23 = vld [vmem:[%s14046_s6 + $0x168] sm:$0xff]  }
  0x72   : > { %v14261_v60 = vpack.c.bf16 %v2016_v50, %v2014_v42  ;;  %v2020_v61 = vrot.slane %v1113_v34, 1  ;;  %v2022_v63 = vrot.slane %v1114_v38, 1  ;;  %v2023_v3 = vrot.slane %v1115_v39, 1  ;;  %16765 = vst [vmem:[#allocation38_spill] sm:$0xff] %v14283_v23  ;;  %v14289_v34 = vld [vmem:[%s14046_s6 + $0x174] sm:$0xff]  }
  0x73   : > { %16761 = vst [vmem:[#allocation34_spill] sm:$0xff] %v14259_v53  ;;  %v2025_v6 = vrot.slane %v1116_v51, 1  ;;  %v2019_v16 = vsel %vm1961_vm2, %v2017_v57, %v2018_v59  ;;  %v1117_v17 = vunpack.c.l.bf16 %v14264_v4  ;;  %v1118_v28 = vunpack.c.h.bf16 %v14264_v4  ;;  %16766 = vst [vmem:[#allocation39_spill] sm:$0xff] %v14289_v34 }
  0x74   : > { %16762 = vst [vmem:[#allocation35_spill] sm:$0xff] %v14261_v60  ;;  %v2021_v21 = vsel %vm1961_vm2, %v2018_v59, %v2020_v61  ;;  %v2024_v25 = vsel %vm1961_vm2, %v2022_v63, %v2023_v3  ;;  %v1119_v30 = vunpack.c.l.bf16 %v1068_v10  ;;  %v1120_v38 = vunpack.c.l.bf16 %v14268_v12  ;;  %v14298_v63 = vld [vmem:[%s14046_s6 + $0xb4] sm:$0xff]  }
  0x75   : > { %v2026_v32 = vsel %vm1961_vm2, %v2023_v3, %v2025_v6  ;;  %v1121_v39 = vunpack.c.h.bf16 %v14268_v12  ;;  %v1122_v42 = vunpack.c.l.bf16 %v1071_v15  ;;  %v14293_v50 = vpack.c.bf16 %v2021_v21, %v2019_v16  ;;  %16769 = vst [vmem:[#allocation42_spill] sm:$0xff] %v14298_v63  ;;  %v1074_v6 = vld [vmem:[%s14046_s6 + $0xbc] sm:$0x1]  ;;  %v14313_v21 = vld [vmem:[%s14046_s6 + $0x180] sm:$0xff]  }
  0x76   : > { %v2027_v51 = vrot.slane %v1117_v17, 1  ;;  %v14295_v57 = vpack.c.bf16 %v2026_v32, %v2024_v25  ;;  %v2028_v59 = vrot.slane %v1118_v28, 1  ;;  %v2030_v61 = vrot.slane %v1119_v30, 1  ;;  %16770 = vst [vmem:[#allocation43_spill] sm:$0xff] %v14313_v21 }
  0x77   : > { %16767 = vst [vmem:[#allocation40_spill] sm:$0xff] %v14293_v50  ;;  %v2032_v10 = vrot.slane %v1120_v38, 1  ;;  %v2033_v48 = vrot.slane %v1121_v39, 1  ;;  %v2035_v3 = vrot.slane %v1122_v42, 1  ;;  %v1123_v15 = vunpack.c.l.bf16 %v14298_v63 }
  0x78   : > { %11604 = vmatmul.mubr.msk.bf16.gmra.mrb[12].mxu1 %vm1487_vm1, %v14225_v5  ;;  %11302 = vmatmul.mubr.msk.bf16.gmra.mrb[16].mxu0 %vm1487_vm1, %v14216_v58  ;;  %16768 = vst [vmem:[#allocation41_spill] sm:$0xff] %v14295_v57  ;;  %v2029_v16 = vsel %vm1961_vm2, %v2027_v51, %v2028_v59  ;;  %v2031_v17 = vsel %vm1961_vm2, %v2028_v59, %v2030_v61  ;;  %v1124_v25 = vunpack.c.h.bf16 %v14298_v63  ;;  %v1125_v28 = vunpack.c.l.bf16 %v1074_v6 }
  0x79   : > { %11607 = vmatprep.mubr.msk.bf16.mxu1 %vm1487_vm1, %v14227_v11  ;;  %11305 = vmatprep.mubr.msk.bf16.mxu0 %vm1487_vm1, %v14221_v62  ;;  %v2034_v30 = vsel %vm1961_vm2, %v2032_v10, %v2033_v48  ;;  %v2036_v32 = vsel %vm1961_vm2, %v2033_v48, %v2035_v3  ;;  %v14318_v38 = vpack.c.bf16 %v2031_v17, %v2029_v16  ;;  %v2037_v39 = vrot.slane %v1123_v15, 1  ;;  %v9954_v3 = vld [vmem:[%s16439_s1 + $0xc] sm:$0xf] }
  0x7a   : > { %v14320_v42 = vpack.c.bf16 %v2036_v32, %v2034_v30  ;;  %v2038_v51 = vrot.slane %v1124_v25, 1  ;;  %v2040_v41 = vrot.slane %v1125_v28, 1  ;;  %v14336_v10 = vsel %vm1536_vm0, %v14081_v56, 0  ;;  %v9804_v25 = vld [vmem:[%s14046_s6 + $0xe0] sm:$0x1] }
  0x7b   : > { %16771 = vst [vmem:[#allocation44_spill] sm:$0xff] %v14318_v38  ;;  %16774 = vst [vmem:[#allocation47_spill] sm:$0xff] %v14336_v10  ;;  %v1182_v56 = vunpack.c.h.bf16 %v14049_v43  ;;  %v9807_v28 = vld [vmem:[%s14046_s6 + $0xec] sm:$0x1]  ;;  %v1184_v30 = vunpack.c.l.bf16 %v14052_v44  ;;  %v1185_v32 = vunpack.c.h.bf16 %v14052_v44 }
  0x7c   : > { %16772 = vst [vmem:[#allocation45_spill] sm:$0xff] %v14320_v42  ;;  %v2039_v59 = vsel %vm1961_vm2, %v2037_v39, %v2038_v51  ;;  %v2041_v48 = vsel %vm1961_vm2, %v2038_v51, %v2040_v41  ;;  %v9801_v41 = vld [vmem:[%s14046_s6 + $0xd4] sm:$0x1]  ;;  %v1187_v39 = vunpack.c.l.bf16 %v14068_v52  ;;  %v1188_v51 = vunpack.c.h.bf16 %v14068_v52 }
  0x7d   : > { %v14332_v61 = vpack.c.bf16 %v2041_v48, %v2039_v59  ;;  %v1183_v6 = vunpack.c.l.bf16 %v9801_v41  ;;  %v4255_v16 = vrot.slane %v1182_v56, 1  ;;  %v1189_v41 = vunpack.c.l.bf16 %v9807_v28 }
  0x7e   : > { %v4260_v56 = vrot.slane %v1185_v32, 1 }
  0x7f   : > { %16773 = vst [vmem:[#allocation46_spill] sm:$0xff] %v14332_v61  ;;  %v4257_v17 = vrot.slane %v1183_v6, 1 }
  0x80   : > { %11608 = vmatmul.mubr.msk.bf16.gmra.mrb[16].mxu1 %vm1487_vm1, %v14259_v53  ;;  %11306 = vmatmul.mubr.msk.bf16.gmra.mrb[20].mxu0 %vm1487_vm1, %v14243_v26 }
  0x81   : > { %11611 = vmatprep.mubr.msk.bf16.mxu1 %vm1487_vm1, %v14261_v60  ;;  %11309 = vmatprep.mubr.msk.bf16.mxu0 %vm1487_vm1, %v14253_v35  ;;  %v4258_v48 = vsel %vm1961_vm2, %v4255_v16, %v4257_v17 }
  0x88   : > { %11612 = vmatmul.mubr.msk.bf16.gmra.mrb[20].mxu1 %vm1487_vm1, %v14293_v50  ;;  %11310 = vmatmul.mubr.msk.bf16.gmra.mrb[24].mxu0 %vm1487_vm1, %v14283_v23 }
  0x89   : > { %11615 = vmatprep.mubr.msk.bf16.mxu1 %vm1487_vm1, %v14295_v57  ;;  %11313 = vmatprep.mubr.msk.bf16.mxu0 %vm1487_vm1, %v14289_v34 }
  0x90   : > { %11616 = vmatmul.mubr.msk.bf16.gmra.mrb[24].mxu1 %vm1487_vm1, %v14318_v38  ;;  %11314 = vmatmul.mubr.msk.bf16.gmra.mrb[28].mxu0 %vm1487_vm1, %v14313_v21 }
  0x91   : > { %11619 = vmatprep.mubr.msk.bf16.mxu1 %vm1487_vm1, %v14320_v42  ;;  %11319 = vmatprep.mubr.msk.bf16.mxu0 %vm1487_vm1, %v14055_v45  ;;  %v1181_v45 = vunpack.c.l.bf16 %v14049_v43 }
  0x93   : > { %v4254_v15 = vrot.slane %v1181_v45, 1  ;;  %v4259_v45 = vrot.slane %v1184_v30, 1 }
  0x95   : > { %v4256_v59 = vsel %vm1961_vm2, %v4254_v15, %v4255_v16  ;;  %v1190_v15 = vunpack.c.l.bf16 %v14073_v54  ;;  %v1191_v16 = vunpack.c.h.bf16 %v14073_v54 }
  0x96   : > { %v4366_v6 = vpack.c.bf16 %v4258_v48, %v4256_v59 }
  0x97   : > { %v4270_v48 = vrot.slane %v1191_v16, 1 }
  0x98   : > { %11620 = vmatmul.mubr.msk.bf16.gmra.mrb[28].mxu1 %vm1487_vm1, %v14332_v61  ;;  %11320 = vmatmul.mubr.msk.bf16.vlgmr.msra.gmra.mrb[0].mxu0 %vm1487_vm1, %v14059_v47 }
  0x99   : > { %11352 = vmatpush3.bf16.msra.mxu0 %v14336_v10  ;;  %11625 = vmatprep.mubr.msk.bf16.mxu1 %vm1487_vm1, %v14049_v43  ;;  %v1186_v43 = vunpack.c.l.bf16 %v9804_v25  ;;  %v9810_v25 = vld [vmem:[%s14046_s6 + $0xf8] sm:$0x1] }
  0x9a   : > { %11323 = vmatprep.mubr.msk.bf16.mxu0 %vm1487_vm1, %v14076_v55  ;;  %13534 = vmatprep.subr.msk.bf16.mxu0 %vm1536_vm0, %v9954_v3  ;;  %v1192_v30 = vunpack.c.l.bf16 %v9810_v25 }
  0xa0   : > { %11626 = vmatmul.mubr.msk.bf16.vlgmr.msra.gmra.mrb[0].mxu1 %vm1487_vm1, %v14052_v44  ;;  %11324 = vmatmul.mubr.msk.bf16.gmra.mrb[4].mxu0 %vm1487_vm1, %v14090_v0 }
  0xa1   : > { %11658 = vmatpush3.bf16.msra.mxu1 %v14336_v10  ;;  %11629 = vmatprep.mubr.msk.bf16.mxu1 %vm1487_vm1, %v14068_v52  ;;  %v4262_v10 = vrot.slane %v1186_v43, 1  ;;  %v1193_v43 = vunpack.c.l.bf16 %v14105_v13 }
  0xa2   : > { %11327 = vmatprep.mubr.msk.bf16.mxu0 %vm1487_vm1, %v14111_v18  ;;  %13543 = vmatprep.subr.msk.bf16.mxu1 %vm1536_vm0, %v9954_v3 }
  0xa3   : > { %v4263_v17 = vsel %vm1961_vm2, %v4260_v56, %v4262_v10  ;;  %v4269_v10 = vrot.slane %v1190_v15, 1  ;;  %v1197_v15 = vunpack.c.h.bf16 %v14128_v29 }
  0xa8   : > { %11630 = vmatmul.mubr.msk.bf16.gmra.mrb[4].mxu1 %vm1487_vm1, %v14073_v54  ;;  %11328 = vmatmul.mubr.msk.bf16.gmra.mrb[8].mxu0 %vm1487_vm1, %v14119_v24 }
  0xa9   : > { %11633 = vmatprep.mubr.msk.bf16.mxu1 %vm1487_vm1, %v14105_v13  ;;  %11331 = vmatprep.mubr.msk.bf16.mxu0 %vm1487_vm1, %v14146_v46 }
  0xb0   : > { %11634 = vmatmul.mubr.msk.bf16.gmra.mrb[8].mxu1 %vm1487_vm1, %v14128_v29  ;;  %11332 = vmatmul.mubr.msk.bf16.gmra.mrb[12].mxu0 %vm1487_vm1, %v14160_v1 }
  0xb1   : > { %11637 = vmatprep.mubr.msk.bf16.mxu1 %vm1487_vm1, %v14141_v37  ;;  %11335 = vmatprep.mubr.msk.bf16.mxu0 %vm1487_vm1, %v14166_v7 }
  0xb8   : > { %11638 = vmatmul.mubr.msk.bf16.gmra.mrb[12].mxu1 %vm1487_vm1, %v14173_v8  ;;  %11336 = vmatmul.mubr.msk.bf16.gmra.mrb[16].mxu0 %vm1487_vm1, %v14196_v36 }
  0xb9   : > { %11641 = vmatprep.mubr.msk.bf16.mxu1 %vm1487_vm1, %v14185_v20  ;;  %11339 = vmatprep.mubr.msk.bf16.mxu0 %vm1487_vm1, %v14200_v40  ;;  %v9861_v40 = vld [vmem:[%s14046_s6 + $0x1c4] sm:$0x1] }
  0xc0   : > { %11642 = vmatmul.mubr.msk.bf16.gmra.mrb[16].mxu1 %vm1487_vm1, %v14216_v58  ;;  %11340 = vmatmul.mubr.msk.bf16.gmra.mrb[20].mxu0 %vm1487_vm1, %v14230_v14  ;;  %v14428_v14 = vld [vmem:[%s16439_s1 + $0x10] sm:$0xf] }
  0xc1   : > { %11645 = vmatprep.mubr.msk.bf16.mxu1 %vm1487_vm1, %v14221_v62  ;;  %11343 = vmatprep.mubr.msk.bf16.mxu0 %vm1487_vm1, %v14234_v22  ;;  %v9813_v22 = vld [vmem:[%s14046_s6 + $0x104] sm:$0x1] }
  0xc8   : > { %11646 = vmatmul.mubr.msk.bf16.gmra.mrb[20].mxu1 %vm1487_vm1, %v14243_v26  ;;  %11344 = vmatmul.mubr.msk.bf16.gmra.mrb[24].mxu0 %vm1487_vm1, %v14264_v4  ;;  %v14421_v4 = vsel %vm1536_vm0, %v9954_v3, 0  ;;  %v4261_v3 = vsel %vm1961_vm2, %v4259_v45, %v4260_v56  ;;  %v9816_v45 = vld [vmem:[%s14046_s6 + $0x110] sm:$0x1]  ;;  %v4274_v56 = vrot.slane %v1193_v43, 1 }
  0xc9   : > { %11649 = vmatprep.mubr.msk.bf16.mxu1 %vm1487_vm1, %v14253_v35  ;;  %11347 = vmatprep.mubr.msk.bf16.mxu0 %vm1487_vm1, %v14268_v12  ;;  %v4265_v12 = vrot.slane %v1188_v51, 1  ;;  %16775 = vst [vmem:[#allocation48_spill] sm:$0xff] %v14421_v4  ;;  %v1195_v51 = vunpack.c.l.bf16 %v9813_v22  ;;  %v14448_v59 = vpack.c.bf16 %v4263_v17, %v4261_v3  ;;  %v4271_v22 = vsel %vm1961_vm2, %v4269_v10, %v4270_v48 }
  0xca   : > { %v1198_v16 = vunpack.c.l.bf16 %v9816_v45  ;;  %v1199_v17 = vunpack.c.l.bf16 %v14141_v37  ;;  %v4280_v10 = vrot.slane %v1197_v15, 1 }
  0xcb   : > { %16776 = vst [vmem:[#allocation49_spill] sm:$0xff] %v14448_v59  ;;  %v4277_v25 = vrot.slane %v1195_v51, 1 }
  0xcc   : > { %v4284_v45 = vrot.slane %v1199_v17, 1 }
  0xd0   : > { %11650 = vmatmul.mubr.msk.bf16.gmra.mrb[24].mxu1 %vm1487_vm1, %v14283_v23  ;;  %11348 = vmatmul.mubr.msk.bf16.gmra.mrb[28].mxu0 %vm1487_vm1, %v14298_v63  ;;  %v4264_v63 = vrot.slane %v1187_v39, 1  ;;  %v1194_v39 = vunpack.c.h.bf16 %v14105_v13 }
  0xd1   : > { %11653 = vmatprep.mubr.msk.bf16.mxu1 %vm1487_vm1, %v14289_v34  ;;  %11353 = vmatprep.mubr.msk.bf16.mxu0 %vm1487_vm1, %v14101_v9  ;;  %v4267_v9 = vrot.slane %v1189_v41, 1  ;;  %v4272_v41 = vrot.slane %v1192_v30, 1 }
  0xd2   : > { %v4266_v28 = vsel %vm1961_vm2, %v4264_v63, %v4265_v12 }
  0xd3   : > { %v4268_v32 = vsel %vm1961_vm2, %v4265_v12, %v4267_v9  ;;  %v9819_v12 = vld [vmem:[%s14046_s6 + $0x11c] sm:$0x1]  ;;  %v1196_v9 = vunpack.c.l.bf16 %v14128_v29  ;;  %v4273_v3 = vsel %vm1961_vm2, %v4270_v48, %v4272_v41  ;;  %v4282_v48 = vrot.slane %v1198_v16, 1 }
  0xd4   : > { %v14450_v63 = vpack.c.bf16 %v4268_v32, %v4266_v28  ;;  %v1200_v28 = vunpack.c.h.bf16 %v14141_v37  ;;  %v1201_v30 = vunpack.c.l.bf16 %v9819_v12  ;;  %v1205_v16 = vunpack.c.l.bf16 %v14185_v20 }
  0xd5   : > { %v4279_v51 = vrot.slane %v1196_v9, 1 }
  0xd6   : > { %16777 = vst [vmem:[#allocation50_spill] sm:$0xff] %v14450_v63  ;;  %v4287_v12 = vrot.slane %v1201_v30, 1 }
  0xd8   : > { %11654 = vmatmul.mubr.msk.bf16.gmra.mrb[28].mxu1 %vm1487_vm1, %v14313_v21  ;;  %11354 = vmatmul.mubr.msk.bf16.vlgmr.msra.gmra.mrb[0].mxu0 %vm1487_vm1, %v14115_v19 }
  0xd9   : > { %11386 = vmatpush3.bf16.msra.mxu0 %v14421_v4  ;;  %11659 = vmatprep.mubr.msk.bf16.mxu1 %vm1487_vm1, %v4366_v6  ;;  %v4275_v6 = vrot.slane %v1194_v39, 1  ;;  %v14473_v39 = vpack.c.bf16 %v4273_v3, %v4271_v22  ;;  %v1206_v3 = vunpack.c.h.bf16 %v14185_v20 }
  0xda   : > { %11357 = vmatprep.mubr.msk.bf16.mxu0 %vm1487_vm1, %v14134_v33  ;;  %13535 = vmatprep.subr.msk.bf16.mxu0 %vm1536_vm0, %v14428_v14 }
  0xdb   : > { %v4276_v32 = vsel %vm1961_vm2, %v4274_v56, %v4275_v6  ;;  %v4278_v43 = vsel %vm1961_vm2, %v4275_v6, %v4277_v25  ;;  %16778 = vst [vmem:[#allocation51_spill] sm:$0xff] %v14473_v39  ;;  %v4281_v56 = vsel %vm1961_vm2, %v4279_v51, %v4280_v10  ;;  %v4283_v6 = vsel %vm1961_vm2, %v4280_v10, %v4282_v48 }
  0xdc   : > { %v14475_v41 = vpack.c.bf16 %v4278_v43, %v4276_v32  ;;  %v1203_v25 = vunpack.c.h.bf16 %v14173_v8  ;;  %v4294_v51 = vrot.slane %v1205_v16, 1  ;;  %v4295_v10 = vrot.slane %v1206_v3, 1 }
  0xde   : > { %16779 = vst [vmem:[#allocation52_spill] sm:$0xff] %v14475_v41  ;;  %v4290_v32 = vrot.slane %v1203_v25, 1  ;;  %v1211_v25 = vunpack.c.l.bf16 %v14221_v62 }
  0xe0   : > { %11660 = vmatmul.mubr.msk.bf16.vlgmr.msra.gmra.mrb[0].mxu1 %vm1487_vm1, %v14448_v59  ;;  %11358 = vmatmul.mubr.msk.bf16.gmra.mrb[4].mxu0 %vm1487_vm1, %v14152_v49  ;;  %v1202_v59 = vunpack.c.l.bf16 %v14173_v8 }
  0xe1   : > { %11692 = vmatpush3.bf16.msra.mxu1 %v14421_v4  ;;  %11663 = vmatprep.mubr.msk.bf16.mxu1 %vm1487_vm1, %v14450_v63  ;;  %v4285_v4 = vrot.slane %v1200_v28, 1  ;;  %v9822_v63 = vld [vmem:[%s14046_s6 + $0x128] sm:$0x1]  ;;  %v14495_v28 = vpack.c.bf16 %v4283_v6, %v4281_v56 }
  0xe2   : > { %11361 = vmatprep.mubr.msk.bf16.mxu0 %vm1487_vm1, %v14162_v2  ;;  %13544 = vmatprep.subr.msk.bf16.mxu1 %vm1536_vm0, %v14428_v14  ;;  %v9825_v2 = vld [vmem:[%s14046_s6 + $0x134] sm:$0x1]  ;;  %v1204_v22 = vunpack.c.l.bf16 %v9822_v63  ;;  %v4289_v30 = vrot.slane %v1202_v59, 1 }
  0xe3   : > { %v4286_v9 = vsel %vm1961_vm2, %v4284_v45, %v4285_v4  ;;  %v4288_v15 = vsel %vm1961_vm2, %v4285_v4, %v4287_v12  ;;  %v1207_v17 = vunpack.c.l.bf16 %v9825_v2  ;;  %16780 = vst [vmem:[#allocation53_spill] sm:$0xff] %v14495_v28  ;;  %v1208_v2 = vunpack.c.l.bf16 %v14216_v58 }
  0xe4   : > { %v14497_v63 = vpack.c.bf16 %v4288_v15, %v4286_v9  ;;  %v4292_v43 = vrot.slane %v1204_v22, 1  ;;  %v1209_v4 = vunpack.c.h.bf16 %v14216_v58  ;;  %v4291_v59 = vsel %vm1961_vm2, %v4289_v30, %v4290_v32 }
  0xe5   : > { %v4297_v48 = vrot.slane %v1207_v17, 1  ;;  %v4296_v12 = vsel %vm1961_vm2, %v4294_v51, %v4295_v10  ;;  %v1212_v22 = vunpack.c.h.bf16 %v14221_v62  ;;  %v4299_v16 = vrot.slane %v1208_v2, 1  ;;  %v9837_v51 = vld [vmem:[%s14046_s6 + $0x164] sm:$0x1] }
  0xe6   : > { %16781 = vst [vmem:[#allocation54_spill] sm:$0xff] %v14497_v63  ;;  %v4293_v45 = vsel %vm1961_vm2, %v4290_v32, %v4292_v43  ;;  %v4300_v3 = vrot.slane %v1209_v4, 1  ;;  %v4304_v32 = vrot.slane %v1211_v25, 1  ;;  %v1217_v4 = vunpack.c.l.bf16 %v14253_v35 }
  0xe7   : > { %v4298_v6 = vsel %vm1961_vm2, %v4295_v10, %v4297_v48  ;;  %v14517_v15 = vpack.c.bf16 %v4293_v45, %v4291_v59  ;;  %v4305_v43 = vrot.slane %v1212_v22, 1  ;;  %v1215_v10 = vunpack.c.h.bf16 %v14243_v26 }
  0xe8   : > { %11664 = vmatmul.mubr.msk.bf16.gmra.mrb[4].mxu1 %vm1487_vm1, %v14473_v39  ;;  %11362 = vmatmul.mubr.msk.bf16.gmra.mrb[8].mxu0 %vm1487_vm1, %v14191_v27  ;;  %v9831_v39 = vld [vmem:[%s14046_s6 + $0x14c] sm:$0x1]  ;;  %v14519_v17 = vpack.c.bf16 %v4298_v6, %v4296_v12  ;;  %v1218_v59 = vunpack.c.h.bf16 %v14253_v35 }
  0xe9   : > { %11667 = vmatprep.mubr.msk.bf16.mxu1 %vm1487_vm1, %v14475_v41  ;;  %11365 = vmatprep.mubr.msk.bf16.mxu0 %vm1487_vm1, %v14193_v31  ;;  %v9828_v41 = vld [vmem:[%s14046_s6 + $0x140] sm:$0x1]  ;;  %v1213_v9 = vunpack.c.l.bf16 %v9831_v39  ;;  %16782 = vst [vmem:[#allocation55_spill] sm:$0xff] %v14517_v15  ;;  %v4301_v39 = vsel %vm1961_vm2, %v4299_v16, %v4300_v3  ;;  %v4306_v45 = vsel %vm1961_vm2, %v4304_v32, %v4305_v43  ;;  %v4310_v22 = vrot.slane %v1215_v10, 1  ;;  %v14761_v31 = vld [vmem:[%s14046_s6 + $0x30c] sm:$0xff]  }
  0xea   : > { %v1210_v56 = vunpack.c.l.bf16 %v9828_v41  ;;  %16783 = vst [vmem:[#allocation56_spill] sm:$0xff] %v14519_v17  ;;  %v1214_v41 = vunpack.c.l.bf16 %v14243_v26  ;;  %v1220_v32 = vunpack.c.l.bf16 %v14283_v23  ;;  %16811 = vst [vmem:[#allocation84_spill] sm:$0xff] %v14761_v31 }
  0xec   : > { %v4302_v30 = vrot.slane %v1210_v56, 1  ;;  %v1219_v56 = vunpack.c.l.bf16 %v9837_v51  ;;  %v4309_v25 = vrot.slane %v1214_v41, 1 }
  0xee   : > { %v4303_v48 = vsel %vm1961_vm2, %v4300_v3, %v4302_v30  ;;  %v4314_v3 = vrot.slane %v1217_v4, 1  ;;  %v4315_v30 = vrot.slane %v1218_v59, 1 }
  0xef   : > { %v14539_v6 = vpack.c.bf16 %v4303_v48, %v4301_v39  ;;  %v1221_v39 = vunpack.c.h.bf16 %v14283_v23  ;;  %v1223_v48 = vunpack.c.l.bf16 %v14289_v34 }
  0xf0   : > { %11668 = vmatmul.mubr.msk.bf16.gmra.mrb[8].mxu1 %vm1487_vm1, %v14495_v28  ;;  %11366 = vmatmul.mubr.msk.bf16.gmra.mrb[12].mxu0 %vm1487_vm1, %v14225_v5  ;;  %v9834_v28 = vld [vmem:[%s14046_s6 + $0x158] sm:$0x1]  ;;  %v4316_v51 = vsel %vm1961_vm2, %v4314_v3, %v4315_v30 }
  0xf1   : > { %11671 = vmatprep.mubr.msk.bf16.mxu1 %vm1487_vm1, %v14497_v63  ;;  %11369 = vmatprep.mubr.msk.bf16.mxu0 %vm1487_vm1, %v14227_v11  ;;  %v4307_v63 = vrot.slane %v1213_v9, 1  ;;  %v1216_v2 = vunpack.c.l.bf16 %v9834_v28  ;;  %16784 = vst [vmem:[#allocation57_spill] sm:$0xff] %v14539_v6  ;;  %v9840_v28 = vld [vmem:[%s14046_s6 + $0x170] sm:$0x1] }
  0xf2   : > { %v1222_v41 = vunpack.c.l.bf16 %v9840_v28  ;;  %v1227_v28 = vunpack.c.h.bf16 %v14313_v21 }
  0xf3   : > { %v4308_v12 = vsel %vm1961_vm2, %v4305_v43, %v4307_v63  ;;  %v4312_v16 = vrot.slane %v1216_v2, 1  ;;  %v4311_v63 = vsel %vm1961_vm2, %v4309_v25, %v4310_v22  ;;  %v1224_v2 = vunpack.c.h.bf16 %v14289_v34  ;;  %v9858_v34 = vld [vmem:[%s14046_s6 + $0x1b8] sm:$0x1] }
  0xf4   : > { %v14541_v9 = vpack.c.bf16 %v4308_v12, %v4306_v45  ;;  %v4319_v12 = vrot.slane %v1220_v32, 1  ;;  %v4322_v25 = vrot.slane %v1222_v41, 1 }
  0xf5   : > { %v4313_v43 = vsel %vm1961_vm2, %v4310_v22, %v4312_v16  ;;  %v4324_v22 = vrot.slane %v1223_v48, 1  ;;  %v4325_v16 = vrot.slane %v1224_v2, 1  ;;  %v4330_v48 = vrot.slane %v1227_v28, 1  ;;  %v14648_v28 = vld [vmem:[%s14046_s6 + $0x288] sm:$0xff]  }
  0xf6   : > { %16785 = vst [vmem:[#allocation58_spill] sm:$0xff] %v14541_v9  ;;  %v14561_v59 = vpack.c.bf16 %v4313_v43, %v4311_v63 }
  0xf7   : > { %v4326_v32 = vsel %vm1961_vm2, %v4324_v22, %v4325_v16 }
  0xf8   : > { %11672 = vmatmul.mubr.msk.bf16.gmra.mrb[12].mxu1 %vm1487_vm1, %v14517_v15  ;;  %11370 = vmatmul.mubr.msk.bf16.gmra.mrb[16].mxu0 %vm1487_vm1, %v14259_v53  ;;  %v9843_v15 = vld [vmem:[%s14046_s6 + $0x17c] sm:$0x1]  ;;  %16786 = vst [vmem:[#allocation59_spill] sm:$0xff] %v14561_v59  ;;  %v14756_v53 = vld [vmem:[%s14046_s6 + $0x24c] sm:$0xff]  }
  0xf9   : > { %11675 = vmatprep.mubr.msk.bf16.mxu1 %vm1487_vm1, %v14519_v17  ;;  %11373 = vmatprep.mubr.msk.bf16.mxu0 %vm1487_vm1, %v14261_v60  ;;  %v4317_v17 = vrot.slane %v1219_v56, 1  ;;  %v1225_v4 = vunpack.c.l.bf16 %v9843_v15  ;;  %v4320_v56 = vrot.slane %v1221_v39, 1  ;;  %v1226_v15 = vunpack.c.l.bf16 %v14313_v21  ;;  %v14751_v60 = vld [vmem:[%s14046_s6 + $0x300] sm:$0xff]   ;;  %16810 = vst [vmem:[#allocation83_spill] sm:$0xff] %v14756_v53  ;;  %v9855_v21 = vld [vmem:[%s14046_s6 + $0x1ac] sm:$0x1] }
  0xfb   : > { %v4318_v10 = vsel %vm1961_vm2, %v4315_v30, %v4317_v17  ;;  %v4327_v3 = vrot.slane %v1225_v4, 1  ;;  %v4321_v17 = vsel %vm1961_vm2, %v4319_v12, %v4320_v56  ;;  %v4323_v30 = vsel %vm1961_vm2, %v4320_v56, %v4322_v25  ;;  %v14598_v12 = vld [vmem:[%s14046_s6 + $0x1a4] sm:$0xff]   ;;  %v14604_v25 = vld [vmem:[%s14046_s6 + $0x1b0] sm:$0xff]  }
  0xfc   : > { %v14563_v45 = vpack.c.bf16 %v4318_v10, %v4316_v51  ;;  %v14581_v51 = vld [vmem:[%s14046_s6 + $0x198] sm:$0xff]   ;;  %v14583_v39 = vpack.c.bf16 %v4323_v30, %v4321_v17  ;;  %v4329_v41 = vrot.slane %v1226_v15, 1  ;;  %16791 = vst [vmem:[#allocation64_spill] sm:$0xff] %v14598_v12  ;;  %v14601_v56 = vld [vmem:[%s14046_s6 + $0x264] sm:$0xff]   ;;  %16793 = vst [vmem:[#allocation66_spill] sm:$0xff] %v14604_v25  ;;  %v1287_v23 = vunpack.c.l.bf16 %v14598_v12 }
  0xfd   : > { %v4328_v43 = vsel %vm1961_vm2, %v4325_v16, %v4327_v3  ;;  %16788 = vst [vmem:[#allocation61_spill] sm:$0xff] %v14581_v51  ;;  %16792 = vst [vmem:[#allocation65_spill] sm:$0xff] %v14601_v56  ;;  %v14610_v16 = vsel %vm1536_vm0, %v14428_v14, 0  ;;  %v14615_v3 = vld [vmem:[%s16439_s1 + $0x14] sm:$0xf]  ;;  %v14628_v15 = vld [vmem:[%s14046_s6 + $0x1bc] sm:$0xff]   ;;  %v1284_v11 = vunpack.c.l.bf16 %v14581_v51  ;;  %v1285_v5 = vunpack.c.h.bf16 %v14581_v51 }
  0xfe   : > { %16787 = vst [vmem:[#allocation60_spill] sm:$0xff] %v14563_v45  ;;  %16789 = vst [vmem:[#allocation62_spill] sm:$0xff] %v14583_v39  ;;  %v14585_v10 = vpack.c.bf16 %v4328_v43, %v4326_v32  ;;  %v14625_v14 = vld [vmem:[%s14046_s6 + $0x270] sm:$0xff]   ;;  %v14633_v17 = vld [vmem:[%s14046_s6 + $0x27c] sm:$0xff]   ;;  %v1288_v35 = vunpack.c.h.bf16 %v14598_v12  ;;  %v14787_v1 = vsel %vm1536_vm0, %v14615_v3, 0 }
  0xff   : > { %16795 = vst [vmem:[#allocation68_spill] sm:$0xff] %v14610_v16  ;;  %16796 = vst [vmem:[#allocation69_spill] sm:$0xff] %v14628_v15  ;;  %v14638_v30 = vld [vmem:[%s14046_s6 + $0x1c8] sm:$0xff]   ;;  %v14656_v32 = vld [vmem:[%s14046_s6 + $0x294] sm:$0xff]   ;;  %v2902_v49 = vrot.slane %v1284_v11, 1  ;;  %v2903_v33 = vrot.slane %v1285_v5, 1  ;;  %v1291_v11 = vunpack.c.h.bf16 %v14604_v25 }
 0x100   : > { %11676 = vmatmul.mubr.msk.bf16.gmra.mrb[16].mxu1 %vm1487_vm1, %v14539_v6  ;;  %11374 = vmatmul.mubr.msk.bf16.gmra.mrb[20].mxu0 %vm1487_vm1, %v14293_v50  ;;  %16790 = vst [vmem:[#allocation63_spill] sm:$0xff] %v14585_v10  ;;  %16797 = vst [vmem:[#allocation70_spill] sm:$0xff] %v14638_v30  ;;  %v14659_v43 = vld [vmem:[%s14046_s6 + $0x1e0] sm:$0xff]   ;;  %v14721_v6 = vld [vmem:[%s14046_s6 + $0x228] sm:$0xff]   ;;  %v2908_v58 = vrot.slane %v1288_v35, 1  ;;  %v1297_v35 = vunpack.c.h.bf16 %v14638_v30 }
 0x101   : > { %11679 = vmatprep.mubr.msk.bf16.mxu1 %vm1487_vm1, %v14541_v9  ;;  %11377 = vmatprep.mubr.msk.bf16.mxu0 %vm1487_vm1, %v14295_v57  ;;  %v9846_v9 = vld [vmem:[%s14046_s6 + $0x188] sm:$0x1]  ;;  %16799 = vst [vmem:[#allocation72_spill] sm:$0xff] %v14656_v32  ;;  %16800 = vst [vmem:[#allocation73_spill] sm:$0xff] %v14659_v43  ;;  %v14741_v57 = vld [vmem:[%s14046_s6 + $0x240] sm:$0xff]   ;;  %v2904_v26 = vsel %vm1961_vm2, %v2902_v49, %v2903_v33  ;;  %v2913_v7 = vrot.slane %v1291_v11, 1 }
 0x102   : > { %v1228_v63 = vunpack.c.l.bf16 %v9846_v9  ;;  %v4331_v9 = vsel %vm1961_vm2, %v4329_v41, %v4330_v48  ;;  %v14670_v41 = vld [vmem:[%s14046_s6 + $0x2a0] sm:$0xff]   ;;  %16806 = vst [vmem:[#allocation79_spill] sm:$0xff] %v14721_v6  ;;  %16809 = vst [vmem:[#allocation82_spill] sm:$0xff] %v14741_v57  ;;  %v14775_v5 = vld [vmem:[%s14046_s6 + $0x318] sm:$0xff]  }
 0x103   : > { %v9852_v50 = vld [vmem:[%s14046_s6 + $0x1a0] sm:$0x1]  ;;  %16812 = vst [vmem:[#allocation85_spill] sm:$0xff] %v14775_v5  ;;  %16813 = vst [vmem:[#allocation86_spill] sm:$0xff] %v14787_v1  ;;  %v14793_v49 = vld [vmem:[%s16439_s1 + $0x18] sm:$0xf] }
 0x104   : > { %v4332_v2 = vrot.slane %v1228_v63, 1  ;;  %v14651_v63 = vld [vmem:[%s14046_s6 + $0x1d4] sm:$0xff]   ;;  %v1286_v27 = vunpack.c.l.bf16 %v9852_v50  ;;  %v1292_v50 = vunpack.c.l.bf16 %v9858_v34 }
 0x105   : > { %16798 = vst [vmem:[#allocation71_spill] sm:$0xff] %v14651_v63 }
 0x106   : > { %v4333_v4 = vsel %vm1961_vm2, %v4330_v48, %v4332_v2  ;;  %v14675_v48 = vld [vmem:[%s14046_s6 + $0x1ec] sm:$0xff]   ;;  %v2905_v19 = vrot.slane %v1286_v27, 1  ;;  %v1289_v27 = vunpack.c.l.bf16 %v9855_v21  ;;  %v2915_v37 = vrot.slane %v1292_v50, 1 }
 0x107   : > { %v14606_v22 = vpack.c.bf16 %v4333_v4, %v4331_v9  ;;  %16801 = vst [vmem:[#allocation74_spill] sm:$0xff] %v14675_v48  ;;  %v14678_v2 = vld [vmem:[%s14046_s6 + $0x2ac] sm:$0xff]   ;;  %v14681_v9 = vld [vmem:[%s14046_s6 + $0x1f8] sm:$0xff]  }
 0x108   : > { %11680 = vmatmul.mubr.msk.bf16.gmra.mrb[20].mxu1 %vm1487_vm1, %v14561_v59  ;;  %11378 = vmatmul.mubr.msk.bf16.gmra.mrb[24].mxu0 %vm1487_vm1, %v14318_v38  ;;  %16802 = vst [vmem:[#allocation75_spill] sm:$0xff] %v14681_v9  ;;  %v14690_v4 = vld [vmem:[%s14046_s6 + $0x2b8] sm:$0xff]   ;;  %v2906_v62 = vsel %vm1961_vm2, %v2903_v33, %v2905_v19  ;;  %v2910_v36 = vrot.slane %v1289_v27, 1  ;;  %v9864_v21 = vld [vmem:[%s14046_s6 + $0x1d0] sm:$0x1]  ;;  %v1293_v19 = vunpack.c.l.bf16 %v14628_v15  ;;  %v1294_v33 = vunpack.c.h.bf16 %v14628_v15 }
 0x109   : > { %11683 = vmatprep.mubr.msk.bf16.mxu1 %vm1487_vm1, %v14563_v45  ;;  %11381 = vmatprep.mubr.msk.bf16.mxu0 %vm1487_vm1, %v14320_v42  ;;  %16794 = vst [vmem:[#allocation67_spill] sm:$0xff] %v14606_v22  ;;  %v14715_v45 = vld [vmem:[%s14046_s6 + $0x21c] sm:$0xff]   ;;  %v14735_v42 = vld [vmem:[%s14046_s6 + $0x234] sm:$0xff]   ;;  %v14783_v20 = vpack.c.bf16 %v2906_v62, %v2904_v26  ;;  %v1295_v62 = vunpack.c.l.bf16 %v9861_v40  ;;  %v1296_v26 = vunpack.c.l.bf16 %v14638_v30 }
 0x10a   : > { %16805 = vst [vmem:[#allocation78_spill] sm:$0xff] %v14715_v45  ;;  %v14718_v59 = vld [vmem:[%s14046_s6 + $0x2dc] sm:$0xff]   ;;  %16807 = vst [vmem:[#allocation80_spill] sm:$0xff] %v14735_v42  ;;  %v14738_v38 = vld [vmem:[%s14046_s6 + $0x2f4] sm:$0xff]   ;;  %v2911_v40 = vsel %vm1961_vm2, %v2908_v58, %v2910_v36  ;;  %v2917_v27 = vrot.slane %v1293_v19, 1  ;;  %v2918_v11 = vrot.slane %v1294_v33, 1 }
 0x10b   : > { %16808 = vst [vmem:[#allocation81_spill] sm:$0xff] %v14738_v38  ;;  %v2923_v36 = vrot.slane %v1297_v35, 1  ;;  %v1302_v35 = vunpack.c.l.bf16 %v14659_v43 }
 0x110   : > { %11684 = vmatmul.mubr.msk.bf16.gmra.mrb[24].mxu1 %vm1487_vm1, %v14583_v39  ;;  %11382 = vmatmul.mubr.msk.bf16.gmra.mrb[28].mxu0 %vm1487_vm1, %v14332_v61  ;;  %v14710_v39 = vld [vmem:[%s14046_s6 + $0x2d0] sm:$0xff]   ;;  %v14730_v61 = vld [vmem:[%s14046_s6 + $0x2e8] sm:$0xff]  }
 0x111   : > { %11687 = vmatprep.mubr.msk.bf16.mxu1 %vm1487_vm1, %v14585_v10  ;;  %11387 = vmatprep.mubr.msk.bf16.mxu0 %vm1487_vm1, %v14581_v51  ;;  %v14701_v10 = vld [vmem:[%s14046_s6 + $0x210] sm:$0xff]   ;;  %v1290_v51 = vunpack.c.l.bf16 %v14604_v25 }
 0x112   : > { %16804 = vst [vmem:[#allocation77_spill] sm:$0xff] %v14701_v10 }
 0x113   : > { %v2912_v8 = vrot.slane %v1290_v51, 1  ;;  %v2916_v51 = vsel %vm1961_vm2, %v2913_v7, %v2915_v37  ;;  %v1299_v37 = vunpack.c.l.bf16 %v14651_v63 }
 0x115   : > { %v2914_v34 = vsel %vm1961_vm2, %v2912_v8, %v2913_v7  ;;  %v9867_v8 = vld [vmem:[%s14046_s6 + $0x1dc] sm:$0x1]  ;;  %v1300_v7 = vunpack.c.h.bf16 %v14651_v63 }
 0x118   : > { %11688 = vmatmul.mubr.msk.bf16.gmra.mrb[28].mxu1 %vm1487_vm1, %v14606_v22  ;;  %11388 = vmatmul.mubr.msk.bf16.vlgmr.msra.gmra.mrb[0].mxu0 %vm1487_vm1, %v14598_v12  ;;  %v14698_v22 = vld [vmem:[%s14046_s6 + $0x2c4] sm:$0xff]   ;;  %v2907_v12 = vrot.slane %v1287_v23, 1 }
 0x119   : > { %11420 = vmatpush3.bf16.msra.mxu0 %v14610_v16  ;;  %11693 = vmatprep.mubr.msk.bf16.mxu1 %vm1487_vm1, %v14601_v56 }
 0x11a   : > { %11391 = vmatprep.mubr.msk.bf16.mxu0 %vm1487_vm1, %v14604_v25  ;;  %13536 = vmatprep.subr.msk.bf16.mxu0 %vm1536_vm0, %v14615_v3  ;;  %v2909_v23 = vsel %vm1961_vm2, %v2907_v12, %v2908_v58  ;;  %v2920_v12 = vrot.slane %v1295_v62, 1  ;;  %v9870_v25 = vld [vmem:[%s14046_s6 + $0x1e8] sm:$0x1]  ;;  %v1301_v62 = vunpack.c.l.bf16 %v9867_v8  ;;  %v9876_v8 = vld [vmem:[%s14046_s6 + $0x200] sm:$0x1] }
 0x11b   : > { %v14814_v50 = vpack.c.bf16 %v2911_v40, %v2909_v23  ;;  %v1303_v23 = vunpack.c.h.bf16 %v14659_v43  ;;  %v1304_v40 = vunpack.c.l.bf16 %v9870_v25 }
 0x11c   : > { %v2921_v19 = vsel %vm1961_vm2, %v2918_v11, %v2920_v12 }
 0x11d   : > { %16814 = vst [vmem:[#allocation87_spill] sm:$0xff] %v14814_v50  ;;  %v2933_v12 = vrot.slane %v1303_v23, 1 }
 0x120   : > { %11694 = vmatmul.mubr.msk.bf16.vlgmr.msra.gmra.mrb[0].mxu1 %vm1487_vm1, %v14625_v14  ;;  %11392 = vmatmul.mubr.msk.bf16.gmra.mrb[4].mxu0 %vm1487_vm1, %v14628_v15  ;;  %v2922_v15 = vrot.slane %v1296_v26, 1 }
 0x121   : > { %11726 = vmatpush3.bf16.msra.mxu1 %v14610_v16  ;;  %11697 = vmatprep.mubr.msk.bf16.mxu1 %vm1487_vm1, %v14633_v17  ;;  %v14695_v16 = vld [vmem:[%s14046_s6 + $0x204] sm:$0xff]  }
 0x122   : > { %11395 = vmatprep.mubr.msk.bf16.mxu0 %vm1487_vm1, %v14638_v30  ;;  %13545 = vmatprep.subr.msk.bf16.mxu1 %vm1536_vm0, %v14615_v3  ;;  %16803 = vst [vmem:[#allocation76_spill] sm:$0xff] %v14695_v16  ;;  %v1298_v3 = vunpack.c.l.bf16 %v9864_v21  ;;  %v14816_v30 = vpack.c.bf16 %v2916_v51, %v2914_v34  ;;  %v2919_v21 = vsel %vm1961_vm2, %v2917_v27, %v2918_v11  ;;  %v2927_v34 = vrot.slane %v1299_v37, 1 }
 0x123   : > { %v2924_v33 = vsel %vm1961_vm2, %v2922_v15, %v2923_v36  ;;  %v14839_v15 = vpack.c.bf16 %v2921_v19, %v2919_v21  ;;  %v2928_v51 = vrot.slane %v1300_v7, 1  ;;  %v2930_v27 = vrot.slane %v1301_v62, 1 }
 0x124   : > { %16815 = vst [vmem:[#allocation88_spill] sm:$0xff] %v14816_v30  ;;  %v2925_v58 = vrot.slane %v1298_v3, 1  ;;  %v2932_v11 = vrot.slane %v1302_v35, 1  ;;  %v1308_v21 = vunpack.c.l.bf16 %v14681_v9  ;;  %v1309_v19 = vunpack.c.h.bf16 %v14681_v9 }
 0x125   : > { %16816 = vst [vmem:[#allocation89_spill] sm:$0xff] %v14839_v15  ;;  %v2929_v25 = vsel %vm1961_vm2, %v2927_v34, %v2928_v51  ;;  %v2931_v37 = vsel %vm1961_vm2, %v2928_v51, %v2930_v27  ;;  %v1311_v29 = vunpack.c.l.bf16 %v14695_v16  ;;  %v1312_v46 = vunpack.c.h.bf16 %v14695_v16 }
 0x126   : > { %v2926_v26 = vsel %vm1961_vm2, %v2923_v36, %v2925_v58  ;;  %v2935_v36 = vrot.slane %v1304_v40, 1  ;;  %v9873_v58 = vld [vmem:[%s14046_s6 + $0x1f4] sm:$0x1]  ;;  %v14861_v35 = vpack.c.bf16 %v2931_v37, %v2929_v25  ;;  %v2942_v27 = vrot.slane %v1308_v21, 1 }
 0x127   : > { %v14841_v3 = vpack.c.bf16 %v2926_v26, %v2924_v33  ;;  %v1307_v7 = vunpack.c.l.bf16 %v9873_v58  ;;  %v2934_v33 = vsel %vm1961_vm2, %v2932_v11, %v2933_v12  ;;  %v1310_v26 = vunpack.c.l.bf16 %v9876_v8 }
 0x128   : > { %11698 = vmatmul.mubr.msk.bf16.gmra.mrb[4].mxu1 %vm1487_vm1, %v14648_v28  ;;  %11396 = vmatmul.mubr.msk.bf16.gmra.mrb[8].mxu0 %vm1487_vm1, %v14651_v63  ;;  %v2936_v62 = vsel %vm1961_vm2, %v2933_v12, %v2935_v36  ;;  %16818 = vst [vmem:[#allocation91_spill] sm:$0xff] %v14861_v35  ;;  %v2943_v58 = vrot.slane %v1309_v19, 1  ;;  %v9882_v63 = vld [vmem:[%s14046_s6 + $0x218] sm:$0x1]  ;;  %v1314_v8 = vunpack.c.l.bf16 %v14701_v10  ;;  %v1315_v25 = vunpack.c.h.bf16 %v14701_v10 }
 0x129   : > { %11701 = vmatprep.mubr.msk.bf16.mxu1 %vm1487_vm1, %v14656_v32  ;;  %11399 = vmatprep.mubr.msk.bf16.mxu0 %vm1487_vm1, %v14659_v43  ;;  %16817 = vst [vmem:[#allocation90_spill] sm:$0xff] %v14841_v3  ;;  %v1306_v43 = vunpack.c.h.bf16 %v14675_v48  ;;  %v14863_v34 = vpack.c.bf16 %v2936_v62, %v2934_v33  ;;  %v2940_v51 = vrot.slane %v1307_v7, 1  ;;  %v1316_v37 = vunpack.c.l.bf16 %v9882_v63 }
 0x12a   : > { %v2944_v11 = vsel %vm1961_vm2, %v2942_v27, %v2943_v58  ;;  %v2947_v21 = vrot.slane %v1311_v29, 1  ;;  %v2948_v19 = vrot.slane %v1312_v46, 1  ;;  %v2952_v62 = vrot.slane %v1314_v8, 1 }
 0x12b   : > { %v2938_v40 = vrot.slane %v1306_v43, 1  ;;  %16819 = vst [vmem:[#allocation92_spill] sm:$0xff] %v14863_v34  ;;  %v1320_v63 = vunpack.c.l.bf16 %v14721_v6 }
 0x12c   : > { %v2949_v27 = vsel %vm1961_vm2, %v2947_v21, %v2948_v19 }
 0x12d   : > { %v2941_v43 = vsel %vm1961_vm2, %v2938_v40, %v2940_v51  ;;  %v9888_v51 = vld [vmem:[%s14046_s6 + $0x230] sm:$0x1] }
 0x130   : > { %11702 = vmatmul.mubr.msk.bf16.gmra.mrb[8].mxu1 %vm1487_vm1, %v14670_v41  ;;  %11400 = vmatmul.mubr.msk.bf16.gmra.mrb[12].mxu0 %vm1487_vm1, %v14675_v48 }
 0x131   : > { %11705 = vmatprep.mubr.msk.bf16.mxu1 %vm1487_vm1, %v14678_v2  ;;  %11403 = vmatprep.mubr.msk.bf16.mxu0 %vm1487_vm1, %v14681_v9  ;;  %v2945_v9 = vrot.slane %v1310_v26, 1  ;;  %v2953_v26 = vrot.slane %v1315_v25, 1 }
 0x133   : > { %v2946_v36 = vsel %vm1961_vm2, %v2943_v58, %v2945_v9  ;;  %v1317_v9 = vunpack.c.l.bf16 %v14715_v45  ;;  %v1318_v58 = vunpack.c.h.bf16 %v14715_v45 }
 0x134   : > { %v14885_v33 = vpack.c.bf16 %v2946_v36, %v2944_v11 }
 0x135   : > { %v2957_v8 = vrot.slane %v1317_v9, 1  ;;  %v2958_v25 = vrot.slane %v1318_v58, 1  ;;  %v1326_v9 = vunpack.c.l.bf16 %v14741_v57  ;;  %v1327_v58 = vunpack.c.h.bf16 %v14741_v57 }
 0x136   : > { %16821 = vst [vmem:[#allocation94_spill] sm:$0xff] %v14885_v33 }
 0x138   : > { %11706 = vmatmul.mubr.msk.bf16.gmra.mrb[12].mxu1 %vm1487_vm1, %v14690_v4  ;;  %11404 = vmatmul.mubr.msk.bf16.gmra.mrb[16].mxu0 %vm1487_vm1, %v14695_v16  ;;  %v1324_v16 = vunpack.c.h.bf16 %v14735_v42 }
 0x139   : > { %11709 = vmatprep.mubr.msk.bf16.mxu1 %vm1487_vm1, %v14698_v22  ;;  %11407 = vmatprep.mubr.msk.bf16.mxu0 %vm1487_vm1, %v14701_v10  ;;  %v1323_v10 = vunpack.c.l.bf16 %v14735_v42 }
 0x140   : > { %11710 = vmatmul.mubr.msk.bf16.gmra.mrb[16].mxu1 %vm1487_vm1, %v14710_v39  ;;  %11408 = vmatmul.mubr.msk.bf16.gmra.mrb[20].mxu0 %vm1487_vm1, %v14715_v45  ;;  %v9894_v45 = vld [vmem:[%s14046_s6 + $0x248] sm:$0x1] }
 0x141   : > { %11713 = vmatprep.mubr.msk.bf16.mxu1 %vm1487_vm1, %v14718_v59  ;;  %11411 = vmatprep.mubr.msk.bf16.mxu0 %vm1487_vm1, %v14721_v6 }
 0x148   : > { %11714 = vmatmul.mubr.msk.bf16.gmra.mrb[20].mxu1 %vm1487_vm1, %v14730_v61  ;;  %11412 = vmatmul.mubr.msk.bf16.gmra.mrb[24].mxu0 %vm1487_vm1, %v14735_v42  ;;  %v1390_v42 = vunpack.c.l.bf16 %v14625_v14 }
 0x149   : > { %11717 = vmatprep.mubr.msk.bf16.mxu1 %vm1487_vm1, %v14738_v38  ;;  %11415 = vmatprep.mubr.msk.bf16.mxu0 %vm1487_vm1, %v14741_v57  ;;  %v9909_v57 = vld [vmem:[%s14046_s6 + $0x284] sm:$0x1] }
 0x150   : > { %11718 = vmatmul.mubr.msk.bf16.gmra.mrb[24].mxu1 %vm1487_vm1, %v14751_v60  ;;  %11416 = vmatmul.mubr.msk.bf16.gmra.mrb[28].mxu0 %vm1487_vm1, %v14756_v53 }
 0x151   : > { %11721 = vmatprep.mubr.msk.bf16.mxu1 %vm1487_vm1, %v14761_v31  ;;  %11421 = vmatprep.mubr.msk.bf16.mxu0 %vm1487_vm1, %v14601_v56 }
 0x158   : > { %11722 = vmatmul.mubr.msk.bf16.gmra.mrb[28].mxu1 %vm1487_vm1, %v14775_v5  ;;  %11422 = vmatmul.mubr.msk.bf16.vlgmr.msra.gmra.mrb[0].mxu0 %vm1487_vm1, %v14625_v14 }
 0x159   : > { %11454 = vmatpush3.bf16.msra.mxu0 %v14787_v1  ;;  %11727 = vmatprep.mubr.msk.bf16.mxu1 %vm1487_vm1, %v14783_v20 }
 0x15a   : > { %11425 = vmatprep.mubr.msk.bf16.mxu0 %vm1487_vm1, %v14633_v17  ;;  %13537 = vmatprep.subr.msk.bf16.mxu0 %vm1536_vm0, %v14793_v49 }
 0x160   : > { %11728 = vmatmul.mubr.msk.bf16.vlgmr.msra.gmra.mrb[0].mxu1 %vm1487_vm1, %v14814_v50  ;;  %11426 = vmatmul.mubr.msk.bf16.gmra.mrb[4].mxu0 %vm1487_vm1, %v14648_v28 }
 0x161   : > { %11760 = vmatpush3.bf16.msra.mxu1 %v14787_v1  ;;  %11731 = vmatprep.mubr.msk.bf16.mxu1 %vm1487_vm1, %v14816_v30  ;;  %v1305_v1 = vunpack.c.l.bf16 %v14675_v48  ;;  %v9879_v48 = vld [vmem:[%s14046_s6 + $0x20c] sm:$0x1] }
 0x162   : > { %11429 = vmatprep.mubr.msk.bf16.mxu0 %vm1487_vm1, %v14656_v32  ;;  %13546 = vmatprep.subr.msk.bf16.mxu1 %vm1536_vm0, %v14793_v49  ;;  %v1313_v12 = vunpack.c.l.bf16 %v9879_v48 }
 0x163   : > { %v2937_v23 = vrot.slane %v1305_v1, 1 }
 0x164   : > { %v2950_v48 = vrot.slane %v1313_v12, 1  ;;  %v1322_v12 = vunpack.c.l.bf16 %v9888_v51 }
 0x165   : > { %v2939_v1 = vsel %vm1961_vm2, %v2937_v23, %v2938_v40  ;;  %v2955_v23 = vrot.slane %v1316_v37, 1  ;;  %v9885_v40 = vld [vmem:[%s14046_s6 + $0x224] sm:$0x1] }
 0x166   : > { %v14883_v7 = vpack.c.bf16 %v2941_v43, %v2939_v1  ;;  %v2951_v29 = vsel %vm1961_vm2, %v2948_v19, %v2950_v48  ;;  %v1319_v46 = vunpack.c.l.bf16 %v9885_v40  ;;  %v1321_v1 = vunpack.c.h.bf16 %v14721_v6  ;;  %v9891_v6 = vld [vmem:[%s14046_s6 + $0x23c] sm:$0x1] }
 0x167   : > { %v2954_v43 = vsel %vm1961_vm2, %v2952_v62, %v2953_v26  ;;  %v2956_v11 = vsel %vm1961_vm2, %v2953_v26, %v2955_v23  ;;  %v14905_v36 = vpack.c.bf16 %v2951_v29, %v2949_v27  ;;  %v2962_v19 = vrot.slane %v1320_v63, 1 }
 0x168   : > { %11732 = vmatmul.mubr.msk.bf16.gmra.mrb[4].mxu1 %vm1487_vm1, %v14839_v15  ;;  %11430 = vmatmul.mubr.msk.bf16.gmra.mrb[8].mxu0 %vm1487_vm1, %v14670_v41  ;;  %16820 = vst [vmem:[#allocation93_spill] sm:$0xff] %v14883_v7  ;;  %v14907_v37 = vpack.c.bf16 %v2956_v11, %v2954_v43  ;;  %v2960_v21 = vrot.slane %v1319_v46, 1  ;;  %v2963_v48 = vrot.slane %v1321_v1, 1  ;;  %v2965_v40 = vrot.slane %v1322_v12, 1 }
 0x169   : > { %11735 = vmatprep.mubr.msk.bf16.mxu1 %vm1487_vm1, %v14841_v3  ;;  %11433 = vmatprep.mubr.msk.bf16.mxu0 %vm1487_vm1, %v14678_v2  ;;  %v2959_v62 = vsel %vm1961_vm2, %v2957_v8, %v2958_v25  ;;  %v1325_v51 = vunpack.c.l.bf16 %v9891_v6  ;;  %v1328_v29 = vunpack.c.l.bf16 %v9894_v45  ;;  %v2967_v63 = vrot.slane %v1323_v10, 1 }
 0x16a   : > { %v2961_v26 = vsel %vm1961_vm2, %v2958_v25, %v2960_v21  ;;  %v2964_v23 = vsel %vm1961_vm2, %v2962_v19, %v2963_v48  ;;  %v2966_v27 = vsel %vm1961_vm2, %v2963_v48, %v2965_v40  ;;  %v2968_v1 = vrot.slane %v1324_v16, 1  ;;  %v9897_v25 = vld [vmem:[%s14046_s6 + $0x254] sm:$0x1]  ;;  %v9903_v21 = vld [vmem:[%s14046_s6 + $0x26c] sm:$0x1] }
 0x16b   : > { %v14927_v46 = vpack.c.bf16 %v2961_v26, %v2959_v62  ;;  %v14929_v43 = vpack.c.bf16 %v2966_v27, %v2964_v23  ;;  %v2970_v6 = vrot.slane %v1325_v51, 1  ;;  %v2972_v11 = vrot.slane %v1326_v9, 1 }
 0x16c   : > { %v2973_v12 = vrot.slane %v1327_v58, 1  ;;  %v2975_v8 = vrot.slane %v1328_v29, 1  ;;  %v1387_v19 = vunpack.c.l.bf16 %v14601_v56  ;;  %v1388_v48 = vunpack.c.h.bf16 %v14601_v56 }
 0x16d   : > { %v2969_v40 = vsel %vm1961_vm2, %v2967_v63, %v2968_v1  ;;  %v2971_v45 = vsel %vm1961_vm2, %v2968_v1, %v2970_v6  ;;  %v1329_v10 = vunpack.c.l.bf16 %v14756_v53  ;;  %v1330_v16 = vunpack.c.h.bf16 %v14756_v53  ;;  %v9906_v53 = vld [vmem:[%s14046_s6 + $0x278] sm:$0x1] }
 0x16e   : > { %v1331_v62 = vunpack.c.l.bf16 %v9897_v25  ;;  %v2974_v26 = vsel %vm1961_vm2, %v2972_v11, %v2973_v12  ;;  %v2976_v23 = vsel %vm1961_vm2, %v2973_v12, %v2975_v8  ;;  %v1389_v51 = vunpack.c.l.bf16 %v9903_v21 }
 0x16f   : > { %v5057_v27 = vrot.slane %v1387_v19, 1  ;;  %v5058_v9 = vrot.slane %v1388_v48, 1  ;;  %v14949_v58 = vpack.c.bf16 %v2971_v45, %v2969_v40  ;;  %v14951_v29 = vpack.c.bf16 %v2976_v23, %v2974_v26 }
 0x170   : > { %11736 = vmatmul.mubr.msk.bf16.gmra.mrb[8].mxu1 %vm1487_vm1, %v14861_v35  ;;  %11434 = vmatmul.mubr.msk.bf16.gmra.mrb[12].mxu0 %vm1487_vm1, %v14690_v4  ;;  %v2977_v63 = vrot.slane %v1329_v10, 1  ;;  %v2978_v1 = vrot.slane %v1330_v16, 1  ;;  %v2980_v6 = vrot.slane %v1331_v62, 1  ;;  %v5060_v25 = vrot.slane %v1389_v51, 1 }
 0x171   : > { %11739 = vmatprep.mubr.msk.bf16.mxu1 %vm1487_vm1, %v14863_v34  ;;  %11437 = vmatprep.mubr.msk.bf16.mxu0 %vm1487_vm1, %v14698_v22  ;;  %v1391_v56 = vunpack.c.h.bf16 %v14625_v14  ;;  %v5059_v8 = vsel %vm1961_vm2, %v5057_v27, %v5058_v9  ;;  %v1392_v21 = vunpack.c.l.bf16 %v9906_v53  ;;  %v1393_v48 = vunpack.c.l.bf16 %v14633_v17 }
 0x172   : > { %v2979_v11 = vsel %vm1961_vm2, %v2977_v63, %v2978_v1  ;;  %v2981_v12 = vsel %vm1961_vm2, %v2978_v1, %v2980_v6  ;;  %v5061_v19 = vsel %vm1961_vm2, %v5058_v9, %v5060_v25  ;;  %v1394_v40 = vunpack.c.h.bf16 %v14633_v17  ;;  %v9912_v9 = vld [vmem:[%s14046_s6 + $0x290] sm:$0x1]  ;;  %v9915_v1 = vld [vmem:[%s14046_s6 + $0x29c] sm:$0x1] }
 0x173   : > { %v1395_v45 = vunpack.c.l.bf16 %v9909_v57  ;;  %v5062_v10 = vrot.slane %v1390_v42, 1  ;;  %v5063_v16 = vrot.slane %v1391_v56, 1  ;;  %v14971_v62 = vpack.c.bf16 %v2981_v12, %v2979_v11  ;;  %v14984_v57 = vld [vmem:[%s16439_s1 + $0x1c] sm:$0xf] }
 0x174   : > { %v14973_v26 = vpack.c.bf16 %v5061_v19, %v5059_v8  ;;  %v5065_v23 = vrot.slane %v1392_v21, 1  ;;  %v14977_v51 = vsel %vm1536_vm0, %v14793_v49, 0  ;;  %v5067_v27 = vrot.slane %v1393_v48, 1 }
 0x175   : > { %16823 = vst [vmem:[#allocation96_spill] sm:$0xff] %v14977_v51  ;;  %v5068_v53 = vrot.slane %v1394_v40, 1  ;;  %v5070_v63 = vrot.slane %v1395_v45, 1  ;;  %v5064_v42 = vsel %vm1961_vm2, %v5062_v10, %v5063_v16  ;;  %v1396_v56 = vunpack.c.l.bf16 %v14648_v28 }
 0x176   : > { %16822 = vst [vmem:[#allocation95_spill] sm:$0xff] %v14973_v26  ;;  %v1397_v49 = vunpack.c.h.bf16 %v14648_v28  ;;  %v5066_v6 = vsel %vm1961_vm2, %v5063_v16, %v5065_v23  ;;  %v1398_v25 = vunpack.c.l.bf16 %v9912_v9  ;;  %v1399_v11 = vunpack.c.l.bf16 %v14656_v32 }
 0x177   : > { %v1400_v12 = vunpack.c.h.bf16 %v14656_v32  ;;  %v5069_v8 = vsel %vm1961_vm2, %v5067_v27, %v5068_v53  ;;  %v5071_v21 = vsel %vm1961_vm2, %v5068_v53, %v5070_v63  ;;  %v1401_v19 = vunpack.c.l.bf16 %v9915_v1  ;;  %v9918_v32 = vld [vmem:[%s14046_s6 + $0x2a8] sm:$0x1] }
 0x178   : > { %11740 = vmatmul.mubr.msk.bf16.gmra.mrb[12].mxu1 %vm1487_vm1, %v14883_v7  ;;  %11438 = vmatmul.mubr.msk.bf16.gmra.mrb[16].mxu0 %vm1487_vm1, %v14710_v39  ;;  %v15005_v48 = vpack.c.bf16 %v5066_v6, %v5064_v42  ;;  %v5072_v40 = vrot.slane %v1396_v56, 1  ;;  %v5073_v45 = vrot.slane %v1397_v49, 1  ;;  %v15007_v10 = vpack.c.bf16 %v5071_v21, %v5069_v8 }
 0x179   : > { %11743 = vmatprep.mubr.msk.bf16.mxu1 %vm1487_vm1, %v14885_v33  ;;  %11441 = vmatprep.mubr.msk.bf16.mxu0 %vm1487_vm1, %v14718_v59  ;;  %v5075_v16 = vrot.slane %v1398_v25, 1  ;;  %v5077_v23 = vrot.slane %v1399_v11, 1  ;;  %v5078_v9 = vrot.slane %v1400_v12, 1  ;;  %v1402_v27 = vunpack.c.l.bf16 %v14670_v41 }
 0x17a   : > { %16824 = vst [vmem:[#allocation97_spill] sm:$0xff] %v15005_v48  ;;  %16825 = vst [vmem:[#allocation98_spill] sm:$0xff] %v15007_v10  ;;  %v1403_v53 = vunpack.c.h.bf16 %v14670_v41  ;;  %v5074_v63 = vsel %vm1961_vm2, %v5072_v40, %v5073_v45  ;;  %v1404_v56 = vunpack.c.l.bf16 %v9918_v32  ;;  %v1405_v6 = vunpack.c.l.bf16 %v14678_v2 }
 0x17b   : > { %v5076_v1 = vsel %vm1961_vm2, %v5073_v45, %v5075_v16  ;;  %v5079_v42 = vsel %vm1961_vm2, %v5077_v23, %v5078_v9  ;;  %v1406_v25 = vunpack.c.h.bf16 %v14678_v2  ;;  %v5082_v8 = vrot.slane %v1402_v27, 1  ;;  %v9924_v23 = vld [vmem:[%s14046_s6 + $0x2c0] sm:$0x1] }
 0x17c   : > { %v15030_v12 = vpack.c.bf16 %v5076_v1, %v5074_v63  ;;  %v5083_v21 = vrot.slane %v1403_v53, 1  ;;  %v5085_v32 = vrot.slane %v1404_v56, 1  ;;  %v5087_v40 = vrot.slane %v1405_v6, 1 }
 0x17d   : > { %v5088_v45 = vrot.slane %v1406_v25, 1  ;;  %v1409_v27 = vunpack.c.h.bf16 %v14690_v4  ;;  %v1410_v63 = vunpack.c.l.bf16 %v9924_v23  ;;  %v1411_v1 = vunpack.c.l.bf16 %v14698_v22  ;;  %v9930_v23 = vld [vmem:[%s14046_s6 + $0x2d8] sm:$0x1] }
 0x17e   : > { %16826 = vst [vmem:[#allocation99_spill] sm:$0xff] %v15030_v12  ;;  %v5086_v53 = vsel %vm1961_vm2, %v5083_v21, %v5085_v32 }
 0x17f   : > { %v5089_v56 = vsel %vm1961_vm2, %v5087_v40, %v5088_v45  ;;  %v5095_v32 = vrot.slane %v1410_v63, 1  ;;  %v1414_v40 = vunpack.c.l.bf16 %v14710_v39  ;;  %v1418_v63 = vunpack.c.h.bf16 %v14718_v59 }
 0x180   : > { %11744 = vmatmul.mubr.msk.bf16.gmra.mrb[16].mxu1 %vm1487_vm1, %v14905_v36  ;;  %11442 = vmatmul.mubr.msk.bf16.gmra.mrb[20].mxu0 %vm1487_vm1, %v14730_v61 }
 0x181   : > { %11747 = vmatprep.mubr.msk.bf16.mxu1 %vm1487_vm1, %v14907_v37  ;;  %11445 = vmatprep.mubr.msk.bf16.mxu0 %vm1487_vm1, %v14738_v38 }
 0x188   : > { %11748 = vmatmul.mubr.msk.bf16.gmra.mrb[20].mxu1 %vm1487_vm1, %v14927_v46  ;;  %11446 = vmatmul.mubr.msk.bf16.gmra.mrb[24].mxu0 %vm1487_vm1, %v14751_v60 }
 0x189   : > { %11751 = vmatprep.mubr.msk.bf16.mxu1 %vm1487_vm1, %v14929_v43  ;;  %11449 = vmatprep.mubr.msk.bf16.mxu0 %vm1487_vm1, %v14761_v31 }
 0x190   : > { %11752 = vmatmul.mubr.msk.bf16.gmra.mrb[24].mxu1 %vm1487_vm1, %v14949_v58  ;;  %11450 = vmatmul.mubr.msk.bf16.gmra.mrb[28].mxu0 %vm1487_vm1, %v14775_v5 }
 0x191   : > { %11755 = vmatprep.mubr.msk.bf16.mxu1 %vm1487_vm1, %v14951_v29  ;;  %11455 = vmatprep.mubr.msk.bf16.mxu0 %vm1487_vm1, %v14783_v20 }
 0x198   : > { %11756 = vmatmul.mubr.msk.bf16.gmra.mrb[28].mxu1 %vm1487_vm1, %v14971_v62  ;;  %11456 = vmatmul.mubr.msk.bf16.vlgmr.msra.gmra.mrb[0].mxu0 %vm1487_vm1, %v14814_v50 }
 0x199   : > { %11488 = vmatpush3.bf16.msra.mxu0 %v14977_v51  ;;  %11761 = vmatprep.mubr.msk.bf16.mxu1 %vm1487_vm1, %v14973_v26  ;;  %v5080_v26 = vrot.slane %v1401_v19, 1 }
 0x19a   : > { %11459 = vmatprep.mubr.msk.bf16.mxu0 %vm1487_vm1, %v14816_v30  ;;  %13538 = vmatprep.subr.msk.bf16.mxu0 %vm1536_vm0, %v14984_v57  ;;  %v9921_v30 = vld [vmem:[%s14046_s6 + $0x2b4] sm:$0x1] }
 0x19b   : > { %v5081_v49 = vsel %vm1961_vm2, %v5078_v9, %v5080_v26  ;;  %v1407_v11 = vunpack.c.l.bf16 %v9921_v30  ;;  %v9927_v26 = vld [vmem:[%s14046_s6 + $0x2cc] sm:$0x1]  ;;  %v5084_v30 = vsel %vm1961_vm2, %v5082_v8, %v5083_v21  ;;  %v1408_v9 = vunpack.c.l.bf16 %v14690_v4 }
 0x19c   : > { %v15032_v19 = vpack.c.bf16 %v5081_v49, %v5079_v42  ;;  %v1412_v42 = vunpack.c.h.bf16 %v14698_v22  ;;  %v1413_v6 = vunpack.c.l.bf16 %v9927_v26  ;;  %v15052_v25 = vpack.c.bf16 %v5086_v53, %v5084_v30 }
 0x19d   : > { %v5090_v16 = vrot.slane %v1407_v11, 1  ;;  %v5092_v11 = vrot.slane %v1408_v9, 1  ;;  %v5093_v8 = vrot.slane %v1409_v27, 1  ;;  %v1416_v9 = vunpack.c.l.bf16 %v9930_v23 }
 0x19e   : > { %16827 = vst [vmem:[#allocation100_spill] sm:$0xff] %v15032_v19  ;;  %16828 = vst [vmem:[#allocation101_spill] sm:$0xff] %v15052_v25  ;;  %v1417_v53 = vunpack.c.l.bf16 %v14718_v59 }
 0x19f   : > { %v5091_v49 = vsel %vm1961_vm2, %v5088_v45, %v5090_v16  ;;  %v1415_v45 = vunpack.c.h.bf16 %v14710_v39  ;;  %v5094_v16 = vsel %vm1961_vm2, %v5092_v11, %v5093_v8  ;;  %v5096_v26 = vsel %vm1961_vm2, %v5093_v8, %v5095_v32 }
 0x1a0   : > { %11762 = vmatmul.mubr.msk.bf16.vlgmr.msra.gmra.mrb[0].mxu1 %vm1487_vm1, %v15005_v48  ;;  %11460 = vmatmul.mubr.msk.bf16.gmra.mrb[4].mxu0 %vm1487_vm1, %v14839_v15  ;;  %v15054_v21 = vpack.c.bf16 %v5091_v49, %v5089_v56  ;;  %v5102_v56 = vrot.slane %v1414_v40, 1  ;;  %v5105_v11 = vrot.slane %v1416_v9, 1  ;;  %v5107_v8 = vrot.slane %v1417_v53, 1 }
 0x1a1   : > { %11794 = vmatpush3.bf16.msra.mxu1 %v14977_v51  ;;  %11765 = vmatprep.mubr.msk.bf16.mxu1 %vm1487_vm1, %v15007_v10  ;;  %v5097_v51 = vrot.slane %v1411_v1, 1  ;;  %v9933_v10 = vld [vmem:[%s14046_s6 + $0x2e4] sm:$0x1]  ;;  %v5103_v49 = vrot.slane %v1415_v45, 1  ;;  %v5108_v32 = vrot.slane %v1418_v63, 1  ;;  %v1423_v45 = vunpack.c.l.bf16 %v14738_v38 }
 0x1a2   : > { %11463 = vmatprep.mubr.msk.bf16.mxu0 %vm1487_vm1, %v14841_v3  ;;  %13547 = vmatprep.subr.msk.bf16.mxu1 %vm1536_vm0, %v14984_v57  ;;  %16829 = vst [vmem:[#allocation102_spill] sm:$0xff] %v15054_v21  ;;  %v1419_v1 = vunpack.c.l.bf16 %v9933_v10 }
 0x1a3   : > { %v5104_v10 = vsel %vm1961_vm2, %v5102_v56, %v5103_v49  ;;  %v5106_v23 = vsel %vm1961_vm2, %v5103_v49, %v5105_v11  ;;  %v5117_v49 = vrot.slane %v1423_v45, 1 }
 0x1a8   : > { %11766 = vmatmul.mubr.msk.bf16.gmra.mrb[4].mxu1 %vm1487_vm1, %v15030_v12  ;;  %11464 = vmatmul.mubr.msk.bf16.gmra.mrb[8].mxu0 %vm1487_vm1, %v14861_v35  ;;  %v5100_v12 = vrot.slane %v1413_v6, 1 }
 0x1a9   : > { %11769 = vmatprep.mubr.msk.bf16.mxu1 %vm1487_vm1, %v15032_v19  ;;  %11467 = vmatprep.mubr.msk.bf16.mxu0 %vm1487_vm1, %v14863_v34  ;;  %v5098_v19 = vrot.slane %v1412_v42, 1  ;;  %v15074_v42 = vpack.c.bf16 %v5096_v26, %v5094_v16  ;;  %v1424_v16 = vunpack.c.h.bf16 %v14738_v38  ;;  %v5109_v26 = vsel %vm1961_vm2, %v5107_v8, %v5108_v32 }
 0x1aa   : > { %v1427_v8 = vunpack.c.h.bf16 %v14751_v60 }
 0x1ab   : > { %v5099_v30 = vsel %vm1961_vm2, %v5097_v51, %v5098_v19  ;;  %v5101_v27 = vsel %vm1961_vm2, %v5098_v19, %v5100_v12  ;;  %16830 = vst [vmem:[#allocation103_spill] sm:$0xff] %v15074_v42  ;;  %v9939_v51 = vld [vmem:[%s14046_s6 + $0x2fc] sm:$0x1]  ;;  %v1420_v12 = vunpack.c.l.bf16 %v14730_v61  ;;  %v1421_v19 = vunpack.c.h.bf16 %v14730_v61 }
 0x1ac   : > { %v15076_v6 = vpack.c.bf16 %v5101_v27, %v5099_v30  ;;  %v1425_v9 = vunpack.c.l.bf16 %v9939_v51  ;;  %v15096_v27 = vpack.c.bf16 %v5106_v23, %v5104_v10  ;;  %v5118_v11 = vrot.slane %v1424_v16, 1 }
 0x1ad   : > { %v5112_v53 = vrot.slane %v1420_v12, 1  ;;  %v5113_v63 = vrot.slane %v1421_v19, 1  ;;  %v1429_v23 = vunpack.c.l.bf16 %v14761_v31 }
 0x1ae   : > { %16831 = vst [vmem:[#allocation104_spill] sm:$0xff] %v15076_v6  ;;  %16832 = vst [vmem:[#allocation105_spill] sm:$0xff] %v15096_v27  ;;  %v5119_v10 = vsel %vm1961_vm2, %v5117_v49, %v5118_v11  ;;  %v1432_v49 = vunpack.c.l.bf16 %v14775_v5 }
 0x1b0   : > { %11770 = vmatmul.mubr.msk.bf16.gmra.mrb[8].mxu1 %vm1487_vm1, %v15052_v25  ;;  %11468 = vmatmul.mubr.msk.bf16.gmra.mrb[12].mxu0 %vm1487_vm1, %v14883_v7  ;;  %v9936_v25 = vld [vmem:[%s14046_s6 + $0x2f0] sm:$0x1] }
 0x1b1   : > { %11773 = vmatprep.mubr.msk.bf16.mxu1 %vm1487_vm1, %v15054_v21  ;;  %11471 = vmatprep.mubr.msk.bf16.mxu0 %vm1487_vm1, %v14885_v33  ;;  %v5110_v21 = vrot.slane %v1419_v1, 1  ;;  %v1422_v40 = vunpack.c.l.bf16 %v9936_v25  ;;  %v9942_v25 = vld [vmem:[%s14046_s6 + $0x308] sm:$0x1] }
 0x1b2   : > { %v1428_v12 = vunpack.c.l.bf16 %v9942_v25 }
 0x1b3   : > { %v5111_v30 = vsel %vm1961_vm2, %v5108_v32, %v5110_v21  ;;  %v5115_v56 = vrot.slane %v1422_v40, 1  ;;  %v1426_v21 = vunpack.c.l.bf16 %v14751_v60  ;;  %v5114_v32 = vsel %vm1961_vm2, %v5112_v53, %v5113_v63 }
 0x1b4   : > { %v15098_v1 = vpack.c.bf16 %v5111_v30, %v5109_v26  ;;  %v1430_v40 = vunpack.c.h.bf16 %v14761_v31  ;;  %v5123_v30 = vrot.slane %v1427_v8, 1  ;;  %v5125_v53 = vrot.slane %v1428_v12, 1 }
 0x1b5   : > { %v5116_v51 = vsel %vm1961_vm2, %v5113_v63, %v5115_v56  ;;  %v5122_v26 = vrot.slane %v1426_v21, 1  ;;  %v5127_v63 = vrot.slane %v1429_v23, 1 }
 0x1b6   : > { %16833 = vst [vmem:[#allocation106_spill] sm:$0xff] %v15098_v1  ;;  %v15118_v16 = vpack.c.bf16 %v5116_v51, %v5114_v32  ;;  %v5128_v56 = vrot.slane %v1430_v40, 1  ;;  %v15155_v40 = vsel %vm1536_vm0, %v14984_v57, 0  ;;  %v16837_v57 = vld [vmem:[#allocation15_spill] sm:$0xff] }
 0x1b7   : > { %16835 = vst [vmem:[#allocation108_spill] sm:$0xff] %v15155_v40 }
 0x1b8   : > { %11774 = vmatmul.mubr.msk.bf16.gmra.mrb[12].mxu1 %vm1487_vm1, %v15074_v42  ;;  %11472 = vmatmul.mubr.msk.bf16.gmra.mrb[16].mxu0 %vm1487_vm1, %v14905_v36  ;;  %v9945_v42 = vld [vmem:[%s14046_s6 + $0x314] sm:$0x1]  ;;  %v5129_v21 = vsel %vm1961_vm2, %v5127_v63, %v5128_v56 }
 0x1b9   : > { %11777 = vmatprep.mubr.msk.bf16.mxu1 %vm1487_vm1, %v15076_v6  ;;  %11475 = vmatprep.mubr.msk.bf16.mxu0 %vm1487_vm1, %v14907_v37  ;;  %v5120_v6 = vrot.slane %v1425_v9, 1  ;;  %v1431_v45 = vunpack.c.l.bf16 %v9945_v42  ;;  %v5126_v42 = vsel %vm1961_vm2, %v5123_v30, %v5125_v53  ;;  %v16840_v53 = vld [vmem:[#allocation14_spill] sm:$0xff]  ;;  %v16841_v63 = vld [vmem:[#allocation19_spill] sm:$0xff] }
 0x1bb   : > { %v5121_v19 = vsel %vm1961_vm2, %v5118_v11, %v5120_v6  ;;  %v5124_v6 = vsel %vm1961_vm2, %v5122_v26, %v5123_v30  ;;  %v1433_v11 = vunpack.c.h.bf16 %v14775_v5  ;;  %v16838_v26 = vld [vmem:[#allocation12_spill] sm:$0xff]  ;;  %v16839_v30 = vld [vmem:[#allocation17_spill] sm:$0xff] }
 0x1bc   : > { %v15120_v9 = vpack.c.bf16 %v5121_v19, %v5119_v10  ;;  %v15137_v32 = vpack.c.bf16 %v5126_v42, %v5124_v6  ;;  %v5132_v10 = vrot.slane %v1432_v49, 1  ;;  %v16843_v6 = vld [vmem:[#allocation24_spill] sm:$0xff]  ;;  %v16844_v42 = vld [vmem:[#allocation21_spill] sm:$0xff] }
 0x1bd   : > { %v5133_v12 = vrot.slane %v1433_v11, 1  ;;  %v16845_v49 = vld [vmem:[#allocation25_spill] sm:$0xff]  ;;  %v16846_v11 = vld [vmem:[#allocation26_spill] sm:$0xff] }
 0x1c0   : > { %11778 = vmatmul.mubr.msk.bf16.gmra.mrb[16].mxu1 %vm1487_vm1, %v15096_v27  ;;  %11476 = vmatmul.mubr.msk.bf16.gmra.mrb[20].mxu0 %vm1487_vm1, %v14927_v46  ;;  %v9948_v27 = vld [vmem:[%s14046_s6 + $0x320] sm:$0x1] }
 0x1c1   : > { %11781 = vmatprep.mubr.msk.bf16.mxu1 %vm1487_vm1, %v15098_v1  ;;  %11479 = vmatprep.mubr.msk.bf16.mxu0 %vm1487_vm1, %v14929_v43  ;;  %v5130_v1 = vrot.slane %v1431_v45, 1  ;;  %v1434_v25 = vunpack.c.l.bf16 %v9948_v27  ;;  %v5134_v27 = vsel %vm1961_vm2, %v5132_v10, %v5133_v12  ;;  %v15160_v45 = vld [vmem:[%s16439_s1 + $0x20] sm:$0xf]  ;;  %v16850_v10 = vld [vmem:[#allocation32_spill] sm:$0xff] }
 0x1c2   : > { %16836 = vst [vmem:[#allocation109_spill] sm:$0xff] %v15160_v45 }
 0x1c3   : > { %v5131_v8 = vsel %vm1961_vm2, %v5128_v56, %v5130_v1  ;;  %v5135_v19 = vrot.slane %v1434_v25, 1  ;;  %v16842_v56 = vld [vmem:[#allocation20_spill] sm:$0xff]  ;;  %v16847_v25 = vld [vmem:[#allocation30_spill] sm:$0xff] }
 0x1c4   : > { %v15139_v51 = vpack.c.bf16 %v5131_v8, %v5129_v21  ;;  %v16848_v21 = vld [vmem:[#allocation27_spill] sm:$0xff] }
 0x1c5   : > { %v5136_v1 = vsel %vm1961_vm2, %v5133_v12, %v5135_v19  ;;  %v16849_v8 = vld [vmem:[#allocation31_spill] sm:$0xff]  ;;  %v16851_v12 = vld [vmem:[#allocation36_spill] sm:$0xff]  ;;  %v16852_v19 = vld [vmem:[#allocation33_spill] sm:$0xff] }
 0x1c6   : > { %v15151_v23 = vpack.c.bf16 %v5136_v1, %v5134_v27  ;;  %v16853_v27 = vld [vmem:[#allocation37_spill] sm:$0xff]  ;;  %v16854_v1 = vld [vmem:[#allocation38_spill] sm:$0xff] }
 0x1c8   : > { %11782 = vmatmul.mubr.msk.bf16.gmra.mrb[20].mxu1 %vm1487_vm1, %v15118_v16  ;;  %11480 = vmatmul.mubr.msk.bf16.gmra.mrb[24].mxu0 %vm1487_vm1, %v14949_v58  ;;  %16834 = vst [vmem:[#allocation107_spill] sm:$0xff] %v15151_v23 }
 0x1c9   : > { %11785 = vmatprep.mubr.msk.bf16.mxu1 %vm1487_vm1, %v15120_v9  ;;  %11483 = vmatprep.mubr.msk.bf16.mxu0 %vm1487_vm1, %v14951_v29 }
 0x1d0   : > { %11786 = vmatmul.mubr.msk.bf16.gmra.mrb[24].mxu1 %vm1487_vm1, %v15137_v32  ;;  %11484 = vmatmul.mubr.msk.bf16.gmra.mrb[28].mxu0 %vm1487_vm1, %v14971_v62 }
 0x1d1   : > { %11789 = vmatprep.mubr.msk.bf16.mxu1 %vm1487_vm1, %v15139_v51  ;;  %11489 = vmatprep.mubr.msk.bf16.mxu0 %vm1487_vm1, %v14059_v47 }
 0x1d8   : > { %11790 = vmatmul.mubr.msk.bf16.gmra.mrb[28].mxu1 %vm1487_vm1, %v15151_v23  ;;  %11490 = vmatmul.mubr.msk.bf16.vlgmr.msra.gmra.mrb[0].mxu0 %vm1487_vm1, %v14076_v55 }
 0x1d9   : > { %11522 = vmatpush3.bf16.msra.mxu0 %v15155_v40  ;;  %11795 = vmatprep.mubr.msk.bf16.mxu1 %vm1487_vm1, %v14052_v44 }
 0x1da   : > { %11493 = vmatprep.mubr.msk.bf16.mxu0 %vm1487_vm1, %v14090_v0  ;;  %13539 = vmatprep.subr.msk.bf16.mxu0 %vm1536_vm0, %v15160_v45 }
 0x1e0   : > { %11796 = vmatmul.mubr.msk.bf16.vlgmr.msra.gmra.mrb[0].mxu1 %vm1487_vm1, %v14068_v52  ;;  %11494 = vmatmul.mubr.msk.bf16.gmra.mrb[4].mxu0 %vm1487_vm1, %v14111_v18 }
 0x1e1   : > { %11828 = vmatpush3.bf16.msra.mxu1 %v15155_v40  ;;  %11799 = vmatprep.mubr.msk.bf16.mxu1 %vm1487_vm1, %v14073_v54  ;;  %v16855_v40 = vld [vmem:[#allocation42_spill] sm:$0xff] }
 0x1e2   : > { %11497 = vmatprep.mubr.msk.bf16.mxu0 %vm1487_vm1, %v14119_v24  ;;  %13548 = vmatprep.subr.msk.bf16.mxu1 %vm1536_vm0, %v15160_v45  ;;  %v16872_v24 = vld [vmem:[#allocation44_spill] sm:$0xff] }
 0x1e8   : > { %11800 = vmatmul.mubr.msk.bf16.gmra.mrb[4].mxu1 %vm1487_vm1, %v14105_v13  ;;  %11498 = vmatmul.mubr.msk.bf16.gmra.mrb[8].mxu0 %vm1487_vm1, %v16837_v57  ;;  %v16864_v57 = vld [vmem:[#allocation22_spill] sm:$0xff] }
 0x1e9   : > { %11803 = vmatprep.mubr.msk.bf16.mxu1 %vm1487_vm1, %v16838_v26  ;;  %11501 = vmatprep.mubr.msk.bf16.mxu0 %vm1487_vm1, %v16839_v30  ;;  %v16863_v30 = vld [vmem:[#allocation18_spill] sm:$0xff] }
 0x1f0   : > { %11804 = vmatmul.mubr.msk.bf16.gmra.mrb[8].mxu1 %vm1487_vm1, %v16840_v53  ;;  %11502 = vmatmul.mubr.msk.bf16.gmra.mrb[12].mxu0 %vm1487_vm1, %v16841_v63  ;;  %v16862_v63 = vld [vmem:[#allocation16_spill] sm:$0xff] }
 0x1f1   : > { %11807 = vmatprep.mubr.msk.bf16.mxu1 %vm1487_vm1, %v16842_v56  ;;  %11505 = vmatprep.mubr.msk.bf16.mxu0 %vm1487_vm1, %v16843_v6  ;;  %v13730_v6 = vld [vmem:[%s16439_s1 + $0x4] sm:$0xf] }
 0x1f8   : > { %11808 = vmatmul.mubr.msk.bf16.gmra.mrb[12].mxu1 %vm1487_vm1, %v16844_v42  ;;  %11506 = vmatmul.mubr.msk.bf16.gmra.mrb[16].mxu0 %vm1487_vm1, %v16845_v49  ;;  %v15234_v49 = vld [vmem:[%s14046_s6 + $0x18c] sm:$0xff]  }
 0x1f9   : > { %11811 = vmatprep.mubr.msk.bf16.mxu1 %vm1487_vm1, %v16846_v11  ;;  %11509 = vmatprep.mubr.msk.bf16.mxu0 %vm1487_vm1, %v16847_v25  ;;  %v15225_v25 = vld [vmem:[%s14046_s6 + $0xc0] sm:$0xff]  }
 0x1fa   : > { %16856 = vst [vmem:[#allocation110_spill] sm:$0xff] %v15225_v25 }
 0x200   : > { %11812 = vmatmul.mubr.msk.bf16.gmra.mrb[16].mxu1 %vm1487_vm1, %v16848_v21  ;;  %11510 = vmatmul.mubr.msk.bf16.gmra.mrb[20].mxu0 %vm1487_vm1, %v16849_v8  ;;  %v16857_v8 = vld [vmem:[#allocation39_spill] sm:$0xff] }
 0x201   : > { %11815 = vmatprep.mubr.msk.bf16.mxu1 %vm1487_vm1, %v16850_v10  ;;  %11513 = vmatprep.mubr.msk.bf16.mxu0 %vm1487_vm1, %v16851_v12  ;;  %v16858_v12 = vld [vmem:[#allocation43_spill] sm:$0xff] }
 0x208   : > { %11816 = vmatmul.mubr.msk.bf16.gmra.mrb[20].mxu1 %vm1487_vm1, %v16852_v19  ;;  %11514 = vmatmul.mubr.msk.bf16.gmra.mrb[24].mxu0 %vm1487_vm1, %v16853_v27  ;;  %v15240_v27 = vsel %vm1536_vm0, %v15160_v45, 0  ;;  %v16861_v45 = vld [vmem:[#allocation13_spill] sm:$0xff] }
 0x209   : > { %11819 = vmatprep.mubr.msk.bf16.mxu1 %vm1487_vm1, %v16854_v1  ;;  %11517 = vmatprep.mubr.msk.bf16.mxu0 %vm1487_vm1, %v16855_v40  ;;  %16859 = vst [vmem:[#allocation43_spill] sm:$0xff] %v15240_v27  ;;  %v16860_v40 = vld [vmem:[#allocation10_spill] sm:$0xff] }
 0x210   : > { %11820 = vmatmul.mubr.msk.bf16.gmra.mrb[24].mxu1 %vm1487_vm1, %v16857_v8  ;;  %11518 = vmatmul.mubr.msk.bf16.gmra.mrb[28].mxu0 %vm1487_vm1, %v15225_v25 }
 0x211   : > { %11823 = vmatprep.mubr.msk.bf16.mxu1 %vm1487_vm1, %v16858_v12  ;;  %11523 = vmatprep.mubr.msk.bf16.mxu0 %vm1487_vm1, %v14052_v44 }
 0x218   : > { %11824 = vmatmul.mubr.msk.bf16.gmra.mrb[28].mxu1 %vm1487_vm1, %v15234_v49  ;;  %11524 = vmatmul.mubr.msk.bf16.vlgmr.msra.gmra.mrb[0].mxu0 %vm1487_vm1, %v14068_v52  ;;  %v16873_v52 = vld [vmem:[#allocation45_spill] sm:$0xff] }
 0x219   : > { %11556 = vmatpush3.bf16.msra.mxu0 %v15240_v27  ;;  %11829 = vmatprep.mubr.msk.bf16.mxu1 %vm1487_vm1, %v16860_v40 }
 0x21a   : > { %11527 = vmatprep.mubr.msk.bf16.mxu0 %vm1487_vm1, %v14073_v54  ;;  %13549 = vmatprep.subr.msk.bf16.mxu0 %vm1536_vm0, %v13730_v6 }
 0x220   : > { %11830 = vmatmul.mubr.msk.bf16.vlgmr.msra.gmra.mrb[0].mxu1 %vm1487_vm1, %v16861_v45  ;;  %11528 = vmatmul.mubr.msk.bf16.gmra.mrb[4].mxu0 %vm1487_vm1, %v14105_v13  ;;  %v1127_v13 = vunpack.c.h.bf16 %v15225_v25 }
 0x221   : > { %11862 = vmatpush3.bf16.msra.mxu1 %v15240_v27  ;;  %11833 = vmatprep.mubr.msk.bf16.mxu1 %vm1487_vm1, %v16862_v63  ;;  %v16865_v27 = vld [vmem:[#allocation23_spill] sm:$0xff] }
 0x222   : > { %11531 = vmatprep.mubr.msk.bf16.mxu0 %vm1487_vm1, %v16838_v26  ;;  %13558 = vmatprep.subr.msk.bf16.mxu1 %vm1536_vm0, %v13730_v6  ;;  %v16866_v6 = vld [vmem:[#allocation28_spill] sm:$0xff]  ;;  %v16867_v26 = vld [vmem:[#allocation29_spill] sm:$0xff] }
 0x228   : > { %11834 = vmatmul.mubr.msk.bf16.gmra.mrb[4].mxu1 %vm1487_vm1, %v16863_v30  ;;  %11532 = vmatmul.mubr.msk.bf16.gmra.mrb[8].mxu0 %vm1487_vm1, %v16840_v53  ;;  %v16868_v53 = vld [vmem:[#allocation34_spill] sm:$0xff] }
 0x229   : > { %11837 = vmatprep.mubr.msk.bf16.mxu1 %vm1487_vm1, %v16864_v57  ;;  %11535 = vmatprep.mubr.msk.bf16.mxu0 %vm1487_vm1, %v16842_v56  ;;  %v16869_v56 = vld [vmem:[#allocation35_spill] sm:$0xff] }
 0x230   : > { %11838 = vmatmul.mubr.msk.bf16.gmra.mrb[8].mxu1 %vm1487_vm1, %v16865_v27  ;;  %11536 = vmatmul.mubr.msk.bf16.gmra.mrb[12].mxu0 %vm1487_vm1, %v16844_v42  ;;  %v16870_v42 = vld [vmem:[#allocation40_spill] sm:$0xff] }
 0x231   : > { %11841 = vmatprep.mubr.msk.bf16.mxu1 %vm1487_vm1, %v16866_v6  ;;  %11539 = vmatprep.mubr.msk.bf16.mxu0 %vm1487_vm1, %v16846_v11  ;;  %v1077_v11 = vld [vmem:[%s14046_s6 + $0xc8] sm:$0x1] }
 0x238   : > { %11842 = vmatmul.mubr.msk.bf16.gmra.mrb[12].mxu1 %vm1487_vm1, %v16867_v26  ;;  %11540 = vmatmul.mubr.msk.bf16.gmra.mrb[16].mxu0 %vm1487_vm1, %v16848_v21  ;;  %v16871_v21 = vld [vmem:[#allocation41_spill] sm:$0xff] }
 0x239   : > { %11845 = vmatprep.mubr.msk.bf16.mxu1 %vm1487_vm1, %v16868_v53  ;;  %11543 = vmatprep.mubr.msk.bf16.mxu0 %vm1487_vm1, %v16850_v10  ;;  %v1126_v10 = vunpack.c.l.bf16 %v15225_v25 }
 0x23b   : > { %v3677_v54 = vrot.slane %v1126_v10, 1  ;;  %v16876_v10 = vld [vmem:[#allocation49_spill] sm:$0xff] }
 0x240   : > { %11846 = vmatmul.mubr.msk.bf16.gmra.mrb[16].mxu1 %vm1487_vm1, %v16869_v56  ;;  %11544 = vmatmul.mubr.msk.bf16.gmra.mrb[20].mxu0 %vm1487_vm1, %v16852_v19  ;;  %v1128_v19 = vunpack.c.l.bf16 %v1077_v11 }
 0x241   : > { %11849 = vmatprep.mubr.msk.bf16.mxu1 %vm1487_vm1, %v16870_v42  ;;  %11547 = vmatprep.mubr.msk.bf16.mxu0 %vm1487_vm1, %v16854_v1  ;;  %v3678_v1 = vrot.slane %v1127_v13, 1  ;;  %v16875_v13 = vld [vmem:[#allocation3_spill] sm:$0xff] }
 0x242   : > { %v3680_v18 = vrot.slane %v1128_v19, 1  ;;  %v16880_v19 = vld [vmem:[#allocation53_spill] sm:$0xff] }
 0x243   : > { %v3679_v25 = vsel %vm1961_vm2, %v3677_v54, %v3678_v1  ;;  %v13731_v54 = vld [vmem:[%s16439_s1] sm:$0xf] }
 0x244   : > { %v3681_v0 = vsel %vm1961_vm2, %v3678_v1, %v3680_v18  ;;  %v16878_v18 = vld [vmem:[#allocation51_spill] sm:$0xff]  ;;  %v16881_v1 = vld [vmem:[#allocation54_spill] sm:$0xff] }
 0x245   : > { %v15318_v11 = vpack.c.bf16 %v3681_v0, %v3679_v25  ;;  %v16877_v0 = vld [vmem:[#allocation50_spill] sm:$0xff]  ;;  %v16879_v25 = vld [vmem:[#allocation52_spill] sm:$0xff] }
 0x248   : > { %11850 = vmatmul.mubr.msk.bf16.gmra.mrb[20].mxu1 %vm1487_vm1, %v16871_v21  ;;  %11548 = vmatmul.mubr.msk.bf16.gmra.mrb[24].mxu0 %vm1487_vm1, %v16857_v8  ;;  %v16874_v8 = vld [vmem:[#allocation46_spill] sm:$0xff] }
 0x249   : > { %11853 = vmatprep.mubr.msk.bf16.mxu1 %vm1487_vm1, %v16872_v24  ;;  %11551 = vmatprep.mubr.msk.bf16.mxu0 %vm1487_vm1, %v16858_v12 }
 0x250   : > { %11854 = vmatmul.mubr.msk.bf16.gmra.mrb[24].mxu1 %vm1487_vm1, %v16873_v52  ;;  %11552 = vmatmul.mubr.msk.bf16.gmra.mrb[28].mxu0 %vm1487_vm1, %v15234_v49 }
 0x251   : > { %11857 = vmatprep.mubr.msk.bf16.mxu1 %vm1487_vm1, %v16874_v8  ;;  %11557 = vmatprep.mubr.msk.bf16.mxu0 %vm1487_vm1, %v16860_v40 }
 0x258   : > { %11858 = vmatmul.mubr.msk.bf16.gmra.mrb[28].mxu1 %vm1487_vm1, %v15318_v11  ;;  %11558 = vmatmul.mubr.msk.bf16.vlgmr.msra.gmra.mrb[0].mxu0 %vm1487_vm1, %v16861_v45 }
 0x259   : > { %11896 = vmatpush3.bf16.msra.mxu0 %v16875_v13  ;;  %11863 = vmatprep.mubr.msk.bf16.mxu1 %vm1487_vm1, %v16876_v10 }
 0x25a   : > { %11561 = vmatprep.mubr.msk.bf16.mxu0 %vm1487_vm1, %v16862_v63  ;;  %13550 = vmatprep.subr.msk.bf16.mxu0 %vm1536_vm0, %v13731_v54 }
 0x260   : > { %11864 = vmatmul.mubr.msk.bf16.vlgmr.msra.gmra.mrb[0].mxu1 %vm1487_vm1, %v16877_v0  ;;  %11562 = vmatmul.mubr.msk.bf16.gmra.mrb[4].mxu0 %vm1487_vm1, %v16863_v30 }
 0x261   : > { %12202 = vmatpush3.bf16.msra.mxu1 %v16875_v13  ;;  %11867 = vmatprep.mubr.msk.bf16.mxu1 %vm1487_vm1, %v16878_v18  ;;  %v16882_v13 = vld [vmem:[#allocation55_spill] sm:$0xff]  ;;  %v16888_v18 = vld [vmem:[#allocation62_spill] sm:$0xff] }
 0x262   : > { %11565 = vmatprep.mubr.msk.bf16.mxu0 %vm1487_vm1, %v16864_v57  ;;  %13559 = vmatprep.subr.msk.bf16.mxu1 %vm1536_vm0, %v13731_v54  ;;  %v16883_v54 = vld [vmem:[#allocation56_spill] sm:$0xff] }
 0x268   : > { %11868 = vmatmul.mubr.msk.bf16.gmra.mrb[4].mxu1 %vm1487_vm1, %v16879_v25  ;;  %11566 = vmatmul.mubr.msk.bf16.gmra.mrb[8].mxu0 %vm1487_vm1, %v16865_v27  ;;  %v16887_v25 = vld [vmem:[#allocation60_spill] sm:$0xff] }
 0x269   : > { %11871 = vmatprep.mubr.msk.bf16.mxu1 %vm1487_vm1, %v16880_v19  ;;  %11569 = vmatprep.mubr.msk.bf16.mxu0 %vm1487_vm1, %v16866_v6  ;;  %v16884_v19 = vld [vmem:[#allocation57_spill] sm:$0xff] }
 0x270   : > { %11872 = vmatmul.mubr.msk.bf16.gmra.mrb[8].mxu1 %vm1487_vm1, %v16881_v1  ;;  %11570 = vmatmul.mubr.msk.bf16.gmra.mrb[12].mxu0 %vm1487_vm1, %v16867_v26  ;;  %v16885_v1 = vld [vmem:[#allocation58_spill] sm:$0xff] }
 0x271   : > { %11875 = vmatprep.mubr.msk.bf16.mxu1 %vm1487_vm1, %v16882_v13  ;;  %11573 = vmatprep.mubr.msk.bf16.mxu0 %vm1487_vm1, %v16868_v53  ;;  %v16886_v13 = vld [vmem:[#allocation59_spill] sm:$0xff] }
 0x278   : > { %11876 = vmatmul.mubr.msk.bf16.gmra.mrb[12].mxu1 %vm1487_vm1, %v16883_v54  ;;  %11574 = vmatmul.mubr.msk.bf16.gmra.mrb[16].mxu0 %vm1487_vm1, %v16869_v56  ;;  %v9849_v54 = vld [vmem:[%s14046_s6 + $0x194] sm:$0x1] }
 0x279   : > { %11879 = vmatprep.mubr.msk.bf16.mxu1 %vm1487_vm1, %v16884_v19  ;;  %11577 = vmatprep.mubr.msk.bf16.mxu0 %vm1487_vm1, %v16870_v42  ;;  %v1229_v19 = vunpack.c.l.bf16 %v15234_v49  ;;  %v16891_v42 = vld [vmem:[#allocation65_spill] sm:$0xff] }
 0x27b   : > { %v5815_v0 = vrot.slane %v1229_v19, 1  ;;  %v16892_v19 = vld [vmem:[#allocation4_spill] sm:$0xff] }
 0x280   : > { %11880 = vmatmul.mubr.msk.bf16.gmra.mrb[16].mxu1 %vm1487_vm1, %v16885_v1  ;;  %11578 = vmatmul.mubr.msk.bf16.gmra.mrb[20].mxu0 %vm1487_vm1, %v16871_v21  ;;  %v1230_v1 = vunpack.c.h.bf16 %v15234_v49  ;;  %v16889_v21 = vld [vmem:[#allocation63_spill] sm:$0xff] }
 0x281   : > { %11883 = vmatprep.mubr.msk.bf16.mxu1 %vm1487_vm1, %v16886_v13  ;;  %11581 = vmatprep.mubr.msk.bf16.mxu0 %vm1487_vm1, %v16872_v24  ;;  %v1231_v13 = vunpack.c.l.bf16 %v9849_v54 }
 0x282   : > { %v5816_v10 = vrot.slane %v1230_v1, 1  ;;  %v16897_v1 = vld [vmem:[#allocation47_spill] sm:$0xff] }
 0x283   : > { %v5818_v24 = vrot.slane %v1231_v13, 1  ;;  %v16898_v13 = vld [vmem:[#allocation66_spill] sm:$0xff] }
 0x288   : > { %11884 = vmatmul.mubr.msk.bf16.gmra.mrb[20].mxu1 %vm1487_vm1, %v16887_v25  ;;  %11582 = vmatmul.mubr.msk.bf16.gmra.mrb[24].mxu0 %vm1487_vm1, %v16873_v52  ;;  %v16890_v25 = vld [vmem:[#allocation67_spill] sm:$0xff]  ;;  %v5817_v52 = vsel %vm1961_vm2, %v5815_v0, %v5816_v10  ;;  %v16895_v0 = vld [vmem:[#allocation61_spill] sm:$0xff] }
 0x289   : > { %11887 = vmatprep.mubr.msk.bf16.mxu1 %vm1487_vm1, %v16888_v18  ;;  %11585 = vmatprep.mubr.msk.bf16.mxu0 %vm1487_vm1, %v16874_v8  ;;  %v5819_v18 = vsel %vm1961_vm2, %v5816_v10, %v5818_v24  ;;  %v13732_v24 = vld [vmem:[%s16439_s1 + $0x8] sm:$0xf] }
 0x28a   : > { %v15396_v54 = vpack.c.bf16 %v5819_v18, %v5817_v52  ;;  %v16893_v52 = vld [vmem:[#allocation88_spill] sm:$0xff] }
 0x28b   : > { %v16894_v10 = vld [vmem:[#allocation72_spill] sm:$0xff] }
 0x28c   : > { %v16896_v18 = vld [vmem:[#allocation64_spill] sm:$0xff] }
 0x290   : > { %11888 = vmatmul.mubr.msk.bf16.gmra.mrb[24].mxu1 %vm1487_vm1, %v16889_v21  ;;  %11586 = vmatmul.mubr.msk.bf16.gmra.mrb[28].mxu0 %vm1487_vm1, %v15318_v11 }
 0x291   : > { %11891 = vmatprep.mubr.msk.bf16.mxu1 %vm1487_vm1, %v16890_v25  ;;  %11897 = vmatprep.mubr.msk.bf16.mxu0 %vm1487_vm1, %v16891_v42 }
 0x298   : > { %11892 = vmatmul.mubr.msk.bf16.gmra.mrb[28].mxu1 %vm1487_vm1, %v15396_v54  ;;  %11898 = vmatmul.mubr.msk.bf16.vlgmr.msra.gmra.mrb[32].mxu0 %vm1487_vm1, %v14625_v14 }
 0x299   : > { %11930 = vmatpush3.bf16.msra.mxu0 %v16892_v19  ;;  %12203 = vmatprep.mubr.msk.bf16.mxu1 %vm1487_vm1, %v14783_v20 }
 0x29a   : > { %11901 = vmatprep.mubr.msk.bf16.mxu0 %vm1487_vm1, %v14633_v17  ;;  %13551 = vmatprep.subr.msk.bf16.mxu0 %vm1536_vm0, %v13732_v24 }
 0x2a0   : > { %12204 = vmatmul.mubr.msk.bf16.vlgmr.msra.gmra.mrb[32].mxu1 %vm1487_vm1, %v14814_v50  ;;  %11902 = vmatmul.mubr.msk.bf16.gmra.mrb[36].mxu0 %vm1487_vm1, %v14648_v28 }
 0x2a1   : > { %12236 = vmatpush3.bf16.msra.mxu1 %v16892_v19  ;;  %12207 = vmatprep.mubr.msk.bf16.mxu1 %vm1487_vm1, %v16893_v52  ;;  %v13733_v19 = vld [vmem:[%s16439_s1 + $0xc] sm:$0xf] }
 0x2a2   : > { %11905 = vmatprep.mubr.msk.bf16.mxu0 %vm1487_vm1, %v16894_v10  ;;  %13560 = vmatprep.subr.msk.bf16.mxu1 %vm1536_vm0, %v13732_v24  ;;  %v16899_v24 = vld [vmem:[#allocation69_spill] sm:$0xff] }
 0x2a8   : > { %12208 = vmatmul.mubr.msk.bf16.gmra.mrb[36].mxu1 %vm1487_vm1, %v14839_v15  ;;  %11906 = vmatmul.mubr.msk.bf16.gmra.mrb[40].mxu0 %vm1487_vm1, %v14670_v41 }
 0x2a9   : > { %12211 = vmatprep.mubr.msk.bf16.mxu1 %vm1487_vm1, %v14841_v3  ;;  %11909 = vmatprep.mubr.msk.bf16.mxu0 %vm1487_vm1, %v14678_v2 }
 0x2b0   : > { %12212 = vmatmul.mubr.msk.bf16.gmra.mrb[40].mxu1 %vm1487_vm1, %v14861_v35  ;;  %11910 = vmatmul.mubr.msk.bf16.gmra.mrb[44].mxu0 %vm1487_vm1, %v14690_v4 }
 0x2b1   : > { %12215 = vmatprep.mubr.msk.bf16.mxu1 %vm1487_vm1, %v14863_v34  ;;  %11913 = vmatprep.mubr.msk.bf16.mxu0 %vm1487_vm1, %v14698_v22 }
 0x2b8   : > { %12216 = vmatmul.mubr.msk.bf16.gmra.mrb[44].mxu1 %vm1487_vm1, %v14883_v7  ;;  %11914 = vmatmul.mubr.msk.bf16.gmra.mrb[48].mxu0 %vm1487_vm1, %v14710_v39 }
 0x2b9   : > { %12219 = vmatprep.mubr.msk.bf16.mxu1 %vm1487_vm1, %v14885_v33  ;;  %11917 = vmatprep.mubr.msk.bf16.mxu0 %vm1487_vm1, %v14718_v59 }
 0x2c0   : > { %12220 = vmatmul.mubr.msk.bf16.gmra.mrb[48].mxu1 %vm1487_vm1, %v14905_v36  ;;  %11918 = vmatmul.mubr.msk.bf16.gmra.mrb[52].mxu0 %vm1487_vm1, %v14730_v61 }
 0x2c1   : > { %12223 = vmatprep.mubr.msk.bf16.mxu1 %vm1487_vm1, %v14907_v37  ;;  %11921 = vmatprep.mubr.msk.bf16.mxu0 %vm1487_vm1, %v14738_v38 }
 0x2c8   : > { %12224 = vmatmul.mubr.msk.bf16.gmra.mrb[52].mxu1 %vm1487_vm1, %v14927_v46  ;;  %11922 = vmatmul.mubr.msk.bf16.gmra.mrb[56].mxu0 %vm1487_vm1, %v14751_v60 }
 0x2c9   : > { %12227 = vmatprep.mubr.msk.bf16.mxu1 %vm1487_vm1, %v14929_v43  ;;  %11925 = vmatprep.mubr.msk.bf16.mxu0 %vm1487_vm1, %v14761_v31 }
 0x2d0   : > { %12228 = vmatmul.mubr.msk.bf16.gmra.mrb[56].mxu1 %vm1487_vm1, %v14949_v58  ;;  %11926 = vmatmul.mubr.msk.bf16.gmra.mrb[60].mxu0 %vm1487_vm1, %v14775_v5 }
 0x2d1   : > { %12231 = vmatprep.mubr.msk.bf16.mxu1 %vm1487_vm1, %v14951_v29  ;;  %11931 = vmatprep.mubr.msk.bf16.mxu0 %vm1487_vm1, %v16895_v0  ;;  %v16901_v0 = vld [vmem:[#allocation71_spill] sm:$0xff] }
 0x2d8   : > { %12232 = vmatmul.mubr.msk.bf16.gmra.mrb[60].mxu1 %vm1487_vm1, %v14971_v62  ;;  %11932 = vmatmul.mubr.msk.bf16.vlgmr.msra.gmra.mrb[32].mxu0 %vm1487_vm1, %v16896_v18 }
 0x2d9   : > { %11964 = vmatpush3.bf16.msra.mxu0 %v16897_v1  ;;  %12237 = vmatprep.mubr.msk.bf16.mxu1 %vm1487_vm1, %v16891_v42  ;;  %v16900_v42 = vld [vmem:[#allocation70_spill] sm:$0xff] }
 0x2da   : > { %11935 = vmatprep.mubr.msk.bf16.mxu0 %vm1487_vm1, %v16898_v13  ;;  %13552 = vmatprep.subr.msk.bf16.mxu0 %vm1536_vm0, %v13733_v19 }
 0x2e0   : > { %12238 = vmatmul.mubr.msk.bf16.vlgmr.msra.gmra.mrb[32].mxu1 %vm1487_vm1, %v14625_v14  ;;  %11936 = vmatmul.mubr.msk.bf16.gmra.mrb[36].mxu0 %vm1487_vm1, %v16899_v24  ;;  %v16902_v24 = vld [vmem:[#allocation73_spill] sm:$0xff] }
 0x2e1   : > { %12270 = vmatpush3.bf16.msra.mxu1 %v16897_v1  ;;  %12241 = vmatprep.mubr.msk.bf16.mxu1 %vm1487_vm1, %v14633_v17  ;;  %v16903_v1 = vld [vmem:[#allocation74_spill] sm:$0xff] }
 0x2e2   : > { %11939 = vmatprep.mubr.msk.bf16.mxu0 %vm1487_vm1, %v16900_v42  ;;  %13561 = vmatprep.subr.msk.bf16.mxu1 %vm1536_vm0, %v13733_v19  ;;  %v16904_v19 = vld [vmem:[#allocation75_spill] sm:$0xff] }
 0x2e8   : > { %12242 = vmatmul.mubr.msk.bf16.gmra.mrb[36].mxu1 %vm1487_vm1, %v14648_v28  ;;  %11940 = vmatmul.mubr.msk.bf16.gmra.mrb[40].mxu0 %vm1487_vm1, %v16901_v0  ;;  %v16905_v0 = vld [vmem:[#allocation76_spill] sm:$0xff] }
 0x2e9   : > { %12245 = vmatprep.mubr.msk.bf16.mxu1 %vm1487_vm1, %v16894_v10  ;;  %11943 = vmatprep.mubr.msk.bf16.mxu0 %vm1487_vm1, %v16902_v24  ;;  %v16906_v24 = vld [vmem:[#allocation77_spill] sm:$0xff] }
 0x2f0   : > { %12246 = vmatmul.mubr.msk.bf16.gmra.mrb[40].mxu1 %vm1487_vm1, %v14670_v41  ;;  %11944 = vmatmul.mubr.msk.bf16.gmra.mrb[44].mxu0 %vm1487_vm1, %v16903_v1  ;;  %v16907_v1 = vld [vmem:[#allocation78_spill] sm:$0xff] }
 0x2f1   : > { %12249 = vmatprep.mubr.msk.bf16.mxu1 %vm1487_vm1, %v14678_v2  ;;  %11947 = vmatprep.mubr.msk.bf16.mxu0 %vm1487_vm1, %v16904_v19  ;;  %v16908_v19 = vld [vmem:[#allocation79_spill] sm:$0xff] }
 0x2f8   : > { %12250 = vmatmul.mubr.msk.bf16.gmra.mrb[44].mxu1 %vm1487_vm1, %v14690_v4  ;;  %11948 = vmatmul.mubr.msk.bf16.gmra.mrb[48].mxu0 %vm1487_vm1, %v16905_v0  ;;  %v16909_v0 = vld [vmem:[#allocation80_spill] sm:$0xff] }
 0x2f9   : > { %12253 = vmatprep.mubr.msk.bf16.mxu1 %vm1487_vm1, %v14698_v22  ;;  %11951 = vmatprep.mubr.msk.bf16.mxu0 %vm1487_vm1, %v16906_v24  ;;  %v16910_v24 = vld [vmem:[#allocation82_spill] sm:$0xff] }
 0x300   : > { %12254 = vmatmul.mubr.msk.bf16.gmra.mrb[48].mxu1 %vm1487_vm1, %v14710_v39  ;;  %11952 = vmatmul.mubr.msk.bf16.gmra.mrb[52].mxu0 %vm1487_vm1, %v16907_v1  ;;  %v16911_v1 = vld [vmem:[#allocation83_spill] sm:$0xff] }
 0x301   : > { %12257 = vmatprep.mubr.msk.bf16.mxu1 %vm1487_vm1, %v14718_v59  ;;  %11955 = vmatprep.mubr.msk.bf16.mxu0 %vm1487_vm1, %v16908_v19 }
 0x308   : > { %12258 = vmatmul.mubr.msk.bf16.gmra.mrb[52].mxu1 %vm1487_vm1, %v14730_v61  ;;  %11956 = vmatmul.mubr.msk.bf16.gmra.mrb[56].mxu0 %vm1487_vm1, %v16909_v0 }
 0x309   : > { %12261 = vmatprep.mubr.msk.bf16.mxu1 %vm1487_vm1, %v14738_v38  ;;  %11959 = vmatprep.mubr.msk.bf16.mxu0 %vm1487_vm1, %v16910_v24  ;;  %v16912_v38 = vld [vmem:[#allocation48_spill] sm:$0xff]  ;;  %v16913_v24 = vld [vmem:[#allocation95_spill] sm:$0xff] }
 0x310   : > { %12262 = vmatmul.mubr.msk.bf16.gmra.mrb[56].mxu1 %vm1487_vm1, %v14751_v60  ;;  %11960 = vmatmul.mubr.msk.bf16.gmra.mrb[60].mxu0 %vm1487_vm1, %v16911_v1 }
 0x311   : > { %12265 = vmatprep.mubr.msk.bf16.mxu1 %vm1487_vm1, %v14761_v31  ;;  %11965 = vmatprep.mubr.msk.bf16.mxu0 %vm1487_vm1, %v14783_v20  ;;  %v13734_v31 = vld [vmem:[%s16439_s1 + $0x10] sm:$0xf]  ;;  %v16914_v20 = vld [vmem:[#allocation98_spill] sm:$0xff] }
 0x318   : > { %12266 = vmatmul.mubr.msk.bf16.gmra.mrb[60].mxu1 %vm1487_vm1, %v14775_v5  ;;  %11966 = vmatmul.mubr.msk.bf16.vlgmr.msra.gmra.mrb[32].mxu0 %vm1487_vm1, %v14814_v50 }
 0x319   : > { %11998 = vmatpush3.bf16.msra.mxu0 %v16912_v38  ;;  %12271 = vmatprep.mubr.msk.bf16.mxu1 %vm1487_vm1, %v16913_v24  ;;  %v16915_v24 = vld [vmem:[#allocation99_spill] sm:$0xff] }
 0x31a   : > { %11969 = vmatprep.mubr.msk.bf16.mxu0 %vm1487_vm1, %v16893_v52  ;;  %13553 = vmatprep.subr.msk.bf16.mxu0 %vm1536_vm0, %v13734_v31 }
 0x320   : > { %12272 = vmatmul.mubr.msk.bf16.vlgmr.msra.gmra.mrb[32].mxu1 %vm1487_vm1, %v15005_v48  ;;  %11970 = vmatmul.mubr.msk.bf16.gmra.mrb[36].mxu0 %vm1487_vm1, %v14839_v15  ;;  %v16916_v48 = vld [vmem:[#allocation100_spill] sm:$0xff] }
 0x321   : > { %12304 = vmatpush3.bf16.msra.mxu1 %v16912_v38  ;;  %12275 = vmatprep.mubr.msk.bf16.mxu1 %vm1487_vm1, %v16914_v20 }
 0x322   : > { %11973 = vmatprep.mubr.msk.bf16.mxu0 %vm1487_vm1, %v14841_v3  ;;  %13562 = vmatprep.subr.msk.bf16.mxu1 %vm1536_vm0, %v13734_v31  ;;  %v16921_v31 = vld [vmem:[#allocation101_spill] sm:$0xff] }
 0x328   : > { %12276 = vmatmul.mubr.msk.bf16.gmra.mrb[36].mxu1 %vm1487_vm1, %v16915_v24  ;;  %11974 = vmatmul.mubr.msk.bf16.gmra.mrb[40].mxu0 %vm1487_vm1, %v14861_v35  ;;  %v16922_v24 = vld [vmem:[#allocation102_spill] sm:$0xff] }
 0x329   : > { %12279 = vmatprep.mubr.msk.bf16.mxu1 %vm1487_vm1, %v16916_v48  ;;  %11977 = vmatprep.mubr.msk.bf16.mxu0 %vm1487_vm1, %v14863_v34 }
 0x32b   : > { %v15571_v38 = vpop.f32.mrb[0].mxu0 }
 0x32c   : > { %16917 = vst [vmem:[#allocation10_spill] sm:$0xff] %v15571_v38  ;;  %v15573_v20 = vpop.f32.mrb[1].mxu0 }
 0x32d   : > { %16918 = vst [vmem:[#allocation13_spill] sm:$0xff] %v15573_v20  ;;  %v15575_v15 = vpop.f32.mrb[2].mxu0 }
 0x32e   : > { %16919 = vst [vmem:[#allocation16_spill] sm:$0xff] %v15575_v15  ;;  %v15577_v3 = vpop.f32.mrb[3].mxu0 }
 0x32f   : > { %16920 = vst [vmem:[#allocation18_spill] sm:$0xff] %v15577_v3  ;;  %v16942_v3 = vld [vmem:[#allocation106_spill] sm:$0xff] }
 0x330   : > { %12280 = vmatmul.mubr.msk.bf16.gmra.mrb[40].mxu1 %vm1487_vm1, %v16921_v31  ;;  %11978 = vmatmul.mubr.msk.bf16.gmra.mrb[44].mxu0 %vm1487_vm1, %v14883_v7  ;;  %v16932_v31 = vld [vmem:[#allocation104_spill] sm:$0xff] }
 0x331   : > { %12283 = vmatprep.mubr.msk.bf16.mxu1 %vm1487_vm1, %v16922_v24  ;;  %11981 = vmatprep.mubr.msk.bf16.mxu0 %vm1487_vm1, %v14885_v33 }
 0x333   : > { %v15587_v48 = vpop.f32.mrb[0].mxu1  ;;  %v15589_v34 = vpop.f32.mrb[4].mxu0 }
 0x334   : > { %16923 = vst [vmem:[#allocation22_spill] sm:$0xff] %v15587_v48  ;;  %16924 = vst [vmem:[#allocation23_spill] sm:$0xff] %v15589_v34  ;;  %v15593_v52 = vpop.f32.mrb[1].mxu1  ;;  %v15595_v50 = vpop.f32.mrb[5].mxu0  ;;  %v16931_v48 = vld [vmem:[#allocation103_spill] sm:$0xff] }
 0x335   : > { %16925 = vst [vmem:[#allocation28_spill] sm:$0xff] %v15593_v52  ;;  %16926 = vst [vmem:[#allocation29_spill] sm:$0xff] %v15595_v50  ;;  %v15599_v7 = vpop.f32.mrb[2].mxu1  ;;  %v15601_v24 = vpop.f32.mrb[6].mxu0 }
 0x336   : > { %16927 = vst [vmem:[#allocation34_spill] sm:$0xff] %v15599_v7  ;;  %16928 = vst [vmem:[#allocation35_spill] sm:$0xff] %v15601_v24  ;;  %v15605_v5 = vpop.f32.mrb[3].mxu1  ;;  %v15607_v1 = vpop.f32.mrb[7].mxu0 }
 0x337   : > { %16929 = vst [vmem:[#allocation46_spill] sm:$0xff] %v15605_v5  ;;  %16930 = vst [vmem:[#allocation3_spill] sm:$0xff] %v15607_v1 }
 0x338   : > { %12284 = vmatmul.mubr.msk.bf16.gmra.mrb[44].mxu1 %vm1487_vm1, %v16931_v48  ;;  %11982 = vmatmul.mubr.msk.bf16.gmra.mrb[48].mxu0 %vm1487_vm1, %v14905_v36 }
 0x339   : > { %12287 = vmatprep.mubr.msk.bf16.mxu1 %vm1487_vm1, %v16932_v31  ;;  %11985 = vmatprep.mubr.msk.bf16.mxu0 %vm1487_vm1, %v14907_v37 }
 0x33b   : > { %v15619_v33 = vpop.f32.mrb[4].mxu1  ;;  %v15621_v7 = vpop.f32.mrb[8].mxu0 }
 0x33c   : > { %16933 = vst [vmem:[#allocation63_spill] sm:$0xff] %v15619_v33  ;;  %16934 = vst [vmem:[#allocation67_spill] sm:$0xff] %v15621_v7  ;;  %v15625_v35 = vpop.f32.mrb[5].mxu1  ;;  %v15627_v5 = vpop.f32.mrb[9].mxu0  ;;  %v16941_v33 = vld [vmem:[#allocation105_spill] sm:$0xff] }
 0x33d   : > { %16935 = vst [vmem:[#allocation65_spill] sm:$0xff] %v15625_v35  ;;  %16936 = vst [vmem:[#allocation4_spill] sm:$0xff] %v15627_v5  ;;  %v15631_v52 = vpop.f32.mrb[6].mxu1  ;;  %v15633_v20 = vpop.f32.mrb[10].mxu0 }
 0x33e   : > { %16937 = vst [vmem:[#allocation72_spill] sm:$0xff] %v15631_v52  ;;  %16938 = vst [vmem:[#allocation61_spill] sm:$0xff] %v15633_v20  ;;  %v15637_v31 = vpop.f32.mrb[7].mxu1  ;;  %v15639_v48 = vpop.f32.mrb[11].mxu0 }
 0x33f   : > { %16939 = vst [vmem:[#allocation64_spill] sm:$0xff] %v15637_v31  ;;  %16940 = vst [vmem:[#allocation47_spill] sm:$0xff] %v15639_v48 }
 0x340   : > { %12288 = vmatmul.mubr.msk.bf16.gmra.mrb[48].mxu1 %vm1487_vm1, %v16941_v33  ;;  %11986 = vmatmul.mubr.msk.bf16.gmra.mrb[52].mxu0 %vm1487_vm1, %v14927_v46 }
 0x341   : > { %12291 = vmatprep.mubr.msk.bf16.mxu1 %vm1487_vm1, %v16942_v3  ;;  %11989 = vmatprep.mubr.msk.bf16.mxu0 %vm1487_vm1, %v14929_v43 }
 0x343   : > { %v15651_v38 = vpop.f32.mrb[8].mxu1  ;;  %v15653_v52 = vpop.f32.mrb[12].mxu0 }
 0x344   : > { %16943 = vst [vmem:[#allocation66_spill] sm:$0xff] %v15651_v38  ;;  %16944 = vst [vmem:[#allocation70_spill] sm:$0xff] %v15653_v52  ;;  %v15657_v15 = vpop.f32.mrb[9].mxu1  ;;  %v15659_v31 = vpop.f32.mrb[13].mxu0 }
 0x345   : > { %16945 = vst [vmem:[#allocation79_spill] sm:$0xff] %v15657_v15  ;;  %16946 = vst [vmem:[#allocation80_spill] sm:$0xff] %v15659_v31  ;;  %v15663_v35 = vpop.f32.mrb[10].mxu1  ;;  %v15665_v50 = vpop.f32.mrb[14].mxu0 }
 0x346   : > { %16947 = vst [vmem:[#allocation48_spill] sm:$0xff] %v15663_v35  ;;  %16948 = vst [vmem:[#allocation95_spill] sm:$0xff] %v15665_v50  ;;  %v15669_v3 = vpop.f32.mrb[11].mxu1  ;;  %v15671_v33 = vpop.f32.mrb[15].mxu0 }
 0x347   : > { %16949 = vst [vmem:[#allocation111_spill] sm:$0xff] %v15669_v3  ;;  %16950 = vst [vmem:[#allocation112_spill] sm:$0xff] %v15671_v33  ;;  %v16967_v33 = vld [vmem:[#allocation68_spill] sm:$0xff] }
 0x348   : > { %12292 = vmatmul.mubr.msk.bf16.gmra.mrb[52].mxu1 %vm1487_vm1, %v15118_v16  ;;  %11990 = vmatmul.mubr.msk.bf16.gmra.mrb[56].mxu0 %vm1487_vm1, %v14949_v58 }
 0x349   : > { %12295 = vmatprep.mubr.msk.bf16.mxu1 %vm1487_vm1, %v15120_v9  ;;  %11993 = vmatprep.mubr.msk.bf16.mxu0 %vm1487_vm1, %v14951_v29 }
 0x34b   : > { %v15683_v34 = vpop.f32.mrb[12].mxu1  ;;  %v15685_v1 = vpop.f32.mrb[16].mxu0 }
 0x34c   : > { %16951 = vst [vmem:[#allocation113_spill] sm:$0xff] %v15683_v34  ;;  %16952 = vst [vmem:[#allocation114_spill] sm:$0xff] %v15685_v1  ;;  %v15689_v24 = vpop.f32.mrb[13].mxu1  ;;  %v15691_v3 = vpop.f32.mrb[17].mxu0 }
 0x34d   : > { %16953 = vst [vmem:[#allocation115_spill] sm:$0xff] %v15689_v24  ;;  %16954 = vst [vmem:[#allocation116_spill] sm:$0xff] %v15691_v3  ;;  %v15695_v20 = vpop.f32.mrb[14].mxu1  ;;  %v15697_v15 = vpop.f32.mrb[18].mxu0 }
 0x34e   : > { %16955 = vst [vmem:[#allocation117_spill] sm:$0xff] %v15695_v20  ;;  %16956 = vst [vmem:[#allocation118_spill] sm:$0xff] %v15697_v15  ;;  %v15701_v38 = vpop.f32.mrb[15].mxu1  ;;  %v15703_v7 = vpop.f32.mrb[19].mxu0 }
 0x34f   : > { %16957 = vst [vmem:[#allocation119_spill] sm:$0xff] %v15701_v38  ;;  %16958 = vst [vmem:[#allocation120_spill] sm:$0xff] %v15703_v7 }
 0x350   : > { %12296 = vmatmul.mubr.msk.bf16.gmra.mrb[56].mxu1 %vm1487_vm1, %v15137_v32  ;;  %11994 = vmatmul.mubr.msk.bf16.gmra.mrb[60].mxu0 %vm1487_vm1, %v14971_v62 }
 0x351   : > { %12299 = vmatprep.mubr.msk.bf16.mxu1 %vm1487_vm1, %v15139_v51  ;;  %11999 = vmatprep.mubr.msk.bf16.mxu0 %vm1487_vm1, %v14059_v47  ;;  %v13735_v47 = vld [vmem:[%s16439_s1 + $0x14] sm:$0xf] }
 0x353   : > { %v15715_v5 = vpop.f32.mrb[16].mxu1  ;;  %v15717_v48 = vpop.f32.mrb[20].mxu0 }
 0x354   : > { %16959 = vst [vmem:[#allocation121_spill] sm:$0xff] %v15715_v5  ;;  %16960 = vst [vmem:[#allocation122_spill] sm:$0xff] %v15717_v48  ;;  %v15721_v35 = vpop.f32.mrb[17].mxu1  ;;  %v15723_v38 = vpop.f32.mrb[21].mxu0  ;;  %v16978_v48 = vld [vmem:[#allocation9_spill] sm:$0xff] }
 0x355   : > { %16961 = vst [vmem:[#allocation123_spill] sm:$0xff] %v15721_v35  ;;  %16962 = vst [vmem:[#allocation124_spill] sm:$0xff] %v15723_v38  ;;  %v15727_v50 = vpop.f32.mrb[18].mxu1  ;;  %v15729_v24 = vpop.f32.mrb[22].mxu0  ;;  %v16968_v35 = vld [vmem:[#allocation7_spill] sm:$0xff] }
 0x356   : > { %16963 = vst [vmem:[#allocation125_spill] sm:$0xff] %v15727_v50  ;;  %16964 = vst [vmem:[#allocation126_spill] sm:$0xff] %v15729_v24  ;;  %v15733_v31 = vpop.f32.mrb[19].mxu1  ;;  %v15735_v34 = vpop.f32.mrb[23].mxu0 }
 0x357   : > { %16965 = vst [vmem:[#allocation127_spill] sm:$0xff] %v15733_v31  ;;  %16966 = vst [vmem:[#allocation128_spill] sm:$0xff] %v15735_v34 }
 0x358   : > { %12300 = vmatmul.mubr.msk.bf16.gmra.mrb[60].mxu1 %vm1487_vm1, %v15151_v23  ;;  %12000 = vmatmul.mubr.msk.bf16.vlgmr.msra.gmra.mrb[32].mxu0 %vm1487_vm1, %v14076_v55  ;;  %v16997_v23 = vld [vmem:[#allocation19_spill] sm:$0xff]  ;;  %v16999_v55 = vld [vmem:[#allocation24_spill] sm:$0xff] }
 0x359   : > { %12032 = vmatpush3.bf16.msra.mxu0 %v16967_v33  ;;  %12305 = vmatprep.mubr.msk.bf16.mxu1 %vm1487_vm1, %v14052_v44 }
 0x35a   : > { %12003 = vmatprep.mubr.msk.bf16.mxu0 %vm1487_vm1, %v16968_v35  ;;  %13554 = vmatprep.subr.msk.bf16.mxu0 %vm1536_vm0, %v13735_v47  ;;  %v16979_v35 = vld [vmem:[#allocation6_spill] sm:$0xff] }
 0x35b   : > { %v15752_v20 = vpop.f32.mrb[20].mxu1  ;;  %v15754_v31 = vpop.f32.mrb[24].mxu0 }
 0x35c   : > { %16969 = vst [vmem:[#allocation68_spill] sm:$0xff] %v15752_v20  ;;  %16970 = vst [vmem:[#allocation7_spill] sm:$0xff] %v15754_v31  ;;  %v15758_v7 = vpop.f32.mrb[21].mxu1  ;;  %v15760_v50 = vpop.f32.mrb[25].mxu0  ;;  %v16977_v20 = vld [vmem:[#allocation5_spill] sm:$0xff]  ;;  %v16989_v31 = vld [vmem:[#allocation15_spill] sm:$0xff] }
 0x35d   : > { %16971 = vst [vmem:[#allocation129_spill] sm:$0xff] %v15758_v7  ;;  %16972 = vst [vmem:[#allocation130_spill] sm:$0xff] %v15760_v50  ;;  %v15764_v15 = vpop.f32.mrb[22].mxu1  ;;  %v15766_v3 = vpop.f32.mrb[26].mxu0  ;;  %v16980_v7 = vld [vmem:[#allocation11_spill] sm:$0xff]  ;;  %v16996_v50 = vld [vmem:[#allocation14_spill] sm:$0xff] }
 0x35e   : > { %16973 = vst [vmem:[#allocation131_spill] sm:$0xff] %v15764_v15  ;;  %16974 = vst [vmem:[#allocation132_spill] sm:$0xff] %v15766_v3  ;;  %v15770_v1 = vpop.f32.mrb[23].mxu1  ;;  %v15772_v52 = vpop.f32.mrb[27].mxu0 }
 0x35f   : > { %16975 = vst [vmem:[#allocation133_spill] sm:$0xff] %v15770_v1  ;;  %16976 = vst [vmem:[#allocation134_spill] sm:$0xff] %v15772_v52 }
 0x360   : > { %12306 = vmatmul.mubr.msk.bf16.vlgmr.msra.gmra.mrb[32].mxu1 %vm1487_vm1, %v16977_v20  ;;  %12004 = vmatmul.mubr.msk.bf16.gmra.mrb[36].mxu0 %vm1487_vm1, %v16978_v48 }
 0x361   : > { %12338 = vmatpush3.bf16.msra.mxu1 %v16967_v33  ;;  %12309 = vmatprep.mubr.msk.bf16.mxu1 %vm1487_vm1, %v16979_v35  ;;  %v16990_v33 = vld [vmem:[#allocation12_spill] sm:$0xff] }
 0x362   : > { %12007 = vmatprep.mubr.msk.bf16.mxu0 %vm1487_vm1, %v16980_v7  ;;  %13563 = vmatprep.subr.msk.bf16.mxu1 %vm1536_vm0, %v13735_v47 }
 0x363   : > { %v15786_v5 = vpop.f32.mrb[24].mxu1  ;;  %v15788_v15 = vpop.f32.mrb[28].mxu0 }
 0x364   : > { %16981 = vst [vmem:[#allocation5_spill] sm:$0xff] %v15786_v5  ;;  %v15792_v1 = vpop.f32.mrb[25].mxu1  ;;  %v15794_v48 = vpop.f32.mrb[29].mxu0  ;;  %v16988_v5 = vld [vmem:[#allocation8_spill] sm:$0xff] }
 0x365   : > { %16982 = vst [vmem:[#allocation9_spill] sm:$0xff] %v15792_v1  ;;  %16983 = vst [vmem:[#allocation6_spill] sm:$0xff] %v15794_v48  ;;  %v15798_v34 = vpop.f32.mrb[26].mxu1  ;;  %v15800_v24 = vpop.f32.mrb[30].mxu0  ;;  %v16991_v1 = vld [vmem:[#allocation17_spill] sm:$0xff]  ;;  %v17010_v48 = vld [vmem:[#allocation38_spill] sm:$0xff] }
 0x366   : > { %16984 = vst [vmem:[#allocation11_spill] sm:$0xff] %v15798_v34  ;;  %16985 = vst [vmem:[#allocation135_spill] sm:$0xff] %v15800_v24  ;;  %v15804_v47 = vpop.f32.mrb[27].mxu1  ;;  %v15806_v38 = vpop.f32.mrb[31].mxu0  ;;  %v16998_v34 = vld [vmem:[#allocation20_spill] sm:$0xff]  ;;  %v17008_v24 = vld [vmem:[#allocation33_spill] sm:$0xff] }
 0x367   : > { %16986 = vst [vmem:[#allocation136_spill] sm:$0xff] %v15804_v47  ;;  %16987 = vst [vmem:[#allocation137_spill] sm:$0xff] %v15806_v38  ;;  %v17006_v38 = vld [vmem:[#allocation32_spill] sm:$0xff] }
 0x368   : > { %12310 = vmatmul.mubr.msk.bf16.gmra.mrb[36].mxu1 %vm1487_vm1, %v16988_v5  ;;  %12008 = vmatmul.mubr.msk.bf16.gmra.mrb[40].mxu0 %vm1487_vm1, %v16989_v31  ;;  %v17001_v31 = vld [vmem:[#allocation25_spill] sm:$0xff] }
 0x369   : > { %12313 = vmatprep.mubr.msk.bf16.mxu1 %vm1487_vm1, %v16990_v33  ;;  %12011 = vmatprep.mubr.msk.bf16.mxu0 %vm1487_vm1, %v16991_v1  ;;  %v17003_v1 = vld [vmem:[#allocation30_spill] sm:$0xff] }
 0x36b   : > { %v15818_v7 = vpop.f32.mrb[28].mxu1 }
 0x36c   : > { %16992 = vst [vmem:[#allocation8_spill] sm:$0xff] %v15818_v7  ;;  %v15822_v3 = vpop.f32.mrb[29].mxu1  ;;  %v17012_v7 = vld [vmem:[#allocation39_spill] sm:$0xff] }
 0x36d   : > { %16993 = vst [vmem:[#allocation15_spill] sm:$0xff] %v15822_v3  ;;  %v15826_v47 = vpop.f32.mrb[30].mxu1  ;;  %v17000_v3 = vld [vmem:[#allocation21_spill] sm:$0xff] }
 0x36e   : > { %16994 = vst [vmem:[#allocation12_spill] sm:$0xff] %v15826_v47  ;;  %v15830_v52 = vpop.f32.mrb[31].mxu1  ;;  %v17002_v47 = vld [vmem:[#allocation26_spill] sm:$0xff] }
 0x36f   : > { %16995 = vst [vmem:[#allocation17_spill] sm:$0xff] %v15830_v52  ;;  %v17004_v52 = vld [vmem:[#allocation27_spill] sm:$0xff] }
 0x370   : > { %12314 = vmatmul.mubr.msk.bf16.gmra.mrb[40].mxu1 %vm1487_vm1, %v16996_v50  ;;  %12012 = vmatmul.mubr.msk.bf16.gmra.mrb[44].mxu0 %vm1487_vm1, %v16997_v23  ;;  %v17005_v23 = vld [vmem:[#allocation31_spill] sm:$0xff] }
 0x371   : > { %12317 = vmatprep.mubr.msk.bf16.mxu1 %vm1487_vm1, %v16998_v34  ;;  %12015 = vmatprep.mubr.msk.bf16.mxu0 %vm1487_vm1, %v16999_v55  ;;  %v17007_v55 = vld [vmem:[#allocation36_spill] sm:$0xff] }
 0x378   : > { %12318 = vmatmul.mubr.msk.bf16.gmra.mrb[44].mxu1 %vm1487_vm1, %v17000_v3  ;;  %12016 = vmatmul.mubr.msk.bf16.gmra.mrb[48].mxu0 %vm1487_vm1, %v17001_v31  ;;  %v17009_v31 = vld [vmem:[#allocation37_spill] sm:$0xff] }
 0x379   : > { %12321 = vmatprep.mubr.msk.bf16.mxu1 %vm1487_vm1, %v17002_v47  ;;  %12019 = vmatprep.mubr.msk.bf16.mxu0 %vm1487_vm1, %v17003_v1  ;;  %v17011_v1 = vld [vmem:[#allocation42_spill] sm:$0xff] }
 0x380   : > { %12322 = vmatmul.mubr.msk.bf16.gmra.mrb[48].mxu1 %vm1487_vm1, %v17004_v52  ;;  %12020 = vmatmul.mubr.msk.bf16.gmra.mrb[52].mxu0 %vm1487_vm1, %v17005_v23  ;;  %v17013_v23 = vld [vmem:[#allocation110_spill] sm:$0xff] }
 0x381   : > { %12325 = vmatprep.mubr.msk.bf16.mxu1 %vm1487_vm1, %v17006_v38  ;;  %12023 = vmatprep.mubr.msk.bf16.mxu0 %vm1487_vm1, %v17007_v55  ;;  %v17014_v55 = vld [vmem:[#allocation86_spill] sm:$0xff] }
 0x388   : > { %12326 = vmatmul.mubr.msk.bf16.gmra.mrb[52].mxu1 %vm1487_vm1, %v17008_v24  ;;  %12024 = vmatmul.mubr.msk.bf16.gmra.mrb[56].mxu0 %vm1487_vm1, %v17009_v31  ;;  %v13736_v31 = vld [vmem:[%s16439_s1 + $0x18] sm:$0xf] }
 0x389   : > { %12329 = vmatprep.mubr.msk.bf16.mxu1 %vm1487_vm1, %v17010_v48  ;;  %12027 = vmatprep.mubr.msk.bf16.mxu0 %vm1487_vm1, %v17011_v1  ;;  %v17048_v1 = vld [vmem:[#allocation43_spill] sm:$0xff] }
 0x390   : > { %12330 = vmatmul.mubr.msk.bf16.gmra.mrb[56].mxu1 %vm1487_vm1, %v17012_v7  ;;  %12028 = vmatmul.mubr.msk.bf16.gmra.mrb[60].mxu0 %vm1487_vm1, %v17013_v23  ;;  %v17049_v23 = vld [vmem:[#allocation87_spill] sm:$0xff] }
 0x391   : > { %12333 = vmatprep.mubr.msk.bf16.mxu1 %vm1487_vm1, %v16858_v12  ;;  %12033 = vmatprep.mubr.msk.bf16.mxu0 %vm1487_vm1, %v14052_v44  ;;  %v17015_v44 = vld [vmem:[#allocation40_spill] sm:$0xff] }
 0x398   : > { %12334 = vmatmul.mubr.msk.bf16.gmra.mrb[60].mxu1 %vm1487_vm1, %v15234_v49  ;;  %12034 = vmatmul.mubr.msk.bf16.vlgmr.msra.gmra.mrb[32].mxu0 %vm1487_vm1, %v16977_v20  ;;  %v17027_v20 = vld [vmem:[#allocation56_spill] sm:$0xff] }
 0x399   : > { %12066 = vmatpush3.bf16.msra.mxu0 %v17014_v55  ;;  %12339 = vmatprep.mubr.msk.bf16.mxu1 %vm1487_vm1, %v16860_v40 }
 0x39a   : > { %12037 = vmatprep.mubr.msk.bf16.mxu0 %vm1487_vm1, %v16979_v35  ;;  %13555 = vmatprep.subr.msk.bf16.mxu0 %vm1536_vm0, %v13736_v31  ;;  %v17043_v35 = vld [vmem:[#allocation81_spill] sm:$0xff] }
 0x3a0   : > { %12340 = vmatmul.mubr.msk.bf16.vlgmr.msra.gmra.mrb[32].mxu1 %vm1487_vm1, %v16861_v45  ;;  %12038 = vmatmul.mubr.msk.bf16.gmra.mrb[36].mxu0 %vm1487_vm1, %v16988_v5  ;;  %v17016_v5 = vld [vmem:[#allocation41_spill] sm:$0xff] }
 0x3a1   : > { %12372 = vmatpush3.bf16.msra.mxu1 %v17014_v55  ;;  %12343 = vmatprep.mubr.msk.bf16.mxu1 %vm1487_vm1, %v16862_v63  ;;  %v17050_v55 = vld [vmem:[#allocation88_spill] sm:$0xff] }
 0x3a2   : > { %12041 = vmatprep.mubr.msk.bf16.mxu0 %vm1487_vm1, %v16990_v33  ;;  %13564 = vmatprep.subr.msk.bf16.mxu1 %vm1536_vm0, %v13736_v31  ;;  %v17045_v33 = vld [vmem:[#allocation83_spill] sm:$0xff]  ;;  %v17056_v31 = vld [vmem:[#allocation94_spill] sm:$0xff] }
 0x3a8   : > { %12344 = vmatmul.mubr.msk.bf16.gmra.mrb[36].mxu1 %vm1487_vm1, %v16863_v30  ;;  %12042 = vmatmul.mubr.msk.bf16.gmra.mrb[40].mxu0 %vm1487_vm1, %v16996_v50  ;;  %v17017_v50 = vld [vmem:[#allocation44_spill] sm:$0xff] }
 0x3a9   : > { %12347 = vmatprep.mubr.msk.bf16.mxu1 %vm1487_vm1, %v16864_v57  ;;  %12045 = vmatprep.mubr.msk.bf16.mxu0 %vm1487_vm1, %v16998_v34  ;;  %v17019_v34 = vld [vmem:[#allocation96_spill] sm:$0xff] }
 0x3b0   : > { %12348 = vmatmul.mubr.msk.bf16.gmra.mrb[40].mxu1 %vm1487_vm1, %v16865_v27  ;;  %12046 = vmatmul.mubr.msk.bf16.gmra.mrb[44].mxu0 %vm1487_vm1, %v17000_v3  ;;  %v17018_v3 = vld [vmem:[#allocation45_spill] sm:$0xff] }
 0x3b1   : > { %12351 = vmatprep.mubr.msk.bf16.mxu1 %vm1487_vm1, %v16866_v6  ;;  %12049 = vmatprep.mubr.msk.bf16.mxu0 %vm1487_vm1, %v17002_v47  ;;  %v17047_v47 = vld [vmem:[#allocation85_spill] sm:$0xff] }
 0x3b8   : > { %12352 = vmatmul.mubr.msk.bf16.gmra.mrb[44].mxu1 %vm1487_vm1, %v16867_v26  ;;  %12050 = vmatmul.mubr.msk.bf16.gmra.mrb[48].mxu0 %vm1487_vm1, %v17004_v52  ;;  %v17024_v52 = vld [vmem:[#allocation53_spill] sm:$0xff] }
 0x3b9   : > { %12355 = vmatprep.mubr.msk.bf16.mxu1 %vm1487_vm1, %v16868_v53  ;;  %12053 = vmatprep.mubr.msk.bf16.mxu0 %vm1487_vm1, %v17006_v38  ;;  %v17042_v38 = vld [vmem:[#allocation78_spill] sm:$0xff] }
 0x3c0   : > { %12356 = vmatmul.mubr.msk.bf16.gmra.mrb[48].mxu1 %vm1487_vm1, %v16869_v56  ;;  %12054 = vmatmul.mubr.msk.bf16.gmra.mrb[52].mxu0 %vm1487_vm1, %v17008_v24  ;;  %v17033_v24 = vld [vmem:[#allocation108_spill] sm:$0xff] }
 0x3c1   : > { %12359 = vmatprep.mubr.msk.bf16.mxu1 %vm1487_vm1, %v17015_v44  ;;  %12057 = vmatprep.mubr.msk.bf16.mxu0 %vm1487_vm1, %v17010_v48  ;;  %v17044_v48 = vld [vmem:[#allocation82_spill] sm:$0xff] }
 0x3c8   : > { %12360 = vmatmul.mubr.msk.bf16.gmra.mrb[52].mxu1 %vm1487_vm1, %v17016_v5  ;;  %12058 = vmatmul.mubr.msk.bf16.gmra.mrb[56].mxu0 %vm1487_vm1, %v17012_v7  ;;  %v9898_v7 = vld [vmem:[%s14046_s6 + $0x258] sm:$0xff]  }
 0x3c9   : > { %12363 = vmatprep.mubr.msk.bf16.mxu1 %vm1487_vm1, %v17017_v50  ;;  %12061 = vmatprep.mubr.msk.bf16.mxu0 %vm1487_vm1, %v16858_v12  ;;  %v17020_v12 = vld [vmem:[#allocation49_spill] sm:$0xff] }
 0x3d0   : > { %12364 = vmatmul.mubr.msk.bf16.gmra.mrb[56].mxu1 %vm1487_vm1, %v17018_v3  ;;  %12062 = vmatmul.mubr.msk.bf16.gmra.mrb[60].mxu0 %vm1487_vm1, %v15234_v49  ;;  %v13737_v49 = vld [vmem:[%s16439_s1 + $0x1c] sm:$0xf] }
 0x3d1   : > { %12367 = vmatprep.mubr.msk.bf16.mxu1 %vm1487_vm1, %v16874_v8  ;;  %12067 = vmatprep.mubr.msk.bf16.mxu0 %vm1487_vm1, %v16860_v40  ;;  %v17021_v40 = vld [vmem:[#allocation50_spill] sm:$0xff] }
 0x3d8   : > { %12368 = vmatmul.mubr.msk.bf16.gmra.mrb[60].mxu1 %vm1487_vm1, %v15318_v11  ;;  %12068 = vmatmul.mubr.msk.bf16.vlgmr.msra.gmra.mrb[32].mxu0 %vm1487_vm1, %v16861_v45  ;;  %v17022_v45 = vld [vmem:[#allocation51_spill] sm:$0xff] }
 0x3d9   : > { %12100 = vmatpush3.bf16.msra.mxu0 %v17019_v34  ;;  %12373 = vmatprep.mubr.msk.bf16.mxu1 %vm1487_vm1, %v17020_v12  ;;  %v17059_v12 = vld [vmem:[#allocation99_spill] sm:$0xff] }
 0x3da   : > { %12071 = vmatprep.mubr.msk.bf16.mxu0 %vm1487_vm1, %v16862_v63  ;;  %13556 = vmatprep.subr.msk.bf16.mxu0 %vm1536_vm0, %v13737_v49  ;;  %v17023_v63 = vld [vmem:[#allocation52_spill] sm:$0xff] }
 0x3e0   : > { %12374 = vmatmul.mubr.msk.bf16.vlgmr.msra.gmra.mrb[32].mxu1 %vm1487_vm1, %v17021_v40  ;;  %12072 = vmatmul.mubr.msk.bf16.gmra.mrb[36].mxu0 %vm1487_vm1, %v16863_v30  ;;  %v17025_v30 = vld [vmem:[#allocation54_spill] sm:$0xff]  ;;  %v17061_v40 = vld [vmem:[#allocation101_spill] sm:$0xff] }
 0x3e1   : > { %12406 = vmatpush3.bf16.msra.mxu1 %v17019_v34  ;;  %12377 = vmatprep.mubr.msk.bf16.mxu1 %vm1487_vm1, %v17022_v45  ;;  %v17058_v34 = vld [vmem:[#allocation98_spill] sm:$0xff] }
 0x3e2   : > { %12075 = vmatprep.mubr.msk.bf16.mxu0 %vm1487_vm1, %v16864_v57  ;;  %13565 = vmatprep.subr.msk.bf16.mxu1 %vm1536_vm0, %v13737_v49  ;;  %v17026_v57 = vld [vmem:[#allocation55_spill] sm:$0xff]  ;;  %v17060_v49 = vld [vmem:[#allocation100_spill] sm:$0xff]  ;;  %v17062_v45 = vld [vmem:[#allocation102_spill] sm:$0xff] }
 0x3e8   : > { %12378 = vmatmul.mubr.msk.bf16.gmra.mrb[36].mxu1 %vm1487_vm1, %v17023_v63  ;;  %12076 = vmatmul.mubr.msk.bf16.gmra.mrb[40].mxu0 %vm1487_vm1, %v16865_v27  ;;  %v17028_v27 = vld [vmem:[#allocation57_spill] sm:$0xff]  ;;  %v17063_v63 = vld [vmem:[#allocation103_spill] sm:$0xff] }
 0x3e9   : > { %12381 = vmatprep.mubr.msk.bf16.mxu1 %vm1487_vm1, %v17024_v52  ;;  %12079 = vmatprep.mubr.msk.bf16.mxu0 %vm1487_vm1, %v16866_v6  ;;  %v17029_v6 = vld [vmem:[#allocation58_spill] sm:$0xff]  ;;  %v17064_v52 = vld [vmem:[#allocation104_spill] sm:$0xff] }
 0x3f0   : > { %12382 = vmatmul.mubr.msk.bf16.gmra.mrb[40].mxu1 %vm1487_vm1, %v17025_v30  ;;  %12080 = vmatmul.mubr.msk.bf16.gmra.mrb[44].mxu0 %vm1487_vm1, %v16867_v26  ;;  %v17030_v26 = vld [vmem:[#allocation59_spill] sm:$0xff]  ;;  %v17065_v30 = vld [vmem:[#allocation105_spill] sm:$0xff] }
 0x3f1   : > { %12385 = vmatprep.mubr.msk.bf16.mxu1 %vm1487_vm1, %v17026_v57  ;;  %12083 = vmatprep.mubr.msk.bf16.mxu0 %vm1487_vm1, %v16868_v53  ;;  %v17031_v53 = vld [vmem:[#allocation60_spill] sm:$0xff]  ;;  %v17066_v57 = vld [vmem:[#allocation106_spill] sm:$0xff] }
 0x3f8   : > { %12386 = vmatmul.mubr.msk.bf16.gmra.mrb[44].mxu1 %vm1487_vm1, %v17027_v20  ;;  %12084 = vmatmul.mubr.msk.bf16.gmra.mrb[48].mxu0 %vm1487_vm1, %v16869_v56  ;;  %v17032_v56 = vld [vmem:[#allocation62_spill] sm:$0xff] }
 0x3f9   : > { %12389 = vmatprep.mubr.msk.bf16.mxu1 %vm1487_vm1, %v17028_v27  ;;  %12087 = vmatprep.mubr.msk.bf16.mxu0 %vm1487_vm1, %v17015_v44 }
 0x400   : > { %12390 = vmatmul.mubr.msk.bf16.gmra.mrb[48].mxu1 %vm1487_vm1, %v17029_v6  ;;  %12088 = vmatmul.mubr.msk.bf16.gmra.mrb[52].mxu0 %vm1487_vm1, %v17016_v5  ;;  %v17068_v6 = vld [vmem:[#allocation10_spill] sm:$0xff] }
 0x401   : > { %12393 = vmatprep.mubr.msk.bf16.mxu1 %vm1487_vm1, %v17030_v26  ;;  %12091 = vmatprep.mubr.msk.bf16.mxu0 %vm1487_vm1, %v17017_v50  ;;  %v17069_v26 = vld [vmem:[#allocation22_spill] sm:$0xff] }
 0x408   : > { %12394 = vmatmul.mubr.msk.bf16.gmra.mrb[52].mxu1 %vm1487_vm1, %v17031_v53  ;;  %12092 = vmatmul.mubr.msk.bf16.gmra.mrb[56].mxu0 %vm1487_vm1, %v17018_v3  ;;  %v17057_v3 = vld [vmem:[#allocation97_spill] sm:$0xff]  ;;  %v17070_v53 = vmax.f32 %v17068_v6, %v17069_v26  ;;  %v17092_v6 = vld [vmem:[#allocation67_spill] sm:$0xff]  ;;  %v17093_v26 = vld [vmem:[#allocation66_spill] sm:$0xff] }
 0x409   : > { %12397 = vmatprep.mubr.msk.bf16.mxu1 %vm1487_vm1, %v17032_v56  ;;  %12095 = vmatprep.mubr.msk.bf16.mxu0 %vm1487_vm1, %v16874_v8  ;;  %v17035_v8 = vld [vmem:[#allocation109_spill] sm:$0xff] }
 0x410   : > { %12398 = vmatmul.mubr.msk.bf16.gmra.mrb[56].mxu1 %vm1487_vm1, %v16889_v21  ;;  %12096 = vmatmul.mubr.msk.bf16.gmra.mrb[60].mxu0 %vm1487_vm1, %v15318_v11  ;;  %v17034_v21 = vld [vmem:[#allocation69_spill] sm:$0xff]  ;;  %v17036_v11 = vld [vmem:[#allocation71_spill] sm:$0xff] }
 0x411   : > { %12401 = vmatprep.mubr.msk.bf16.mxu1 %vm1487_vm1, %v16890_v25  ;;  %12101 = vmatprep.mubr.msk.bf16.mxu0 %vm1487_vm1, %v16896_v18  ;;  %v17037_v25 = vld [vmem:[#allocation73_spill] sm:$0xff]  ;;  %v17039_v18 = vld [vmem:[#allocation75_spill] sm:$0xff] }
 0x418   : > { %12402 = vmatmul.mubr.msk.bf16.gmra.mrb[60].mxu1 %vm1487_vm1, %v15396_v54  ;;  %12102 = vmatmul.mubr.msk.bf16.vlgmr.msra.gmra.mrb[32].mxu0 %vm1487_vm1, %v16898_v13  ;;  %v17038_v54 = vld [vmem:[#allocation74_spill] sm:$0xff]  ;;  %v17040_v13 = vld [vmem:[#allocation76_spill] sm:$0xff] }
 0x419   : > { %12134 = vmatpush3.bf16.msra.mxu0 %v17033_v24  ;;  %12407 = vmatprep.mubr.msk.bf16.mxu1 %vm1487_vm1, %v14625_v14 }
 0x41a   : > { %12105 = vmatprep.mubr.msk.bf16.mxu0 %vm1487_vm1, %v17034_v21  ;;  %13557 = vmatprep.subr.msk.bf16.mxu0 %vm1536_vm0, %v17035_v8  ;;  %v17072_v21 = vld [vmem:[#allocation28_spill] sm:$0xff] }
 0x420   : > { %12408 = vmatmul.mubr.msk.bf16.vlgmr.msra.gmra.mrb[32].mxu1 %vm1487_vm1, %v14633_v17  ;;  %12106 = vmatmul.mubr.msk.bf16.gmra.mrb[36].mxu0 %vm1487_vm1, %v16900_v42  ;;  %v17041_v42 = vld [vmem:[#allocation77_spill] sm:$0xff] }
 0x421   : > { %12440 = vmatpush3.bf16.msra.mxu1 %v17033_v24  ;;  %12411 = vmatprep.mubr.msk.bf16.mxu1 %vm1487_vm1, %v14648_v28  ;;  %v17071_v24 = vld [vmem:[#allocation13_spill] sm:$0xff] }
 0x422   : > { %12109 = vmatprep.mubr.msk.bf16.mxu0 %vm1487_vm1, %v17036_v11  ;;  %13566 = vmatprep.subr.msk.bf16.mxu1 %vm1536_vm0, %v17035_v8  ;;  %v17073_v8 = vmax.f32 %v17071_v24, %v17072_v21 }
 0x428   : > { %12412 = vmatmul.mubr.msk.bf16.gmra.mrb[36].mxu1 %vm1487_vm1, %v16894_v10  ;;  %12110 = vmatmul.mubr.msk.bf16.gmra.mrb[40].mxu0 %vm1487_vm1, %v17037_v25 }
 0x429   : > { %12415 = vmatprep.mubr.msk.bf16.mxu1 %vm1487_vm1, %v14670_v41  ;;  %12113 = vmatprep.mubr.msk.bf16.mxu0 %vm1487_vm1, %v17038_v54  ;;  %v17074_v54 = vld [vmem:[#allocation16_spill] sm:$0xff] }
 0x430   : > { %12416 = vmatmul.mubr.msk.bf16.gmra.mrb[40].mxu1 %vm1487_vm1, %v14678_v2  ;;  %12114 = vmatmul.mubr.msk.bf16.gmra.mrb[44].mxu0 %vm1487_vm1, %v17039_v18  ;;  %v17075_v18 = vld [vmem:[#allocation34_spill] sm:$0xff] }
 0x431   : > { %12419 = vmatprep.mubr.msk.bf16.mxu1 %vm1487_vm1, %v14690_v4  ;;  %12117 = vmatprep.mubr.msk.bf16.mxu0 %vm1487_vm1, %v17040_v13  ;;  %v17076_v13 = vmax.f32 %v17074_v54, %v17075_v18 }
 0x438   : > { %12420 = vmatmul.mubr.msk.bf16.gmra.mrb[44].mxu1 %vm1487_vm1, %v14698_v22  ;;  %12118 = vmatmul.mubr.msk.bf16.gmra.mrb[48].mxu0 %vm1487_vm1, %v17041_v42 }
 0x439   : > { %12423 = vmatprep.mubr.msk.bf16.mxu1 %vm1487_vm1, %v14710_v39  ;;  %12121 = vmatprep.mubr.msk.bf16.mxu0 %vm1487_vm1, %v17042_v38 }
 0x440   : > { %12424 = vmatmul.mubr.msk.bf16.gmra.mrb[48].mxu1 %vm1487_vm1, %v14718_v59  ;;  %12122 = vmatmul.mubr.msk.bf16.gmra.mrb[52].mxu0 %vm1487_vm1, %v16908_v19  ;;  %v17046_v19 = vld [vmem:[#allocation84_spill] sm:$0xff] }
 0x441   : > { %12427 = vmatprep.mubr.msk.bf16.mxu1 %vm1487_vm1, %v14730_v61  ;;  %12125 = vmatprep.mubr.msk.bf16.mxu0 %vm1487_vm1, %v16909_v0  ;;  %v16085_v0 = vld [vmem:[%s14046_s6 + $0x324] sm:$0xff]  }
 0x448   : > { %12428 = vmatmul.mubr.msk.bf16.gmra.mrb[52].mxu1 %vm1487_vm1, %v17043_v35  ;;  %12126 = vmatmul.mubr.msk.bf16.gmra.mrb[56].mxu0 %vm1487_vm1, %v17044_v48  ;;  %v17078_v48 = vld [vmem:[#allocation46_spill] sm:$0xff] }
 0x449   : > { %12431 = vmatprep.mubr.msk.bf16.mxu1 %vm1487_vm1, %v14751_v60  ;;  %12129 = vmatprep.mubr.msk.bf16.mxu0 %vm1487_vm1, %v17045_v33 }
 0x450   : > { %12432 = vmatmul.mubr.msk.bf16.gmra.mrb[56].mxu1 %vm1487_vm1, %v17046_v19  ;;  %12130 = vmatmul.mubr.msk.bf16.gmra.mrb[60].mxu0 %vm1487_vm1, %v9898_v7 }
 0x451   : > { %12435 = vmatprep.mubr.msk.bf16.mxu1 %vm1487_vm1, %v17047_v47  ;;  %12135 = vmatprep.mubr.msk.bf16.mxu0 %vm1487_vm1, %v14625_v14  ;;  %v17051_v14 = vld [vmem:[#allocation89_spill] sm:$0xff] }
 0x458   : > { %12436 = vmatmul.mubr.msk.bf16.gmra.mrb[60].mxu1 %vm1487_vm1, %v16085_v0  ;;  %12136 = vmatmul.mubr.msk.bf16.vlgmr.msra.gmra.mrb[32].mxu0 %vm1487_vm1, %v14633_v17  ;;  %v17052_v17 = vld [vmem:[#allocation90_spill] sm:$0xff] }
 0x459   : > { %12168 = vmatpush3.bf16.msra.mxu0 %v17048_v1  ;;  %12441 = vmatprep.mubr.msk.bf16.mxu1 %vm1487_vm1, %v17049_v23 }
 0x45a   : > { %12139 = vmatprep.mubr.msk.bf16.mxu0 %vm1487_vm1, %v14648_v28  ;;  %v17053_v28 = vld [vmem:[#allocation91_spill] sm:$0xff] }
 0x460   : > { %12442 = vmatmul.mubr.msk.bf16.vlgmr.msra.gmra.mrb[32].mxu1 %vm1487_vm1, %v17050_v55  ;;  %12140 = vmatmul.mubr.msk.bf16.gmra.mrb[36].mxu0 %vm1487_vm1, %v16894_v10  ;;  %v17054_v10 = vld [vmem:[#allocation92_spill] sm:$0xff] }
 0x461   : > { %12474 = vmatpush3.bf16.msra.mxu1 %v17048_v1  ;;  %12445 = vmatprep.mubr.msk.bf16.mxu1 %vm1487_vm1, %v17051_v14 }
 0x462   : > { %12143 = vmatprep.mubr.msk.bf16.mxu0 %vm1487_vm1, %v14670_v41  ;;  %v17055_v41 = vld [vmem:[#allocation93_spill] sm:$0xff] }
 0x468   : > { %12446 = vmatmul.mubr.msk.bf16.gmra.mrb[36].mxu1 %vm1487_vm1, %v17052_v17  ;;  %12144 = vmatmul.mubr.msk.bf16.gmra.mrb[40].mxu0 %vm1487_vm1, %v14678_v2 }
 0x469   : > { %12449 = vmatprep.mubr.msk.bf16.mxu1 %vm1487_vm1, %v17053_v28  ;;  %12147 = vmatprep.mubr.msk.bf16.mxu0 %vm1487_vm1, %v14690_v4 }
 0x470   : > { %12450 = vmatmul.mubr.msk.bf16.gmra.mrb[40].mxu1 %vm1487_vm1, %v17054_v10  ;;  %12148 = vmatmul.mubr.msk.bf16.gmra.mrb[44].mxu0 %vm1487_vm1, %v14698_v22 }
 0x471   : > { %12453 = vmatprep.mubr.msk.bf16.mxu1 %vm1487_vm1, %v17055_v41  ;;  %12151 = vmatprep.mubr.msk.bf16.mxu0 %vm1487_vm1, %v14710_v39  ;;  %v9900_v39 = vld [vmem:[%s14046_s6 + $0x260] sm:$0x1] }
 0x472   : > { %v1334_v22 = vunpack.c.l.bf16 %v9900_v39  ;;  %v17083_v39 = vld [vmem:[#allocation29_spill] sm:$0xff] }
 0x474   : > { %v7545_v44 = vrot.slane %v1334_v22, 1 }
 0x478   : > { %12454 = vmatmul.mubr.msk.bf16.gmra.mrb[44].mxu1 %vm1487_vm1, %v17056_v31  ;;  %12152 = vmatmul.mubr.msk.bf16.gmra.mrb[48].mxu0 %vm1487_vm1, %v14718_v59  ;;  %v1333_v59 = vunpack.c.h.bf16 %v9898_v7 }
 0x479   : > { %12457 = vmatprep.mubr.msk.bf16.mxu1 %vm1487_vm1, %v14905_v36  ;;  %12155 = vmatprep.mubr.msk.bf16.mxu0 %vm1487_vm1, %v14730_v61  ;;  %v1332_v61 = vunpack.c.l.bf16 %v9898_v7 }
 0x47a   : > { %v7543_v4 = vrot.slane %v1333_v59, 1 }
 0x47b   : > { %v7542_v2 = vrot.slane %v1332_v61, 1  ;;  %v17084_v61 = vld [vmem:[#allocation65_spill] sm:$0xff] }
 0x47c   : > { %v7546_v5 = vsel %vm1961_vm2, %v7543_v4, %v7545_v44  ;;  %v17085_v59 = vmax.f32 %v17083_v39, %v17084_v61 }
 0x480   : > { %12458 = vmatmul.mubr.msk.bf16.gmra.mrb[48].mxu1 %vm1487_vm1, %v14907_v37  ;;  %12156 = vmatmul.mubr.msk.bf16.gmra.mrb[52].mxu0 %vm1487_vm1, %v17043_v35  ;;  %v17077_v35 = vld [vmem:[#allocation18_spill] sm:$0xff] }
 0x481   : > { %12461 = vmatprep.mubr.msk.bf16.mxu1 %vm1487_vm1, %v14927_v46  ;;  %12159 = vmatprep.mubr.msk.bf16.mxu0 %vm1487_vm1, %v14751_v60  ;;  %v7544_v60 = vsel %vm1961_vm2, %v7542_v2, %v7543_v4  ;;  %v17079_v33 = vmax.f32 %v17077_v35, %v17078_v48  ;;  %v17098_v48 = vld [vmem:[#allocation61_spill] sm:$0xff] }
 0x482   : > { %v7549_v50 = vpack.c.bf16 %v7546_v5, %v7544_v60  ;;  %v17086_v5 = vld [vmem:[#allocation35_spill] sm:$0xff] }
 0x488   : > { %12462 = vmatmul.mubr.msk.bf16.gmra.mrb[52].mxu1 %vm1487_vm1, %v14929_v43  ;;  %12160 = vmatmul.mubr.msk.bf16.gmra.mrb[56].mxu0 %vm1487_vm1, %v17046_v19 }
 0x489   : > { %12465 = vmatprep.mubr.msk.bf16.mxu1 %vm1487_vm1, %v14949_v58  ;;  %12163 = vmatprep.mubr.msk.bf16.mxu0 %vm1487_vm1, %v17047_v47  ;;  %v16241_v47 = vld [vmem:[%s16440_s2] ss:$0 sm:$0xff] }
 0x490   : > { %12466 = vmatmul.mubr.msk.bf16.gmra.mrb[56].mxu1 %vm1487_vm1, %v14951_v29  ;;  %12164 = vmatmul.mubr.msk.bf16.gmra.mrb[60].mxu0 %vm1487_vm1, %v16085_v0 }
 0x491   : > { %12469 = vmatprep.mubr.msk.bf16.mxu1 %vm1487_vm1, %v14971_v62  ;;  %12169 = vmatprep.mubr.msk.bf16.mxu0 %vm1487_vm1, %v17049_v23 }
 0x498   : > { %12470 = vmatmul.mubr.msk.bf16.gmra.mrb[60].mxu1 %vm1487_vm1, %v7549_v50  ;;  %12170 = vmatmul.mubr.msk.bf16.vlgmr.msra.gmra.mrb[32].mxu0 %vm1487_vm1, %v17050_v55  ;;  %v17080_v55 = vld [vmem:[#allocation23_spill] sm:$0xff] }
 0x499   : > { %12475 = vmatprep.mubr.msk.bf16.mxu1 %vm1487_vm1, %v17057_v3  ;;  %12173 = vmatprep.mubr.msk.bf16.mxu0 %vm1487_vm1, %v17051_v14  ;;  %v17081_v14 = vld [vmem:[#allocation63_spill] sm:$0xff] }
 0x4a0   : > { %12476 = vmatmul.mubr.msk.bf16.vlgmr.msra.gmra.mrb[32].mxu1 %vm1487_vm1, %v17058_v34  ;;  %12174 = vmatmul.mubr.msk.bf16.gmra.mrb[36].mxu0 %vm1487_vm1, %v17052_v17  ;;  %v17082_v17 = vmax.f32 %v17080_v55, %v17081_v14  ;;  %v17101_v55 = vld [vmem:[#allocation47_spill] sm:$0xff] }
 0x4a1   : > { %12479 = vmatprep.mubr.msk.bf16.mxu1 %vm1487_vm1, %v17059_v12  ;;  %12177 = vmatprep.mubr.msk.bf16.mxu0 %vm1487_vm1, %v17053_v28  ;;  %v17102_v14 = vld [vmem:[#allocation111_spill] sm:$0xff] }
 0x4a8   : > { %12480 = vmatmul.mubr.msk.bf16.gmra.mrb[36].mxu1 %vm1487_vm1, %v17060_v49  ;;  %12178 = vmatmul.mubr.msk.bf16.gmra.mrb[40].mxu0 %vm1487_vm1, %v17054_v10 }
 0x4a9   : > { %12483 = vmatprep.mubr.msk.bf16.mxu1 %vm1487_vm1, %v17061_v40  ;;  %12181 = vmatprep.mubr.msk.bf16.mxu0 %vm1487_vm1, %v17055_v41 }
 0x4b0   : > { %12484 = vmatmul.mubr.msk.bf16.gmra.mrb[40].mxu1 %vm1487_vm1, %v17062_v45  ;;  %12182 = vmatmul.mubr.msk.bf16.gmra.mrb[44].mxu0 %vm1487_vm1, %v17056_v31  ;;  %v17089_v45 = vld [vmem:[#allocation3_spill] sm:$0xff] }
 0x4b1   : > { %12487 = vmatprep.mubr.msk.bf16.mxu1 %vm1487_vm1, %v17063_v63  ;;  %12185 = vmatprep.mubr.msk.bf16.mxu0 %vm1487_vm1, %v14905_v36  ;;  %v9951_v36 = vld [vmem:[%s14046_s6 + $0x32c] sm:$0x1]  ;;  %s9797_s6 = sshll.u32 %s9791_s15, 5 }
 0x4b2   : > { %p1021_p8 = scmp.lt.s32.totalorder %s9797_s6, 63  ;;  %v17090_v63 = vld [vmem:[#allocation64_spill] sm:$0xff] }
 0x4b4   : > { %s17167_s6 = smov (!%p1021_p8, %s9797_s6), 63 }
 0x4b5   : > { %s9798_s21 = sshll.u32 %s17167_s6, 2 }
 0x4b6   : > { %s16261_s24 = scalar_lea.vmem %s16441_s3, %s9798_s21 }
 0x4b8   : > { %12488 = vmatmul.mubr.msk.bf16.gmra.mrb[44].mxu1 %vm1487_vm1, %v17064_v52  ;;  %12186 = vmatmul.mubr.msk.bf16.gmra.mrb[48].mxu0 %vm1487_vm1, %v14907_v37  ;;  %v1435_v37 = vunpack.c.l.bf16 %v16085_v0  ;;  %v17091_v52 = vmax.f32 %v17089_v45, %v17090_v63 }
 0x4b9   : > { %12491 = vmatprep.mubr.msk.bf16.mxu1 %vm1487_vm1, %v17065_v30  ;;  %12189 = vmatprep.mubr.msk.bf16.mxu0 %vm1487_vm1, %v14927_v46  ;;  %v1436_v46 = vunpack.c.h.bf16 %v16085_v0 }
 0x4c0   : > { %12492 = vmatmul.mubr.msk.bf16.gmra.mrb[48].mxu1 %vm1487_vm1, %v17066_v57  ;;  %12190 = vmatmul.mubr.msk.bf16.gmra.mrb[52].mxu0 %vm1487_vm1, %v14929_v43  ;;  %v1437_v43 = vunpack.c.l.bf16 %v9951_v36 }
 0x4c1   : > { %12495 = vmatprep.mubr.msk.bf16.mxu1 %vm1487_vm1, %v15118_v16  ;;  %12193 = vmatprep.mubr.msk.bf16.mxu0 %vm1487_vm1, %v14949_v58  ;;  %v9261_v58 = vrot.slane %v1435_v37, 1  ;;  %v9262_v16 = vrot.slane %v1436_v46, 1 }
 0x4c2   : > { %v9264_v20 = vrot.slane %v1437_v43, 1 }
 0x4c4   : > { %v9265_v27 = vsel %vm1961_vm2, %v9262_v16, %v9264_v20 }
 0x4c8   : > { %12496 = vmatmul.mubr.msk.bf16.gmra.mrb[52].mxu1 %vm1487_vm1, %v15120_v9  ;;  %12194 = vmatmul.mubr.msk.bf16.gmra.mrb[56].mxu0 %vm1487_vm1, %v14951_v29  ;;  %v17067_v29 = vld [vmem:[#allocation107_spill] sm:$0xff]  ;;  %v9263_v9 = vsel %vm1961_vm2, %v9261_v58, %v9262_v16 }
 0x4c9   : > { %12499 = vmatprep.mubr.msk.bf16.mxu1 %vm1487_vm1, %v15137_v32  ;;  %12197 = vmatprep.mubr.msk.bf16.mxu0 %vm1487_vm1, %v14971_v62  ;;  %v9268_v32 = vpack.c.bf16 %v9265_v27, %v9263_v9 }
 0x4d0   : > { %12500 = vmatmul.mubr.msk.bf16.gmra.mrb[56].mxu1 %vm1487_vm1, %v15139_v51  ;;  %12198 = vmatmul.mubr.msk.bf16.gmra.mrb[60].mxu0 %vm1487_vm1, %v7549_v50  ;;  %v17087_v50 = vld [vmem:[#allocation72_spill] sm:$0xff] }
 0x4d1   : > { %12503 = vmatprep.mubr.msk.bf16.mxu1 %vm1487_vm1, %v17067_v29  ;;  %v17088_v3 = vmax.f32 %v17086_v5, %v17087_v50 }
 0x4d8   : > { %12504 = vmatmul.mubr.msk.bf16.gmra.mrb[60].mxu1 %vm1487_vm1, %v9268_v32 }
 0x56b   : > { %v12171_v62 = vpop.f32.mrb[32].mxu0 }
 0x56c   : > { %v7748_v56 = vmax.f32 %v17070_v53, %v12171_v62  ;;  %v7587_v51 = vpop.f32.mrb[33].mxu0  ;;  %v17094_v53 = vmax.f32 %v17092_v6, %v17093_v26  ;;  %v17113_v26 = vld [vmem:[#allocation112_spill] sm:$0xff] }
 0x56d   : > { %v7746_v11 = vmax.f32 %v17073_v8, %v7587_v51  ;;  %v12172_v25 = vpop.f32.mrb[34].mxu0 }
 0x56e   : > { %v7749_v42 = vmax.f32 %v17076_v13, %v12172_v25  ;;  %v7590_v38 = vpop.f32.mrb[35].mxu0  ;;  %v17096_v25 = vld [vmem:[#allocation79_spill] sm:$0xff] }
 0x56f   : > { %v7747_v7 = vmax.f32 %v17079_v33, %v7590_v38  ;;  %v17099_v33 = vld [vmem:[#allocation48_spill] sm:$0xff] }
 0x573   : > { %v12477_v19 = vpop.f32.mrb[32].mxu1  ;;  %v12175_v0 = vpop.f32.mrb[36].mxu0 }
 0x574   : > { %v9467_v1 = vmax.f32 %v7748_v56, %v12477_v19  ;;  %v9306_v23 = vpop.f32.mrb[33].mxu1  ;;  %v7752_v28 = vmax.f32 %v17082_v17, %v12175_v0  ;;  %v7603_v10 = vpop.f32.mrb[37].mxu0  ;;  %v17103_v17 = vmax.f32 %v17101_v55, %v17102_v14 }
 0x575   : > { %v9465_v41 = vmax.f32 %v7746_v11, %v9306_v23  ;;  %v12478_v31 = vpop.f32.mrb[34].mxu1  ;;  %v7750_v22 = vmax.f32 %v17085_v59, %v7603_v10  ;;  %v12176_v2 = vpop.f32.mrb[38].mxu0  ;;  %v17095_v11 = vld [vmem:[#allocation4_spill] sm:$0xff] }
 0x576   : > { %v9506_v4 = vadd.f32 %v16241_v47, %v9467_v1  ;;  %v9468_v44 = vmax.f32 %v7749_v42, %v12478_v31  ;;  %v9309_v60 = vpop.f32.mrb[35].mxu1  ;;  %v7753_v34 = vmax.f32 %v17088_v3, %v12176_v2  ;;  %v7606_v12 = vpop.f32.mrb[39].mxu0  ;;  %v17097_v54 = vmax.f32 %v17095_v11, %v17096_v25  ;;  %v17104_v3 = vld [vmem:[#allocation70_spill] sm:$0xff] }
 0x577   : > { %v9504_v49 = vadd.f32 %v16241_v47, %v9465_v41  ;;  %v9466_v40 = vmax.f32 %v7747_v7, %v9309_v60  ;;  %v7751_v30 = vmax.f32 %v17091_v52, %v7606_v12  ;;  %v17100_v7 = vmax.f32 %v17098_v48, %v17099_v33 }
 0x578   : > { %v9538_v57 = vmax.f32 %v9506_v4, 0.0  ;;  %v9507_v36 = vadd.f32 %v16241_v47, %v9468_v44 }
 0x579   : > { %v9536_v37 = vmax.f32 %v9504_v49, 0.0  ;;  %v9505_v46 = vadd.f32 %v16241_v47, %v9466_v40 }
 0x57a   : > { %v10641_v43 = vpack.c.bf16 %v9538_v57, %v9538_v57  ;;  %v9539_v58 = vmax.f32 %v9507_v36, 0.0  ;;  %v17108_v57 = vld [vmem:[#allocation115_spill] sm:$0xff] }
 0x57b   : > { %v10639_v16 = vpack.c.bf16 %v9536_v37, %v9536_v37  ;;  %v9537_v20 = vmax.f32 %v9505_v46, 0.0  ;;  %v12481_v29 = vpop.f32.mrb[36].mxu1  ;;  %v12179_v9 = vpop.f32.mrb[40].mxu0 }
 0x57c   : > { %9699 = vst.msk [vmem:[%s16261_s24 + $0x8] sm:$0xf] %vm9696_vm3, %v10641_v43  ;;  %v10642_v27 = vpack.c.bf16 %v9539_v58, %v9539_v58  ;;  %v9471_v32 = vmax.f32 %v7752_v28, %v12481_v29  ;;  %v9322_v62 = vpop.f32.mrb[37].mxu1  ;;  %v7756_v56 = vmax.f32 %v17094_v53, %v12179_v9  ;;  %v7619_v51 = vpop.f32.mrb[41].mxu0  ;;  %v17111_v29 = vld [vmem:[#allocation117_spill] sm:$0xff]  ;;  %v17114_v53 = vld [vmem:[#allocation119_spill] sm:$0xff] }
 0x57d   : > { %9697 = vst.msk [vmem:[%s16261_s24] sm:$0xf] %vm9696_vm3, %v10639_v16  ;;  %v10640_v24 = vpack.c.bf16 %v9537_v20, %v9537_v20  ;;  %v9469_v21 = vmax.f32 %v7750_v22, %v9322_v62  ;;  %v12482_v8 = vpop.f32.mrb[38].mxu1  ;;  %v7754_v18 = vmax.f32 %v17097_v54, %v7619_v51  ;;  %v12180_v13 = vpop.f32.mrb[42].mxu0  ;;  %v17110_v20 = vld [vmem:[#allocation95_spill] sm:$0xff] }
 0x57e   : > { %9700 = vst.msk [vmem:[%s16261_s24 + $0xc] sm:$0xf] %vm9696_vm3, %v10642_v27  ;;  %v9510_v42 = vadd.f32 %v16241_v47, %v9471_v32  ;;  %v9472_v38 = vmax.f32 %v7753_v34, %v12482_v8  ;;  %v9325_v35 = vpop.f32.mrb[39].mxu1  ;;  %v7757_v19 = vmax.f32 %v17100_v7, %v12180_v13  ;;  %v7622_v0 = vpop.f32.mrb[43].mxu0  ;;  %v17105_v34 = vld [vmem:[#allocation113_spill] sm:$0xff]  ;;  %v17112_v9 = vmax.f32 %v17110_v20, %v17111_v29  ;;  %v17116_v7 = vld [vmem:[#allocation114_spill] sm:$0xff] }
 0x57f   : > { %9698 = vst.msk [vmem:[%s16261_s24 + $0x4] sm:$0xf] %vm9696_vm3, %v10640_v24  ;;  %v9508_v1 = vadd.f32 %v16241_v47, %v9469_v21  ;;  %v9470_v23 = vmax.f32 %v7751_v30, %v9325_v35  ;;  %v7755_v28 = vmax.f32 %v17103_v17, %v7622_v0  ;;  %v17106_v12 = vmax.f32 %v17104_v3, %v17105_v34  ;;  %v17107_v30 = vld [vmem:[#allocation80_spill] sm:$0xff] }
 0x580   : > { %v9542_v10 = vmax.f32 %v9510_v42, 0.0  ;;  %v9511_v41 = vadd.f32 %v16241_v47, %v9472_v38  ;;  %v17109_v36 = vmax.f32 %v17107_v30, %v17108_v57  ;;  %v17125_v34 = vld [vmem:[#allocation120_spill] sm:$0xff] }
 0x581   : > { %v9540_v31 = vmax.f32 %v9508_v1, 0.0  ;;  %v9509_v39 = vadd.f32 %v16241_v47, %v9470_v23 }
 0x582   : > { %v10645_v61 = vpack.c.bf16 %v9542_v10, %v9542_v10  ;;  %v9543_v59 = vmax.f32 %v9511_v41, 0.0  ;;  %v17120_v10 = vld [vmem:[#allocation123_spill] sm:$0xff] }
 0x583   : > { %v10643_v22 = vpack.c.bf16 %v9540_v31, %v9540_v31  ;;  %v9541_v2 = vmax.f32 %v9509_v39, 0.0  ;;  %v12485_v4 = vpop.f32.mrb[40].mxu1  ;;  %v12183_v44 = vpop.f32.mrb[44].mxu0 }
 0x584   : > { %9703 = vst.msk [vmem:[%s16261_s24 + $0x18] sm:$0xf] %vm9696_vm3, %v10645_v61  ;;  %v10646_v60 = vpack.c.bf16 %v9543_v59, %v9543_v59  ;;  %v9475_v5 = vmax.f32 %v7756_v56, %v12485_v4  ;;  %v9338_v50 = vpop.f32.mrb[41].mxu1  ;;  %v7760_v49 = vmax.f32 %v17106_v12, %v12183_v44  ;;  %v7635_v40 = vpop.f32.mrb[45].mxu0  ;;  %v17115_v56 = vmax.f32 %v17113_v26, %v17114_v53  ;;  %v17123_v4 = vld [vmem:[#allocation125_spill] sm:$0xff]  ;;  %v17126_v12 = vld [vmem:[#allocation127_spill] sm:$0xff] }
 0x585   : > { %9701 = vst.msk [vmem:[%s16261_s24 + $0x10] sm:$0xf] %vm9696_vm3, %v10643_v22  ;;  %v10644_v45 = vpack.c.bf16 %v9541_v2, %v9541_v2  ;;  %v9473_v63 = vmax.f32 %v7754_v18, %v9338_v50  ;;  %v12486_v52 = vpop.f32.mrb[42].mxu1  ;;  %v7758_v37 = vmax.f32 %v17109_v36, %v7635_v40  ;;  %v12184_v46 = vpop.f32.mrb[46].mxu0  ;;  %v17122_v2 = vld [vmem:[#allocation118_spill] sm:$0xff] }
 0x586   : > { %9704 = vst.msk [vmem:[%s16261_s24 + $0x1c] sm:$0xf] %vm9696_vm3, %v10646_v60  ;;  %v9514_v43 = vadd.f32 %v16241_v47, %v9475_v5  ;;  %v9476_v58 = vmax.f32 %v7757_v19, %v12486_v52  ;;  %v9341_v16 = vpop.f32.mrb[43].mxu1  ;;  %v7761_v27 = vmax.f32 %v17112_v9, %v12184_v46  ;;  %v7638_v32 = vpop.f32.mrb[47].mxu0  ;;  %v17117_v19 = vld [vmem:[#allocation121_spill] sm:$0xff]  ;;  %v17124_v44 = vmax.f32 %v17122_v2, %v17123_v4  ;;  %v17128_v9 = vld [vmem:[#allocation122_spill] sm:$0xff] }
 0x587   : > { %9702 = vst.msk [vmem:[%s16261_s24 + $0x14] sm:$0xf] %vm9696_vm3, %v10644_v45  ;;  %v9512_v62 = vadd.f32 %v16241_v47, %v9473_v63  ;;  %v9474_v6 = vmax.f32 %v7755_v28, %v9341_v16  ;;  %v7759_v51 = vmax.f32 %v17115_v56, %v7638_v32  ;;  %v17118_v0 = vmax.f32 %v17116_v7, %v17117_v19  ;;  %v17119_v28 = vld [vmem:[#allocation116_spill] sm:$0xff] }
 0x588   : > { %v9546_v24 = vmax.f32 %v9514_v43, 0.0  ;;  %v9515_v21 = vadd.f32 %v16241_v47, %v9476_v58  ;;  %v17121_v41 = vmax.f32 %v17119_v28, %v17120_v10  ;;  %v17137_v19 = vld [vmem:[#allocation128_spill] sm:$0xff] }
 0x589   : > { %v9544_v8 = vmax.f32 %v9512_v62, 0.0  ;;  %v9513_v11 = vadd.f32 %v16241_v47, %v9474_v6 }
 0x58a   : > { %v10649_v25 = vpack.c.bf16 %v9546_v24, %v9546_v24  ;;  %v9547_v54 = vmax.f32 %v9515_v21, 0.0  ;;  %v17132_v24 = vld [vmem:[#allocation129_spill] sm:$0xff] }
 0x58b   : > { %v10647_v18 = vpack.c.bf16 %v9544_v8, %v9544_v8  ;;  %v9545_v13 = vmax.f32 %v9513_v11, 0.0  ;;  %v12489_v42 = vpop.f32.mrb[44].mxu1  ;;  %v12187_v38 = vpop.f32.mrb[48].mxu0 }
 0x58c   : > { %9707 = vst.msk [vmem:[%s16261_s24 + $0x28] sm:$0xf] %vm9696_vm3, %v10649_v25  ;;  %v10650_v35 = vpack.c.bf16 %v9547_v54, %v9547_v54  ;;  %v9479_v48 = vmax.f32 %v7760_v49, %v12489_v42  ;;  %v9354_v33 = vpop.f32.mrb[45].mxu1  ;;  %v7764_v1 = vmax.f32 %v17118_v0, %v12187_v38  ;;  %v7651_v23 = vpop.f32.mrb[49].mxu0  ;;  %v17127_v49 = vmax.f32 %v17125_v34, %v17126_v12  ;;  %v17135_v42 = vld [vmem:[#allocation131_spill] sm:$0xff]  ;;  %v17138_v0 = vld [vmem:[#allocation133_spill] sm:$0xff] }
 0x58d   : > { %9705 = vst.msk [vmem:[%s16261_s24 + $0x20] sm:$0xf] %vm9696_vm3, %v10647_v18  ;;  %v10648_v55 = vpack.c.bf16 %v9545_v13, %v9545_v13  ;;  %v9477_v14 = vmax.f32 %v7758_v37, %v9354_v33  ;;  %v12490_v17 = vpop.f32.mrb[46].mxu1  ;;  %v7762_v31 = vmax.f32 %v17121_v41, %v7651_v23  ;;  %v12188_v39 = vpop.f32.mrb[50].mxu0  ;;  %v17134_v13 = vld [vmem:[#allocation126_spill] sm:$0xff] }
 0x58e   : > { %9708 = vst.msk [vmem:[%s16261_s24 + $0x2c] sm:$0xf] %vm9696_vm3, %v10650_v35  ;;  %v9518_v61 = vadd.f32 %v16241_v47, %v9479_v48  ;;  %v9480_v59 = vmax.f32 %v7761_v27, %v12490_v17  ;;  %v9357_v22 = vpop.f32.mrb[47].mxu1  ;;  %v7765_v60 = vmax.f32 %v17124_v44, %v12188_v39  ;;  %v7654_v5 = vpop.f32.mrb[51].mxu0  ;;  %v17129_v27 = vld [vmem:[#allocation68_spill] sm:$0xff]  ;;  %v17136_v38 = vmax.f32 %v17134_v13, %v17135_v42  ;;  %v17140_v44 = vld [vmem:[#allocation7_spill] sm:$0xff] }
 0x58f   : > { %9706 = vst.msk [vmem:[%s16261_s24 + $0x24] sm:$0xf] %vm9696_vm3, %v10648_v55  ;;  %v9516_v50 = vadd.f32 %v16241_v47, %v9477_v14  ;;  %v9478_v3 = vmax.f32 %v7759_v51, %v9357_v22  ;;  %v7763_v40 = vmax.f32 %v17127_v49, %v7654_v5  ;;  %v17130_v32 = vmax.f32 %v17128_v9, %v17129_v27  ;;  %v17131_v51 = vld [vmem:[#allocation124_spill] sm:$0xff]  ;;  %v17149_v27 = vld [vmem:[#allocation134_spill] sm:$0xff] }
 0x590   : > { %v9550_v45 = vmax.f32 %v9518_v61, 0.0  ;;  %v9519_v63 = vadd.f32 %v16241_v47, %v9480_v59  ;;  %v17133_v21 = vmax.f32 %v17131_v51, %v17132_v24 }
 0x591   : > { %v9548_v52 = vmax.f32 %v9516_v50, 0.0  ;;  %v9517_v30 = vadd.f32 %v16241_v47, %v9478_v3 }
 0x592   : > { %v10653_v57 = vpack.c.bf16 %v9550_v45, %v9550_v45  ;;  %v9551_v36 = vmax.f32 %v9519_v63, 0.0  ;;  %v17144_v45 = vld [vmem:[#allocation9_spill] sm:$0xff] }
 0x593   : > { %v10651_v37 = vpack.c.bf16 %v9548_v52, %v9548_v52  ;;  %v9549_v46 = vmax.f32 %v9517_v30, 0.0  ;;  %v12493_v43 = vpop.f32.mrb[48].mxu1  ;;  %v12191_v58 = vpop.f32.mrb[52].mxu0 }
 0x594   : > { %9711 = vst.msk [vmem:[%s16261_s24 + $0x38] sm:$0xf] %vm9696_vm3, %v10653_v57  ;;  %v10654_v16 = vpack.c.bf16 %v9551_v36, %v9551_v36  ;;  %v9483_v20 = vmax.f32 %v7764_v1, %v12493_v43  ;;  %v9370_v29 = vpop.f32.mrb[49].mxu1  ;;  %v7768_v62 = vmax.f32 %v17130_v32, %v12191_v58  ;;  %v7667_v6 = vpop.f32.mrb[53].mxu0  ;;  %v17139_v1 = vmax.f32 %v17137_v19, %v17138_v0  ;;  %v17147_v43 = vld [vmem:[#allocation11_spill] sm:$0xff]  ;;  %v17150_v32 = vld [vmem:[#allocation136_spill] sm:$0xff] }
 0x595   : > { %9709 = vst.msk [vmem:[%s16261_s24 + $0x30] sm:$0xf] %vm9696_vm3, %v10651_v37  ;;  %v10652_v26 = vpack.c.bf16 %v9549_v46, %v9549_v46  ;;  %v9481_v53 = vmax.f32 %v7762_v31, %v9370_v29  ;;  %v12494_v56 = vpop.f32.mrb[50].mxu1  ;;  %v7766_v8 = vmax.f32 %v17133_v21, %v7667_v6  ;;  %v12192_v11 = vpop.f32.mrb[54].mxu0  ;;  %v17146_v46 = vld [vmem:[#allocation132_spill] sm:$0xff] }
 0x596   : > { %9712 = vst.msk [vmem:[%s16261_s24 + $0x3c] sm:$0xf] %vm9696_vm3, %v10654_v16  ;;  %v9522_v25 = vadd.f32 %v16241_v47, %v9483_v20  ;;  %v9484_v54 = vmax.f32 %v7765_v60, %v12494_v56  ;;  %v9373_v18 = vpop.f32.mrb[51].mxu1  ;;  %v7769_v35 = vmax.f32 %v17136_v38, %v12192_v11  ;;  %v7670_v48 = vpop.f32.mrb[55].mxu0  ;;  %v17141_v60 = vld [vmem:[#allocation5_spill] sm:$0xff]  ;;  %v17148_v58 = vmax.f32 %v17146_v46, %v17147_v43  ;;  %v17152_v38 = vld [vmem:[#allocation8_spill] sm:$0xff] }
 0x597   : > { %9710 = vst.msk [vmem:[%s16261_s24 + $0x34] sm:$0xf] %vm9696_vm3, %v10652_v26  ;;  %v9520_v33 = vadd.f32 %v16241_v47, %v9481_v53  ;;  %v9482_v7 = vmax.f32 %v7763_v40, %v9373_v18  ;;  %v7767_v23 = vmax.f32 %v17139_v1, %v7670_v48  ;;  %v17142_v5 = vmax.f32 %v17140_v44, %v17141_v60  ;;  %v17143_v40 = vld [vmem:[#allocation130_spill] sm:$0xff]  ;;  %v17161_v44 = vld [vmem:[#allocation17_spill] sm:$0xff] }
 0x598   : > { %v9554_v55 = vmax.f32 %v9522_v25, 0.0  ;;  %v9523_v14 = vadd.f32 %v16241_v47, %v9484_v54  ;;  %v17145_v63 = vmax.f32 %v17143_v40, %v17144_v45  ;;  %v17154_v1 = vld [vmem:[#allocation6_spill] sm:$0xff] }
 0x599   : > { %v9552_v17 = vmax.f32 %v9520_v33, 0.0  ;;  %v9521_v28 = vadd.f32 %v16241_v47, %v9482_v7 }
 0x59a   : > { %v10657_v10 = vpack.c.bf16 %v9554_v55, %v9554_v55  ;;  %v9555_v41 = vmax.f32 %v9523_v14, 0.0 }
 0x59b   : > { %v10655_v31 = vpack.c.bf16 %v9552_v17, %v9552_v17  ;;  %v9553_v39 = vmax.f32 %v9521_v28, 0.0  ;;  %v12497_v61 = vpop.f32.mrb[52].mxu1  ;;  %v12195_v59 = vpop.f32.mrb[56].mxu0 }
 0x59c   : > { %9715 = vst.msk [vmem:[%s16261_s24 + $0x48] sm:$0xf] %vm9696_vm3, %v10657_v10  ;;  %v10658_v22 = vpack.c.bf16 %v9555_v41, %v9555_v41  ;;  %v9487_v2 = vmax.f32 %v7768_v62, %v12497_v61  ;;  %v9386_v4 = vpop.f32.mrb[53].mxu1  ;;  %v7772_v50 = vmax.f32 %v17142_v5, %v12195_v59  ;;  %v7683_v3 = vpop.f32.mrb[57].mxu0  ;;  %v17151_v62 = vmax.f32 %v17149_v27, %v17150_v32 }
 0x59d   : > { %9713 = vst.msk [vmem:[%s16261_s24 + $0x40] sm:$0xf] %vm9696_vm3, %v10655_v31  ;;  %v10656_v34 = vpack.c.bf16 %v9553_v39, %v9553_v39  ;;  %v9485_v12 = vmax.f32 %v7766_v8, %v9386_v4  ;;  %v12498_v49 = vpop.f32.mrb[54].mxu1  ;;  %v7770_v52 = vmax.f32 %v17145_v63, %v7683_v3  ;;  %v12196_v30 = vpop.f32.mrb[58].mxu0  ;;  %v17157_v31 = vld [vmem:[#allocation135_spill] sm:$0xff]  ;;  %v17160_v4 = vld [vmem:[#allocation137_spill] sm:$0xff] }
 0x59e   : > { %9716 = vst.msk [vmem:[%s16261_s24 + $0x4c] sm:$0xf] %vm9696_vm3, %v10658_v22  ;;  %v9526_v57 = vadd.f32 %v16241_v47, %v9487_v2  ;;  %v9488_v36 = vmax.f32 %v7769_v35, %v12498_v49  ;;  %v9389_v37 = vpop.f32.mrb[55].mxu1  ;;  %v7773_v16 = vmax.f32 %v17148_v58, %v12196_v30  ;;  %v7686_v20 = vpop.f32.mrb[59].mxu0  ;;  %v17153_v35 = vmax.f32 %v15788_v15, %v17152_v38  ;;  %v17158_v15 = vld [vmem:[#allocation12_spill] sm:$0xff] }
 0x59f   : > { %9714 = vst.msk [vmem:[%s16261_s24 + $0x44] sm:$0xf] %vm9696_vm3, %v10656_v34  ;;  %v9524_v29 = vadd.f32 %v16241_v47, %v9485_v12  ;;  %v9486_v9 = vmax.f32 %v7767_v23, %v9389_v37  ;;  %v7771_v6 = vmax.f32 %v17151_v62, %v7686_v20  ;;  %v17155_v23 = vld [vmem:[#allocation15_spill] sm:$0xff]  ;;  %v17159_v39 = vmax.f32 %v17157_v31, %v17158_v15 }
 0x5a0   : > { %v9558_v26 = vmax.f32 %v9526_v57, 0.0  ;;  %v9527_v53 = vadd.f32 %v16241_v47, %v9488_v36  ;;  %v17156_v55 = vmax.f32 %v17154_v1, %v17155_v23  ;;  %v17162_v60 = vmax.f32 %v17160_v4, %v17161_v44 }
 0x5a1   : > { %v9556_v56 = vmax.f32 %v9524_v29, 0.0  ;;  %v9525_v51 = vadd.f32 %v16241_v47, %v9486_v9 }
 0x5a2   : > { %v10661_v24 = vpack.c.bf16 %v9558_v26, %v9558_v26  ;;  %v9559_v21 = vmax.f32 %v9527_v53, 0.0 }
 0x5a3   : > { %v10659_v8 = vpack.c.bf16 %v9556_v56, %v9556_v56  ;;  %v9557_v11 = vmax.f32 %v9525_v51, 0.0  ;;  %v12501_v25 = vpop.f32.mrb[56].mxu1  ;;  %v12199_v54 = vpop.f32.mrb[60].mxu0 }
 0x5a4   : > { %9719 = vst.msk [vmem:[%s16261_s24 + $0x58] sm:$0xf] %vm9696_vm3, %v10661_v24  ;;  %v10662_v18 = vpack.c.bf16 %v9559_v21, %v9559_v21  ;;  %v9491_v13 = vmax.f32 %v7772_v50, %v12501_v25  ;;  %v9402_v42 = vpop.f32.mrb[57].mxu1  ;;  %v7776_v48 = vmax.f32 %v17153_v35, %v12199_v54  ;;  %v7699_v33 = vpop.f32.mrb[61].mxu0 }
 0x5a5   : > { %9717 = vst.msk [vmem:[%s16261_s24 + $0x50] sm:$0xf] %vm9696_vm3, %v10659_v8  ;;  %v10660_v7 = vpack.c.bf16 %v9557_v11, %v9557_v11  ;;  %v9489_v19 = vmax.f32 %v7770_v52, %v9402_v42  ;;  %v12502_v0 = vpop.f32.mrb[58].mxu1  ;;  %v7774_v14 = vmax.f32 %v17156_v55, %v7699_v33  ;;  %v12200_v17 = vpop.f32.mrb[62].mxu0 }
 0x5a6   : > { %9720 = vst.msk [vmem:[%s16261_s24 + $0x5c] sm:$0xf] %vm9696_vm3, %v10662_v18  ;;  %v9530_v28 = vadd.f32 %v16241_v47, %v9491_v13  ;;  %v9492_v10 = vmax.f32 %v7773_v16, %v12502_v0  ;;  %v9405_v41 = vpop.f32.mrb[59].mxu1  ;;  %v7777_v61 = vmax.f32 %v17159_v39, %v12200_v17  ;;  %v7702_v59 = vpop.f32.mrb[63].mxu0 }
 0x5a7   : > { %9718 = vst.msk [vmem:[%s16261_s24 + $0x54] sm:$0xf] %vm9696_vm3, %v10660_v7  ;;  %v9528_v22 = vadd.f32 %v16241_v47, %v9489_v19  ;;  %v9490_v2 = vmax.f32 %v7771_v6, %v9405_v41  ;;  %v7775_v5 = vmax.f32 %v17162_v60, %v7702_v59 }
 0x5a8   : > { %v9562_v50 = vmax.f32 %v9530_v28, 0.0  ;;  %v9531_v3 = vadd.f32 %v16241_v47, %v9492_v10 }
 0x5a9   : > { %v9560_v34 = vmax.f32 %v9528_v22, 0.0  ;;  %v9529_v12 = vadd.f32 %v16241_v47, %v9490_v2 }
 0x5aa   : > { %v10665_v49 = vpack.c.bf16 %v9562_v50, %v9562_v50  ;;  %v9563_v40 = vmax.f32 %v9531_v3, 0.0 }
 0x5ab   : > { %v10663_v45 = vpack.c.bf16 %v9560_v34, %v9560_v34  ;;  %v9561_v63 = vmax.f32 %v9529_v12, 0.0  ;;  %v12505_v52 = vpop.f32.mrb[60].mxu1 }
 0x5ac   : > { %9723 = vst.msk [vmem:[%s16261_s24 + $0x68] sm:$0xf] %vm9696_vm3, %v10665_v49  ;;  %v10666_v30 = vpack.c.bf16 %v9563_v40, %v9563_v40  ;;  %v9495_v57 = vmax.f32 %v7776_v48, %v12505_v52  ;;  %v9418_v36 = vpop.f32.mrb[61].mxu1 }
 0x5ad   : > { %9721 = vst.msk [vmem:[%s16261_s24 + $0x60] sm:$0xf] %vm9696_vm3, %v10663_v45  ;;  %v10664_v37 = vpack.c.bf16 %v9561_v63, %v9561_v63  ;;  %v9493_v46 = vmax.f32 %v7774_v14, %v9418_v36  ;;  %v12506_v43 = vpop.f32.mrb[62].mxu1 }
 0x5ae   : > { %9724 = vst.msk [vmem:[%s16261_s24 + $0x6c] sm:$0xf] %vm9696_vm3, %v10666_v30  ;;  %v9534_v58 = vadd.f32 %v16241_v47, %v9495_v57  ;;  %v9496_v16 = vmax.f32 %v7777_v61, %v12506_v43  ;;  %v9421_v20 = vpop.f32.mrb[63].mxu1 }
 0x5af   : > { %9722 = vst.msk [vmem:[%s16261_s24 + $0x64] sm:$0xf] %vm9696_vm3, %v10664_v37  ;;  %v9532_v29 = vadd.f32 %v16241_v47, %v9493_v46  ;;  %v9494_v9 = vmax.f32 %v7775_v5, %v9421_v20 }
 0x5b0   : > { %v9566_v27 = vmax.f32 %v9534_v58, 0.0  ;;  %v9535_v32 = vadd.f32 %v16241_v47, %v9496_v16 }
 0x5b1   : > { %v9564_v62 = vmax.f32 %v9532_v29, 0.0  ;;  %v9533_v6 = vadd.f32 %v16241_v47, %v9494_v9 }
 0x5b2   : > { %v10669_v26 = vpack.c.bf16 %v9566_v27, %v9566_v27  ;;  %v9567_v53 = vmax.f32 %v9535_v32, 0.0 }
 0x5b3   : > { %v10667_v56 = vpack.c.bf16 %v9564_v62, %v9564_v62  ;;  %v9565_v51 = vmax.f32 %v9533_v6, 0.0 }
 0x5b4   : > { %9727 = vst.msk [vmem:[%s16261_s24 + $0x78] sm:$0xf] %vm9696_vm3, %v10669_v26  ;;  %v10670_v24 = vpack.c.bf16 %v9567_v53, %v9567_v53 }
 0x5b5   : > { %9725 = vst.msk [vmem:[%s16261_s24 + $0x70] sm:$0xf] %vm9696_vm3, %v10667_v56  ;;  %v10668_v21 = vpack.c.bf16 %v9565_v51, %v9565_v51 }
 0x5b6   : > { %9728 = vst.msk [vmem:[%s16261_s24 + $0x7c] sm:$0xf] %vm9696_vm3, %v10670_v24 }
 0x5b7   : > { %9726 = vst.msk [vmem:[%s16261_s24 + $0x74] sm:$0xf] %vm9696_vm3, %v10668_v21 }
 0x5b8 PF: > { %p10_p9 = scmp.ge.s32.totalorder %s13799_s16, 4   ;;  %s17163_s12 = smov %s13756_s13 }
 0x5b9   : > { %s17164_s13 = smov %s13808_s19  ;;  %s17165_s14 = smov %s13799_s16 }
 0x5ba   :  { %12 = sbr.rel (!%p10_p9) target bundleno = 2 (0x2), region = 119 }

// kernel: attention_cnn_forward.8
= control target key start
LH: loop header
LB: loop body
LE: loop exit
PB: predicated region body
PF: predicated region fallthrough
CT: control target
= control target key end

     0   :  { %v781_v32 = vmov 0.0|0.0   ;;  %vm782_vm0 = vmmov 0   ;;  %v783_v33 = vmov 0.0   ;;  %v784_v34 = vmov 0   ;;  %s972_s1 = inlined_call_operand.vmem [shape: bf16[256,64], index: 1, kind: input, shape index: {}]   ;;  %s973_s0 = inlined_call_operand.vmem [shape: bf16[128,256], index: 0, kind: input, shape index: {}]   ;;  %s974_s4 = inlined_call_operand.<no memory space> [shape: f32[1,1], index: 4, kind: input, shape index: {}]   ;;  %s975_s2 = inlined_call_operand.vmem [shape: f32[1,64], index: 2, kind: input, shape index: {}]   ;;  %s976_s3 = inlined_call_operand.vmem [shape: f32[8,64], index: 3, kind: input, shape index: {}]   ;;  %s977_s5 = inlined_call_operand.vmem [shape: f32[1,128], index: 5, kind: output, shape index: {}]  }
   0x1   :  { %v709_v0 = vld [vmem:[%s972_s1 + $0x40] sm:$0xff]   ;;  %v711_v2 = vld [vmem:[%s972_s1 + $0x48] sm:$0xff]   ;;  %v713_v4 = vld [vmem:[%s972_s1 + $0x50] sm:$0xff]   ;;  %672 = vmatprep.subr.bf16.mxu1 %v781_v32  ;;  %669 = vmatprep.mubr.msk.f32.mxu1 %vm782_vm0, %v783_v33  ;;  %v10_v35 = vstv %s974_s4  ;;  %vm368_vm1 = vcmask 523264  }
   0x2   :  { %v710_v1 = vld [vmem:[%s972_s1] sm:$0xff]   ;;  %556 = vmatprep.subr.bf16.mxu0 %v709_v0  ;;  %v712_v3 = vld [vmem:[%s972_s1 + $0x8] sm:$0xff]   ;;  %v714_v5 = vld [vmem:[%s972_s1 + $0x10] sm:$0xff]   ;;  %708 = vset.pattern.permute.xlu0 %v784_v34  ;;  %11 = vst [vmem:[#allocation2] sm:$0x1] %v10_v35 }
   0x3   :  { %557 = vmatpush3.bf16.msra.mxu0 %v710_v1  ;;  %v715_v6 = vld [vmem:[%s972_s1 + $0x58] sm:$0xff]   ;;  %v717_v8 = vld [vmem:[%s972_s1 + $0x60] sm:$0xff]   ;;  %v719_v10 = vld [vmem:[%s972_s1 + $0x68] sm:$0xff]  }
   0x4   :  { %558 = vmatprep.subr.bf16.mxu0 %v711_v2  ;;  %v716_v7 = vld [vmem:[%s972_s1 + $0x18] sm:$0xff]   ;;  %v718_v9 = vld [vmem:[%s972_s1 + $0x20] sm:$0xff]   ;;  %v720_v12 = vld [vmem:[%s972_s1 + $0x28] sm:$0xff]  }
   0x5   :  { %v727_v11 = vld [vmem:[%s973_s0 + $0x4] ss:$8 sps:$4 sm:$0xff]   ;;  %v721_v13 = vld [vmem:[%s972_s1 + $0x70] sm:$0xff]   ;;  %v723_v15 = vld [vmem:[%s972_s1 + $0x78] sm:$0xff]  }
   0x6   :  { %286 = vmatprep.mubr.bf16.mxu0 %v727_v11  ;;  %v722_v14 = vld [vmem:[%s972_s1 + $0x30] sm:$0xff]   ;;  %v724_v16 = vld [vmem:[%s972_s1 + $0x38] sm:$0xff]   ;;  %v725_v17 = vld [vmem:[%s973_s0] ss:$8 sps:$4 sm:$0xff]  }
   0x7   :  { %559 = vmatpush3.bf16.msra.mxu0 %v712_v3  ;;  %v728_v18 = vld [vmem:[%s973_s0 + $0x14] ss:$8 sps:$4 sm:$0xff]   ;;  %v730_v19 = vld [vmem:[%s973_s0 + $0x10] ss:$8 sps:$4 sm:$0xff]   ;;  %v731_v20 = vld [vmem:[%s973_s0 + $0x24] ss:$8 sps:$4 sm:$0xff]  }
   0x8   :  { %560 = vmatprep.subr.bf16.mxu0 %v713_v4  ;;  %v733_v21 = vld [vmem:[%s973_s0 + $0x20] ss:$8 sps:$4 sm:$0xff]   ;;  %v734_v22 = vld [vmem:[%s973_s0 + $0x34] ss:$8 sps:$4 sm:$0xff]   ;;  %v736_v23 = vld [vmem:[%s973_s0 + $0x30] ss:$8 sps:$4 sm:$0xff]  }
   0x9   :  { %v737_v24 = vld [vmem:[%s973_s0 + $0x44] ss:$8 sps:$4 sm:$0xff]   ;;  %v739_v25 = vld [vmem:[%s973_s0 + $0x40] ss:$8 sps:$4 sm:$0xff]   ;;  %v740_v26 = vld [vmem:[%s973_s0 + $0x54] ss:$8 sps:$4 sm:$0xff]  }
   0xa   :  { %v742_v27 = vld [vmem:[%s973_s0 + $0x50] ss:$8 sps:$4 sm:$0xff]   ;;  %v743_v28 = vld [vmem:[%s973_s0 + $0x64] ss:$8 sps:$4 sm:$0xff]   ;;  %v745_v29 = vld [vmem:[%s973_s0 + $0x60] ss:$8 sps:$4 sm:$0xff]  }
   0xb   :  { %561 = vmatpush3.bf16.msra.mxu0 %v714_v5  ;;  %v746_v30 = vld [vmem:[%s973_s0 + $0x74] ss:$8 sps:$4 sm:$0xff]   ;;  %v748_v31 = vld [vmem:[%s973_s0 + $0x70] ss:$8 sps:$4 sm:$0xff]   ;;  %v490_v36 = vld [vmem:[#allocation2] sm:$0x1] }
   0xc   :  { %562 = vmatprep.subr.bf16.mxu0 %v715_v6  ;;  %493 = vperm.xlu0 %708, %v490_v36   ;;  %v918_v38 = vld [vmem:[%s975_s2] ss:$0 sm:$0xff]  ;;  %vm926_vm2 = vmpackc.low %vm368_vm1, %vm368_vm1 }
   0xf   :  { %563 = vmatpush3.bf16.msra.mxu0 %v716_v7 }
  0x10   :  { %564 = vmatprep.subr.bf16.mxu0 %v717_v8 }
  0x13   :  { %565 = vmatpush3.bf16.msra.mxu0 %v718_v9 }
  0x14   :  { %566 = vmatprep.subr.bf16.mxu0 %v719_v10 }
  0x17   :  { %567 = vmatpush3.bf16.msra.mxu0 %v720_v12 }
  0x18   :  { %568 = vmatprep.subr.bf16.mxu0 %v721_v13 }
  0x1b   :  { %569 = vmatpush3.bf16.msra.mxu0 %v722_v14 }
  0x1c   :  { %570 = vmatprep.subr.bf16.mxu0 %v723_v15 }
  0x1f   :  { %571 = vmatpush3.bf16.msra.mxu0 %v724_v16 }
  0x22   :  { %287 = vmatmul.mubr.bf16.vlgmr.msra.gmra.mrb[0].mxu0 %v725_v17 }
  0x23   :  { %294 = vmatprep.mubr.bf16.mxu0 %v728_v18 }
  0x2a   :  { %295 = vmatmul.mubr.bf16.gmra.mrb[4].mxu0 %v730_v19 }
  0x2b   :  { %302 = vmatprep.mubr.bf16.mxu0 %v731_v20 }
  0x32   :  { %303 = vmatmul.mubr.bf16.gmra.mrb[8].mxu0 %v733_v21 }
  0x33   :  { %310 = vmatprep.mubr.bf16.mxu0 %v734_v22 }
  0x3a   :  { %311 = vmatmul.mubr.bf16.gmra.mrb[12].mxu0 %v736_v23 }
  0x3b   :  { %318 = vmatprep.mubr.bf16.mxu0 %v737_v24 }
  0x42   :  { %319 = vmatmul.mubr.bf16.gmra.mrb[16].mxu0 %v739_v25 }
  0x43   :  { %326 = vmatprep.mubr.bf16.mxu0 %v740_v26 }
  0x4a   :  { %327 = vmatmul.mubr.bf16.gmra.mrb[20].mxu0 %v742_v27 }
  0x4b   :  { %334 = vmatprep.mubr.bf16.mxu0 %v743_v28 }
  0x52   :  { %335 = vmatmul.mubr.bf16.gmra.mrb[24].mxu0 %v745_v29 }
  0x53   :  { %342 = vmatprep.mubr.bf16.mxu0 %v746_v30 }
  0x5a   :  { %343 = vmatmul.mubr.bf16.gmra.mrb[28].mxu0 %v748_v31 }
  0xf5   :  { %v572_v37 = vpop.f32.mrb[0].mxu0 }
  0xf6   :  { %v573_v39 = vpop.f32.mrb[1].mxu0 }
  0xf7   :  { %v574_v40 = vadd.f32 %v573_v39, %v572_v37  ;;  %v575_v41 = vpop.f32.mrb[2].mxu0 }
  0xf8   :  { %v576_v42 = vpop.f32.mrb[3].mxu0 }
  0xf9   :  { %v289_v43 = vadd.f32 %v574_v40, %v918_v38  ;;  %v577_v44 = vadd.f32 %v576_v42, %v575_v41 }
  0xfb   :  { %v292_v45 = vadd.f32 %v577_v44, %v918_v38  ;;  %749 = vtanh.f32 %v289_v43 }
  0xfd   :  { %751 = vtanh.f32 %v292_v45  ;;  %v578_v46 = vpop.f32.mrb[4].mxu0 }
  0xfe   :  { %v579_v47 = vpop.f32.mrb[5].mxu0 }
  0xff   :  { %v580_v48 = vadd.f32 %v579_v47, %v578_v46  ;;  %v581_v49 = vpop.f32.mrb[6].mxu0 }
 0x100   :  { %v582_v50 = vpop.f32.mrb[7].mxu0 }
 0x101   :  { %v297_v51 = vadd.f32 %v580_v48, %v918_v38  ;;  %v583_v52 = vadd.f32 %v582_v50, %v581_v49 }
 0x103   :  { %v300_v53 = vadd.f32 %v583_v52, %v918_v38  ;;  %753 = vtanh.f32 %v297_v51 }
 0x105   :  { %755 = vtanh.f32 %v300_v53  ;;  %v584_v54 = vpop.f32.mrb[8].mxu0  ;;  %v750_v55 = vpop.eup %749 }
 0x106   :  { %v585_v56 = vpop.f32.mrb[9].mxu0 }
 0x107   :  { %v752_v57 = vpop.eup %751  ;;  %v586_v58 = vadd.f32 %v585_v56, %v584_v54  ;;  %v587_v59 = vpop.f32.mrb[10].mxu0 }
 0x108   :  { %v588_v61 = vpop.f32.mrb[11].mxu0  ;;  %v673_v62 = vpack.c.bf16 %v752_v57, %v750_v55 }
 0x109   :  { %v305_v63 = vadd.f32 %v586_v58, %v918_v38  ;;  %v589_v0 = vadd.f32 %v588_v61, %v587_v59 }
 0x10a   :  { %675 = vmatpush3.bf16.xpose.msk.msra.mxu1 %vm926_vm2, %v673_v62 }
 0x10b   :  { %v308_v1 = vadd.f32 %v589_v0, %v918_v38  ;;  %676 = vmatprep.subr.bf16.mxu1 %v781_v32  ;;  %757 = vtanh.f32 %v305_v63 }
 0x10d   :  { %759 = vtanh.f32 %v308_v1  ;;  %v590_v2 = vpop.f32.mrb[12].mxu0  ;;  %v754_v3 = vpop.eup %753 }
 0x10e   :  { %v591_v4 = vpop.f32.mrb[13].mxu0 }
 0x10f   :  { %v756_v5 = vpop.eup %755  ;;  %v592_v6 = vadd.f32 %v591_v4, %v590_v2  ;;  %v593_v7 = vpop.f32.mrb[14].mxu0  ;;  %v496_v2 = vlaneseq }
 0x110   :  { %v594_v8 = vpop.f32.mrb[15].mxu0  ;;  %v677_v9 = vpack.c.bf16 %v756_v5, %v754_v3  ;;  %v494_v5 = vpop.permute.xlu0 %493 }
 0x111   :  { %v313_v10 = vadd.f32 %v592_v6, %v918_v38  ;;  %v595_v11 = vadd.f32 %v594_v8, %v593_v7  ;;  %v497_v3 = vshrl.u32 %v496_v2, 7 }
 0x112   :  { %679 = vmatpush3.bf16.xpose.msk.msra.mxu1 %vm926_vm2, %v677_v9 }
 0x113   :  { %v316_v12 = vadd.f32 %v595_v11, %v918_v38  ;;  %680 = vmatprep.subr.bf16.mxu1 %v781_v32  ;;  %761 = vtanh.f32 %v313_v10  ;;  %v498_v4 = vsub.s32 0, %v497_v3 }
 0x115   :  { %763 = vtanh.f32 %v316_v12  ;;  %v596_v13 = vpop.f32.mrb[16].mxu0  ;;  %v758_v14 = vpop.eup %757  ;;  %v499_v6 = vrot.slane %v494_v5, %v498_v4 }
 0x116   :  { %v597_v15 = vpop.f32.mrb[17].mxu0 }
 0x117   :  { %v760_v16 = vpop.eup %759  ;;  %v598_v17 = vadd.f32 %v597_v15, %v596_v13  ;;  %v599_v18 = vpop.f32.mrb[18].mxu0 }
 0x118   :  { %v600_v19 = vpop.f32.mrb[19].mxu0  ;;  %v681_v20 = vpack.c.bf16 %v760_v16, %v758_v14 }
 0x119   :  { %v321_v21 = vadd.f32 %v598_v17, %v918_v38  ;;  %v601_v22 = vadd.f32 %v600_v19, %v599_v18 }
 0x11a   :  { %683 = vmatpush3.bf16.xpose.msk.msra.mxu1 %vm926_vm2, %v681_v20 }
 0x11b   :  { %v324_v23 = vadd.f32 %v601_v22, %v918_v38  ;;  %684 = vmatprep.subr.bf16.mxu1 %v781_v32  ;;  %765 = vtanh.f32 %v321_v21 }
 0x11d   :  { %767 = vtanh.f32 %v324_v23  ;;  %v602_v24 = vpop.f32.mrb[20].mxu0  ;;  %v762_v25 = vpop.eup %761 }
 0x11e   :  { %v603_v26 = vpop.f32.mrb[21].mxu0 }
 0x11f   :  { %v764_v27 = vpop.eup %763  ;;  %v604_v28 = vadd.f32 %v603_v26, %v602_v24  ;;  %v605_v29 = vpop.f32.mrb[22].mxu0 }
 0x120   :  { %v606_v30 = vpop.f32.mrb[23].mxu0  ;;  %v685_v31 = vpack.c.bf16 %v764_v27, %v762_v25 }
 0x121   :  { %v329_v33 = vadd.f32 %v604_v28, %v918_v38  ;;  %v607_v34 = vadd.f32 %v606_v30, %v605_v29 }
 0x122   :  { %687 = vmatpush3.bf16.xpose.msk.msra.mxu1 %vm926_vm2, %v685_v31 }
 0x123   :  { %v332_v35 = vadd.f32 %v607_v34, %v918_v38  ;;  %688 = vmatprep.subr.bf16.mxu1 %v781_v32  ;;  %769 = vtanh.f32 %v329_v33 }
 0x125   :  { %771 = vtanh.f32 %v332_v35  ;;  %v608_v36 = vpop.f32.mrb[24].mxu0  ;;  %v766_v37 = vpop.eup %765 }
 0x126   :  { %v609_v39 = vpop.f32.mrb[25].mxu0 }
 0x127   :  { %v768_v40 = vpop.eup %767  ;;  %v610_v41 = vadd.f32 %v609_v39, %v608_v36  ;;  %v611_v42 = vpop.f32.mrb[26].mxu0 }
 0x128   :  { %v612_v43 = vpop.f32.mrb[27].mxu0  ;;  %v689_v44 = vpack.c.bf16 %v768_v40, %v766_v37 }
 0x129   :  { %v337_v45 = vadd.f32 %v610_v41, %v918_v38  ;;  %v613_v46 = vadd.f32 %v612_v43, %v611_v42 }
 0x12a   :  { %691 = vmatpush3.bf16.xpose.msk.msra.mxu1 %vm926_vm2, %v689_v44 }
 0x12b   :  { %v340_v47 = vadd.f32 %v613_v46, %v918_v38  ;;  %692 = vmatprep.subr.bf16.mxu1 %v781_v32  ;;  %773 = vtanh.f32 %v337_v45 }
 0x12d   :  { %775 = vtanh.f32 %v340_v47  ;;  %v614_v48 = vpop.f32.mrb[28].mxu0  ;;  %v770_v49 = vpop.eup %769 }
 0x12e   :  { %v615_v50 = vpop.f32.mrb[29].mxu0 }
 0x12f   :  { %v772_v51 = vpop.eup %771  ;;  %v616_v52 = vadd.f32 %v615_v50, %v614_v48  ;;  %v617_v53 = vpop.f32.mrb[30].mxu0 }
 0x130   :  { %v618_v54 = vpop.f32.mrb[31].mxu0  ;;  %v693_v55 = vpack.c.bf16 %v772_v51, %v770_v49 }
 0x131   :  { %v345_v56 = vadd.f32 %v616_v52, %v918_v38  ;;  %v619_v57 = vadd.f32 %v618_v54, %v617_v53 }
 0x132   :  { %695 = vmatpush3.bf16.xpose.msk.msra.mxu1 %vm926_vm2, %v693_v55 }
 0x133   :  { %v348_v58 = vadd.f32 %v619_v57, %v918_v38  ;;  %696 = vmatprep.subr.bf16.mxu1 %v781_v32  ;;  %777 = vtanh.f32 %v345_v56  ;;  %v367_v38 = vld [vmem:[%s976_s3] sm:$0xff] }
 0x135   :  { %779 = vtanh.f32 %v348_v58  ;;  %v774_v59 = vpop.eup %773 }
 0x137   :  { %v776_v61 = vpop.eup %775 }
 0x138   :  { %v697_v62 = vpack.c.bf16 %v776_v61, %v774_v59 }
 0x13a   :  { %699 = vmatpush3.bf16.xpose.msk.msra.mxu1 %vm926_vm2, %v697_v62 }
 0x13b   :  { %700 = vmatprep.subr.bf16.mxu1 %v781_v32 }
 0x13d   :  { %v778_v63 = vpop.eup %777 }
 0x13f   :  { %v780_v0 = vpop.eup %779 }
 0x140   :  { %v701_v1 = vpack.c.bf16 %v780_v0, %v778_v63 }
 0x142   :  { %703 = vmatpush3.bf16.xpose.msk.msra.mxu1 %vm926_vm2, %v701_v1 }
 0x149   :  { %670 = vmatmul.mubr.msk.f32.vlgmr.msra.gmra.mrb[0].mxu1 %vm368_vm1, %v367_v38 }
 0x21c   :  { %v486_v7 = vpop.f32.mrb[0].mxu1 }
 0x21d   :  { %v500_v8 = vadd.f32 %v499_v6, %v486_v7  ;;  %v671_v32 = vpop.f32.mrb[1].mxu1 }
 0x21f   :  { %501 = vst [vmem:[%s977_s5] sm:$0x1] %v500_v8 }

// kernel: attention_cnn_forward.9
= control target key start
LH: loop header
LB: loop body
LE: loop exit
PB: predicated region body
PF: predicated region fallthrough
CT: control target
= control target key end

     0   :  { %s697_s19 = smov 64   ;;  %vm90_vm0 = vcmask 523264   ;;  %s952_s1 = inlined_call_operand.vmem [shape: bf16[128,64], index: 1, kind: input, shape index: {}]   ;;  %s953_s2 = inlined_call_operand.vmem [shape: bf16[256,128], index: 2, kind: input, shape index: {}]   ;;  %s954_s0 = inlined_call_operand.vmem [shape: bf16[128,256], index: 0, kind: input, shape index: {}]   ;;  %s955_s3 = inlined_call_operand.vmem [shape: f32[1,128], index: 3, kind: input, shape index: {}]   ;;  %s956_s4 = inlined_call_operand.vmem [shape: f32[128,128], index: 4, kind: output, shape index: {}]  }
   0x1   :  { %v726_v0 = vld [vmem:[%s952_s1] sm:$0xff]   ;;  %v737_v2 = vld [vmem:[%s952_s1 + $0x8] sm:$0xff]   ;;  %v749_v4 = vld [vmem:[%s952_s1 + $0x10] sm:$0xff]  }
   0x2   :  { %v731_v1 = vld [vmem:[%s952_s1 + $0x20] sm:$0xff]   ;;  %74 = vrot.lane.b32.xlu0 %v726_v0, %s697_s19  ;;  %76 = vrot.lane.b32.xlu1 %v737_v2, %s697_s19  ;;  %v743_v3 = vld [vmem:[%s952_s1 + $0x28] sm:$0xff]  }
   0x3   :  { %v754_v5 = vld [vmem:[%s952_s1 + $0x30] sm:$0xff]   ;;  %v760_v6 = vld [vmem:[%s952_s1 + $0x18] sm:$0xff]   ;;  %v681_v7 = vld [vmem:[%s953_s2 + $0x40] sm:$0xff]  }
   0x4   :  { %v682_v8 = vld [vmem:[%s953_s2] sm:$0xff]   ;;  %v772_v9 = vld [vmem:[%s952_s1 + $0x38] sm:$0xff]   ;;  %592 = vmatprep.subr.bf16.mxu0 %v681_v7  ;;  %v683_v10 = vld [vmem:[%s953_s2 + $0x48] sm:$0xff]   ;;  %656 = vmatprep.subr.bf16.mxu1 %v681_v7 }
   0x5   :  { %593 = vmatpush3.bf16.msra.mxu0 %v682_v8  ;;  %v684_v11 = vld [vmem:[%s953_s2 + $0x8] sm:$0xff]   ;;  %v685_v12 = vld [vmem:[%s953_s2 + $0x50] sm:$0xff]   ;;  %664 = vmatpush3.bf16.msra.mxu1 %v682_v8  ;;  %v687_v14 = vld [vmem:[%s953_s2 + $0x58] sm:$0xff]  }
   0x6   :  { %82 = vrot.lane.b32.xlu0 %v731_v1, %s697_s19  ;;  %84 = vrot.lane.b32.xlu1 %v743_v3, %s697_s19  ;;  %v686_v13 = vld [vmem:[%s953_s2 + $0x10] sm:$0xff]   ;;  %v688_v15 = vld [vmem:[%s953_s2 + $0x18] sm:$0xff]  }
   0x7   :  { %594 = vmatprep.subr.bf16.mxu0 %v683_v10  ;;  %657 = vmatprep.subr.bf16.mxu1 %v683_v10  ;;  %v689_v16 = vld [vmem:[%s953_s2 + $0x60] sm:$0xff]   ;;  %v691_v18 = vld [vmem:[%s953_s2 + $0x68] sm:$0xff]   ;;  %v693_v20 = vld [vmem:[%s953_s2 + $0x70] sm:$0xff]  }
   0x8   :  { %v690_v17 = vld [vmem:[%s953_s2 + $0x20] sm:$0xff]   ;;  %v692_v19 = vld [vmem:[%s953_s2 + $0x28] sm:$0xff]   ;;  %v694_v21 = vld [vmem:[%s953_s2 + $0x30] sm:$0xff]  }
   0x9   :  { %595 = vmatpush3.bf16.msra.mxu0 %v684_v11  ;;  %665 = vmatpush3.bf16.msra.mxu1 %v684_v11  ;;  %v695_v22 = vld [vmem:[%s953_s2 + $0x78] sm:$0xff]   ;;  %v115_v26 = vld [vmem:[%s954_s0] sm:$0xff]  ;;  %v116_v27 = vld [vmem:[%s954_s0 + $0x8] sm:$0xff] }
   0xa   :  { %78 = vrot.lane.b32.xlu0 %v749_v4, %s697_s19  ;;  %86 = vrot.lane.b32.xlu1 %v754_v5, %s697_s19  ;;  %v696_v23 = vld [vmem:[%s953_s2 + $0x38] sm:$0xff]   ;;  %v117_v32 = vld [vmem:[%s954_s0 + $0x10] sm:$0xff] }
   0xb   :  { %596 = vmatprep.subr.bf16.mxu0 %v685_v12  ;;  %658 = vmatprep.subr.bf16.mxu1 %v685_v12  ;;  %v118_v33 = vld [vmem:[%s954_s0 + $0x18] sm:$0xff]  ;;  %v123_v40 = vld [vmem:[%s954_s0 + $0x40] sm:$0xff]  ;;  %v124_v41 = vld [vmem:[%s954_s0 + $0x48] sm:$0xff] }
   0xc   :  { %v125_v50 = vld [vmem:[%s954_s0 + $0x50] sm:$0xff]  ;;  %v126_v51 = vld [vmem:[%s954_s0 + $0x58] sm:$0xff]  ;;  %v119_v63 = vld [vmem:[%s954_s0 + $0x20] sm:$0xff] }
   0xd   :  { %597 = vmatpush3.bf16.msra.mxu0 %v686_v13  ;;  %666 = vmatpush3.bf16.msra.mxu1 %v686_v13  ;;  %v127_v7 = vld [vmem:[%s954_s0 + $0x60] sm:$0xff]  ;;  %v128_v8 = vld [vmem:[%s954_s0 + $0x68] sm:$0xff] }
   0xe   :  { %80 = vrot.lane.b32.xlu0 %v760_v6, %s697_s19  ;;  %88 = vrot.lane.b32.xlu1 %v772_v9, %s697_s19 }
   0xf   :  { %598 = vmatprep.subr.bf16.mxu0 %v687_v14  ;;  %659 = vmatprep.subr.bf16.mxu1 %v687_v14 }
  0x11   :  { %599 = vmatpush3.bf16.msra.mxu0 %v688_v15  ;;  %667 = vmatpush3.bf16.msra.mxu1 %v688_v15 }
  0x12   :  { %600 = vmatprep.subr.bf16.mxu0 %v689_v16  ;;  %660 = vmatprep.subr.bf16.mxu1 %v689_v16 }
  0x15   :  { %601 = vmatpush3.bf16.msra.mxu0 %v690_v17  ;;  %668 = vmatpush3.bf16.msra.mxu1 %v690_v17 }
  0x16   :  { %602 = vmatprep.subr.bf16.mxu0 %v691_v18  ;;  %661 = vmatprep.subr.bf16.mxu1 %v691_v18 }
  0x19   :  { %603 = vmatpush3.bf16.msra.mxu0 %v692_v19  ;;  %669 = vmatpush3.bf16.msra.mxu1 %v692_v19 }
  0x1a   :  { %604 = vmatprep.subr.bf16.mxu0 %v693_v20  ;;  %662 = vmatprep.subr.bf16.mxu1 %v693_v20 }
  0x1d   :  { %605 = vmatpush3.bf16.msra.mxu0 %v694_v21  ;;  %670 = vmatpush3.bf16.msra.mxu1 %v694_v21 }
  0x1e   :  { %606 = vmatprep.subr.bf16.mxu0 %v695_v22  ;;  %663 = vmatprep.subr.bf16.mxu1 %v695_v22 }
  0x21   :  { %607 = vmatpush3.bf16.msra.mxu0 %v696_v23  ;;  %671 = vmatpush3.bf16.msra.mxu1 %v696_v23 }
  0x74   :  { %v75_v24 = vpop.permute.xlu0 %74  ;;  %v77_v30 = vpop.permute.xlu1 %76 }
  0x75   :  { %v93_v25 = vsel %vm90_vm0, %v726_v0, %v75_v24  ;;  %v96_v31 = vsel %vm90_vm0, %v737_v2, %v77_v30  ;;  %v120_v0 = vld [vmem:[%s954_s0 + $0x28] sm:$0xff]  ;;  %v121_v24 = vld [vmem:[%s954_s0 + $0x30] sm:$0xff] }
  0x76   :  { %v543_v28 = vcombine.low %v93_v25, %v93_v25  ;;  %v544_v29 = vcombine.high %v93_v25, %v93_v25  ;;  %v545_v35 = vcombine.low %v96_v31, %v96_v31  ;;  %v546_v36 = vcombine.high %v96_v31, %v96_v31  ;;  %v122_v25 = vld [vmem:[%s954_s0 + $0x38] sm:$0xff] }
  0x77   :  { %v130_v31 = vld [vmem:[%s954_s0 + $0x78] sm:$0xff] }
  0x78   :  { %v83_v34 = vpop.permute.xlu0 %82  ;;  %v187_v37 = vmul.bf16 %v543_v28, %v115_v26  ;;  %v188_v38 = vmul.bf16 %v544_v29, %v116_v27  ;;  %v189_v44 = vmul.bf16 %v545_v35, %v117_v32  ;;  %v190_v45 = vmul.bf16 %v546_v36, %v118_v33  ;;  %v85_v46 = vpop.permute.xlu1 %84 }
  0x79   :  { %v105_v39 = vsel %vm90_vm0, %v731_v1, %v83_v34  ;;  %v108_v49 = vsel %vm90_vm0, %v743_v3, %v85_v46 }
  0x7a   :  { %v551_v42 = vcombine.low %v105_v39, %v105_v39  ;;  %v552_v43 = vcombine.high %v105_v39, %v105_v39  ;;  %v561_v47 = vcombine.high %v187_v37, %v188_v38  ;;  %v560_v48 = vcombine.low %v187_v37, %v188_v38 }
  0x7b   :  { %v553_v52 = vcombine.low %v108_v49, %v108_v49  ;;  %v554_v53 = vcombine.high %v108_v49, %v108_v49  ;;  %v563_v58 = vcombine.high %v189_v44, %v190_v45 }
  0x7c   :  { %v195_v54 = vmul.bf16 %v551_v42, %v123_v40  ;;  %v196_v55 = vmul.bf16 %v552_v43, %v124_v41  ;;  %v79_v56 = vpop.permute.xlu0 %78  ;;  %450 = vmatprep.mubr.bf16.mxu0 %v561_v47  ;;  %v87_v1 = vpop.permute.xlu1 %86  ;;  %v886_v41 = vld [vmem:[%s955_s3] ss:$0 sm:$0xff] }
  0x7d   :  { %v99_v57 = vsel %vm90_vm0, %v749_v4, %v79_v56  ;;  %451 = vmatmul.mubr.bf16.vlgmr.msra.gmra.mrb[0].mxu0 %v560_v48  ;;  %v197_v59 = vmul.bf16 %v553_v52, %v125_v50  ;;  %v198_v60 = vmul.bf16 %v554_v53, %v126_v51  ;;  %v111_v4 = vsel %vm90_vm0, %v754_v5, %v87_v1 }
  0x7e   :  { %v569_v61 = vcombine.high %v195_v54, %v196_v55  ;;  %v568_v62 = vcombine.low %v195_v54, %v196_v55  ;;  %v547_v2 = vcombine.low %v99_v57, %v99_v57  ;;  %v548_v3 = vcombine.high %v99_v57, %v99_v57  ;;  %458 = vmatprep.mubr.bf16.mxu0 %v563_v58 }
  0x7f   :  { %v555_v10 = vcombine.low %v111_v4, %v111_v4  ;;  %v556_v11 = vcombine.high %v111_v4, %v111_v4  ;;  %v571_v12 = vcombine.high %v197_v59, %v198_v60  ;;  %v562_v5 = vcombine.low %v189_v44, %v190_v45 }
  0x80   :  { %482 = vmatprep.mubr.bf16.mxu1 %v569_v61  ;;  %v81_v13 = vpop.permute.xlu0 %80  ;;  %v191_v14 = vmul.bf16 %v547_v2, %v119_v63  ;;  %v192_v15 = vmul.bf16 %v548_v3, %v120_v0  ;;  %v89_v19 = vpop.permute.xlu1 %88 }
  0x81   :  { %483 = vmatmul.mubr.bf16.vlgmr.msra.gmra.mrb[0].mxu1 %v568_v62  ;;  %v102_v16 = vsel %vm90_vm0, %v760_v6, %v81_v13  ;;  %v199_v17 = vmul.bf16 %v555_v10, %v127_v7  ;;  %v200_v18 = vmul.bf16 %v556_v11, %v128_v8  ;;  %v114_v23 = vsel %vm90_vm0, %v772_v9, %v89_v19  ;;  %v129_v9 = vld [vmem:[%s954_s0 + $0x70] sm:$0xff] }
  0x82   :  { %490 = vmatprep.mubr.bf16.mxu1 %v571_v12  ;;  %v549_v20 = vcombine.low %v102_v16, %v102_v16  ;;  %v550_v21 = vcombine.high %v102_v16, %v102_v16  ;;  %v565_v22 = vcombine.high %v191_v14, %v192_v15  ;;  %v570_v6 = vcombine.low %v197_v59, %v198_v60 }
  0x83   :  { %v557_v26 = vcombine.low %v114_v23, %v114_v23  ;;  %v558_v27 = vcombine.high %v114_v23, %v114_v23  ;;  %v573_v28 = vcombine.high %v199_v17, %v200_v18  ;;  %v564_v32 = vcombine.low %v191_v14, %v192_v15 }
  0x84   :  { %v193_v29 = vmul.bf16 %v549_v20, %v121_v24  ;;  %v194_v30 = vmul.bf16 %v550_v21, %v122_v25  ;;  %v572_v36 = vcombine.low %v199_v17, %v200_v18 }
  0x85   :  { %459 = vmatmul.mubr.bf16.gmra.mrb[4].mxu0 %v562_v5  ;;  %v201_v33 = vmul.bf16 %v557_v26, %v129_v9  ;;  %v202_v34 = vmul.bf16 %v558_v27, %v130_v31 }
  0x86   :  { %466 = vmatprep.mubr.bf16.mxu0 %v565_v22  ;;  %v567_v35 = vcombine.high %v193_v29, %v194_v30  ;;  %v566_v38 = vcombine.low %v193_v29, %v194_v30 }
  0x87   :  { %v575_v37 = vcombine.high %v201_v33, %v202_v34  ;;  %v574_v39 = vcombine.low %v201_v33, %v202_v34 }
  0x89   :  { %491 = vmatmul.mubr.bf16.gmra.mrb[4].mxu1 %v570_v6 }
  0x8a   :  { %498 = vmatprep.mubr.bf16.mxu1 %v573_v28 }
  0x8d   :  { %467 = vmatmul.mubr.bf16.gmra.mrb[8].mxu0 %v564_v32 }
  0x8e   :  { %474 = vmatprep.mubr.bf16.mxu0 %v567_v35 }
  0x91   :  { %499 = vmatmul.mubr.bf16.gmra.mrb[8].mxu1 %v572_v36 }
  0x92   :  { %506 = vmatprep.mubr.bf16.mxu1 %v575_v37 }
  0x95   :  { %475 = vmatmul.mubr.bf16.gmra.mrb[12].mxu0 %v566_v38 }
  0x99   :  { %507 = vmatmul.mubr.bf16.gmra.mrb[12].mxu1 %v574_v39 }
 0x150   :  { %v608_v40 = vpop.f32.mrb[0].mxu0 }
 0x151   :  { %v609_v42 = vpop.f32.mrb[1].mxu0 }
 0x152   :  { %v610_v43 = vadd.f32 %v609_v42, %v608_v40  ;;  %v611_v44 = vpop.f32.mrb[2].mxu0 }
 0x153   :  { %v612_v45 = vpop.f32.mrb[3].mxu0 }
 0x154   :  { %v632_v46 = vpop.f32.mrb[0].mxu1  ;;  %v453_v47 = vadd.f32 %v610_v43, %v886_v41  ;;  %v613_v48 = vadd.f32 %v612_v45, %v611_v44 }
 0x155   :  { %v633_v49 = vpop.f32.mrb[1].mxu1 }
 0x156   :  { %v634_v50 = vadd.f32 %v633_v49, %v632_v46  ;;  %v635_v51 = vpop.f32.mrb[2].mxu1  ;;  %515 = vst [vmem:[%s956_s4] sm:$0xff] %v453_v47  ;;  %v456_v52 = vadd.f32 %v613_v48, %v886_v41 }
 0x157   :  { %v636_v53 = vpop.f32.mrb[3].mxu1 }
 0x158   :  { %v485_v54 = vadd.f32 %v634_v50, %v886_v41  ;;  %v637_v55 = vadd.f32 %v636_v53, %v635_v51  ;;  %516 = vst [vmem:[%s956_s4 + $0x8] sm:$0xff] %v456_v52  ;;  %v614_v56 = vpop.f32.mrb[4].mxu0 }
 0x159   :  { %v615_v58 = vpop.f32.mrb[5].mxu0 }
 0x15a   :  { %523 = vst [vmem:[%s956_s4 + $0x40] sm:$0xff] %v485_v54  ;;  %v488_v57 = vadd.f32 %v637_v55, %v886_v41  ;;  %v616_v59 = vadd.f32 %v615_v58, %v614_v56  ;;  %v617_v60 = vpop.f32.mrb[6].mxu0 }
 0x15b   :  { %v618_v61 = vpop.f32.mrb[7].mxu0 }
 0x15c   :  { %524 = vst [vmem:[%s956_s4 + $0x48] sm:$0xff] %v488_v57  ;;  %v638_v62 = vpop.f32.mrb[4].mxu1  ;;  %v461_v63 = vadd.f32 %v616_v59, %v886_v41  ;;  %v619_v0 = vadd.f32 %v618_v61, %v617_v60 }
 0x15d   :  { %v639_v1 = vpop.f32.mrb[5].mxu1 }
 0x15e   :  { %v640_v2 = vadd.f32 %v639_v1, %v638_v62  ;;  %v641_v3 = vpop.f32.mrb[6].mxu1  ;;  %517 = vst [vmem:[%s956_s4 + $0x10] sm:$0xff] %v461_v63  ;;  %v464_v4 = vadd.f32 %v619_v0, %v886_v41 }
 0x15f   :  { %v642_v7 = vpop.f32.mrb[7].mxu1 }
 0x160   :  { %v493_v8 = vadd.f32 %v640_v2, %v886_v41  ;;  %v643_v10 = vadd.f32 %v642_v7, %v641_v3  ;;  %518 = vst [vmem:[%s956_s4 + $0x18] sm:$0xff] %v464_v4  ;;  %v620_v11 = vpop.f32.mrb[8].mxu0 }
 0x161   :  { %v621_v13 = vpop.f32.mrb[9].mxu0 }
 0x162   :  { %525 = vst [vmem:[%s956_s4 + $0x50] sm:$0xff] %v493_v8  ;;  %v496_v12 = vadd.f32 %v643_v10, %v886_v41  ;;  %v622_v14 = vadd.f32 %v621_v13, %v620_v11  ;;  %v623_v15 = vpop.f32.mrb[10].mxu0 }
 0x163   :  { %v624_v16 = vpop.f32.mrb[11].mxu0 }
 0x164   :  { %526 = vst [vmem:[%s956_s4 + $0x58] sm:$0xff] %v496_v12  ;;  %v644_v5 = vpop.f32.mrb[8].mxu1  ;;  %v469_v17 = vadd.f32 %v622_v14, %v886_v41  ;;  %v625_v18 = vadd.f32 %v624_v16, %v623_v15 }
 0x165   :  { %v645_v19 = vpop.f32.mrb[9].mxu1 }
 0x166   :  { %v646_v20 = vadd.f32 %v645_v19, %v644_v5  ;;  %v647_v21 = vpop.f32.mrb[10].mxu1  ;;  %519 = vst [vmem:[%s956_s4 + $0x20] sm:$0xff] %v469_v17  ;;  %v472_v22 = vadd.f32 %v625_v18, %v886_v41 }
 0x167   :  { %v648_v23 = vpop.f32.mrb[11].mxu1 }
 0x168   :  { %v501_v24 = vadd.f32 %v646_v20, %v886_v41  ;;  %v649_v25 = vadd.f32 %v648_v23, %v647_v21  ;;  %520 = vst [vmem:[%s956_s4 + $0x28] sm:$0xff] %v472_v22  ;;  %v626_v6 = vpop.f32.mrb[12].mxu0 }
 0x169   :  { %v627_v27 = vpop.f32.mrb[13].mxu0 }
 0x16a   :  { %527 = vst [vmem:[%s956_s4 + $0x60] sm:$0xff] %v501_v24  ;;  %v504_v26 = vadd.f32 %v649_v25, %v886_v41  ;;  %v628_v28 = vadd.f32 %v627_v27, %v626_v6  ;;  %v629_v29 = vpop.f32.mrb[14].mxu0 }
 0x16b   :  { %v630_v30 = vpop.f32.mrb[15].mxu0 }
 0x16c   :  { %528 = vst [vmem:[%s956_s4 + $0x68] sm:$0xff] %v504_v26  ;;  %v650_v9 = vpop.f32.mrb[12].mxu1  ;;  %v477_v31 = vadd.f32 %v628_v28, %v886_v41  ;;  %v631_v32 = vadd.f32 %v630_v30, %v629_v29 }
 0x16d   :  { %v651_v33 = vpop.f32.mrb[13].mxu1 }
 0x16e   :  { %v652_v34 = vadd.f32 %v651_v33, %v650_v9  ;;  %v653_v35 = vpop.f32.mrb[14].mxu1  ;;  %521 = vst [vmem:[%s956_s4 + $0x30] sm:$0xff] %v477_v31  ;;  %v480_v36 = vadd.f32 %v631_v32, %v886_v41 }
 0x16f   :  { %v654_v37 = vpop.f32.mrb[15].mxu1 }
 0x170   :  { %v509_v38 = vadd.f32 %v652_v34, %v886_v41  ;;  %v655_v39 = vadd.f32 %v654_v37, %v653_v35  ;;  %522 = vst [vmem:[%s956_s4 + $0x38] sm:$0xff] %v480_v36 }
 0x172   :  { %529 = vst [vmem:[%s956_s4 + $0x70] sm:$0xff] %v509_v38  ;;  %v512_v40 = vadd.f32 %v655_v39, %v886_v41 }
 0x174   :  { %530 = vst [vmem:[%s956_s4 + $0x78] sm:$0xff] %v512_v40 }

</bundles_post_ra>
